<compile_context>
chip_gen: v7x
topology: tpu7x:2x2x1
jax: 0.10.0
libtpu: 0.0.40
codegen_flags: <defaults>
</compile_context>

<pallas_src>
import functools

import jax
import jax.numpy as jnp
from jax.experimental import pallas as pl
from jax.experimental.pallas import tpu as pltpu


# ------------------------------- helpers ------------------------------------

def _round_up(x, m):
    return (x + m - 1) // m * m


def _mm_kp_np(K, N):
    """Padded (K, N) dims for a weight matrix, consistent with tile selection."""
    Kp = _round_up(K, 128)
    if Kp > 1024:                      # large K: 512-wide reduction tiles
        Kp = _round_up(Kp, 512)
    Np = _round_up(N, 128)
    return Kp, Np


# --------------------------- Pallas matmul kernels ---------------------------

def _matmul_kernel(a_ref, b_ref, o_ref, acc_ref):
    @pl.when(pl.program_id(2) == 0)
    def _():
        acc_ref[...] = jnp.zeros_like(acc_ref)

    acc_ref[...] += jnp.dot(a_ref[...], b_ref[...],
                            preferred_element_type=jnp.float32)

    @pl.when(pl.program_id(2) == pl.num_programs(2) - 1)
    def _():
        o_ref[...] = acc_ref[...].astype(o_ref.dtype)


def _matmul_bias_kernel(a_ref, b_ref, bias_ref, o_ref, acc_ref):
    @pl.when(pl.program_id(2) == 0)
    def _():
        acc_ref[...] = jnp.zeros_like(acc_ref)

    acc_ref[...] += jnp.dot(a_ref[...], b_ref[...],
                            preferred_element_type=jnp.float32)

    @pl.when(pl.program_id(2) == pl.num_programs(2) - 1)
    def _():
        o_ref[...] = (acc_ref[...] + bias_ref[...]).astype(o_ref.dtype)


def pallas_matmul(a, w_pad, *, out_dtype=jnp.bfloat16, bias_pad=None,
                  n_valid=None):
    """(M, K) @ pre-padded bf16 (Kp, Np) -> (M, n_valid).

    bf16 operands, f32 MXU accumulation, per-call tile sizes.
    """
    M, K = a.shape
    Kp, Np = w_pad.shape
    assert K <= Kp

    tm = min(128, _round_up(M, 8))           # don't pad tiny M to 128
    Mp = _round_up(M, tm)
    tk = Kp if Kp <= 1024 else 512           # single reduction step when possible
    tn = 256 if Np % 256 == 0 else 128       # 256-wide N tiles feed the 256x256 MXU
    assert Kp % tk == 0 and Np % tn == 0

    a_p = jnp.pad(a.astype(jnp.bfloat16), ((0, Mp - M), (0, Kp - K)))

    in_specs = [pl.BlockSpec((tm, tk), lambda i, j, k: (i, k)),
                pl.BlockSpec((tk, tn), lambda i, j, k: (k, j))]
    args = (a_p, w_pad)
    kernel = _matmul_kernel
    if bias_pad is not None:
        kernel = _matmul_bias_kernel
        in_specs = in_specs + [pl.BlockSpec((1, tn), lambda i, j, k: (0, j))]
        args = (a_p, w_pad, bias_pad)

    out = pl.pallas_call(
        kernel,
        out_shape=jax.ShapeDtypeStruct((Mp, Np), out_dtype),
        grid_spec=pltpu.PrefetchScalarGridSpec(
            num_scalar_prefetch=0,
            grid=(Mp // tm, Np // tn, Kp // tk),
            in_specs=in_specs,
            out_specs=pl.BlockSpec((tm, tn), lambda i, j, k: (i, j)),
            scratch_shapes=[pltpu.VMEM((tm, tn), jnp.float32)]),
        compiler_params=pltpu.CompilerParams(
            dimension_semantics=("parallel", "parallel", "arbitrary")),
    )(*args)

    nv = Np if n_valid is None else n_valid
    return out[:M, :nv]


# ----------------------- fused BN-affine (+res, +ReLU) -----------------------

def _affine_kernel(x_ref, s_ref, b_ref, o_ref, *, relu):
    y = x_ref[...].astype(jnp.float32) * s_ref[...] + b_ref[...]
    if relu:
        y = jnp.maximum(y, 0.0)
    o_ref[...] = y.astype(o_ref.dtype)


def _affine_res_kernel(x_ref, s_ref, b_ref, r_ref, o_ref, *, relu):
    y = (x_ref[...].astype(jnp.float32) * s_ref[...] + b_ref[...]
         + r_ref[...].astype(jnp.float32))
    if relu:
        y = jnp.maximum(y, 0.0)
    o_ref[...] = y.astype(o_ref.dtype)


def pallas_affine(x, scale, bias, residual=None, relu=True,
                  out_dtype=jnp.bfloat16):
    """Per-channel scale/shift (+residual) (+ReLU); bf16 I/O, f32 compute.

    Tiled over rows ("parallel" grid) and presented lane-dense: C=64 inputs
    are folded to 128-wide slabs to avoid masked partial stores.
    """
    M, C = x.shape
    fold = 1
    if C < 128 and 128 % C == 0 and (M * C) % 128 == 0:
        fold = 128 // C
    Mf, Cf = M // fold, C * fold

    xr = x.reshape(Mf, Cf)
    s = jnp.tile(scale.astype(jnp.float32), fold).reshape(1, Cf)
    b = jnp.tile(bias.astype(jnp.float32), fold).reshape(1, Cf)
    rr = None if residual is None else residual.reshape(Mf, Cf)

    bm = min(512, _round_up(Mf, 8))
    if _round_up(Mf, bm) // bm < 2 and bm >= 16:   # give megacore >=2 blocks
        bm = _round_up(bm // 2, 8)
    Mp = _round_up(Mf, bm)
    if Mp > Mf:
        xr = jnp.pad(xr, ((0, Mp - Mf), (0, 0)))
        if rr is not None:
            rr = jnp.pad(rr, ((0, Mp - Mf), (0, 0)))

    row_spec = pl.BlockSpec((bm, Cf), lambda i: (i, 0))
    vec_spec = pl.BlockSpec((1, Cf), lambda i: (0, 0))
    if rr is None:
        kernel = functools.partial(_affine_kernel, relu=relu)
        args, in_specs = (xr, s, b), [row_spec, vec_spec, vec_spec]
    else:
        kernel = functools.partial(_affine_res_kernel, relu=relu)
        args, in_specs = (xr, s, b, rr), [row_spec, vec_spec, vec_spec, row_spec]

    out = pl.pallas_call(
        kernel,
        out_shape=jax.ShapeDtypeStruct((Mp, Cf), out_dtype),
        grid=(Mp // bm,),
        in_specs=in_specs,
        out_specs=row_spec,
        compiler_params=pltpu.CompilerParams(
            dimension_semantics=("parallel",)),
    )(*args)
    return out[:Mf].reshape(M, C)


# ------------------------------ maxpool kernel -------------------------------

def _maxpool_kernel(p00_ref, p01_ref, p10_ref, p11_ref, o_ref, *, OH, OW):
    # 3x3 / stride-2 window max expressed as nine stride-1 windows of the four
    # 2x2 phase tensors (no strided in-kernel access, no 9x HBM stack).
    m = p00_ref[:, 0:OH, 0:OW, :]
    m = jnp.maximum(m, p00_ref[:, 0:OH, 1:OW + 1, :])
    m = jnp.maximum(m, p00_ref[:, 1:OH + 1, 0:OW, :])
    m = jnp.maximum(m, p00_ref[:, 1:OH + 1, 1:OW + 1, :])
    m = jnp.maximum(m, p01_ref[:, 0:OH, 0:OW, :])
    m = jnp.maximum(m, p01_ref[:, 1:OH + 1, 0:OW, :])
    m = jnp.maximum(m, p10_ref[:, 0:OH, 0:OW, :])
    m = jnp.maximum(m, p10_ref[:, 0:OH, 1:OW + 1, :])
    m = jnp.maximum(m, p11_ref[:, 0:OH, 0:OW, :])
    o_ref[...] = m


def maxpool_3x3_s2_p1(x_nhwc):
    N, H, W, C = x_nhwc.shape
    assert H % 2 == 0 and W % 2 == 0
    OH, OW = H // 2, W // 2
    xp = jnp.pad(x_nhwc, ((0, 0), (1, 1), (1, 1), (0, 0)),
                 constant_values=-jnp.inf)
    # 2x2 phase decomposition (the four phases partition xp: ~1x traffic).
    p00 = xp[:, 0::2, 0::2, :]
    p01 = xp[:, 0::2, 1::2, :]
    p10 = xp[:, 1::2, 0::2, :]
    p11 = xp[:, 1::2, 1::2, :]
    H2, W2 = OH + 1, OW + 1

    kernel = functools.partial(_maxpool_kernel, OH=OH, OW=OW)
    phase_spec = pl.BlockSpec((1, H2, W2, C), lambda n: (n, 0, 0, 0))
    return pl.pallas_call(
        kernel,
        out_shape=jax.ShapeDtypeStruct((N, OH, OW, C), x_nhwc.dtype),
        grid=(N,),
        in_specs=[phase_spec, phase_spec, phase_spec, phase_spec],
        out_specs=pl.BlockSpec((1, OH, OW, C), lambda n: (n, 0, 0, 0)),
        compiler_params=pltpu.CompilerParams(
            dimension_semantics=("parallel",)),
    )(p00, p01, p10, p11)


# ------------------------------- avgpool kernel -------------------------------

def _avgpool_kernel(x_ref, o_ref):
    o_ref[...] = jnp.mean(x_ref[...].astype(jnp.float32), axis=1)


def pallas_global_avgpool(x_nhwc):
    """Adaptive average pool to 1x1: (N,H,W,C) -> (N,C) f32."""
    N, H, W, C = x_nhwc.shape
    x3 = x_nhwc.reshape(N, H * W, C)
    tc = 128 if C % 128 == 0 else C
    return pl.pallas_call(
        _avgpool_kernel,
        out_shape=jax.ShapeDtypeStruct((N, C), jnp.float32),
        grid=(C // tc,),
        in_specs=[pl.BlockSpec((N, H * W, tc), lambda j: (0, 0, j))],
        out_specs=pl.BlockSpec((N, tc), lambda j: (0, j)),
        compiler_params=pltpu.CompilerParams(
            dimension_semantics=("parallel",)),
    )(x3)


# ------------------------------ JAX glue layers -------------------------------

def conv2d_pallas(x_nhwc, w_pad, *, kh, kw, stride, padding, oc):
    """Conv2d (bias=False) via im2col (bf16) + Pallas MXU matmul."""
    N, H, W, C = x_nhwc.shape
    OH = (H + 2 * padding - kh) // stride + 1
    OW = (W + 2 * padding - kw) // stride + 1
    xp = x_nhwc if padding == 0 else jnp.pad(
        x_nhwc, ((0, 0), (padding, padding), (padding, padding), (0, 0)))
    cols = [xp[:, dy:dy + stride * OH:stride, dx:dx + stride * OW:stride, :]
            for dy in range(kh) for dx in range(kw)]
    patches = cols[0] if len(cols) == 1 else jnp.concatenate(cols, axis=-1)
    a = patches.reshape(N * OH * OW, kh * kw * C)
    out = pallas_matmul(a, w_pad, out_dtype=jnp.bfloat16, n_valid=oc)
    return out.reshape(N, OH, OW, oc)


def batchnorm(x_flat, gamma, beta, residual=None, relu=True, eps=1e-5):
    # Training-mode BN (batch statistics, biased variance) like PyTorch default.
    # Stats in f32; data stays bf16 through the fused affine kernel.
    xf = x_flat.astype(jnp.float32)
    mean = jnp.mean(xf, axis=0)
    var = jnp.var(xf, axis=0)
    scale = gamma / jnp.sqrt(var + eps)
    bias = beta - mean * scale
    return pallas_affine(x_flat, scale, bias, residual=residual, relu=relu)


def basic_block(x, p, pre, stride, has_down):
    N, H, W, Cin = x.shape
    oc = p[pre + 'bn1_g'].shape[0]
    out = conv2d_pallas(x, p[pre + 'conv1_w'], kh=3, kw=3, stride=stride,
                        padding=1, oc=oc)
    N2, OH, OW, _ = out.shape
    out = batchnorm(out.reshape(-1, oc), p[pre + 'bn1_g'], p[pre + 'bn1_b'],
                    relu=True).reshape(N2, OH, OW, oc)
    out = conv2d_pallas(out, p[pre + 'conv2_w'], kh=3, kw=3, stride=1,
                        padding=1, oc=oc)
    if has_down:
        idn = conv2d_pallas(x, p[pre + 'down_w'], kh=1, kw=1, stride=stride,
                            padding=0, oc=oc)
        idn_flat = batchnorm(idn.reshape(-1, oc), p[pre + 'down_g'],
                             p[pre + 'down_b'], relu=False)
    else:
        idn_flat = x.reshape(-1, Cin)
    out_flat = batchnorm(out.reshape(-1, oc), p[pre + 'bn2_g'],
                         p[pre + 'bn2_b'], residual=idn_flat, relu=True)
    return out_flat.reshape(N2, OH, OW, oc)


def simple_resnet_forward(params, x_nchw):
    x = jnp.transpose(x_nchw, (0, 2, 3, 1)).astype(jnp.bfloat16)  # NCHW->NHWC
    # stem
    x = conv2d_pallas(x, params['conv1_w'], kh=7, kw=7, stride=2, padding=3,
                      oc=64)
    N, H, W, C = x.shape
    x = batchnorm(x.reshape(-1, C), params['bn1_g'], params['bn1_b'],
                  relu=True).reshape(N, H, W, C)
    x = maxpool_3x3_s2_p1(x)
    # residual stages
    strides = [1, 2, 2, 2]
    for li in range(1, 5):
        for bi in range(2):
            pre = f'layer{li}_{bi}_'
            st = strides[li - 1] if bi == 0 else 1
            has_down = (pre + 'down_w') in params
            x = basic_block(x, params, pre, st, has_down)
    # head: avgpool -> fc with bias fused into the matmul epilogue
    feat = pallas_global_avgpool(x)                               # (N, 512) f32
    logits = pallas_matmul(feat, params['fc_w'], out_dtype=jnp.float32,
                           bias_pad=params['fc_b'], n_valid=10)   # (N, 10)
    return logits


# ---------------------------- parameter creation -----------------------------

def _prep_conv_weight(w_oihw):
    """OIHW f32 -> pre-transposed, pre-padded (Kp, Np) bf16 matmul weight."""
    OC, IC, KH, KW = w_oihw.shape
    K = KH * KW * IC
    wm = jnp.transpose(w_oihw, (2, 3, 1, 0)).reshape(K, OC)
    Kp, Np = _mm_kp_np(K, OC)
    return jnp.pad(wm, ((0, Kp - K), (0, Np - OC))).astype(jnp.bfloat16)


def init_params(key):
    keys = iter(jax.random.split(key, 64))

    def conv_w(oc, ic, kh, kw):
        std = (2.0 / (ic * kh * kw)) ** 0.5
        return jax.random.normal(next(keys), (oc, ic, kh, kw), jnp.float32) * std

    p = {}
    p['conv1_w'] = _prep_conv_weight(conv_w(64, 3, 7, 7))
    p['bn1_g'] = jnp.ones((64,), jnp.float32)
    p['bn1_b'] = jnp.zeros((64,), jnp.float32)

    layer_plan = [(64, 64, 1), (64, 128, 2), (128, 256, 2), (256, 512, 2)]
    for li, (cin, cout, stride) in enumerate(layer_plan, start=1):
        for bi in range(2):
            ic = cin if bi == 0 else cout
            st = stride if bi == 0 else 1
            pre = f'layer{li}_{bi}_'
            p[pre + 'conv1_w'] = _prep_conv_weight(conv_w(cout, ic, 3, 3))
            p[pre + 'bn1_g'] = jnp.ones((cout,), jnp.float32)
            p[pre + 'bn1_b'] = jnp.zeros((cout,), jnp.float32)
            p[pre + 'conv2_w'] = _prep_conv_weight(conv_w(cout, cout, 3, 3))
            p[pre + 'bn2_g'] = jnp.ones((cout,), jnp.float32)
            p[pre + 'bn2_b'] = jnp.zeros((cout,), jnp.float32)
            if bi == 0 and (st != 1 or ic != cout):
                p[pre + 'down_w'] = _prep_conv_weight(conv_w(cout, ic, 1, 1))
                p[pre + 'down_g'] = jnp.ones((cout,), jnp.float32)
                p[pre + 'down_b'] = jnp.zeros((cout,), jnp.float32)

    fc_w = jax.random.normal(next(keys), (512, 10), jnp.float32) / (512 ** 0.5)
    Kp, Np = _mm_kp_np(512, 10)
    p['fc_w'] = jnp.pad(fc_w, ((0, Kp - 512), (0, Np - 10))).astype(jnp.bfloat16)
    p['fc_b'] = jnp.zeros((1, Np), jnp.float32)   # bias pre-padded, fused in matmul
    return p


# ---------------------------------- main --------------------------------------

if __name__ == "__main__":
    key = jax.random.PRNGKey(0)
    pkey, xkey = jax.random.split(key)
    params = init_params(pkey)
    # ResNet-18 expects 3 input channels; 32x32 spatial survives all 5 /2 stages.
    x = jax.random.normal(xkey, (2, 3, 32, 32), jnp.float32)      # NCHW input

    fwd = jax.jit(simple_resnet_forward)
    out = fwd(params, x)
    jax.block_until_ready(out)
    assert out.shape == (2, 10) and out.dtype == jnp.float32
    print("KERNEL_OK")
</pallas_src>

<mosaic_0001>
module attributes {stable_mosaic.version = 11 : i64} {
  func.func @_matmul_kernel(%arg0: i32, %arg1: i32, %arg2: i32, %arg3: memref<128x256xbf16, #tpu.memory_space<vmem>>, %arg4: memref<256x128xbf16, #tpu.memory_space<vmem>>, %arg5: memref<128x128xbf16, #tpu.memory_space<vmem>>, %arg6: memref<128x128xf32, #tpu.memory_space<vmem>>) attributes {dimension_semantics = [#tpu.dimension_semantics<parallel>, #tpu.dimension_semantics<parallel>, #tpu.dimension_semantics<arbitrary>], iteration_bounds = array<i64: 4, 1, 1>, scalar_prefetch = 0 : i64, scratch_operands = 1 : i64, tpu.core_type = #tpu.core_type<tc>, window_params = [{transform_indices = @transform_0, window_bounds = array<i64: 128, 256>}, {transform_indices = @transform_1, window_bounds = array<i64: 256, 128>}, {transform_indices = @transform_2, window_bounds = array<i64: 128, 128>}]} {
    %c0_i32 = arith.constant 0 : i32
    %0 = arith.cmpi eq, %arg2, %c0_i32 : i32
    %1 = arith.extui %0 : i1 to i32
    %c0_i32_0 = arith.constant 0 : i32
    %2 = arith.cmpi ne, %1, %c0_i32_0 : i32
    scf.if %2 {
      %cst_10 = arith.constant 0.000000e+00 : f32
      %12 = vector.broadcast %cst_10 : f32 to vector<128x128xf32>
      %c0_11 = arith.constant 0 : index
      %c0_12 = arith.constant 0 : index
      %13 = vector.load %arg6[%c0_11, %c0_12] : memref<128x128xf32, #tpu.memory_space<vmem>>, vector<128x128xf32>
      tpu.vector_store %arg6[%c0_11, %c0_12], %12 {strides = array<i32>} : memref<128x128xf32, #tpu.memory_space<vmem>>, vector<128x128xf32>,
    } else {
    }
    %c0 = arith.constant 0 : index
    %c0_1 = arith.constant 0 : index
    %3 = vector.load %arg6[%c0, %c0_1] : memref<128x128xf32, #tpu.memory_space<vmem>>, vector<128x128xf32>
    %c0_2 = arith.constant 0 : index
    %c0_3 = arith.constant 0 : index
    %4 = vector.load %arg3[%c0_2, %c0_3] : memref<128x256xbf16, #tpu.memory_space<vmem>>, vector<128x256xbf16>
    %c0_4 = arith.constant 0 : index
    %c0_5 = arith.constant 0 : index
    %5 = vector.load %arg4[%c0_4, %c0_5] : memref<256x128xbf16, #tpu.memory_space<vmem>>, vector<256x128xbf16>
    %cst = arith.constant dense<0.000000e+00> : vector<128x128xf32>
    %6 = tpu.matmul %4, %5, %cst {dimension_numbers = #tpu.dot_dimension_numbers<[1], [0], [0], [1], [0, 0, 1, 1], [], []>} : vector<128x256xbf16>, vector<256x128xbf16>, vector<128x128xf32> -> vector<128x128xf32>
    %7 = arith.addf %3, %6 : vector<128x128xf32>
    %c0_6 = arith.constant 0 : index
    %c0_7 = arith.constant 0 : index
    %8 = vector.load %arg6[%c0_6, %c0_7] : memref<128x128xf32, #tpu.memory_space<vmem>>, vector<128x128xf32>
    tpu.vector_store %arg6[%c0_6, %c0_7], %7 {strides = array<i32>} : memref<128x128xf32, #tpu.memory_space<vmem>>, vector<128x128xf32>,
    %c0_i32_8 = arith.constant 0 : i32
    %9 = arith.cmpi eq, %arg2, %c0_i32_8 : i32
    %10 = arith.extui %9 : i1 to i32
    %c0_i32_9 = arith.constant 0 : i32
    %11 = arith.cmpi ne, %10, %c0_i32_9 : i32
    scf.if %11 {
      %c0_10 = arith.constant 0 : index
      %c0_11 = arith.constant 0 : index
      %12 = vector.load %arg6[%c0_10, %c0_11] : memref<128x128xf32, #tpu.memory_space<vmem>>, vector<128x128xf32>
      %13 = arith.truncf %12 : vector<128x128xf32> to vector<128x128xbf16>
      %c0_12 = arith.constant 0 : index
      %c0_13 = arith.constant 0 : index
      %14 = vector.load %arg5[%c0_12, %c0_13] : memref<128x128xbf16, #tpu.memory_space<vmem>>, vector<128x128xbf16>
      tpu.vector_store %arg5[%c0_12, %c0_13], %13 {strides = array<i32>} : memref<128x128xbf16, #tpu.memory_space<vmem>>, vector<128x128xbf16>,
    } else {
    }
    return
  }
  func.func @transform_0(%arg0: i32, %arg1: i32, %arg2: i32) -> (i32, i32) {
    %c0_i32 = arith.constant 0 : i32
    return %arg0, %arg2 : i32, i32
  }
  func.func @transform_1(%arg0: i32, %arg1: i32, %arg2: i32) -> (i32, i32) {
    %c0_i32 = arith.constant 0 : i32
    return %arg2, %arg1 : i32, i32
  }
  func.func @transform_2(%arg0: i32, %arg1: i32, %arg2: i32) -> (i32, i32) {
    %c0_i32 = arith.constant 0 : i32
    return %arg0, %arg1 : i32, i32
  }
}

module attributes {stable_mosaic.version = 11 : i64} {
  func.func @_affine_kernel(%arg0: i32, %arg1: memref<128x128xbf16, #tpu.memory_space<vmem>>, %arg2: memref<1x128xf32, #tpu.memory_space<vmem>>, %arg3: memref<1x128xf32, #tpu.memory_space<vmem>>, %arg4: memref<128x128xbf16, #tpu.memory_space<vmem>>) attributes {dimension_semantics = [#tpu.dimension_semantics<parallel>], iteration_bounds = array<i64: 2>, scalar_prefetch = 0 : i64, scratch_operands = 0 : i64, tpu.core_type = #tpu.core_type<tc>, window_params = [{transform_indices = @transform_0, window_bounds = array<i64: 128, 128>}, {pipeline_mode = #tpu.pipeline_mode<synchronous>, transform_indices = @transform_1, window_bounds = array<i64: 1, 128>}, {pipeline_mode = #tpu.pipeline_mode<synchronous>, transform_indices = @transform_2, window_bounds = array<i64: 1, 128>}, {transform_indices = @transform_3, window_bounds = array<i64: 128, 128>}]} {
    %c0 = arith.constant 0 : index
    %c0_0 = arith.constant 0 : index
    %0 = vector.load %arg1[%c0, %c0_0] : memref<128x128xbf16, #tpu.memory_space<vmem>>, vector<128x128xbf16>
    %1 = arith.extf %0 : vector<128x128xbf16> to vector<128x128xf32>
    %c0_1 = arith.constant 0 : index
    %c0_2 = arith.constant 0 : index
    %2 = vector.load %arg2[%c0_1, %c0_2] : memref<1x128xf32, #tpu.memory_space<vmem>>, vector<1x128xf32>
    %3 = vector.broadcast %2 : vector<1x128xf32> to vector<128x128xf32>
    %4 = arith.mulf %1, %3 : vector<128x128xf32>
    %c0_3 = arith.constant 0 : index
    %c0_4 = arith.constant 0 : index
    %5 = vector.load %arg3[%c0_3, %c0_4] : memref<1x128xf32, #tpu.memory_space<vmem>>, vector<1x128xf32>
    %6 = vector.broadcast %5 : vector<1x128xf32> to vector<128x128xf32>
    %7 = arith.addf %4, %6 : vector<128x128xf32>
    %cst = arith.constant 0.000000e+00 : f32
    %8 = vector.broadcast %cst : f32 to vector<128x128xf32>
    %9 = arith.maximumf %7, %8 : vector<128x128xf32>
    %10 = arith.truncf %9 : vector<128x128xf32> to vector<128x128xbf16>
    %c0_5 = arith.constant 0 : index
    %c0_6 = arith.constant 0 : index
    %11 = vector.load %arg4[%c0_5, %c0_6] : memref<128x128xbf16, #tpu.memory_space<vmem>>, vector<128x128xbf16>
    tpu.vector_store %arg4[%c0_5, %c0_6], %10 {strides = array<i32>} : memref<128x128xbf16, #tpu.memory_space<vmem>>, vector<128x128xbf16>,
    return
  }
  func.func @transform_0(%arg0: i32) -> (i32, i32) {
    %c0_i32 = arith.constant 0 : i32
    %c0_i32_0 = arith.constant 0 : i32
    return %arg0, %c0_i32 : i32, i32
  }
  func.func @transform_1(%arg0: i32) -> (i32, i32) {
    %c0_i32 = arith.constant 0 : i32
    %c0_i32_0 = arith.constant 0 : i32
    %c0_i32_1 = arith.constant 0 : i32
    return %c0_i32, %c0_i32_0 : i32, i32
  }
  func.func @transform_2(%arg0: i32) -> (i32, i32) {
    %c0_i32 = arith.constant 0 : i32
    %c0_i32_0 = arith.constant 0 : i32
    %c0_i32_1 = arith.constant 0 : i32
    return %c0_i32, %c0_i32_0 : i32, i32
  }
  func.func @transform_3(%arg0: i32) -> (i32, i32) {
    %c0_i32 = arith.constant 0 : i32
    %c0_i32_0 = arith.constant 0 : i32
    return %arg0, %c0_i32 : i32, i32
  }
}

module attributes {stable_mosaic.version = 11 : i64} {
  func.func @_maxpool_kernel(%arg0: i32, %arg1: memref<1x9x9x64xbf16, #tpu.memory_space<vmem>>, %arg2: memref<1x9x9x64xbf16, #tpu.memory_space<vmem>>, %arg3: memref<1x9x9x64xbf16, #tpu.memory_space<vmem>>, %arg4: memref<1x9x9x64xbf16, #tpu.memory_space<vmem>>, %arg5: memref<1x8x8x64xbf16, #tpu.memory_space<vmem>>) attributes {dimension_semantics = [#tpu.dimension_semantics<parallel>], iteration_bounds = array<i64: 2>, scalar_prefetch = 0 : i64, scratch_operands = 0 : i64, tpu.core_type = #tpu.core_type<tc>, window_params = [{transform_indices = @transform_0, window_bounds = array<i64: 1, 9, 9, 64>}, {transform_indices = @transform_1, window_bounds = array<i64: 1, 9, 9, 64>}, {transform_indices = @transform_2, window_bounds = array<i64: 1, 9, 9, 64>}, {transform_indices = @transform_3, window_bounds = array<i64: 1, 9, 9, 64>}, {transform_indices = @transform_4, window_bounds = array<i64: 1, 8, 8, 64>}]} {
    %c0 = arith.constant 0 : index
    %c0_0 = arith.constant 0 : index
    %c0_1 = arith.constant 0 : index
    %c0_2 = arith.constant 0 : index
    %0 = vector.load %arg1[%c0, %c0_0, %c0_1, %c0_2] : memref<1x9x9x64xbf16, #tpu.memory_space<vmem>>, vector<1x8x8x64xbf16>
    %c0_3 = arith.constant 0 : index
    %c0_4 = arith.constant 0 : index
    %c1 = arith.constant 1 : index
    %c0_5 = arith.constant 0 : index
    %1 = vector.load %arg1[%c0_3, %c0_4, %c1, %c0_5] : memref<1x9x9x64xbf16, #tpu.memory_space<vmem>>, vector<1x8x8x64xbf16>
    %2 = arith.maximumf %0, %1 : vector<1x8x8x64xbf16>
    %c0_6 = arith.constant 0 : index
    %c1_7 = arith.constant 1 : index
    %c0_8 = arith.constant 0 : index
    %c0_9 = arith.constant 0 : index
    %3 = vector.load %arg1[%c0_6, %c1_7, %c0_8, %c0_9] : memref<1x9x9x64xbf16, #tpu.memory_space<vmem>>, vector<1x8x8x64xbf16>
    %4 = arith.maximumf %2, %3 : vector<1x8x8x64xbf16>
    %c0_10 = arith.constant 0 : index
    %c1_11 = arith.constant 1 : index
    %c1_12 = arith.constant 1 : index
    %c0_13 = arith.constant 0 : index
    %5 = vector.load %arg1[%c0_10, %c1_11, %c1_12, %c0_13] : memref<1x9x9x64xbf16, #tpu.memory_space<vmem>>, vector<1x8x8x64xbf16>
    %6 = arith.maximumf %4, %5 : vector<1x8x8x64xbf16>
    %c0_14 = arith.constant 0 : index
    %c0_15 = arith.constant 0 : index
    %c0_16 = arith.constant 0 : index
    %c0_17 = arith.constant 0 : index
    %7 = vector.load %arg2[%c0_14, %c0_15, %c0_16, %c0_17] : memref<1x9x9x64xbf16, #tpu.memory_space<vmem>>, vector<1x8x8x64xbf16>
    %8 = arith.maximumf %6, %7 : vector<1x8x8x64xbf16>
    %c0_18 = arith.constant 0 : index
    %c1_19 = arith.constant 1 : index
    %c0_20 = arith.constant 0 : index
    %c0_21 = arith.constant 0 : index
    %9 = vector.load %arg2[%c0_18, %c1_19, %c0_20, %c0_21] : memref<1x9x9x64xbf16, #tpu.memory_space<vmem>>, vector<1x8x8x64xbf16>
    %10 = arith.maximumf %8, %9 : vector<1x8x8x64xbf16>
    %c0_22 = arith.constant 0 : index
    %c0_23 = arith.constant 0 : index
    %c0_24 = arith.constant 0 : index
    %c0_25 = arith.constant 0 : index
    %11 = vector.load %arg3[%c0_22, %c0_23, %c0_24, %c0_25] : memref<1x9x9x64xbf16, #tpu.memory_space<vmem>>, vector<1x8x8x64xbf16>
    %12 = arith.maximumf %10, %11 : vector<1x8x8x64xbf16>
    %c0_26 = arith.constant 0 : index
    %c0_27 = arith.constant 0 : index
    %c1_28 = arith.constant 1 : index
    %c0_29 = arith.constant 0 : index
    %13 = vector.load %arg3[%c0_26, %c0_27, %c1_28, %c0_29] : memref<1x9x9x64xbf16, #tpu.memory_space<vmem>>, vector<1x8x8x64xbf16>
    %14 = arith.maximumf %12, %13 : vector<1x8x8x64xbf16>
    %c0_30 = arith.constant 0 : index
    %c0_31 = arith.constant 0 : index
    %c0_32 = arith.constant 0 : index
    %c0_33 = arith.constant 0 : index
    %15 = vector.load %arg4[%c0_30, %c0_31, %c0_32, %c0_33] : memref<1x9x9x64xbf16, #tpu.memory_space<vmem>>, vector<1x8x8x64xbf16>
    %16 = arith.maximumf %14, %15 : vector<1x8x8x64xbf16>
    %c0_34 = arith.constant 0 : index
    %c0_35 = arith.constant 0 : index
    %c0_36 = arith.constant 0 : index
    %c0_37 = arith.constant 0 : index
    %17 = vector.load %arg5[%c0_34, %c0_35, %c0_36, %c0_37] : memref<1x8x8x64xbf16, #tpu.memory_space<vmem>>, vector<1x8x8x64xbf16>
    tpu.vector_store %arg5[%c0_34, %c0_35, %c0_36, %c0_37], %16 {strides = array<i32>} : memref<1x8x8x64xbf16, #tpu.memory_space<vmem>>, vector<1x8x8x64xbf16>,
    return
  }
  func.func @transform_0(%arg0: i32) -> (i32, i32, i32, i32) {
    %c0_i32 = arith.constant 0 : i32
    %c0_i32_0 = arith.constant 0 : i32
    %c0_i32_1 = arith.constant 0 : i32
    %c0_i32_2 = arith.constant 0 : i32
    return %arg0, %c0_i32, %c0_i32_0, %c0_i32_1 : i32, i32, i32, i32
  }
  func.func @transform_1(%arg0: i32) -> (i32, i32, i32, i32) {
    %c0_i32 = arith.constant 0 : i32
    %c0_i32_0 = arith.constant 0 : i32
    %c0_i32_1 = arith.constant 0 : i32
    %c0_i32_2 = arith.constant 0 : i32
    return %arg0, %c0_i32, %c0_i32_0, %c0_i32_1 : i32, i32, i32, i32
  }
  func.func @transform_2(%arg0: i32) -> (i32, i32, i32, i32) {
    %c0_i32 = arith.constant 0 : i32
    %c0_i32_0 = arith.constant 0 : i32
    %c0_i32_1 = arith.constant 0 : i32
    %c0_i32_2 = arith.constant 0 : i32
    return %arg0, %c0_i32, %c0_i32_0, %c0_i32_1 : i32, i32, i32, i32
  }
  func.func @transform_3(%arg0: i32) -> (i32, i32, i32, i32) {
    %c0_i32 = arith.constant 0 : i32
    %c0_i32_0 = arith.constant 0 : i32
    %c0_i32_1 = arith.constant 0 : i32
    %c0_i32_2 = arith.constant 0 : i32
    return %arg0, %c0_i32, %c0_i32_0, %c0_i32_1 : i32, i32, i32, i32
  }
  func.func @transform_4(%arg0: i32) -> (i32, i32, i32, i32) {
    %c0_i32 = arith.constant 0 : i32
    %c0_i32_0 = arith.constant 0 : i32
    %c0_i32_1 = arith.constant 0 : i32
    %c0_i32_2 = arith.constant 0 : i32
    return %arg0, %c0_i32, %c0_i32_0, %c0_i32_1 : i32, i32, i32, i32
  }
}

module attributes {stable_mosaic.version = 11 : i64} {
  func.func @_matmul_kernel(%arg0: i32, %arg1: i32, %arg2: i32, %arg3: memref<128x640xbf16, #tpu.memory_space<vmem>>, %arg4: memref<640x128xbf16, #tpu.memory_space<vmem>>, %arg5: memref<128x128xbf16, #tpu.memory_space<vmem>>, %arg6: memref<128x128xf32, #tpu.memory_space<vmem>>) attributes {dimension_semantics = [#tpu.dimension_semantics<parallel>, #tpu.dimension_semantics<parallel>, #tpu.dimension_semantics<arbitrary>], iteration_bounds = array<i64: 1, 1, 1>, scalar_prefetch = 0 : i64, scratch_operands = 1 : i64, tpu.core_type = #tpu.core_type<tc>, window_params = [{transform_indices = @transform_0, window_bounds = array<i64: 128, 640>}, {transform_indices = @transform_1, window_bounds = array<i64: 640, 128>}, {transform_indices = @transform_2, window_bounds = array<i64: 128, 128>}]} {
    %c0_i32 = arith.constant 0 : i32
    %0 = arith.cmpi eq, %arg2, %c0_i32 : i32
    %1 = arith.extui %0 : i1 to i32
    %c0_i32_0 = arith.constant 0 : i32
    %2 = arith.cmpi ne, %1, %c0_i32_0 : i32
    scf.if %2 {
      %cst_10 = arith.constant 0.000000e+00 : f32
      %12 = vector.broadcast %cst_10 : f32 to vector<128x128xf32>
      %c0_11 = arith.constant 0 : index
      %c0_12 = arith.constant 0 : index
      %13 = vector.load %arg6[%c0_11, %c0_12] : memref<128x128xf32, #tpu.memory_space<vmem>>, vector<128x128xf32>
      tpu.vector_store %arg6[%c0_11, %c0_12], %12 {strides = array<i32>} : memref<128x128xf32, #tpu.memory_space<vmem>>, vector<128x128xf32>,
    } else {
    }
    %c0 = arith.constant 0 : index
    %c0_1 = arith.constant 0 : index
    %3 = vector.load %arg6[%c0, %c0_1] : memref<128x128xf32, #tpu.memory_space<vmem>>, vector<128x128xf32>
    %c0_2 = arith.constant 0 : index
    %c0_3 = arith.constant 0 : index
    %4 = vector.load %arg3[%c0_2, %c0_3] : memref<128x640xbf16, #tpu.memory_space<vmem>>, vector<128x640xbf16>
    %c0_4 = arith.constant 0 : index
    %c0_5 = arith.constant 0 : index
    %5 = vector.load %arg4[%c0_4, %c0_5] : memref<640x128xbf16, #tpu.memory_space<vmem>>, vector<640x128xbf16>
    %cst = arith.constant dense<0.000000e+00> : vector<128x128xf32>
    %6 = tpu.matmul %4, %5, %cst {dimension_numbers = #tpu.dot_dimension_numbers<[1], [0], [0], [1], [0, 0, 1, 1], [], []>} : vector<128x640xbf16>, vector<640x128xbf16>, vector<128x128xf32> -> vector<128x128xf32>
    %7 = arith.addf %3, %6 : vector<128x128xf32>
    %c0_6 = arith.constant 0 : index
    %c0_7 = arith.constant 0 : index
    %8 = vector.load %arg6[%c0_6, %c0_7] : memref<128x128xf32, #tpu.memory_space<vmem>>, vector<128x128xf32>
    tpu.vector_store %arg6[%c0_6, %c0_7], %7 {strides = array<i32>} : memref<128x128xf32, #tpu.memory_space<vmem>>, vector<128x128xf32>,
    %c0_i32_8 = arith.constant 0 : i32
    %9 = arith.cmpi eq, %arg2, %c0_i32_8 : i32
    %10 = arith.extui %9 : i1 to i32
    %c0_i32_9 = arith.constant 0 : i32
    %11 = arith.cmpi ne, %10, %c0_i32_9 : i32
    scf.if %11 {
      %c0_10 = arith.constant 0 : index
      %c0_11 = arith.constant 0 : index
      %12 = vector.load %arg6[%c0_10, %c0_11] : memref<128x128xf32, #tpu.memory_space<vmem>>, vector<128x128xf32>
      %13 = arith.truncf %12 : vector<128x128xf32> to vector<128x128xbf16>
      %c0_12 = arith.constant 0 : index
      %c0_13 = arith.constant 0 : index
      %14 = vector.load %arg5[%c0_12, %c0_13] : memref<128x128xbf16, #tpu.memory_space<vmem>>, vector<128x128xbf16>
      tpu.vector_store %arg5[%c0_12, %c0_13], %13 {strides = array<i32>} : memref<128x128xbf16, #tpu.memory_space<vmem>>, vector<128x128xbf16>,
    } else {
    }
    return
  }
  func.func @transform_0(%arg0: i32, %arg1: i32, %arg2: i32) -> (i32, i32) {
    %c0_i32 = arith.constant 0 : i32
    return %arg0, %arg2 : i32, i32
  }
  func.func @transform_1(%arg0: i32, %arg1: i32, %arg2: i32) -> (i32, i32) {
    %c0_i32 = arith.constant 0 : i32
    return %arg2, %arg1 : i32, i32
  }
  func.func @transform_2(%arg0: i32, %arg1: i32, %arg2: i32) -> (i32, i32) {
    %c0_i32 = arith.constant 0 : i32
    return %arg0, %arg1 : i32, i32
  }
}

module attributes {stable_mosaic.version = 11 : i64} {
  func.func @_affine_kernel(%arg0: i32, %arg1: memref<32x128xbf16, #tpu.memory_space<vmem>>, %arg2: memref<1x128xf32, #tpu.memory_space<vmem>>, %arg3: memref<1x128xf32, #tpu.memory_space<vmem>>, %arg4: memref<32x128xbf16, #tpu.memory_space<vmem>>) attributes {dimension_semantics = [#tpu.dimension_semantics<parallel>], iteration_bounds = array<i64: 2>, scalar_prefetch = 0 : i64, scratch_operands = 0 : i64, tpu.core_type = #tpu.core_type<tc>, window_params = [{transform_indices = @transform_0, window_bounds = array<i64: 32, 128>}, {pipeline_mode = #tpu.pipeline_mode<synchronous>, transform_indices = @transform_1, window_bounds = array<i64: 1, 128>}, {pipeline_mode = #tpu.pipeline_mode<synchronous>, transform_indices = @transform_2, window_bounds = array<i64: 1, 128>}, {transform_indices = @transform_3, window_bounds = array<i64: 32, 128>}]} {
    %c0 = arith.constant 0 : index
    %c0_0 = arith.constant 0 : index
    %0 = vector.load %arg1[%c0, %c0_0] : memref<32x128xbf16, #tpu.memory_space<vmem>>, vector<32x128xbf16>
    %1 = arith.extf %0 : vector<32x128xbf16> to vector<32x128xf32>
    %c0_1 = arith.constant 0 : index
    %c0_2 = arith.constant 0 : index
    %2 = vector.load %arg2[%c0_1, %c0_2] : memref<1x128xf32, #tpu.memory_space<vmem>>, vector<1x128xf32>
    %3 = vector.broadcast %2 : vector<1x128xf32> to vector<32x128xf32>
    %4 = arith.mulf %1, %3 : vector<32x128xf32>
    %c0_3 = arith.constant 0 : index
    %c0_4 = arith.constant 0 : index
    %5 = vector.load %arg3[%c0_3, %c0_4] : memref<1x128xf32, #tpu.memory_space<vmem>>, vector<1x128xf32>
    %6 = vector.broadcast %5 : vector<1x128xf32> to vector<32x128xf32>
    %7 = arith.addf %4, %6 : vector<32x128xf32>
    %cst = arith.constant 0.000000e+00 : f32
    %8 = vector.broadcast %cst : f32 to vector<32x128xf32>
    %9 = arith.maximumf %7, %8 : vector<32x128xf32>
    %10 = arith.truncf %9 : vector<32x128xf32> to vector<32x128xbf16>
    %c0_5 = arith.constant 0 : index
    %c0_6 = arith.constant 0 : index
    %11 = vector.load %arg4[%c0_5, %c0_6] : memref<32x128xbf16, #tpu.memory_space<vmem>>, vector<32x128xbf16>
    tpu.vector_store %arg4[%c0_5, %c0_6], %10 {strides = array<i32>} : memref<32x128xbf16, #tpu.memory_space<vmem>>, vector<32x128xbf16>,
    return
  }
  func.func @transform_0(%arg0: i32) -> (i32, i32) {
    %c0_i32 = arith.constant 0 : i32
    %c0_i32_0 = arith.constant 0 : i32
    return %arg0, %c0_i32 : i32, i32
  }
  func.func @transform_1(%arg0: i32) -> (i32, i32) {
    %c0_i32 = arith.constant 0 : i32
    %c0_i32_0 = arith.constant 0 : i32
    %c0_i32_1 = arith.constant 0 : i32
    return %c0_i32, %c0_i32_0 : i32, i32
  }
  func.func @transform_2(%arg0: i32) -> (i32, i32) {
    %c0_i32 = arith.constant 0 : i32
    %c0_i32_0 = arith.constant 0 : i32
    %c0_i32_1 = arith.constant 0 : i32
    return %c0_i32, %c0_i32_0 : i32, i32
  }
  func.func @transform_3(%arg0: i32) -> (i32, i32) {
    %c0_i32 = arith.constant 0 : i32
    %c0_i32_0 = arith.constant 0 : i32
    return %arg0, %c0_i32 : i32, i32
  }
}

module attributes {stable_mosaic.version = 11 : i64} {
  func.func @_affine_res_kernel(%arg0: i32, %arg1: memref<32x128xbf16, #tpu.memory_space<vmem>>, %arg2: memref<1x128xf32, #tpu.memory_space<vmem>>, %arg3: memref<1x128xf32, #tpu.memory_space<vmem>>, %arg4: memref<32x128xbf16, #tpu.memory_space<vmem>>, %arg5: memref<32x128xbf16, #tpu.memory_space<vmem>>) attributes {dimension_semantics = [#tpu.dimension_semantics<parallel>], iteration_bounds = array<i64: 2>, scalar_prefetch = 0 : i64, scratch_operands = 0 : i64, tpu.core_type = #tpu.core_type<tc>, window_params = [{transform_indices = @transform_0, window_bounds = array<i64: 32, 128>}, {pipeline_mode = #tpu.pipeline_mode<synchronous>, transform_indices = @transform_1, window_bounds = array<i64: 1, 128>}, {pipeline_mode = #tpu.pipeline_mode<synchronous>, transform_indices = @transform_2, window_bounds = array<i64: 1, 128>}, {transform_indices = @transform_3, window_bounds = array<i64: 32, 128>}, {transform_indices = @transform_4, window_bounds = array<i64: 32, 128>}]} {
    %c0 = arith.constant 0 : index
    %c0_0 = arith.constant 0 : index
    %0 = vector.load %arg1[%c0, %c0_0] : memref<32x128xbf16, #tpu.memory_space<vmem>>, vector<32x128xbf16>
    %1 = arith.extf %0 : vector<32x128xbf16> to vector<32x128xf32>
    %c0_1 = arith.constant 0 : index
    %c0_2 = arith.constant 0 : index
    %2 = vector.load %arg2[%c0_1, %c0_2] : memref<1x128xf32, #tpu.memory_space<vmem>>, vector<1x128xf32>
    %3 = vector.broadcast %2 : vector<1x128xf32> to vector<32x128xf32>
    %4 = arith.mulf %1, %3 : vector<32x128xf32>
    %c0_3 = arith.constant 0 : index
    %c0_4 = arith.constant 0 : index
    %5 = vector.load %arg3[%c0_3, %c0_4] : memref<1x128xf32, #tpu.memory_space<vmem>>, vector<1x128xf32>
    %6 = vector.broadcast %5 : vector<1x128xf32> to vector<32x128xf32>
    %7 = arith.addf %4, %6 : vector<32x128xf32>
    %c0_5 = arith.constant 0 : index
    %c0_6 = arith.constant 0 : index
    %8 = vector.load %arg4[%c0_5, %c0_6] : memref<32x128xbf16, #tpu.memory_space<vmem>>, vector<32x128xbf16>
    %9 = arith.extf %8 : vector<32x128xbf16> to vector<32x128xf32>
    %10 = arith.addf %7, %9 : vector<32x128xf32>
    %cst = arith.constant 0.000000e+00 : f32
    %11 = vector.broadcast %cst : f32 to vector<32x128xf32>
    %12 = arith.maximumf %10, %11 : vector<32x128xf32>
    %13 = arith.truncf %12 : vector<32x128xf32> to vector<32x128xbf16>
    %c0_7 = arith.constant 0 : index
    %c0_8 = arith.constant 0 : index
    %14 = vector.load %arg5[%c0_7, %c0_8] : memref<32x128xbf16, #tpu.memory_space<vmem>>, vector<32x128xbf16>
    tpu.vector_store %arg5[%c0_7, %c0_8], %13 {strides = array<i32>} : memref<32x128xbf16, #tpu.memory_space<vmem>>, vector<32x128xbf16>,
    return
  }
  func.func @transform_0(%arg0: i32) -> (i32, i32) {
    %c0_i32 = arith.constant 0 : i32
    %c0_i32_0 = arith.constant 0 : i32
    return %arg0, %c0_i32 : i32, i32
  }
  func.func @transform_1(%arg0: i32) -> (i32, i32) {
    %c0_i32 = arith.constant 0 : i32
    %c0_i32_0 = arith.constant 0 : i32
    %c0_i32_1 = arith.constant 0 : i32
    return %c0_i32, %c0_i32_0 : i32, i32
  }
  func.func @transform_2(%arg0: i32) -> (i32, i32) {
    %c0_i32 = arith.constant 0 : i32
    %c0_i32_0 = arith.constant 0 : i32
    %c0_i32_1 = arith.constant 0 : i32
    return %c0_i32, %c0_i32_0 : i32, i32
  }
  func.func @transform_3(%arg0: i32) -> (i32, i32) {
    %c0_i32 = arith.constant 0 : i32
    %c0_i32_0 = arith.constant 0 : i32
    return %arg0, %c0_i32 : i32, i32
  }
  func.func @transform_4(%arg0: i32) -> (i32, i32) {
    %c0_i32 = arith.constant 0 : i32
    %c0_i32_0 = arith.constant 0 : i32
    return %arg0, %c0_i32 : i32, i32
  }
}

module attributes {stable_mosaic.version = 11 : i64} {
  func.func @_affine_kernel(%arg0: i32, %arg1: memref<16x128xbf16, #tpu.memory_space<vmem>>, %arg2: memref<1x128xf32, #tpu.memory_space<vmem>>, %arg3: memref<1x128xf32, #tpu.memory_space<vmem>>, %arg4: memref<16x128xbf16, #tpu.memory_space<vmem>>) attributes {dimension_semantics = [#tpu.dimension_semantics<parallel>], iteration_bounds = array<i64: 2>, scalar_prefetch = 0 : i64, scratch_operands = 0 : i64, tpu.core_type = #tpu.core_type<tc>, window_params = [{transform_indices = @transform_0, window_bounds = array<i64: 16, 128>}, {pipeline_mode = #tpu.pipeline_mode<synchronous>, transform_indices = @transform_1, window_bounds = array<i64: 1, 128>}, {pipeline_mode = #tpu.pipeline_mode<synchronous>, transform_indices = @transform_2, window_bounds = array<i64: 1, 128>}, {transform_indices = @transform_3, window_bounds = array<i64: 16, 128>}]} {
    %c0 = arith.constant 0 : index
    %c0_0 = arith.constant 0 : index
    %0 = vector.load %arg1[%c0, %c0_0] : memref<16x128xbf16, #tpu.memory_space<vmem>>, vector<16x128xbf16>
    %1 = arith.extf %0 : vector<16x128xbf16> to vector<16x128xf32>
    %c0_1 = arith.constant 0 : index
    %c0_2 = arith.constant 0 : index
    %2 = vector.load %arg2[%c0_1, %c0_2] : memref<1x128xf32, #tpu.memory_space<vmem>>, vector<1x128xf32>
    %3 = vector.broadcast %2 : vector<1x128xf32> to vector<16x128xf32>
    %4 = arith.mulf %1, %3 : vector<16x128xf32>
    %c0_3 = arith.constant 0 : index
    %c0_4 = arith.constant 0 : index
    %5 = vector.load %arg3[%c0_3, %c0_4] : memref<1x128xf32, #tpu.memory_space<vmem>>, vector<1x128xf32>
    %6 = vector.broadcast %5 : vector<1x128xf32> to vector<16x128xf32>
    %7 = arith.addf %4, %6 : vector<16x128xf32>
    %8 = arith.truncf %7 : vector<16x128xf32> to vector<16x128xbf16>
    %c0_5 = arith.constant 0 : index
    %c0_6 = arith.constant 0 : index
    %9 = vector.load %arg4[%c0_5, %c0_6] : memref<16x128xbf16, #tpu.memory_space<vmem>>, vector<16x128xbf16>
    tpu.vector_store %arg4[%c0_5, %c0_6], %8 {strides = array<i32>} : memref<16x128xbf16, #tpu.memory_space<vmem>>, vector<16x128xbf16>,
    return
  }
  func.func @transform_0(%arg0: i32) -> (i32, i32) {
    %c0_i32 = arith.constant 0 : i32
    %c0_i32_0 = arith.constant 0 : i32
    return %arg0, %c0_i32 : i32, i32
  }
  func.func @transform_1(%arg0: i32) -> (i32, i32) {
    %c0_i32 = arith.constant 0 : i32
    %c0_i32_0 = arith.constant 0 : i32
    %c0_i32_1 = arith.constant 0 : i32
    return %c0_i32, %c0_i32_0 : i32, i32
  }
  func.func @transform_2(%arg0: i32) -> (i32, i32) {
    %c0_i32 = arith.constant 0 : i32
    %c0_i32_0 = arith.constant 0 : i32
    %c0_i32_1 = arith.constant 0 : i32
    return %c0_i32, %c0_i32_0 : i32, i32
  }
  func.func @transform_3(%arg0: i32) -> (i32, i32) {
    %c0_i32 = arith.constant 0 : i32
    %c0_i32_0 = arith.constant 0 : i32
    return %arg0, %c0_i32 : i32, i32
  }
}

module attributes {stable_mosaic.version = 11 : i64} {
  func.func @_matmul_kernel(%arg0: i32, %arg1: i32, %arg2: i32, %arg3: memref<32x128xbf16, #tpu.memory_space<vmem>>, %arg4: memref<128x128xbf16, #tpu.memory_space<vmem>>, %arg5: memref<32x128xbf16, #tpu.memory_space<vmem>>, %arg6: memref<32x128xf32, #tpu.memory_space<vmem>>) attributes {dimension_semantics = [#tpu.dimension_semantics<parallel>, #tpu.dimension_semantics<parallel>, #tpu.dimension_semantics<arbitrary>], iteration_bounds = array<i64: 1, 1, 1>, scalar_prefetch = 0 : i64, scratch_operands = 1 : i64, tpu.core_type = #tpu.core_type<tc>, window_params = [{transform_indices = @transform_0, window_bounds = array<i64: 32, 128>}, {transform_indices = @transform_1, window_bounds = array<i64: 128, 128>}, {transform_indices = @transform_2, window_bounds = array<i64: 32, 128>}]} {
    %c0_i32 = arith.constant 0 : i32
    %0 = arith.cmpi eq, %arg2, %c0_i32 : i32
    %1 = arith.extui %0 : i1 to i32
    %c0_i32_0 = arith.constant 0 : i32
    %2 = arith.cmpi ne, %1, %c0_i32_0 : i32
    scf.if %2 {
      %cst_10 = arith.constant 0.000000e+00 : f32
      %12 = vector.broadcast %cst_10 : f32 to vector<32x128xf32>
      %c0_11 = arith.constant 0 : index
      %c0_12 = arith.constant 0 : index
      %13 = vector.load %arg6[%c0_11, %c0_12] : memref<32x128xf32, #tpu.memory_space<vmem>>, vector<32x128xf32>
      tpu.vector_store %arg6[%c0_11, %c0_12], %12 {strides = array<i32>} : memref<32x128xf32, #tpu.memory_space<vmem>>, vector<32x128xf32>,
    } else {
    }
    %c0 = arith.constant 0 : index
    %c0_1 = arith.constant 0 : index
    %3 = vector.load %arg6[%c0, %c0_1] : memref<32x128xf32, #tpu.memory_space<vmem>>, vector<32x128xf32>
    %c0_2 = arith.constant 0 : index
    %c0_3 = arith.constant 0 : index
    %4 = vector.load %arg3[%c0_2, %c0_3] : memref<32x128xbf16, #tpu.memory_space<vmem>>, vector<32x128xbf16>
    %c0_4 = arith.constant 0 : index
    %c0_5 = arith.constant 0 : index
    %5 = vector.load %arg4[%c0_4, %c0_5] : memref<128x128xbf16, #tpu.memory_space<vmem>>, vector<128x128xbf16>
    %cst = arith.constant dense<0.000000e+00> : vector<32x128xf32>
    %6 = tpu.matmul %4, %5, %cst {dimension_numbers = #tpu.dot_dimension_numbers<[1], [0], [0], [1], [0, 0, 1, 1], [], []>} : vector<32x128xbf16>, vector<128x128xbf16>, vector<32x128xf32> -> vector<32x128xf32>
    %7 = arith.addf %3, %6 : vector<32x128xf32>
    %c0_6 = arith.constant 0 : index
    %c0_7 = arith.constant 0 : index
    %8 = vector.load %arg6[%c0_6, %c0_7] : memref<32x128xf32, #tpu.memory_space<vmem>>, vector<32x128xf32>
    tpu.vector_store %arg6[%c0_6, %c0_7], %7 {strides = array<i32>} : memref<32x128xf32, #tpu.memory_space<vmem>>, vector<32x128xf32>,
    %c0_i32_8 = arith.constant 0 : i32
    %9 = arith.cmpi eq, %arg2, %c0_i32_8 : i32
    %10 = arith.extui %9 : i1 to i32
    %c0_i32_9 = arith.constant 0 : i32
    %11 = arith.cmpi ne, %10, %c0_i32_9 : i32
    scf.if %11 {
      %c0_10 = arith.constant 0 : index
      %c0_11 = arith.constant 0 : index
      %12 = vector.load %arg6[%c0_10, %c0_11] : memref<32x128xf32, #tpu.memory_space<vmem>>, vector<32x128xf32>
      %13 = arith.truncf %12 : vector<32x128xf32> to vector<32x128xbf16>
      %c0_12 = arith.constant 0 : index
      %c0_13 = arith.constant 0 : index
      %14 = vector.load %arg5[%c0_12, %c0_13] : memref<32x128xbf16, #tpu.memory_space<vmem>>, vector<32x128xbf16>
      tpu.vector_store %arg5[%c0_12, %c0_13], %13 {strides = array<i32>} : memref<32x128xbf16, #tpu.memory_space<vmem>>, vector<32x128xbf16>,
    } else {
    }
    return
  }
  func.func @transform_0(%arg0: i32, %arg1: i32, %arg2: i32) -> (i32, i32) {
    %c0_i32 = arith.constant 0 : i32
    return %arg0, %arg2 : i32, i32
  }
  func.func @transform_1(%arg0: i32, %arg1: i32, %arg2: i32) -> (i32, i32) {
    %c0_i32 = arith.constant 0 : i32
    return %arg2, %arg1 : i32, i32
  }
  func.func @transform_2(%arg0: i32, %arg1: i32, %arg2: i32) -> (i32, i32) {
    %c0_i32 = arith.constant 0 : i32
    return %arg0, %arg1 : i32, i32
  }
}

module attributes {stable_mosaic.version = 11 : i64} {
  func.func @_matmul_kernel(%arg0: i32, %arg1: i32, %arg2: i32, %arg3: memref<32x640xbf16, #tpu.memory_space<vmem>>, %arg4: memref<640x128xbf16, #tpu.memory_space<vmem>>, %arg5: memref<32x128xbf16, #tpu.memory_space<vmem>>, %arg6: memref<32x128xf32, #tpu.memory_space<vmem>>) attributes {dimension_semantics = [#tpu.dimension_semantics<parallel>, #tpu.dimension_semantics<parallel>, #tpu.dimension_semantics<arbitrary>], iteration_bounds = array<i64: 1, 1, 1>, scalar_prefetch = 0 : i64, scratch_operands = 1 : i64, tpu.core_type = #tpu.core_type<tc>, window_params = [{transform_indices = @transform_0, window_bounds = array<i64: 32, 640>}, {transform_indices = @transform_1, window_bounds = array<i64: 640, 128>}, {transform_indices = @transform_2, window_bounds = array<i64: 32, 128>}]} {
    %c0_i32 = arith.constant 0 : i32
    %0 = arith.cmpi eq, %arg2, %c0_i32 : i32
    %1 = arith.extui %0 : i1 to i32
    %c0_i32_0 = arith.constant 0 : i32
    %2 = arith.cmpi ne, %1, %c0_i32_0 : i32
    scf.if %2 {
      %cst_10 = arith.constant 0.000000e+00 : f32
      %12 = vector.broadcast %cst_10 : f32 to vector<32x128xf32>
      %c0_11 = arith.constant 0 : index
      %c0_12 = arith.constant 0 : index
      %13 = vector.load %arg6[%c0_11, %c0_12] : memref<32x128xf32, #tpu.memory_space<vmem>>, vector<32x128xf32>
      tpu.vector_store %arg6[%c0_11, %c0_12], %12 {strides = array<i32>} : memref<32x128xf32, #tpu.memory_space<vmem>>, vector<32x128xf32>,
    } else {
    }
    %c0 = arith.constant 0 : index
    %c0_1 = arith.constant 0 : index
    %3 = vector.load %arg6[%c0, %c0_1] : memref<32x128xf32, #tpu.memory_space<vmem>>, vector<32x128xf32>
    %c0_2 = arith.constant 0 : index
    %c0_3 = arith.constant 0 : index
    %4 = vector.load %arg3[%c0_2, %c0_3] : memref<32x640xbf16, #tpu.memory_space<vmem>>, vector<32x640xbf16>
    %c0_4 = arith.constant 0 : index
    %c0_5 = arith.constant 0 : index
    %5 = vector.load %arg4[%c0_4, %c0_5] : memref<640x128xbf16, #tpu.memory_space<vmem>>, vector<640x128xbf16>
    %cst = arith.constant dense<0.000000e+00> : vector<32x128xf32>
    %6 = tpu.matmul %4, %5, %cst {dimension_numbers = #tpu.dot_dimension_numbers<[1], [0], [0], [1], [0, 0, 1, 1], [], []>} : vector<32x640xbf16>, vector<640x128xbf16>, vector<32x128xf32> -> vector<32x128xf32>
    %7 = arith.addf %3, %6 : vector<32x128xf32>
    %c0_6 = arith.constant 0 : index
    %c0_7 = arith.constant 0 : index
    %8 = vector.load %arg6[%c0_6, %c0_7] : memref<32x128xf32, #tpu.memory_space<vmem>>, vector<32x128xf32>
    tpu.vector_store %arg6[%c0_6, %c0_7], %7 {strides = array<i32>} : memref<32x128xf32, #tpu.memory_space<vmem>>, vector<32x128xf32>,
    %c0_i32_8 = arith.constant 0 : i32
    %9 = arith.cmpi eq, %arg2, %c0_i32_8 : i32
    %10 = arith.extui %9 : i1 to i32
    %c0_i32_9 = arith.constant 0 : i32
    %11 = arith.cmpi ne, %10, %c0_i32_9 : i32
    scf.if %11 {
      %c0_10 = arith.constant 0 : index
      %c0_11 = arith.constant 0 : index
      %12 = vector.load %arg6[%c0_10, %c0_11] : memref<32x128xf32, #tpu.memory_space<vmem>>, vector<32x128xf32>
      %13 = arith.truncf %12 : vector<32x128xf32> to vector<32x128xbf16>
      %c0_12 = arith.constant 0 : index
      %c0_13 = arith.constant 0 : index
      %14 = vector.load %arg5[%c0_12, %c0_13] : memref<32x128xbf16, #tpu.memory_space<vmem>>, vector<32x128xbf16>
      tpu.vector_store %arg5[%c0_12, %c0_13], %13 {strides = array<i32>} : memref<32x128xbf16, #tpu.memory_space<vmem>>, vector<32x128xbf16>,
    } else {
    }
    return
  }
  func.func @transform_0(%arg0: i32, %arg1: i32, %arg2: i32) -> (i32, i32) {
    %c0_i32 = arith.constant 0 : i32
    return %arg0, %arg2 : i32, i32
  }
  func.func @transform_1(%arg0: i32, %arg1: i32, %arg2: i32) -> (i32, i32) {
    %c0_i32 = arith.constant 0 : i32
    return %arg2, %arg1 : i32, i32
  }
  func.func @transform_2(%arg0: i32, %arg1: i32, %arg2: i32) -> (i32, i32) {
    %c0_i32 = arith.constant 0 : i32
    return %arg0, %arg1 : i32, i32
  }
}

module attributes {stable_mosaic.version = 11 : i64} {
  func.func @_affine_kernel(%arg0: i32, %arg1: memref<16x128xbf16, #tpu.memory_space<vmem>>, %arg2: memref<1x128xf32, #tpu.memory_space<vmem>>, %arg3: memref<1x128xf32, #tpu.memory_space<vmem>>, %arg4: memref<16x128xbf16, #tpu.memory_space<vmem>>) attributes {dimension_semantics = [#tpu.dimension_semantics<parallel>], iteration_bounds = array<i64: 2>, scalar_prefetch = 0 : i64, scratch_operands = 0 : i64, tpu.core_type = #tpu.core_type<tc>, window_params = [{transform_indices = @transform_0, window_bounds = array<i64: 16, 128>}, {pipeline_mode = #tpu.pipeline_mode<synchronous>, transform_indices = @transform_1, window_bounds = array<i64: 1, 128>}, {pipeline_mode = #tpu.pipeline_mode<synchronous>, transform_indices = @transform_2, window_bounds = array<i64: 1, 128>}, {transform_indices = @transform_3, window_bounds = array<i64: 16, 128>}]} {
    %c0 = arith.constant 0 : index
    %c0_0 = arith.constant 0 : index
    %0 = vector.load %arg1[%c0, %c0_0] : memref<16x128xbf16, #tpu.memory_space<vmem>>, vector<16x128xbf16>
    %1 = arith.extf %0 : vector<16x128xbf16> to vector<16x128xf32>
    %c0_1 = arith.constant 0 : index
    %c0_2 = arith.constant 0 : index
    %2 = vector.load %arg2[%c0_1, %c0_2] : memref<1x128xf32, #tpu.memory_space<vmem>>, vector<1x128xf32>
    %3 = vector.broadcast %2 : vector<1x128xf32> to vector<16x128xf32>
    %4 = arith.mulf %1, %3 : vector<16x128xf32>
    %c0_3 = arith.constant 0 : index
    %c0_4 = arith.constant 0 : index
    %5 = vector.load %arg3[%c0_3, %c0_4] : memref<1x128xf32, #tpu.memory_space<vmem>>, vector<1x128xf32>
    %6 = vector.broadcast %5 : vector<1x128xf32> to vector<16x128xf32>
    %7 = arith.addf %4, %6 : vector<16x128xf32>
    %cst = arith.constant 0.000000e+00 : f32
    %8 = vector.broadcast %cst : f32 to vector<16x128xf32>
    %9 = arith.maximumf %7, %8 : vector<16x128xf32>
    %10 = arith.truncf %9 : vector<16x128xf32> to vector<16x128xbf16>
    %c0_5 = arith.constant 0 : index
    %c0_6 = arith.constant 0 : index
    %11 = vector.load %arg4[%c0_5, %c0_6] : memref<16x128xbf16, #tpu.memory_space<vmem>>, vector<16x128xbf16>
    tpu.vector_store %arg4[%c0_5, %c0_6], %10 {strides = array<i32>} : memref<16x128xbf16, #tpu.memory_space<vmem>>, vector<16x128xbf16>,
    return
  }
  func.func @transform_0(%arg0: i32) -> (i32, i32) {
    %c0_i32 = arith.constant 0 : i32
    %c0_i32_0 = arith.constant 0 : i32
    return %arg0, %c0_i32 : i32, i32
  }
  func.func @transform_1(%arg0: i32) -> (i32, i32) {
    %c0_i32 = arith.constant 0 : i32
    %c0_i32_0 = arith.constant 0 : i32
    %c0_i32_1 = arith.constant 0 : i32
    return %c0_i32, %c0_i32_0 : i32, i32
  }
  func.func @transform_2(%arg0: i32) -> (i32, i32) {
    %c0_i32 = arith.constant 0 : i32
    %c0_i32_0 = arith.constant 0 : i32
    %c0_i32_1 = arith.constant 0 : i32
    return %c0_i32, %c0_i32_0 : i32, i32
  }
  func.func @transform_3(%arg0: i32) -> (i32, i32) {
    %c0_i32 = arith.constant 0 : i32
    %c0_i32_0 = arith.constant 0 : i32
    return %arg0, %c0_i32 : i32, i32
  }
}

module attributes {stable_mosaic.version = 11 : i64} {
  func.func @_affine_res_kernel(%arg0: i32, %arg1: memref<16x128xbf16, #tpu.memory_space<vmem>>, %arg2: memref<1x128xf32, #tpu.memory_space<vmem>>, %arg3: memref<1x128xf32, #tpu.memory_space<vmem>>, %arg4: memref<16x128xbf16, #tpu.memory_space<vmem>>, %arg5: memref<16x128xbf16, #tpu.memory_space<vmem>>) attributes {dimension_semantics = [#tpu.dimension_semantics<parallel>], iteration_bounds = array<i64: 2>, scalar_prefetch = 0 : i64, scratch_operands = 0 : i64, tpu.core_type = #tpu.core_type<tc>, window_params = [{transform_indices = @transform_0, window_bounds = array<i64: 16, 128>}, {pipeline_mode = #tpu.pipeline_mode<synchronous>, transform_indices = @transform_1, window_bounds = array<i64: 1, 128>}, {pipeline_mode = #tpu.pipeline_mode<synchronous>, transform_indices = @transform_2, window_bounds = array<i64: 1, 128>}, {transform_indices = @transform_3, window_bounds = array<i64: 16, 128>}, {transform_indices = @transform_4, window_bounds = array<i64: 16, 128>}]} {
    %c0 = arith.constant 0 : index
    %c0_0 = arith.constant 0 : index
    %0 = vector.load %arg1[%c0, %c0_0] : memref<16x128xbf16, #tpu.memory_space<vmem>>, vector<16x128xbf16>
    %1 = arith.extf %0 : vector<16x128xbf16> to vector<16x128xf32>
    %c0_1 = arith.constant 0 : index
    %c0_2 = arith.constant 0 : index
    %2 = vector.load %arg2[%c0_1, %c0_2] : memref<1x128xf32, #tpu.memory_space<vmem>>, vector<1x128xf32>
    %3 = vector.broadcast %2 : vector<1x128xf32> to vector<16x128xf32>
    %4 = arith.mulf %1, %3 : vector<16x128xf32>
    %c0_3 = arith.constant 0 : index
    %c0_4 = arith.constant 0 : index
    %5 = vector.load %arg3[%c0_3, %c0_4] : memref<1x128xf32, #tpu.memory_space<vmem>>, vector<1x128xf32>
    %6 = vector.broadcast %5 : vector<1x128xf32> to vector<16x128xf32>
    %7 = arith.addf %4, %6 : vector<16x128xf32>
    %c0_5 = arith.constant 0 : index
    %c0_6 = arith.constant 0 : index
    %8 = vector.load %arg4[%c0_5, %c0_6] : memref<16x128xbf16, #tpu.memory_space<vmem>>, vector<16x128xbf16>
    %9 = arith.extf %8 : vector<16x128xbf16> to vector<16x128xf32>
    %10 = arith.addf %7, %9 : vector<16x128xf32>
    %cst = arith.constant 0.000000e+00 : f32
    %11 = vector.broadcast %cst : f32 to vector<16x128xf32>
    %12 = arith.maximumf %10, %11 : vector<16x128xf32>
    %13 = arith.truncf %12 : vector<16x128xf32> to vector<16x128xbf16>
    %c0_7 = arith.constant 0 : index
    %c0_8 = arith.constant 0 : index
    %14 = vector.load %arg5[%c0_7, %c0_8] : memref<16x128xbf16, #tpu.memory_space<vmem>>, vector<16x128xbf16>
    tpu.vector_store %arg5[%c0_7, %c0_8], %13 {strides = array<i32>} : memref<16x128xbf16, #tpu.memory_space<vmem>>, vector<16x128xbf16>,
    return
  }
  func.func @transform_0(%arg0: i32) -> (i32, i32) {
    %c0_i32 = arith.constant 0 : i32
    %c0_i32_0 = arith.constant 0 : i32
    return %arg0, %c0_i32 : i32, i32
  }
  func.func @transform_1(%arg0: i32) -> (i32, i32) {
    %c0_i32 = arith.constant 0 : i32
    %c0_i32_0 = arith.constant 0 : i32
    %c0_i32_1 = arith.constant 0 : i32
    return %c0_i32, %c0_i32_0 : i32, i32
  }
  func.func @transform_2(%arg0: i32) -> (i32, i32) {
    %c0_i32 = arith.constant 0 : i32
    %c0_i32_0 = arith.constant 0 : i32
    %c0_i32_1 = arith.constant 0 : i32
    return %c0_i32, %c0_i32_0 : i32, i32
  }
  func.func @transform_3(%arg0: i32) -> (i32, i32) {
    %c0_i32 = arith.constant 0 : i32
    %c0_i32_0 = arith.constant 0 : i32
    return %arg0, %c0_i32 : i32, i32
  }
  func.func @transform_4(%arg0: i32) -> (i32, i32) {
    %c0_i32 = arith.constant 0 : i32
    %c0_i32_0 = arith.constant 0 : i32
    return %arg0, %c0_i32 : i32, i32
  }
}

module attributes {stable_mosaic.version = 11 : i64} {
  func.func @_matmul_kernel(%arg0: i32, %arg1: i32, %arg2: i32, %arg3: memref<32x512xbf16, #tpu.memory_space<vmem>>, %arg4: memref<512x128xbf16, #tpu.memory_space<vmem>>, %arg5: memref<32x128xbf16, #tpu.memory_space<vmem>>, %arg6: memref<32x128xf32, #tpu.memory_space<vmem>>) attributes {dimension_semantics = [#tpu.dimension_semantics<parallel>, #tpu.dimension_semantics<parallel>, #tpu.dimension_semantics<arbitrary>], iteration_bounds = array<i64: 1, 1, 3>, scalar_prefetch = 0 : i64, scratch_operands = 1 : i64, tpu.core_type = #tpu.core_type<tc>, window_params = [{transform_indices = @transform_0, window_bounds = array<i64: 32, 512>}, {transform_indices = @transform_1, window_bounds = array<i64: 512, 128>}, {transform_indices = @transform_2, window_bounds = array<i64: 32, 128>}]} {
    %c0_i32 = arith.constant 0 : i32
    %0 = arith.cmpi eq, %arg2, %c0_i32 : i32
    %1 = arith.extui %0 : i1 to i32
    %c0_i32_0 = arith.constant 0 : i32
    %2 = arith.cmpi ne, %1, %c0_i32_0 : i32
    scf.if %2 {
      %cst_9 = arith.constant 0.000000e+00 : f32
      %12 = vector.broadcast %cst_9 : f32 to vector<32x128xf32>
      %c0_10 = arith.constant 0 : index
      %c0_11 = arith.constant 0 : index
      %13 = vector.load %arg6[%c0_10, %c0_11] : memref<32x128xf32, #tpu.memory_space<vmem>>, vector<32x128xf32>
      tpu.vector_store %arg6[%c0_10, %c0_11], %12 {strides = array<i32>} : memref<32x128xf32, #tpu.memory_space<vmem>>, vector<32x128xf32>,
    } else {
    }
    %c0 = arith.constant 0 : index
    %c0_1 = arith.constant 0 : index
    %3 = vector.load %arg6[%c0, %c0_1] : memref<32x128xf32, #tpu.memory_space<vmem>>, vector<32x128xf32>
    %c0_2 = arith.constant 0 : index
    %c0_3 = arith.constant 0 : index
    %4 = vector.load %arg3[%c0_2, %c0_3] : memref<32x512xbf16, #tpu.memory_space<vmem>>, vector<32x512xbf16>
    %c0_4 = arith.constant 0 : index
    %c0_5 = arith.constant 0 : index
    %5 = vector.load %arg4[%c0_4, %c0_5] : memref<512x128xbf16, #tpu.memory_space<vmem>>, vector<512x128xbf16>
    %cst = arith.constant dense<0.000000e+00> : vector<32x128xf32>
    %6 = tpu.matmul %4, %5, %cst {dimension_numbers = #tpu.dot_dimension_numbers<[1], [0], [0], [1], [0, 0, 1, 1], [], []>} : vector<32x512xbf16>, vector<512x128xbf16>, vector<32x128xf32> -> vector<32x128xf32>
    %7 = arith.addf %3, %6 : vector<32x128xf32>
    %c0_6 = arith.constant 0 : index
    %c0_7 = arith.constant 0 : index
    %8 = vector.load %arg6[%c0_6, %c0_7] : memref<32x128xf32, #tpu.memory_space<vmem>>, vector<32x128xf32>
    tpu.vector_store %arg6[%c0_6, %c0_7], %7 {strides = array<i32>} : memref<32x128xf32, #tpu.memory_space<vmem>>, vector<32x128xf32>,
    %c2_i32 = arith.constant 2 : i32
    %9 = arith.cmpi eq, %arg2, %c2_i32 : i32
    %10 = arith.extui %9 : i1 to i32
    %c0_i32_8 = arith.constant 0 : i32
    %11 = arith.cmpi ne, %10, %c0_i32_8 : i32
    scf.if %11 {
      %c0_9 = arith.constant 0 : index
      %c0_10 = arith.constant 0 : index
      %12 = vector.load %arg6[%c0_9, %c0_10] : memref<32x128xf32, #tpu.memory_space<vmem>>, vector<32x128xf32>
      %13 = arith.truncf %12 : vector<32x128xf32> to vector<32x128xbf16>
      %c0_11 = arith.constant 0 : index
      %c0_12 = arith.constant 0 : index
      %14 = vector.load %arg5[%c0_11, %c0_12] : memref<32x128xbf16, #tpu.memory_space<vmem>>, vector<32x128xbf16>
      tpu.vector_store %arg5[%c0_11, %c0_12], %13 {strides = array<i32>} : memref<32x128xbf16, #tpu.memory_space<vmem>>, vector<32x128xbf16>,
    } else {
    }
    return
  }
  func.func @transform_0(%arg0: i32, %arg1: i32, %arg2: i32) -> (i32, i32) {
    %c0_i32 = arith.constant 0 : i32
    return %arg0, %arg2 : i32, i32
  }
  func.func @transform_1(%arg0: i32, %arg1: i32, %arg2: i32) -> (i32, i32) {
    %c0_i32 = arith.constant 0 : i32
    return %arg2, %arg1 : i32, i32
  }
  func.func @transform_2(%arg0: i32, %arg1: i32, %arg2: i32) -> (i32, i32) {
    %c0_i32 = arith.constant 0 : i32
    return %arg0, %arg1 : i32, i32
  }
}

module attributes {stable_mosaic.version = 11 : i64} {
  func.func @_matmul_kernel(%arg0: i32, %arg1: i32, %arg2: i32, %arg3: memref<8x128xbf16, #tpu.memory_space<vmem>>, %arg4: memref<128x256xbf16, #tpu.memory_space<vmem>>, %arg5: memref<8x256xbf16, #tpu.memory_space<vmem>>, %arg6: memref<8x256xf32, #tpu.memory_space<vmem>>) attributes {dimension_semantics = [#tpu.dimension_semantics<parallel>, #tpu.dimension_semantics<parallel>, #tpu.dimension_semantics<arbitrary>], iteration_bounds = array<i64: 1, 1, 1>, scalar_prefetch = 0 : i64, scratch_operands = 1 : i64, tpu.core_type = #tpu.core_type<tc>, window_params = [{transform_indices = @transform_0, window_bounds = array<i64: 8, 128>}, {transform_indices = @transform_1, window_bounds = array<i64: 128, 256>}, {transform_indices = @transform_2, window_bounds = array<i64: 8, 256>}]} {
    %c0_i32 = arith.constant 0 : i32
    %0 = arith.cmpi eq, %arg2, %c0_i32 : i32
    %1 = arith.extui %0 : i1 to i32
    %c0_i32_0 = arith.constant 0 : i32
    %2 = arith.cmpi ne, %1, %c0_i32_0 : i32
    scf.if %2 {
      %cst_10 = arith.constant 0.000000e+00 : f32
      %12 = vector.broadcast %cst_10 : f32 to vector<8x256xf32>
      %c0_11 = arith.constant 0 : index
      %c0_12 = arith.constant 0 : index
      %13 = vector.load %arg6[%c0_11, %c0_12] : memref<8x256xf32, #tpu.memory_space<vmem>>, vector<8x256xf32>
      tpu.vector_store %arg6[%c0_11, %c0_12], %12 {strides = array<i32>} : memref<8x256xf32, #tpu.memory_space<vmem>>, vector<8x256xf32>,
    } else {
    }
    %c0 = arith.constant 0 : index
    %c0_1 = arith.constant 0 : index
    %3 = vector.load %arg6[%c0, %c0_1] : memref<8x256xf32, #tpu.memory_space<vmem>>, vector<8x256xf32>
    %c0_2 = arith.constant 0 : index
    %c0_3 = arith.constant 0 : index
    %4 = vector.load %arg3[%c0_2, %c0_3] : memref<8x128xbf16, #tpu.memory_space<vmem>>, vector<8x128xbf16>
    %c0_4 = arith.constant 0 : index
    %c0_5 = arith.constant 0 : index
    %5 = vector.load %arg4[%c0_4, %c0_5] : memref<128x256xbf16, #tpu.memory_space<vmem>>, vector<128x256xbf16>
    %cst = arith.constant dense<0.000000e+00> : vector<8x256xf32>
    %6 = tpu.matmul %4, %5, %cst {dimension_numbers = #tpu.dot_dimension_numbers<[1], [0], [0], [1], [0, 0, 1, 1], [], []>} : vector<8x128xbf16>, vector<128x256xbf16>, vector<8x256xf32> -> vector<8x256xf32>
    %7 = arith.addf %3, %6 : vector<8x256xf32>
    %c0_6 = arith.constant 0 : index
    %c0_7 = arith.constant 0 : index
    %8 = vector.load %arg6[%c0_6, %c0_7] : memref<8x256xf32, #tpu.memory_space<vmem>>, vector<8x256xf32>
    tpu.vector_store %arg6[%c0_6, %c0_7], %7 {strides = array<i32>} : memref<8x256xf32, #tpu.memory_space<vmem>>, vector<8x256xf32>,
    %c0_i32_8 = arith.constant 0 : i32
    %9 = arith.cmpi eq, %arg2, %c0_i32_8 : i32
    %10 = arith.extui %9 : i1 to i32
    %c0_i32_9 = arith.constant 0 : i32
    %11 = arith.cmpi ne, %10, %c0_i32_9 : i32
    scf.if %11 {
      %c0_10 = arith.constant 0 : index
      %c0_11 = arith.constant 0 : index
      %12 = vector.load %arg6[%c0_10, %c0_11] : memref<8x256xf32, #tpu.memory_space<vmem>>, vector<8x256xf32>
      %13 = arith.truncf %12 : vector<8x256xf32> to vector<8x256xbf16>
      %c0_12 = arith.constant 0 : index
      %c0_13 = arith.constant 0 : index
      %14 = vector.load %arg5[%c0_12, %c0_13] : memref<8x256xbf16, #tpu.memory_space<vmem>>, vector<8x256xbf16>
      tpu.vector_store %arg5[%c0_12, %c0_13], %13 {strides = array<i32>} : memref<8x256xbf16, #tpu.memory_space<vmem>>, vector<8x256xbf16>,
    } else {
    }
    return
  }
  func.func @transform_0(%arg0: i32, %arg1: i32, %arg2: i32) -> (i32, i32) {
    %c0_i32 = arith.constant 0 : i32
    return %arg0, %arg2 : i32, i32
  }
  func.func @transform_1(%arg0: i32, %arg1: i32, %arg2: i32) -> (i32, i32) {
    %c0_i32 = arith.constant 0 : i32
    return %arg2, %arg1 : i32, i32
  }
  func.func @transform_2(%arg0: i32, %arg1: i32, %arg2: i32) -> (i32, i32) {
    %c0_i32 = arith.constant 0 : i32
    return %arg0, %arg1 : i32, i32
  }
}

module attributes {stable_mosaic.version = 11 : i64} {
  func.func @_affine_kernel(%arg0: i32, %arg1: memref<8x256xbf16, #tpu.memory_space<vmem>>, %arg2: memref<1x256xf32, #tpu.memory_space<vmem>>, %arg3: memref<1x256xf32, #tpu.memory_space<vmem>>, %arg4: memref<8x256xbf16, #tpu.memory_space<vmem>>) attributes {dimension_semantics = [#tpu.dimension_semantics<parallel>], iteration_bounds = array<i64: 1>, scalar_prefetch = 0 : i64, scratch_operands = 0 : i64, tpu.core_type = #tpu.core_type<tc>, window_params = [{transform_indices = @transform_0, window_bounds = array<i64: 8, 256>}, {pipeline_mode = #tpu.pipeline_mode<synchronous>, transform_indices = @transform_1, window_bounds = array<i64: 1, 256>}, {pipeline_mode = #tpu.pipeline_mode<synchronous>, transform_indices = @transform_2, window_bounds = array<i64: 1, 256>}, {transform_indices = @transform_3, window_bounds = array<i64: 8, 256>}]} {
    %c0 = arith.constant 0 : index
    %c0_0 = arith.constant 0 : index
    %0 = vector.load %arg1[%c0, %c0_0] : memref<8x256xbf16, #tpu.memory_space<vmem>>, vector<8x256xbf16>
    %1 = arith.extf %0 : vector<8x256xbf16> to vector<8x256xf32>
    %c0_1 = arith.constant 0 : index
    %c0_2 = arith.constant 0 : index
    %2 = vector.load %arg2[%c0_1, %c0_2] : memref<1x256xf32, #tpu.memory_space<vmem>>, vector<1x256xf32>
    %3 = vector.broadcast %2 : vector<1x256xf32> to vector<8x256xf32>
    %4 = arith.mulf %1, %3 : vector<8x256xf32>
    %c0_3 = arith.constant 0 : index
    %c0_4 = arith.constant 0 : index
    %5 = vector.load %arg3[%c0_3, %c0_4] : memref<1x256xf32, #tpu.memory_space<vmem>>, vector<1x256xf32>
    %6 = vector.broadcast %5 : vector<1x256xf32> to vector<8x256xf32>
    %7 = arith.addf %4, %6 : vector<8x256xf32>
    %8 = arith.truncf %7 : vector<8x256xf32> to vector<8x256xbf16>
    %c0_5 = arith.constant 0 : index
    %c0_6 = arith.constant 0 : index
    %9 = vector.load %arg4[%c0_5, %c0_6] : memref<8x256xbf16, #tpu.memory_space<vmem>>, vector<8x256xbf16>
    tpu.vector_store %arg4[%c0_5, %c0_6], %8 {strides = array<i32>} : memref<8x256xbf16, #tpu.memory_space<vmem>>, vector<8x256xbf16>,
    return
  }
  func.func @transform_0(%arg0: i32) -> (i32, i32) {
    %c0_i32 = arith.constant 0 : i32
    %c0_i32_0 = arith.constant 0 : i32
    return %arg0, %c0_i32 : i32, i32
  }
  func.func @transform_1(%arg0: i32) -> (i32, i32) {
    %c0_i32 = arith.constant 0 : i32
    %c0_i32_0 = arith.constant 0 : i32
    %c0_i32_1 = arith.constant 0 : i32
    return %c0_i32, %c0_i32_0 : i32, i32
  }
  func.func @transform_2(%arg0: i32) -> (i32, i32) {
    %c0_i32 = arith.constant 0 : i32
    %c0_i32_0 = arith.constant 0 : i32
    %c0_i32_1 = arith.constant 0 : i32
    return %c0_i32, %c0_i32_0 : i32, i32
  }
  func.func @transform_3(%arg0: i32) -> (i32, i32) {
    %c0_i32 = arith.constant 0 : i32
    %c0_i32_0 = arith.constant 0 : i32
    return %arg0, %c0_i32 : i32, i32
  }
}

module attributes {stable_mosaic.version = 11 : i64} {
  func.func @_matmul_kernel(%arg0: i32, %arg1: i32, %arg2: i32, %arg3: memref<8x512xbf16, #tpu.memory_space<vmem>>, %arg4: memref<512x256xbf16, #tpu.memory_space<vmem>>, %arg5: memref<8x256xbf16, #tpu.memory_space<vmem>>, %arg6: memref<8x256xf32, #tpu.memory_space<vmem>>) attributes {dimension_semantics = [#tpu.dimension_semantics<parallel>, #tpu.dimension_semantics<parallel>, #tpu.dimension_semantics<arbitrary>], iteration_bounds = array<i64: 1, 1, 3>, scalar_prefetch = 0 : i64, scratch_operands = 1 : i64, tpu.core_type = #tpu.core_type<tc>, window_params = [{transform_indices = @transform_0, window_bounds = array<i64: 8, 512>}, {transform_indices = @transform_1, window_bounds = array<i64: 512, 256>}, {transform_indices = @transform_2, window_bounds = array<i64: 8, 256>}]} {
    %c0_i32 = arith.constant 0 : i32
    %0 = arith.cmpi eq, %arg2, %c0_i32 : i32
    %1 = arith.extui %0 : i1 to i32
    %c0_i32_0 = arith.constant 0 : i32
    %2 = arith.cmpi ne, %1, %c0_i32_0 : i32
    scf.if %2 {
      %cst_9 = arith.constant 0.000000e+00 : f32
      %12 = vector.broadcast %cst_9 : f32 to vector<8x256xf32>
      %c0_10 = arith.constant 0 : index
      %c0_11 = arith.constant 0 : index
      %13 = vector.load %arg6[%c0_10, %c0_11] : memref<8x256xf32, #tpu.memory_space<vmem>>, vector<8x256xf32>
      tpu.vector_store %arg6[%c0_10, %c0_11], %12 {strides = array<i32>} : memref<8x256xf32, #tpu.memory_space<vmem>>, vector<8x256xf32>,
    } else {
    }
    %c0 = arith.constant 0 : index
    %c0_1 = arith.constant 0 : index
    %3 = vector.load %arg6[%c0, %c0_1] : memref<8x256xf32, #tpu.memory_space<vmem>>, vector<8x256xf32>
    %c0_2 = arith.constant 0 : index
    %c0_3 = arith.constant 0 : index
    %4 = vector.load %arg3[%c0_2, %c0_3] : memref<8x512xbf16, #tpu.memory_space<vmem>>, vector<8x512xbf16>
    %c0_4 = arith.constant 0 : index
    %c0_5 = arith.constant 0 : index
    %5 = vector.load %arg4[%c0_4, %c0_5] : memref<512x256xbf16, #tpu.memory_space<vmem>>, vector<512x256xbf16>
    %cst = arith.constant dense<0.000000e+00> : vector<8x256xf32>
    %6 = tpu.matmul %4, %5, %cst {dimension_numbers = #tpu.dot_dimension_numbers<[1], [0], [0], [1], [0, 0, 1, 1], [], []>} : vector<8x512xbf16>, vector<512x256xbf16>, vector<8x256xf32> -> vector<8x256xf32>
    %7 = arith.addf %3, %6 : vector<8x256xf32>
    %c0_6 = arith.constant 0 : index
    %c0_7 = arith.constant 0 : index
    %8 = vector.load %arg6[%c0_6, %c0_7] : memref<8x256xf32, #tpu.memory_space<vmem>>, vector<8x256xf32>
    tpu.vector_store %arg6[%c0_6, %c0_7], %7 {strides = array<i32>} : memref<8x256xf32, #tpu.memory_space<vmem>>, vector<8x256xf32>,
    %c2_i32 = arith.constant 2 : i32
    %9 = arith.cmpi eq, %arg2, %c2_i32 : i32
    %10 = arith.extui %9 : i1 to i32
    %c0_i32_8 = arith.constant 0 : i32
    %11 = arith.cmpi ne, %10, %c0_i32_8 : i32
    scf.if %11 {
      %c0_9 = arith.constant 0 : index
      %c0_10 = arith.constant 0 : index
      %12 = vector.load %arg6[%c0_9, %c0_10] : memref<8x256xf32, #tpu.memory_space<vmem>>, vector<8x256xf32>
      %13 = arith.truncf %12 : vector<8x256xf32> to vector<8x256xbf16>
      %c0_11 = arith.constant 0 : index
      %c0_12 = arith.constant 0 : index
      %14 = vector.load %arg5[%c0_11, %c0_12] : memref<8x256xbf16, #tpu.memory_space<vmem>>, vector<8x256xbf16>
      tpu.vector_store %arg5[%c0_11, %c0_12], %13 {strides = array<i32>} : memref<8x256xbf16, #tpu.memory_space<vmem>>, vector<8x256xbf16>,
    } else {
    }
    return
  }
  func.func @transform_0(%arg0: i32, %arg1: i32, %arg2: i32) -> (i32, i32) {
    %c0_i32 = arith.constant 0 : i32
    return %arg0, %arg2 : i32, i32
  }
  func.func @transform_1(%arg0: i32, %arg1: i32, %arg2: i32) -> (i32, i32) {
    %c0_i32 = arith.constant 0 : i32
    return %arg2, %arg1 : i32, i32
  }
  func.func @transform_2(%arg0: i32, %arg1: i32, %arg2: i32) -> (i32, i32) {
    %c0_i32 = arith.constant 0 : i32
    return %arg0, %arg1 : i32, i32
  }
}

module attributes {stable_mosaic.version = 11 : i64} {
  func.func @_affine_kernel(%arg0: i32, %arg1: memref<8x256xbf16, #tpu.memory_space<vmem>>, %arg2: memref<1x256xf32, #tpu.memory_space<vmem>>, %arg3: memref<1x256xf32, #tpu.memory_space<vmem>>, %arg4: memref<8x256xbf16, #tpu.memory_space<vmem>>) attributes {dimension_semantics = [#tpu.dimension_semantics<parallel>], iteration_bounds = array<i64: 1>, scalar_prefetch = 0 : i64, scratch_operands = 0 : i64, tpu.core_type = #tpu.core_type<tc>, window_params = [{transform_indices = @transform_0, window_bounds = array<i64: 8, 256>}, {pipeline_mode = #tpu.pipeline_mode<synchronous>, transform_indices = @transform_1, window_bounds = array<i64: 1, 256>}, {pipeline_mode = #tpu.pipeline_mode<synchronous>, transform_indices = @transform_2, window_bounds = array<i64: 1, 256>}, {transform_indices = @transform_3, window_bounds = array<i64: 8, 256>}]} {
    %c0 = arith.constant 0 : index
    %c0_0 = arith.constant 0 : index
    %0 = vector.load %arg1[%c0, %c0_0] : memref<8x256xbf16, #tpu.memory_space<vmem>>, vector<8x256xbf16>
    %1 = arith.extf %0 : vector<8x256xbf16> to vector<8x256xf32>
    %c0_1 = arith.constant 0 : index
    %c0_2 = arith.constant 0 : index
    %2 = vector.load %arg2[%c0_1, %c0_2] : memref<1x256xf32, #tpu.memory_space<vmem>>, vector<1x256xf32>
    %3 = vector.broadcast %2 : vector<1x256xf32> to vector<8x256xf32>
    %4 = arith.mulf %1, %3 : vector<8x256xf32>
    %c0_3 = arith.constant 0 : index
    %c0_4 = arith.constant 0 : index
    %5 = vector.load %arg3[%c0_3, %c0_4] : memref<1x256xf32, #tpu.memory_space<vmem>>, vector<1x256xf32>
    %6 = vector.broadcast %5 : vector<1x256xf32> to vector<8x256xf32>
    %7 = arith.addf %4, %6 : vector<8x256xf32>
    %cst = arith.constant 0.000000e+00 : f32
    %8 = vector.broadcast %cst : f32 to vector<8x256xf32>
    %9 = arith.maximumf %7, %8 : vector<8x256xf32>
    %10 = arith.truncf %9 : vector<8x256xf32> to vector<8x256xbf16>
    %c0_5 = arith.constant 0 : index
    %c0_6 = arith.constant 0 : index
    %11 = vector.load %arg4[%c0_5, %c0_6] : memref<8x256xbf16, #tpu.memory_space<vmem>>, vector<8x256xbf16>
    tpu.vector_store %arg4[%c0_5, %c0_6], %10 {strides = array<i32>} : memref<8x256xbf16, #tpu.memory_space<vmem>>, vector<8x256xbf16>,
    return
  }
  func.func @transform_0(%arg0: i32) -> (i32, i32) {
    %c0_i32 = arith.constant 0 : i32
    %c0_i32_0 = arith.constant 0 : i32
    return %arg0, %c0_i32 : i32, i32
  }
  func.func @transform_1(%arg0: i32) -> (i32, i32) {
    %c0_i32 = arith.constant 0 : i32
    %c0_i32_0 = arith.constant 0 : i32
    %c0_i32_1 = arith.constant 0 : i32
    return %c0_i32, %c0_i32_0 : i32, i32
  }
  func.func @transform_2(%arg0: i32) -> (i32, i32) {
    %c0_i32 = arith.constant 0 : i32
    %c0_i32_0 = arith.constant 0 : i32
    %c0_i32_1 = arith.constant 0 : i32
    return %c0_i32, %c0_i32_0 : i32, i32
  }
  func.func @transform_3(%arg0: i32) -> (i32, i32) {
    %c0_i32 = arith.constant 0 : i32
    %c0_i32_0 = arith.constant 0 : i32
    return %arg0, %c0_i32 : i32, i32
  }
}

module attributes {stable_mosaic.version = 11 : i64} {
  func.func @_matmul_kernel(%arg0: i32, %arg1: i32, %arg2: i32, %arg3: memref<8x512xbf16, #tpu.memory_space<vmem>>, %arg4: memref<512x256xbf16, #tpu.memory_space<vmem>>, %arg5: memref<8x256xbf16, #tpu.memory_space<vmem>>, %arg6: memref<8x256xf32, #tpu.memory_space<vmem>>) attributes {dimension_semantics = [#tpu.dimension_semantics<parallel>, #tpu.dimension_semantics<parallel>, #tpu.dimension_semantics<arbitrary>], iteration_bounds = array<i64: 1, 1, 5>, scalar_prefetch = 0 : i64, scratch_operands = 1 : i64, tpu.core_type = #tpu.core_type<tc>, window_params = [{transform_indices = @transform_0, window_bounds = array<i64: 8, 512>}, {transform_indices = @transform_1, window_bounds = array<i64: 512, 256>}, {transform_indices = @transform_2, window_bounds = array<i64: 8, 256>}]} {
    %c0_i32 = arith.constant 0 : i32
    %0 = arith.cmpi eq, %arg2, %c0_i32 : i32
    %1 = arith.extui %0 : i1 to i32
    %c0_i32_0 = arith.constant 0 : i32
    %2 = arith.cmpi ne, %1, %c0_i32_0 : i32
    scf.if %2 {
      %cst_9 = arith.constant 0.000000e+00 : f32
      %12 = vector.broadcast %cst_9 : f32 to vector<8x256xf32>
      %c0_10 = arith.constant 0 : index
      %c0_11 = arith.constant 0 : index
      %13 = vector.load %arg6[%c0_10, %c0_11] : memref<8x256xf32, #tpu.memory_space<vmem>>, vector<8x256xf32>
      tpu.vector_store %arg6[%c0_10, %c0_11], %12 {strides = array<i32>} : memref<8x256xf32, #tpu.memory_space<vmem>>, vector<8x256xf32>,
    } else {
    }
    %c0 = arith.constant 0 : index
    %c0_1 = arith.constant 0 : index
    %3 = vector.load %arg6[%c0, %c0_1] : memref<8x256xf32, #tpu.memory_space<vmem>>, vector<8x256xf32>
    %c0_2 = arith.constant 0 : index
    %c0_3 = arith.constant 0 : index
    %4 = vector.load %arg3[%c0_2, %c0_3] : memref<8x512xbf16, #tpu.memory_space<vmem>>, vector<8x512xbf16>
    %c0_4 = arith.constant 0 : index
    %c0_5 = arith.constant 0 : index
    %5 = vector.load %arg4[%c0_4, %c0_5] : memref<512x256xbf16, #tpu.memory_space<vmem>>, vector<512x256xbf16>
    %cst = arith.constant dense<0.000000e+00> : vector<8x256xf32>
    %6 = tpu.matmul %4, %5, %cst {dimension_numbers = #tpu.dot_dimension_numbers<[1], [0], [0], [1], [0, 0, 1, 1], [], []>} : vector<8x512xbf16>, vector<512x256xbf16>, vector<8x256xf32> -> vector<8x256xf32>
    %7 = arith.addf %3, %6 : vector<8x256xf32>
    %c0_6 = arith.constant 0 : index
    %c0_7 = arith.constant 0 : index
    %8 = vector.load %arg6[%c0_6, %c0_7] : memref<8x256xf32, #tpu.memory_space<vmem>>, vector<8x256xf32>
    tpu.vector_store %arg6[%c0_6, %c0_7], %7 {strides = array<i32>} : memref<8x256xf32, #tpu.memory_space<vmem>>, vector<8x256xf32>,
    %c4_i32 = arith.constant 4 : i32
    %9 = arith.cmpi eq, %arg2, %c4_i32 : i32
    %10 = arith.extui %9 : i1 to i32
    %c0_i32_8 = arith.constant 0 : i32
    %11 = arith.cmpi ne, %10, %c0_i32_8 : i32
    scf.if %11 {
      %c0_9 = arith.constant 0 : index
      %c0_10 = arith.constant 0 : index
      %12 = vector.load %arg6[%c0_9, %c0_10] : memref<8x256xf32, #tpu.memory_space<vmem>>, vector<8x256xf32>
      %13 = arith.truncf %12 : vector<8x256xf32> to vector<8x256xbf16>
      %c0_11 = arith.constant 0 : index
      %c0_12 = arith.constant 0 : index
      %14 = vector.load %arg5[%c0_11, %c0_12] : memref<8x256xbf16, #tpu.memory_space<vmem>>, vector<8x256xbf16>
      tpu.vector_store %arg5[%c0_11, %c0_12], %13 {strides = array<i32>} : memref<8x256xbf16, #tpu.memory_space<vmem>>, vector<8x256xbf16>,
    } else {
    }
    return
  }
  func.func @transform_0(%arg0: i32, %arg1: i32, %arg2: i32) -> (i32, i32) {
    %c0_i32 = arith.constant 0 : i32
    return %arg0, %arg2 : i32, i32
  }
  func.func @transform_1(%arg0: i32, %arg1: i32, %arg2: i32) -> (i32, i32) {
    %c0_i32 = arith.constant 0 : i32
    return %arg2, %arg1 : i32, i32
  }
  func.func @transform_2(%arg0: i32, %arg1: i32, %arg2: i32) -> (i32, i32) {
    %c0_i32 = arith.constant 0 : i32
    return %arg0, %arg1 : i32, i32
  }
}

module attributes {stable_mosaic.version = 11 : i64} {
  func.func @_affine_res_kernel(%arg0: i32, %arg1: memref<8x256xbf16, #tpu.memory_space<vmem>>, %arg2: memref<1x256xf32, #tpu.memory_space<vmem>>, %arg3: memref<1x256xf32, #tpu.memory_space<vmem>>, %arg4: memref<8x256xbf16, #tpu.memory_space<vmem>>, %arg5: memref<8x256xbf16, #tpu.memory_space<vmem>>) attributes {dimension_semantics = [#tpu.dimension_semantics<parallel>], iteration_bounds = array<i64: 1>, scalar_prefetch = 0 : i64, scratch_operands = 0 : i64, tpu.core_type = #tpu.core_type<tc>, window_params = [{transform_indices = @transform_0, window_bounds = array<i64: 8, 256>}, {pipeline_mode = #tpu.pipeline_mode<synchronous>, transform_indices = @transform_1, window_bounds = array<i64: 1, 256>}, {pipeline_mode = #tpu.pipeline_mode<synchronous>, transform_indices = @transform_2, window_bounds = array<i64: 1, 256>}, {transform_indices = @transform_3, window_bounds = array<i64: 8, 256>}, {transform_indices = @transform_4, window_bounds = array<i64: 8, 256>}]} {
    %c0 = arith.constant 0 : index
    %c0_0 = arith.constant 0 : index
    %0 = vector.load %arg1[%c0, %c0_0] : memref<8x256xbf16, #tpu.memory_space<vmem>>, vector<8x256xbf16>
    %1 = arith.extf %0 : vector<8x256xbf16> to vector<8x256xf32>
    %c0_1 = arith.constant 0 : index
    %c0_2 = arith.constant 0 : index
    %2 = vector.load %arg2[%c0_1, %c0_2] : memref<1x256xf32, #tpu.memory_space<vmem>>, vector<1x256xf32>
    %3 = vector.broadcast %2 : vector<1x256xf32> to vector<8x256xf32>
    %4 = arith.mulf %1, %3 : vector<8x256xf32>
    %c0_3 = arith.constant 0 : index
    %c0_4 = arith.constant 0 : index
    %5 = vector.load %arg3[%c0_3, %c0_4] : memref<1x256xf32, #tpu.memory_space<vmem>>, vector<1x256xf32>
    %6 = vector.broadcast %5 : vector<1x256xf32> to vector<8x256xf32>
    %7 = arith.addf %4, %6 : vector<8x256xf32>
    %c0_5 = arith.constant 0 : index
    %c0_6 = arith.constant 0 : index
    %8 = vector.load %arg4[%c0_5, %c0_6] : memref<8x256xbf16, #tpu.memory_space<vmem>>, vector<8x256xbf16>
    %9 = arith.extf %8 : vector<8x256xbf16> to vector<8x256xf32>
    %10 = arith.addf %7, %9 : vector<8x256xf32>
    %cst = arith.constant 0.000000e+00 : f32
    %11 = vector.broadcast %cst : f32 to vector<8x256xf32>
    %12 = arith.maximumf %10, %11 : vector<8x256xf32>
    %13 = arith.truncf %12 : vector<8x256xf32> to vector<8x256xbf16>
    %c0_7 = arith.constant 0 : index
    %c0_8 = arith.constant 0 : index
    %14 = vector.load %arg5[%c0_7, %c0_8] : memref<8x256xbf16, #tpu.memory_space<vmem>>, vector<8x256xbf16>
    tpu.vector_store %arg5[%c0_7, %c0_8], %13 {strides = array<i32>} : memref<8x256xbf16, #tpu.memory_space<vmem>>, vector<8x256xbf16>,
    return
  }
  func.func @transform_0(%arg0: i32) -> (i32, i32) {
    %c0_i32 = arith.constant 0 : i32
    %c0_i32_0 = arith.constant 0 : i32
    return %arg0, %c0_i32 : i32, i32
  }
  func.func @transform_1(%arg0: i32) -> (i32, i32) {
    %c0_i32 = arith.constant 0 : i32
    %c0_i32_0 = arith.constant 0 : i32
    %c0_i32_1 = arith.constant 0 : i32
    return %c0_i32, %c0_i32_0 : i32, i32
  }
  func.func @transform_2(%arg0: i32) -> (i32, i32) {
    %c0_i32 = arith.constant 0 : i32
    %c0_i32_0 = arith.constant 0 : i32
    %c0_i32_1 = arith.constant 0 : i32
    return %c0_i32, %c0_i32_0 : i32, i32
  }
  func.func @transform_3(%arg0: i32) -> (i32, i32) {
    %c0_i32 = arith.constant 0 : i32
    %c0_i32_0 = arith.constant 0 : i32
    return %arg0, %c0_i32 : i32, i32
  }
  func.func @transform_4(%arg0: i32) -> (i32, i32) {
    %c0_i32 = arith.constant 0 : i32
    %c0_i32_0 = arith.constant 0 : i32
    return %arg0, %c0_i32 : i32, i32
  }
}

module attributes {stable_mosaic.version = 11 : i64} {
  func.func @_matmul_kernel(%arg0: i32, %arg1: i32, %arg2: i32, %arg3: memref<8x512xbf16, #tpu.memory_space<vmem>>, %arg4: memref<512x256xbf16, #tpu.memory_space<vmem>>, %arg5: memref<8x256xbf16, #tpu.memory_space<vmem>>, %arg6: memref<8x256xf32, #tpu.memory_space<vmem>>) attributes {dimension_semantics = [#tpu.dimension_semantics<parallel>, #tpu.dimension_semantics<parallel>, #tpu.dimension_semantics<arbitrary>], iteration_bounds = array<i64: 1, 2, 5>, scalar_prefetch = 0 : i64, scratch_operands = 1 : i64, tpu.core_type = #tpu.core_type<tc>, window_params = [{transform_indices = @transform_0, window_bounds = array<i64: 8, 512>}, {transform_indices = @transform_1, window_bounds = array<i64: 512, 256>}, {transform_indices = @transform_2, window_bounds = array<i64: 8, 256>}]} {
    %c0_i32 = arith.constant 0 : i32
    %0 = arith.cmpi eq, %arg2, %c0_i32 : i32
    %1 = arith.extui %0 : i1 to i32
    %c0_i32_0 = arith.constant 0 : i32
    %2 = arith.cmpi ne, %1, %c0_i32_0 : i32
    scf.if %2 {
      %cst_9 = arith.constant 0.000000e+00 : f32
      %12 = vector.broadcast %cst_9 : f32 to vector<8x256xf32>
      %c0_10 = arith.constant 0 : index
      %c0_11 = arith.constant 0 : index
      %13 = vector.load %arg6[%c0_10, %c0_11] : memref<8x256xf32, #tpu.memory_space<vmem>>, vector<8x256xf32>
      tpu.vector_store %arg6[%c0_10, %c0_11], %12 {strides = array<i32>} : memref<8x256xf32, #tpu.memory_space<vmem>>, vector<8x256xf32>,
    } else {
    }
    %c0 = arith.constant 0 : index
    %c0_1 = arith.constant 0 : index
    %3 = vector.load %arg6[%c0, %c0_1] : memref<8x256xf32, #tpu.memory_space<vmem>>, vector<8x256xf32>
    %c0_2 = arith.constant 0 : index
    %c0_3 = arith.constant 0 : index
    %4 = vector.load %arg3[%c0_2, %c0_3] : memref<8x512xbf16, #tpu.memory_space<vmem>>, vector<8x512xbf16>
    %c0_4 = arith.constant 0 : index
    %c0_5 = arith.constant 0 : index
    %5 = vector.load %arg4[%c0_4, %c0_5] : memref<512x256xbf16, #tpu.memory_space<vmem>>, vector<512x256xbf16>
    %cst = arith.constant dense<0.000000e+00> : vector<8x256xf32>
    %6 = tpu.matmul %4, %5, %cst {dimension_numbers = #tpu.dot_dimension_numbers<[1], [0], [0], [1], [0, 0, 1, 1], [], []>} : vector<8x512xbf16>, vector<512x256xbf16>, vector<8x256xf32> -> vector<8x256xf32>
    %7 = arith.addf %3, %6 : vector<8x256xf32>
    %c0_6 = arith.constant 0 : index
    %c0_7 = arith.constant 0 : index
    %8 = vector.load %arg6[%c0_6, %c0_7] : memref<8x256xf32, #tpu.memory_space<vmem>>, vector<8x256xf32>
    tpu.vector_store %arg6[%c0_6, %c0_7], %7 {strides = array<i32>} : memref<8x256xf32, #tpu.memory_space<vmem>>, vector<8x256xf32>,
    %c4_i32 = arith.constant 4 : i32
    %9 = arith.cmpi eq, %arg2, %c4_i32 : i32
    %10 = arith.extui %9 : i1 to i32
    %c0_i32_8 = arith.constant 0 : i32
    %11 = arith.cmpi ne, %10, %c0_i32_8 : i32
    scf.if %11 {
      %c0_9 = arith.constant 0 : index
      %c0_10 = arith.constant 0 : index
      %12 = vector.load %arg6[%c0_9, %c0_10] : memref<8x256xf32, #tpu.memory_space<vmem>>, vector<8x256xf32>
      %13 = arith.truncf %12 : vector<8x256xf32> to vector<8x256xbf16>
      %c0_11 = arith.constant 0 : index
      %c0_12 = arith.constant 0 : index
      %14 = vector.load %arg5[%c0_11, %c0_12] : memref<8x256xbf16, #tpu.memory_space<vmem>>, vector<8x256xbf16>
      tpu.vector_store %arg5[%c0_11, %c0_12], %13 {strides = array<i32>} : memref<8x256xbf16, #tpu.memory_space<vmem>>, vector<8x256xbf16>,
    } else {
    }
    return
  }
  func.func @transform_0(%arg0: i32, %arg1: i32, %arg2: i32) -> (i32, i32) {
    %c0_i32 = arith.constant 0 : i32
    return %arg0, %arg2 : i32, i32
  }
  func.func @transform_1(%arg0: i32, %arg1: i32, %arg2: i32) -> (i32, i32) {
    %c0_i32 = arith.constant 0 : i32
    return %arg2, %arg1 : i32, i32
  }
  func.func @transform_2(%arg0: i32, %arg1: i32, %arg2: i32) -> (i32, i32) {
    %c0_i32 = arith.constant 0 : i32
    return %arg0, %arg1 : i32, i32
  }
}

module attributes {stable_mosaic.version = 11 : i64} {
  func.func @_matmul_kernel(%arg0: i32, %arg1: i32, %arg2: i32, %arg3: memref<8x256xbf16, #tpu.memory_space<vmem>>, %arg4: memref<256x256xbf16, #tpu.memory_space<vmem>>, %arg5: memref<8x256xbf16, #tpu.memory_space<vmem>>, %arg6: memref<8x256xf32, #tpu.memory_space<vmem>>) attributes {dimension_semantics = [#tpu.dimension_semantics<parallel>, #tpu.dimension_semantics<parallel>, #tpu.dimension_semantics<arbitrary>], iteration_bounds = array<i64: 1, 2, 1>, scalar_prefetch = 0 : i64, scratch_operands = 1 : i64, tpu.core_type = #tpu.core_type<tc>, window_params = [{transform_indices = @transform_0, window_bounds = array<i64: 8, 256>}, {transform_indices = @transform_1, window_bounds = array<i64: 256, 256>}, {transform_indices = @transform_2, window_bounds = array<i64: 8, 256>}]} {
    %c0_i32 = arith.constant 0 : i32
    %0 = arith.cmpi eq, %arg2, %c0_i32 : i32
    %1 = arith.extui %0 : i1 to i32
    %c0_i32_0 = arith.constant 0 : i32
    %2 = arith.cmpi ne, %1, %c0_i32_0 : i32
    scf.if %2 {
      %cst_10 = arith.constant 0.000000e+00 : f32
      %12 = vector.broadcast %cst_10 : f32 to vector<8x256xf32>
      %c0_11 = arith.constant 0 : index
      %c0_12 = arith.constant 0 : index
      %13 = vector.load %arg6[%c0_11, %c0_12] : memref<8x256xf32, #tpu.memory_space<vmem>>, vector<8x256xf32>
      tpu.vector_store %arg6[%c0_11, %c0_12], %12 {strides = array<i32>} : memref<8x256xf32, #tpu.memory_space<vmem>>, vector<8x256xf32>,
    } else {
    }
    %c0 = arith.constant 0 : index
    %c0_1 = arith.constant 0 : index
    %3 = vector.load %arg6[%c0, %c0_1] : memref<8x256xf32, #tpu.memory_space<vmem>>, vector<8x256xf32>
    %c0_2 = arith.constant 0 : index
    %c0_3 = arith.constant 0 : index
    %4 = vector.load %arg3[%c0_2, %c0_3] : memref<8x256xbf16, #tpu.memory_space<vmem>>, vector<8x256xbf16>
    %c0_4 = arith.constant 0 : index
    %c0_5 = arith.constant 0 : index
    %5 = vector.load %arg4[%c0_4, %c0_5] : memref<256x256xbf16, #tpu.memory_space<vmem>>, vector<256x256xbf16>
    %cst = arith.constant dense<0.000000e+00> : vector<8x256xf32>
    %6 = tpu.matmul %4, %5, %cst {dimension_numbers = #tpu.dot_dimension_numbers<[1], [0], [0], [1], [0, 0, 1, 1], [], []>} : vector<8x256xbf16>, vector<256x256xbf16>, vector<8x256xf32> -> vector<8x256xf32>
    %7 = arith.addf %3, %6 : vector<8x256xf32>
    %c0_6 = arith.constant 0 : index
    %c0_7 = arith.constant 0 : index
    %8 = vector.load %arg6[%c0_6, %c0_7] : memref<8x256xf32, #tpu.memory_space<vmem>>, vector<8x256xf32>
    tpu.vector_store %arg6[%c0_6, %c0_7], %7 {strides = array<i32>} : memref<8x256xf32, #tpu.memory_space<vmem>>, vector<8x256xf32>,
    %c0_i32_8 = arith.constant 0 : i32
    %9 = arith.cmpi eq, %arg2, %c0_i32_8 : i32
    %10 = arith.extui %9 : i1 to i32
    %c0_i32_9 = arith.constant 0 : i32
    %11 = arith.cmpi ne, %10, %c0_i32_9 : i32
    scf.if %11 {
      %c0_10 = arith.constant 0 : index
      %c0_11 = arith.constant 0 : index
      %12 = vector.load %arg6[%c0_10, %c0_11] : memref<8x256xf32, #tpu.memory_space<vmem>>, vector<8x256xf32>
      %13 = arith.truncf %12 : vector<8x256xf32> to vector<8x256xbf16>
      %c0_12 = arith.constant 0 : index
      %c0_13 = arith.constant 0 : index
      %14 = vector.load %arg5[%c0_12, %c0_13] : memref<8x256xbf16, #tpu.memory_space<vmem>>, vector<8x256xbf16>
      tpu.vector_store %arg5[%c0_12, %c0_13], %13 {strides = array<i32>} : memref<8x256xbf16, #tpu.memory_space<vmem>>, vector<8x256xbf16>,
    } else {
    }
    return
  }
  func.func @transform_0(%arg0: i32, %arg1: i32, %arg2: i32) -> (i32, i32) {
    %c0_i32 = arith.constant 0 : i32
    return %arg0, %arg2 : i32, i32
  }
  func.func @transform_1(%arg0: i32, %arg1: i32, %arg2: i32) -> (i32, i32) {
    %c0_i32 = arith.constant 0 : i32
    return %arg2, %arg1 : i32, i32
  }
  func.func @transform_2(%arg0: i32, %arg1: i32, %arg2: i32) -> (i32, i32) {
    %c0_i32 = arith.constant 0 : i32
    return %arg0, %arg1 : i32, i32
  }
}

module attributes {stable_mosaic.version = 11 : i64} {
  func.func @_affine_kernel(%arg0: i32, %arg1: memref<8x512xbf16, #tpu.memory_space<vmem>>, %arg2: memref<1x512xf32, #tpu.memory_space<vmem>>, %arg3: memref<1x512xf32, #tpu.memory_space<vmem>>, %arg4: memref<8x512xbf16, #tpu.memory_space<vmem>>) attributes {dimension_semantics = [#tpu.dimension_semantics<parallel>], iteration_bounds = array<i64: 1>, scalar_prefetch = 0 : i64, scratch_operands = 0 : i64, tpu.core_type = #tpu.core_type<tc>, window_params = [{transform_indices = @transform_0, window_bounds = array<i64: 8, 512>}, {pipeline_mode = #tpu.pipeline_mode<synchronous>, transform_indices = @transform_1, window_bounds = array<i64: 1, 512>}, {pipeline_mode = #tpu.pipeline_mode<synchronous>, transform_indices = @transform_2, window_bounds = array<i64: 1, 512>}, {transform_indices = @transform_3, window_bounds = array<i64: 8, 512>}]} {
    %c0 = arith.constant 0 : index
    %c0_0 = arith.constant 0 : index
    %0 = vector.load %arg1[%c0, %c0_0] : memref<8x512xbf16, #tpu.memory_space<vmem>>, vector<8x512xbf16>
    %1 = arith.extf %0 : vector<8x512xbf16> to vector<8x512xf32>
    %c0_1 = arith.constant 0 : index
    %c0_2 = arith.constant 0 : index
    %2 = vector.load %arg2[%c0_1, %c0_2] : memref<1x512xf32, #tpu.memory_space<vmem>>, vector<1x512xf32>
    %3 = vector.broadcast %2 : vector<1x512xf32> to vector<8x512xf32>
    %4 = arith.mulf %1, %3 : vector<8x512xf32>
    %c0_3 = arith.constant 0 : index
    %c0_4 = arith.constant 0 : index
    %5 = vector.load %arg3[%c0_3, %c0_4] : memref<1x512xf32, #tpu.memory_space<vmem>>, vector<1x512xf32>
    %6 = vector.broadcast %5 : vector<1x512xf32> to vector<8x512xf32>
    %7 = arith.addf %4, %6 : vector<8x512xf32>
    %cst = arith.constant 0.000000e+00 : f32
    %8 = vector.broadcast %cst : f32 to vector<8x512xf32>
    %9 = arith.maximumf %7, %8 : vector<8x512xf32>
    %10 = arith.truncf %9 : vector<8x512xf32> to vector<8x512xbf16>
    %c0_5 = arith.constant 0 : index
    %c0_6 = arith.constant 0 : index
    %11 = vector.load %arg4[%c0_5, %c0_6] : memref<8x512xbf16, #tpu.memory_space<vmem>>, vector<8x512xbf16>
    tpu.vector_store %arg4[%c0_5, %c0_6], %10 {strides = array<i32>} : memref<8x512xbf16, #tpu.memory_space<vmem>>, vector<8x512xbf16>,
    return
  }
  func.func @transform_0(%arg0: i32) -> (i32, i32) {
    %c0_i32 = arith.constant 0 : i32
    %c0_i32_0 = arith.constant 0 : i32
    return %arg0, %c0_i32 : i32, i32
  }
  func.func @transform_1(%arg0: i32) -> (i32, i32) {
    %c0_i32 = arith.constant 0 : i32
    %c0_i32_0 = arith.constant 0 : i32
    %c0_i32_1 = arith.constant 0 : i32
    return %c0_i32, %c0_i32_0 : i32, i32
  }
  func.func @transform_2(%arg0: i32) -> (i32, i32) {
    %c0_i32 = arith.constant 0 : i32
    %c0_i32_0 = arith.constant 0 : i32
    %c0_i32_1 = arith.constant 0 : i32
    return %c0_i32, %c0_i32_0 : i32, i32
  }
  func.func @transform_3(%arg0: i32) -> (i32, i32) {
    %c0_i32 = arith.constant 0 : i32
    %c0_i32_0 = arith.constant 0 : i32
    return %arg0, %c0_i32 : i32, i32
  }
}

module attributes {stable_mosaic.version = 11 : i64} {
  func.func @_matmul_kernel(%arg0: i32, %arg1: i32, %arg2: i32, %arg3: memref<8x512xbf16, #tpu.memory_space<vmem>>, %arg4: memref<512x256xbf16, #tpu.memory_space<vmem>>, %arg5: memref<8x256xbf16, #tpu.memory_space<vmem>>, %arg6: memref<8x256xf32, #tpu.memory_space<vmem>>) attributes {dimension_semantics = [#tpu.dimension_semantics<parallel>, #tpu.dimension_semantics<parallel>, #tpu.dimension_semantics<arbitrary>], iteration_bounds = array<i64: 1, 2, 9>, scalar_prefetch = 0 : i64, scratch_operands = 1 : i64, tpu.core_type = #tpu.core_type<tc>, window_params = [{transform_indices = @transform_0, window_bounds = array<i64: 8, 512>}, {transform_indices = @transform_1, window_bounds = array<i64: 512, 256>}, {transform_indices = @transform_2, window_bounds = array<i64: 8, 256>}]} {
    %c0_i32 = arith.constant 0 : i32
    %0 = arith.cmpi eq, %arg2, %c0_i32 : i32
    %1 = arith.extui %0 : i1 to i32
    %c0_i32_0 = arith.constant 0 : i32
    %2 = arith.cmpi ne, %1, %c0_i32_0 : i32
    scf.if %2 {
      %cst_9 = arith.constant 0.000000e+00 : f32
      %12 = vector.broadcast %cst_9 : f32 to vector<8x256xf32>
      %c0_10 = arith.constant 0 : index
      %c0_11 = arith.constant 0 : index
      %13 = vector.load %arg6[%c0_10, %c0_11] : memref<8x256xf32, #tpu.memory_space<vmem>>, vector<8x256xf32>
      tpu.vector_store %arg6[%c0_10, %c0_11], %12 {strides = array<i32>} : memref<8x256xf32, #tpu.memory_space<vmem>>, vector<8x256xf32>,
    } else {
    }
    %c0 = arith.constant 0 : index
    %c0_1 = arith.constant 0 : index
    %3 = vector.load %arg6[%c0, %c0_1] : memref<8x256xf32, #tpu.memory_space<vmem>>, vector<8x256xf32>
    %c0_2 = arith.constant 0 : index
    %c0_3 = arith.constant 0 : index
    %4 = vector.load %arg3[%c0_2, %c0_3] : memref<8x512xbf16, #tpu.memory_space<vmem>>, vector<8x512xbf16>
    %c0_4 = arith.constant 0 : index
    %c0_5 = arith.constant 0 : index
    %5 = vector.load %arg4[%c0_4, %c0_5] : memref<512x256xbf16, #tpu.memory_space<vmem>>, vector<512x256xbf16>
    %cst = arith.constant dense<0.000000e+00> : vector<8x256xf32>
    %6 = tpu.matmul %4, %5, %cst {dimension_numbers = #tpu.dot_dimension_numbers<[1], [0], [0], [1], [0, 0, 1, 1], [], []>} : vector<8x512xbf16>, vector<512x256xbf16>, vector<8x256xf32> -> vector<8x256xf32>
    %7 = arith.addf %3, %6 : vector<8x256xf32>
    %c0_6 = arith.constant 0 : index
    %c0_7 = arith.constant 0 : index
    %8 = vector.load %arg6[%c0_6, %c0_7] : memref<8x256xf32, #tpu.memory_space<vmem>>, vector<8x256xf32>
    tpu.vector_store %arg6[%c0_6, %c0_7], %7 {strides = array<i32>} : memref<8x256xf32, #tpu.memory_space<vmem>>, vector<8x256xf32>,
    %c8_i32 = arith.constant 8 : i32
    %9 = arith.cmpi eq, %arg2, %c8_i32 : i32
    %10 = arith.extui %9 : i1 to i32
    %c0_i32_8 = arith.constant 0 : i32
    %11 = arith.cmpi ne, %10, %c0_i32_8 : i32
    scf.if %11 {
      %c0_9 = arith.constant 0 : index
      %c0_10 = arith.constant 0 : index
      %12 = vector.load %arg6[%c0_9, %c0_10] : memref<8x256xf32, #tpu.memory_space<vmem>>, vector<8x256xf32>
      %13 = arith.truncf %12 : vector<8x256xf32> to vector<8x256xbf16>
      %c0_11 = arith.constant 0 : index
      %c0_12 = arith.constant 0 : index
      %14 = vector.load %arg5[%c0_11, %c0_12] : memref<8x256xbf16, #tpu.memory_space<vmem>>, vector<8x256xbf16>
      tpu.vector_store %arg5[%c0_11, %c0_12], %13 {strides = array<i32>} : memref<8x256xbf16, #tpu.memory_space<vmem>>, vector<8x256xbf16>,
    } else {
    }
    return
  }
  func.func @transform_0(%arg0: i32, %arg1: i32, %arg2: i32) -> (i32, i32) {
    %c0_i32 = arith.constant 0 : i32
    return %arg0, %arg2 : i32, i32
  }
  func.func @transform_1(%arg0: i32, %arg1: i32, %arg2: i32) -> (i32, i32) {
    %c0_i32 = arith.constant 0 : i32
    return %arg2, %arg1 : i32, i32
  }
  func.func @transform_2(%arg0: i32, %arg1: i32, %arg2: i32) -> (i32, i32) {
    %c0_i32 = arith.constant 0 : i32
    return %arg0, %arg1 : i32, i32
  }
}

module attributes {stable_mosaic.version = 11 : i64} {
  func.func @_affine_kernel(%arg0: i32, %arg1: memref<8x512xbf16, #tpu.memory_space<vmem>>, %arg2: memref<1x512xf32, #tpu.memory_space<vmem>>, %arg3: memref<1x512xf32, #tpu.memory_space<vmem>>, %arg4: memref<8x512xbf16, #tpu.memory_space<vmem>>) attributes {dimension_semantics = [#tpu.dimension_semantics<parallel>], iteration_bounds = array<i64: 1>, scalar_prefetch = 0 : i64, scratch_operands = 0 : i64, tpu.core_type = #tpu.core_type<tc>, window_params = [{transform_indices = @transform_0, window_bounds = array<i64: 8, 512>}, {pipeline_mode = #tpu.pipeline_mode<synchronous>, transform_indices = @transform_1, window_bounds = array<i64: 1, 512>}, {pipeline_mode = #tpu.pipeline_mode<synchronous>, transform_indices = @transform_2, window_bounds = array<i64: 1, 512>}, {transform_indices = @transform_3, window_bounds = array<i64: 8, 512>}]} {
    %c0 = arith.constant 0 : index
    %c0_0 = arith.constant 0 : index
    %0 = vector.load %arg1[%c0, %c0_0] : memref<8x512xbf16, #tpu.memory_space<vmem>>, vector<8x512xbf16>
    %1 = arith.extf %0 : vector<8x512xbf16> to vector<8x512xf32>
    %c0_1 = arith.constant 0 : index
    %c0_2 = arith.constant 0 : index
    %2 = vector.load %arg2[%c0_1, %c0_2] : memref<1x512xf32, #tpu.memory_space<vmem>>, vector<1x512xf32>
    %3 = vector.broadcast %2 : vector<1x512xf32> to vector<8x512xf32>
    %4 = arith.mulf %1, %3 : vector<8x512xf32>
    %c0_3 = arith.constant 0 : index
    %c0_4 = arith.constant 0 : index
    %5 = vector.load %arg3[%c0_3, %c0_4] : memref<1x512xf32, #tpu.memory_space<vmem>>, vector<1x512xf32>
    %6 = vector.broadcast %5 : vector<1x512xf32> to vector<8x512xf32>
    %7 = arith.addf %4, %6 : vector<8x512xf32>
    %8 = arith.truncf %7 : vector<8x512xf32> to vector<8x512xbf16>
    %c0_5 = arith.constant 0 : index
    %c0_6 = arith.constant 0 : index
    %9 = vector.load %arg4[%c0_5, %c0_6] : memref<8x512xbf16, #tpu.memory_space<vmem>>, vector<8x512xbf16>
    tpu.vector_store %arg4[%c0_5, %c0_6], %8 {strides = array<i32>} : memref<8x512xbf16, #tpu.memory_space<vmem>>, vector<8x512xbf16>,
    return
  }
  func.func @transform_0(%arg0: i32) -> (i32, i32) {
    %c0_i32 = arith.constant 0 : i32
    %c0_i32_0 = arith.constant 0 : i32
    return %arg0, %c0_i32 : i32, i32
  }
  func.func @transform_1(%arg0: i32) -> (i32, i32) {
    %c0_i32 = arith.constant 0 : i32
    %c0_i32_0 = arith.constant 0 : i32
    %c0_i32_1 = arith.constant 0 : i32
    return %c0_i32, %c0_i32_0 : i32, i32
  }
  func.func @transform_2(%arg0: i32) -> (i32, i32) {
    %c0_i32 = arith.constant 0 : i32
    %c0_i32_0 = arith.constant 0 : i32
    %c0_i32_1 = arith.constant 0 : i32
    return %c0_i32, %c0_i32_0 : i32, i32
  }
  func.func @transform_3(%arg0: i32) -> (i32, i32) {
    %c0_i32 = arith.constant 0 : i32
    %c0_i32_0 = arith.constant 0 : i32
    return %arg0, %c0_i32 : i32, i32
  }
}

module attributes {stable_mosaic.version = 11 : i64} {
  func.func @_affine_res_kernel(%arg0: i32, %arg1: memref<8x512xbf16, #tpu.memory_space<vmem>>, %arg2: memref<1x512xf32, #tpu.memory_space<vmem>>, %arg3: memref<1x512xf32, #tpu.memory_space<vmem>>, %arg4: memref<8x512xbf16, #tpu.memory_space<vmem>>, %arg5: memref<8x512xbf16, #tpu.memory_space<vmem>>) attributes {dimension_semantics = [#tpu.dimension_semantics<parallel>], iteration_bounds = array<i64: 1>, scalar_prefetch = 0 : i64, scratch_operands = 0 : i64, tpu.core_type = #tpu.core_type<tc>, window_params = [{transform_indices = @transform_0, window_bounds = array<i64: 8, 512>}, {pipeline_mode = #tpu.pipeline_mode<synchronous>, transform_indices = @transform_1, window_bounds = array<i64: 1, 512>}, {pipeline_mode = #tpu.pipeline_mode<synchronous>, transform_indices = @transform_2, window_bounds = array<i64: 1, 512>}, {transform_indices = @transform_3, window_bounds = array<i64: 8, 512>}, {transform_indices = @transform_4, window_bounds = array<i64: 8, 512>}]} {
    %c0 = arith.constant 0 : index
    %c0_0 = arith.constant 0 : index
    %0 = vector.load %arg1[%c0, %c0_0] : memref<8x512xbf16, #tpu.memory_space<vmem>>, vector<8x512xbf16>
    %1 = arith.extf %0 : vector<8x512xbf16> to vector<8x512xf32>
    %c0_1 = arith.constant 0 : index
    %c0_2 = arith.constant 0 : index
    %2 = vector.load %arg2[%c0_1, %c0_2] : memref<1x512xf32, #tpu.memory_space<vmem>>, vector<1x512xf32>
    %3 = vector.broadcast %2 : vector<1x512xf32> to vector<8x512xf32>
    %4 = arith.mulf %1, %3 : vector<8x512xf32>
    %c0_3 = arith.constant 0 : index
    %c0_4 = arith.constant 0 : index
    %5 = vector.load %arg3[%c0_3, %c0_4] : memref<1x512xf32, #tpu.memory_space<vmem>>, vector<1x512xf32>
    %6 = vector.broadcast %5 : vector<1x512xf32> to vector<8x512xf32>
    %7 = arith.addf %4, %6 : vector<8x512xf32>
    %c0_5 = arith.constant 0 : index
    %c0_6 = arith.constant 0 : index
    %8 = vector.load %arg4[%c0_5, %c0_6] : memref<8x512xbf16, #tpu.memory_space<vmem>>, vector<8x512xbf16>
    %9 = arith.extf %8 : vector<8x512xbf16> to vector<8x512xf32>
    %10 = arith.addf %7, %9 : vector<8x512xf32>
    %cst = arith.constant 0.000000e+00 : f32
    %11 = vector.broadcast %cst : f32 to vector<8x512xf32>
    %12 = arith.maximumf %10, %11 : vector<8x512xf32>
    %13 = arith.truncf %12 : vector<8x512xf32> to vector<8x512xbf16>
    %c0_7 = arith.constant 0 : index
    %c0_8 = arith.constant 0 : index
    %14 = vector.load %arg5[%c0_7, %c0_8] : memref<8x512xbf16, #tpu.memory_space<vmem>>, vector<8x512xbf16>
    tpu.vector_store %arg5[%c0_7, %c0_8], %13 {strides = array<i32>} : memref<8x512xbf16, #tpu.memory_space<vmem>>, vector<8x512xbf16>,
    return
  }
  func.func @transform_0(%arg0: i32) -> (i32, i32) {
    %c0_i32 = arith.constant 0 : i32
    %c0_i32_0 = arith.constant 0 : i32
    return %arg0, %c0_i32 : i32, i32
  }
  func.func @transform_1(%arg0: i32) -> (i32, i32) {
    %c0_i32 = arith.constant 0 : i32
    %c0_i32_0 = arith.constant 0 : i32
    %c0_i32_1 = arith.constant 0 : i32
    return %c0_i32, %c0_i32_0 : i32, i32
  }
  func.func @transform_2(%arg0: i32) -> (i32, i32) {
    %c0_i32 = arith.constant 0 : i32
    %c0_i32_0 = arith.constant 0 : i32
    %c0_i32_1 = arith.constant 0 : i32
    return %c0_i32, %c0_i32_0 : i32, i32
  }
  func.func @transform_3(%arg0: i32) -> (i32, i32) {
    %c0_i32 = arith.constant 0 : i32
    %c0_i32_0 = arith.constant 0 : i32
    return %arg0, %c0_i32 : i32, i32
  }
  func.func @transform_4(%arg0: i32) -> (i32, i32) {
    %c0_i32 = arith.constant 0 : i32
    %c0_i32_0 = arith.constant 0 : i32
    return %arg0, %c0_i32 : i32, i32
  }
}

module attributes {stable_mosaic.version = 11 : i64} {
  func.func @_avgpool_kernel(%arg0: i32, %arg1: memref<2x1x128xbf16, #tpu.memory_space<vmem>>, %arg2: memref<2x128xf32, #tpu.memory_space<vmem>>) attributes {dimension_semantics = [#tpu.dimension_semantics<parallel>], iteration_bounds = array<i64: 4>, scalar_prefetch = 0 : i64, scratch_operands = 0 : i64, tpu.core_type = #tpu.core_type<tc>, window_params = [{transform_indices = @transform_0, window_bounds = array<i64: 2, 1, 128>}, {transform_indices = @transform_1, window_bounds = array<i64: 2, 128>}]} {
    %c0 = arith.constant 0 : index
    %c0_0 = arith.constant 0 : index
    %c0_1 = arith.constant 0 : index
    %0 = vector.load %arg1[%c0, %c0_0, %c0_1] : memref<2x1x128xbf16, #tpu.memory_space<vmem>>, vector<2x1x128xbf16>
    %1 = arith.extf %0 : vector<2x1x128xbf16> to vector<2x1x128xf32>
    %cst = arith.constant dense<0.000000e+00> : vector<2x128xf32>
    %2 = vector.multi_reduction <add>, %1, %cst [1] : vector<2x1x128xf32> to vector<2x128xf32>
    %cst_2 = arith.constant 1.000000e+00 : f32
    %3 = vector.broadcast %cst_2 : f32 to vector<2x128xf32>
    %4 = arith.divf %2, %3 : vector<2x128xf32>
    %c0_3 = arith.constant 0 : index
    %c0_4 = arith.constant 0 : index
    %5 = vector.load %arg2[%c0_3, %c0_4] : memref<2x128xf32, #tpu.memory_space<vmem>>, vector<2x128xf32>
    tpu.vector_store %arg2[%c0_3, %c0_4], %4 {strides = array<i32>} : memref<2x128xf32, #tpu.memory_space<vmem>>, vector<2x128xf32>,
    return
  }
  func.func @transform_0(%arg0: i32) -> (i32, i32, i32) {
    %c0_i32 = arith.constant 0 : i32
    %c0_i32_0 = arith.constant 0 : i32
    %c0_i32_1 = arith.constant 0 : i32
    return %c0_i32, %c0_i32_0, %arg0 : i32, i32, i32
  }
  func.func @transform_1(%arg0: i32) -> (i32, i32) {
    %c0_i32 = arith.constant 0 : i32
    %c0_i32_0 = arith.constant 0 : i32
    return %c0_i32, %arg0 : i32, i32
  }
}

module attributes {stable_mosaic.version = 11 : i64} {
  func.func @_matmul_bias_kernel(%arg0: i32, %arg1: i32, %arg2: i32, %arg3: memref<8x512xbf16, #tpu.memory_space<vmem>>, %arg4: memref<512x128xbf16, #tpu.memory_space<vmem>>, %arg5: memref<1x128xf32, #tpu.memory_space<vmem>>, %arg6: memref<8x128xf32, #tpu.memory_space<vmem>>, %arg7: memref<8x128xf32, #tpu.memory_space<vmem>>) attributes {dimension_semantics = [#tpu.dimension_semantics<parallel>, #tpu.dimension_semantics<parallel>, #tpu.dimension_semantics<arbitrary>], iteration_bounds = array<i64: 1, 1, 1>, scalar_prefetch = 0 : i64, scratch_operands = 1 : i64, tpu.core_type = #tpu.core_type<tc>, window_params = [{transform_indices = @transform_0, window_bounds = array<i64: 8, 512>}, {transform_indices = @transform_1, window_bounds = array<i64: 512, 128>}, {transform_indices = @transform_2, window_bounds = array<i64: 1, 128>}, {transform_indices = @transform_3, window_bounds = array<i64: 8, 128>}]} {
    %c0_i32 = arith.constant 0 : i32
    %0 = arith.cmpi eq, %arg2, %c0_i32 : i32
    %1 = arith.extui %0 : i1 to i32
    %c0_i32_0 = arith.constant 0 : i32
    %2 = arith.cmpi ne, %1, %c0_i32_0 : i32
    scf.if %2 {
      %cst_10 = arith.constant 0.000000e+00 : f32
      %12 = vector.broadcast %cst_10 : f32 to vector<8x128xf32>
      %c0_11 = arith.constant 0 : index
      %c0_12 = arith.constant 0 : index
      %13 = vector.load %arg7[%c0_11, %c0_12] : memref<8x128xf32, #tpu.memory_space<vmem>>, vector<8x128xf32>
      tpu.vector_store %arg7[%c0_11, %c0_12], %12 {strides = array<i32>} : memref<8x128xf32, #tpu.memory_space<vmem>>, vector<8x128xf32>,
    } else {
    }
    %c0 = arith.constant 0 : index
    %c0_1 = arith.constant 0 : index
    %3 = vector.load %arg7[%c0, %c0_1] : memref<8x128xf32, #tpu.memory_space<vmem>>, vector<8x128xf32>
    %c0_2 = arith.constant 0 : index
    %c0_3 = arith.constant 0 : index
    %4 = vector.load %arg3[%c0_2, %c0_3] : memref<8x512xbf16, #tpu.memory_space<vmem>>, vector<8x512xbf16>
    %c0_4 = arith.constant 0 : index
    %c0_5 = arith.constant 0 : index
    %5 = vector.load %arg4[%c0_4, %c0_5] : memref<512x128xbf16, #tpu.memory_space<vmem>>, vector<512x128xbf16>
    %cst = arith.constant dense<0.000000e+00> : vector<8x128xf32>
    %6 = tpu.matmul %4, %5, %cst {dimension_numbers = #tpu.dot_dimension_numbers<[1], [0], [0], [1], [0, 0, 1, 1], [], []>} : vector<8x512xbf16>, vector<512x128xbf16>, vector<8x128xf32> -> vector<8x128xf32>
    %7 = arith.addf %3, %6 : vector<8x128xf32>
    %c0_6 = arith.constant 0 : index
    %c0_7 = arith.constant 0 : index
    %8 = vector.load %arg7[%c0_6, %c0_7] : memref<8x128xf32, #tpu.memory_space<vmem>>, vector<8x128xf32>
    tpu.vector_store %arg7[%c0_6, %c0_7], %7 {strides = array<i32>} : memref<8x128xf32, #tpu.memory_space<vmem>>, vector<8x128xf32>,
    %c0_i32_8 = arith.constant 0 : i32
    %9 = arith.cmpi eq, %arg2, %c0_i32_8 : i32
    %10 = arith.extui %9 : i1 to i32
    %c0_i32_9 = arith.constant 0 : i32
    %11 = arith.cmpi ne, %10, %c0_i32_9 : i32
    scf.if %11 {
      %c0_10 = arith.constant 0 : index
      %c0_11 = arith.constant 0 : index
      %12 = vector.load %arg7[%c0_10, %c0_11] : memref<8x128xf32, #tpu.memory_space<vmem>>, vector<8x128xf32>
      %c0_12 = arith.constant 0 : index
      %c0_13 = arith.constant 0 : index
      %13 = vector.load %arg5[%c0_12, %c0_13] : memref<1x128xf32, #tpu.memory_space<vmem>>, vector<1x128xf32>
      %14 = vector.broadcast %13 : vector<1x128xf32> to vector<8x128xf32>
      %15 = arith.addf %12, %14 : vector<8x128xf32>
      %c0_14 = arith.constant 0 : index
      %c0_15 = arith.constant 0 : index
      %16 = vector.load %arg6[%c0_14, %c0_15] : memref<8x128xf32, #tpu.memory_space<vmem>>, vector<8x128xf32>
      tpu.vector_store %arg6[%c0_14, %c0_15], %15 {strides = array<i32>} : memref<8x128xf32, #tpu.memory_space<vmem>>, vector<8x128xf32>,
    } else {
    }
    return
  }
  func.func @transform_0(%arg0: i32, %arg1: i32, %arg2: i32) -> (i32, i32) {
    %c0_i32 = arith.constant 0 : i32
    return %arg0, %arg2 : i32, i32
  }
  func.func @transform_1(%arg0: i32, %arg1: i32, %arg2: i32) -> (i32, i32) {
    %c0_i32 = arith.constant 0 : i32
    return %arg2, %arg1 : i32, i32
  }
  func.func @transform_2(%arg0: i32, %arg1: i32, %arg2: i32) -> (i32, i32) {
    %c0_i32 = arith.constant 0 : i32
    %c0_i32_0 = arith.constant 0 : i32
    return %c0_i32, %arg1 : i32, i32
  }
  func.func @transform_3(%arg0: i32, %arg1: i32, %arg2: i32) -> (i32, i32) {
    %c0_i32 = arith.constant 0 : i32
    return %arg0, %arg1 : i32, i32
  }
}

</mosaic_0001>

<bundles_post_ra>
// kernel: tile.83
= control target key start
LH: loop header
LB: loop body
LE: loop exit
PB: predicated region body
PF: predicated region fallthrough
CT: control target
= control target key end

     0   :  { %s22_s0 = inlined_call_operand.vmem [shape: f32[64], index: 0, kind: input, shape index: {}]   ;;  %s23_s1 = inlined_call_operand.vmem [shape: f32[2,64], index: 1, kind: output, shape index: {}]  }
   0x1   :  { %v4_v0 = vld [vmem:[%s22_s0] ss:$0 sm:$0xff] }
   0x2   :  { %5 = vst [vmem:[%s23_s1] sm:$0x3] %v4_v0 }

// kernel: tile.84
= control target key start
LH: loop header
LB: loop body
LE: loop exit
PB: predicated region body
PF: predicated region fallthrough
CT: control target
= control target key end

     0   :  { %vm7_vm0 = vcmask 523264   ;;  %vm13_vm1 = vcmask 1048064   ;;  %s39_s0 = inlined_call_operand.vmem [shape: f32[2,64], index: 0, kind: input, shape index: {}]   ;;  %s40_s1 = inlined_call_operand.vmem [shape: f32[1,128], index: 1, kind: output, shape index: {}]  }
   0x1   :  { %v4_v0 = vld [vmem:[%s39_s0] sm:$0x3]  ;;  %s22_s0 = smov 64  }
   0x2   :  { %5 = vst [vmem:[#allocation1] sm:$0x3] %v4_v0 }
   0x9   :  { %v10_v1 = vld [vmem:[#allocation1 + $0x1] sm:$0x1]   ;;  %v6_v2 = vld [vmem:[#allocation1] sm:$0x1]  }
   0xa   :  { %11 = vrot.lane.b32.xlu0 %v10_v1, %s22_s0  ;;  %8 = vst.msk [vmem:[#allocation0] sm:$0x1] %vm7_vm0, %v6_v2  }
  0x7c   :  { %v12_v3 = vpop.permute.xlu0 %11  }
  0x7d   :  { %14 = vst.msk [vmem:[#allocation0] sm:$0x1] %vm13_vm1, %v12_v3  }
  0x84   :  { %v18_v4 = vld [vmem:[#allocation0] sm:$0x1] }
  0x85   :  { %20 = vst [vmem:[%s40_s1] sm:$0x1] %v18_v4 }

// kernel: simple_resnet_forward.44
= control target key start
LH: loop header
LB: loop body
LE: loop exit
PB: predicated region body
PF: predicated region fallthrough
CT: control target
= control target key end

     0   :  { %s571_s12 = smov 0   ;;  %s657_s0 = inlined_call_operand.vmem [shape: bf16[256,128], index: 0, kind: input, shape index: {}]   ;;  %s658_s1 = inlined_call_operand.vmem [shape: f32[1,128], index: 1, kind: input, shape index: {}]   ;;  %s659_s2 = inlined_call_operand.vmem [shape: f32[1,128], index: 2, kind: input, shape index: {}]   ;;  %s660_s3 = inlined_call_operand.vmem [shape: bf16[256,128], index: 3, kind: output, shape index: {}]  }
   0x1 LB: > { %s404_s13 = sadd.s32 4294967295, %s549_s12   ;;  %p408_p0 = scmp.ge.s32.totalorder %s549_s12, 1  ;;  %s549_s12 = sphi %s571_s12, %s13_s12  }
   0x2   : > { %p138_p1 = scmp.lt.s32.totalorder %s549_s12, 3 }
   0x4   : > { %p139_p2 = pnand %p408_p0, %p138_p1 }
   0x5   : > { %s409_s14 = sshll.u32 (!%p139_p2), %s404_s13, 4  ;;  %v592_v0 = vld [vmem:[%s658_s1] ss:$0 sm:$0xff] (!%p139_p2) }
   0x6   : > { %142 = sbr.rel (%p139_p2) target bundleno = 39 (0x27), region = 32  ;;  %p163_p3 = scmp.lt.s32.totalorder (!%p139_p2), %s409_s14, 31  ;;  %v601_v9 = vld [vmem:[%s659_s2] ss:$0 sm:$0xff] (!%p139_p2) }
   0xd   : > { %s662_s14 = smov (!%p163_p3, %s409_s14), 31 }
   0xe   : > { %s410_s15 = sshll.u32 %s662_s14, 2 }
   0xf   : > { %s587_s18 = scalar_lea.vmem %s657_s0, %s410_s15  ;;  %s626_s25 = scalar_lea.vmem %s660_s3, %s410_s15 }
  0x10   : > { %v450_v1 = vld [vmem:[%s587_s18] sm:$0xff]   ;;  %v521_v2 = vld [vmem:[%s587_s18 + $0x8] sm:$0xff]   ;;  %v522_v3 = vld [vmem:[%s587_s18 + $0x10] sm:$0xff]  }
  0x11   : > { %v451_v4 = vunpack.c.l.bf16 %v450_v1  ;;  %v452_v5 = vunpack.c.h.bf16 %v450_v1  ;;  %v455_v6 = vunpack.c.l.bf16 %v521_v2  ;;  %v456_v7 = vunpack.c.h.bf16 %v521_v2  ;;  %v523_v8 = vld [vmem:[%s587_s18 + $0x18] sm:$0xff]   ;;  %v524_v30 = vld [vmem:[%s587_s18 + $0x20] sm:$0xff]   ;;  %v525_v35 = vld [vmem:[%s587_s18 + $0x28] sm:$0xff]  }
  0x12   : > { %v459_v10 = vunpack.c.l.bf16 %v522_v3  ;;  %v460_v11 = vunpack.c.h.bf16 %v522_v3  ;;  %v463_v12 = vunpack.c.l.bf16 %v523_v8  ;;  %v464_v13 = vunpack.c.h.bf16 %v523_v8  ;;  %v526_v40 = vld [vmem:[%s587_s18 + $0x30] sm:$0xff]   ;;  %v527_v45 = vld [vmem:[%s587_s18 + $0x38] sm:$0xff]  }
  0x13   : > { %v213_v14 = vmul.f32 %v451_v4, %v592_v0  ;;  %v214_v15 = vmul.f32 %v452_v5, %v592_v0  ;;  %v215_v16 = vmul.f32 %v455_v6, %v592_v0  ;;  %v216_v17 = vmul.f32 %v456_v7, %v592_v0 }
  0x14   : > { %v217_v18 = vmul.f32 %v459_v10, %v592_v0  ;;  %v218_v19 = vmul.f32 %v460_v11, %v592_v0  ;;  %v219_v20 = vmul.f32 %v463_v12, %v592_v0  ;;  %v220_v21 = vmul.f32 %v464_v13, %v592_v0 }
  0x15   : > { %v236_v22 = vadd.f32 %v601_v9, %v213_v14  ;;  %v237_v23 = vadd.f32 %v601_v9, %v214_v15  ;;  %v238_v24 = vadd.f32 %v601_v9, %v215_v16  ;;  %v239_v25 = vadd.f32 %v601_v9, %v216_v17 }
  0x16   : > { %v240_v26 = vadd.f32 %v601_v9, %v217_v18  ;;  %v241_v27 = vadd.f32 %v601_v9, %v218_v19  ;;  %v242_v28 = vadd.f32 %v601_v9, %v219_v20  ;;  %v243_v29 = vadd.f32 %v601_v9, %v220_v21 }
  0x17   : > { %v252_v31 = vmax.f32 %v236_v22, 0.0  ;;  %v253_v32 = vmax.f32 %v237_v23, 0.0  ;;  %v254_v33 = vmax.f32 %v238_v24, 0.0  ;;  %v255_v34 = vmax.f32 %v239_v25, 0.0 }
  0x18   : > { %v256_v36 = vmax.f32 %v240_v26, 0.0  ;;  %v257_v37 = vmax.f32 %v241_v27, 0.0  ;;  %v258_v38 = vmax.f32 %v242_v28, 0.0  ;;  %v259_v39 = vmax.f32 %v243_v29, 0.0 }
  0x19   : > { %v484_v41 = vpack.c.bf16 %v253_v32, %v252_v31  ;;  %v489_v42 = vpack.c.bf16 %v255_v34, %v254_v33  ;;  %v467_v43 = vunpack.c.l.bf16 %v524_v30  ;;  %v468_v44 = vunpack.c.h.bf16 %v524_v30 }
  0x1a   : > { %v494_v46 = vpack.c.bf16 %v257_v37, %v256_v36  ;;  %v499_v47 = vpack.c.bf16 %v259_v39, %v258_v38  ;;  %v471_v48 = vunpack.c.l.bf16 %v525_v35  ;;  %v472_v49 = vunpack.c.h.bf16 %v525_v35 }
  0x1b   : > { %485 = vst [vmem:[%s626_s25] sm:$0xff] %v484_v41   ;;  %528 = vst [vmem:[%s626_s25 + $0x8] sm:$0xff] %v489_v42   ;;  %v221_v50 = vmul.f32 %v467_v43, %v592_v0  ;;  %v222_v51 = vmul.f32 %v468_v44, %v592_v0  ;;  %v475_v52 = vunpack.c.l.bf16 %v526_v40  ;;  %v476_v53 = vunpack.c.h.bf16 %v526_v40 }
  0x1c   : > { %529 = vst [vmem:[%s626_s25 + $0x10] sm:$0xff] %v494_v46   ;;  %530 = vst [vmem:[%s626_s25 + $0x18] sm:$0xff] %v499_v47   ;;  %v223_v54 = vmul.f32 %v471_v48, %v592_v0  ;;  %v224_v55 = vmul.f32 %v472_v49, %v592_v0  ;;  %v479_v56 = vunpack.c.l.bf16 %v527_v45  ;;  %v480_v57 = vunpack.c.h.bf16 %v527_v45 }
  0x1d   : > { %v244_v58 = vadd.f32 %v601_v9, %v221_v50  ;;  %v245_v59 = vadd.f32 %v601_v9, %v222_v51  ;;  %v225_v60 = vmul.f32 %v475_v52, %v592_v0  ;;  %v226_v61 = vmul.f32 %v476_v53, %v592_v0 }
  0x1e   : > { %v246_v62 = vadd.f32 %v601_v9, %v223_v54  ;;  %v247_v63 = vadd.f32 %v601_v9, %v224_v55  ;;  %v227_v1 = vmul.f32 %v479_v56, %v592_v0  ;;  %v228_v2 = vmul.f32 %v480_v57, %v592_v0 }
  0x1f   : > { %v260_v3 = vmax.f32 %v244_v58, 0.0  ;;  %v261_v4 = vmax.f32 %v245_v59, 0.0  ;;  %v248_v5 = vadd.f32 %v601_v9, %v225_v60  ;;  %v249_v6 = vadd.f32 %v601_v9, %v226_v61 }
  0x20   : > { %v262_v7 = vmax.f32 %v246_v62, 0.0  ;;  %v263_v8 = vmax.f32 %v247_v63, 0.0  ;;  %v250_v10 = vadd.f32 %v601_v9, %v227_v1  ;;  %v251_v11 = vadd.f32 %v601_v9, %v228_v2 }
  0x21   : > { %v504_v12 = vpack.c.bf16 %v261_v4, %v260_v3  ;;  %v264_v13 = vmax.f32 %v248_v5, 0.0  ;;  %v265_v14 = vmax.f32 %v249_v6, 0.0 }
  0x22   : > { %v509_v15 = vpack.c.bf16 %v263_v8, %v262_v7  ;;  %v266_v0 = vmax.f32 %v250_v10, 0.0  ;;  %v267_v16 = vmax.f32 %v251_v11, 0.0 }
  0x23   : > { %531 = vst [vmem:[%s626_s25 + $0x20] sm:$0xff] %v504_v12   ;;  %v514_v17 = vpack.c.bf16 %v265_v14, %v264_v13 }
  0x24   : > { %532 = vst [vmem:[%s626_s25 + $0x28] sm:$0xff] %v509_v15   ;;  %v519_v18 = vpack.c.bf16 %v267_v16, %v266_v0 }
  0x25   : > { %533 = vst [vmem:[%s626_s25 + $0x30] sm:$0xff] %v514_v17  }
  0x26   : > { %534 = vst [vmem:[%s626_s25 + $0x38] sm:$0xff] %v519_v18  }
  0x27 PF: > { %s13_s12 = sadd.s32 1, %s549_s12  }
  0x28   : > { %p10_p4 = scmp.ge.s32.totalorder %s13_s12, 4  }
  0x2a   :  { %12 = sbr.rel (!%p10_p4) target bundleno = 1 (0x1), region = 62 }

// kernel: simple_resnet_forward.43
= control target key start
LH: loop header
LB: loop body
LE: loop exit
PB: predicated region body
PF: predicated region fallthrough
CT: control target
= control target key end

     0   :  { %s1125_s9 = smov 0   ;;  %s1127_s10 = smov 0   ;;  %s1238_s0 = inlined_call_operand.vmem [shape: bf16[512,256], index: 0, kind: input, shape index: {}]   ;;  %s1239_s1 = inlined_call_operand.vmem [shape: bf16[256,128], index: 1, kind: input, shape index: {}]   ;;  %s1240_s2 = inlined_call_operand.vmem [shape: bf16[512,128], index: 2, kind: output, shape index: {}]  }
   0x1   :  { %s1129_s11 = smov 0  }
   0x2 LB: > { %s31_s12 = sadd.s32 1, %s1104_s10  ;;  %p822_p0 = scmp.ge.s32.totalorder %s1108_s11, 1  ;;  %s1108_s11 = sphi %s1129_s11, %s12_s11   ;;  %s1104_s10 = sphi %s1127_s10, %s1242_s10   ;;  %s1100_s9 = sphi %s1125_s9, %s1241_s9  }
   0x3   : > { %p33_p1 = scmp.ge.s32.totalorder %s31_s12, 4  ;;  %p158_p2 = scmp.lt.s32.totalorder %s1108_s11, 5 }
   0x5   : > { %s1244_s12 = smov (%p33_p1, %s31_s12), 0  ;;  %p159_p3 = pnand %p822_p0, %p158_p2 }
   0x6   : > { %v1046_v0 = vld [vmem:[%s1239_s1 + $0x40] sm:$0xff] (!%p159_p3)   ;;  %s823_s15 = sshll.u32 (!%p159_p3), %s1100_s9, 4  ;;  %v1048_v2 = vld [vmem:[%s1239_s1 + $0x48] sm:$0xff] (!%p159_p3)   ;;  %v1050_v4 = vld [vmem:[%s1239_s1 + $0x50] sm:$0xff] (!%p159_p3)  }
   0x7   : > { %162 = sbr.rel (%p159_p3) target bundleno = 283 (0x11b), region = 28  ;;  %v1047_v1 = vld [vmem:[%s1239_s1] sm:$0xff] (!%p159_p3)   ;;  %942 = vmatprep.subr.bf16.mxu0 (!%p159_p3), %v1046_v0  ;;  %1006 = vmatprep.subr.bf16.mxu1 (!%p159_p3), %v1046_v0  ;;  %v1049_v3 = vld [vmem:[%s1239_s1 + $0x8] sm:$0xff] (!%p159_p3)   ;;  %p198_p4 = scmp.lt.s32.totalorder (!%p159_p3), %s823_s15, 63  ;;  %v1051_v5 = vld [vmem:[%s1239_s1 + $0x10] sm:$0xff] (!%p159_p3)  }
   0x8   : > { %943 = vmatpush3.bf16.msra.mxu0 (!%p159_p3), %v1047_v1  ;;  %1014 = vmatpush3.bf16.msra.mxu1 (!%p159_p3), %v1047_v1  ;;  %v1052_v6 = vld [vmem:[%s1239_s1 + $0x58] sm:$0xff] (!%p159_p3)   ;;  %v1054_v8 = vld [vmem:[%s1239_s1 + $0x60] sm:$0xff] (!%p159_p3)   ;;  %v1056_v10 = vld [vmem:[%s1239_s1 + $0x68] sm:$0xff] (!%p159_p3)  }
   0x9   : > { %944 = vmatprep.subr.bf16.mxu0 (!%p159_p3), %v1048_v2  ;;  %1007 = vmatprep.subr.bf16.mxu1 (!%p159_p3), %v1048_v2  ;;  %v1053_v7 = vld [vmem:[%s1239_s1 + $0x18] sm:$0xff] (!%p159_p3)   ;;  %v1055_v9 = vld [vmem:[%s1239_s1 + $0x20] sm:$0xff] (!%p159_p3)   ;;  %v1057_v13 = vld [vmem:[%s1239_s1 + $0x28] sm:$0xff] (!%p159_p3)  }
   0xa   : > { %v1058_v14 = vld [vmem:[%s1239_s1 + $0x70] sm:$0xff] (!%p159_p3)   ;;  %v1060_v16 = vld [vmem:[%s1239_s1 + $0x78] sm:$0xff] (!%p159_p3)  }
   0xb   : > { %v1059_v15 = vld [vmem:[%s1239_s1 + $0x30] sm:$0xff] (!%p159_p3)   ;;  %v1061_v17 = vld [vmem:[%s1239_s1 + $0x38] sm:$0xff] (!%p159_p3)  }
   0xc   : > { %945 = vmatpush3.bf16.msra.mxu0 (!%p159_p3), %v1049_v3  ;;  %1015 = vmatpush3.bf16.msra.mxu1 (!%p159_p3), %v1049_v3 }
   0xd   : > { %946 = vmatprep.subr.bf16.mxu0 (!%p159_p3), %v1050_v4  ;;  %1008 = vmatprep.subr.bf16.mxu1 (!%p159_p3), %v1050_v4 }
   0xe   : > { %s1246_s15 = smov (!%p198_p4, %s823_s15), 63 }
   0xf   : > { %s878_s30 = sshll.u32 %s1246_s15, 3  ;;  %s827_s26 = sshll.u32 %s1246_s15, 2 }
  0x10   : > { %947 = vmatpush3.bf16.msra.mxu0 %v1051_v5  ;;  %1016 = vmatpush3.bf16.msra.mxu1 %v1051_v5  ;;  %s1176_s7 = scalar_lea.vmem %s1238_s0, %s878_s30  ;;  %s1219_s29 = scalar_lea.vmem %s1240_s2, %s827_s26 }
  0x11   : > { %948 = vmatprep.subr.bf16.mxu0 %v1052_v6  ;;  %1009 = vmatprep.subr.bf16.mxu1 %v1052_v6  ;;  %v1064_v11 = vld [vmem:[%s1176_s7 + $0x4] ss:$8 sps:$4 sm:$0xff]   ;;  %v1062_v18 = vld [vmem:[%s1176_s7] ss:$8 sps:$4 sm:$0xff]   ;;  %v1068_v20 = vld [vmem:[%s1176_s7 + $0x14] ss:$8 sps:$4 sm:$0xff]  }
  0x12   : > { %v1067_v12 = vld [vmem:[%s1176_s7 + $0x44] ss:$8 sps:$4 sm:$0xff]   ;;  %519 = vmatprep.mubr.bf16.mxu0 %v1064_v11  ;;  %v1065_v19 = vld [vmem:[%s1176_s7 + $0x40] ss:$8 sps:$4 sm:$0xff]   ;;  %v1070_v21 = vld [vmem:[%s1176_s7 + $0x54] ss:$8 sps:$4 sm:$0xff]  }
  0x13   : > { %551 = vmatprep.mubr.bf16.mxu1 %v1067_v12  ;;  %v1072_v22 = vld [vmem:[%s1176_s7 + $0x10] ss:$8 sps:$4 sm:$0xff]   ;;  %v1074_v24 = vld [vmem:[%s1176_s7 + $0x24] ss:$8 sps:$4 sm:$0xff]   ;;  %v1078_v26 = vld [vmem:[%s1176_s7 + $0x20] ss:$8 sps:$4 sm:$0xff]  }
  0x14   : > { %949 = vmatpush3.bf16.msra.mxu0 %v1053_v7  ;;  %1017 = vmatpush3.bf16.msra.mxu1 %v1053_v7  ;;  %v1073_v23 = vld [vmem:[%s1176_s7 + $0x50] ss:$8 sps:$4 sm:$0xff]   ;;  %v1076_v25 = vld [vmem:[%s1176_s7 + $0x64] ss:$8 sps:$4 sm:$0xff]   ;;  %v1079_v27 = vld [vmem:[%s1176_s7 + $0x60] ss:$8 sps:$4 sm:$0xff]  }
  0x15   : > { %950 = vmatprep.subr.bf16.mxu0 %v1054_v8  ;;  %1010 = vmatprep.subr.bf16.mxu1 %v1054_v8  ;;  %v1080_v28 = vld [vmem:[%s1176_s7 + $0x34] ss:$8 sps:$4 sm:$0xff]   ;;  %v1084_v30 = vld [vmem:[%s1176_s7 + $0x30] ss:$8 sps:$4 sm:$0xff]  }
  0x16   : > { %v1082_v29 = vld [vmem:[%s1176_s7 + $0x74] ss:$8 sps:$4 sm:$0xff]   ;;  %v1085_v31 = vld [vmem:[%s1176_s7 + $0x70] ss:$8 sps:$4 sm:$0xff]  }
  0x18   : > { %951 = vmatpush3.bf16.msra.mxu0 %v1055_v9  ;;  %1018 = vmatpush3.bf16.msra.mxu1 %v1055_v9 }
  0x19   : > { %952 = vmatprep.subr.bf16.mxu0 %v1056_v10  ;;  %1011 = vmatprep.subr.bf16.mxu1 %v1056_v10 }
  0x1c   : > { %953 = vmatpush3.bf16.msra.mxu0 %v1057_v13  ;;  %1019 = vmatpush3.bf16.msra.mxu1 %v1057_v13 }
  0x1d   : > { %954 = vmatprep.subr.bf16.mxu0 %v1058_v14  ;;  %1012 = vmatprep.subr.bf16.mxu1 %v1058_v14 }
  0x20   : > { %955 = vmatpush3.bf16.msra.mxu0 %v1059_v15  ;;  %1020 = vmatpush3.bf16.msra.mxu1 %v1059_v15 }
  0x21   : > { %956 = vmatprep.subr.bf16.mxu0 %v1060_v16  ;;  %1013 = vmatprep.subr.bf16.mxu1 %v1060_v16 }
  0x24   : > { %957 = vmatpush3.bf16.msra.mxu0 %v1061_v17  ;;  %1021 = vmatpush3.bf16.msra.mxu1 %v1061_v17 }
  0x27   : > { %520 = vmatmul.mubr.bf16.vlgmr.msra.gmra.mrb[0].mxu0 %v1062_v18  ;;  %552 = vmatmul.mubr.bf16.vlgmr.msra.gmra.mrb[0].mxu1 %v1065_v19 }
  0x28   : > { %527 = vmatprep.mubr.bf16.mxu0 %v1068_v20  ;;  %559 = vmatprep.mubr.bf16.mxu1 %v1070_v21 }
  0x2f   : > { %528 = vmatmul.mubr.bf16.gmra.mrb[4].mxu0 %v1072_v22  ;;  %560 = vmatmul.mubr.bf16.gmra.mrb[4].mxu1 %v1073_v23 }
  0x30   : > { %535 = vmatprep.mubr.bf16.mxu0 %v1074_v24  ;;  %567 = vmatprep.mubr.bf16.mxu1 %v1076_v25 }
  0x37   : > { %536 = vmatmul.mubr.bf16.gmra.mrb[8].mxu0 %v1078_v26  ;;  %568 = vmatmul.mubr.bf16.gmra.mrb[8].mxu1 %v1079_v27 }
  0x38   : > { %543 = vmatprep.mubr.bf16.mxu0 %v1080_v28  ;;  %575 = vmatprep.mubr.bf16.mxu1 %v1082_v29 }
  0x3f   : > { %544 = vmatmul.mubr.bf16.gmra.mrb[12].mxu0 %v1084_v30  ;;  %576 = vmatmul.mubr.bf16.gmra.mrb[12].mxu1 %v1085_v31 }
  0xfa   : > { %v958_v32 = vpop.f32.mrb[0].mxu0  ;;  %v982_v33 = vpop.f32.mrb[0].mxu1 }
  0xfb   : > { %v959_v34 = vpop.f32.mrb[1].mxu0  ;;  %v983_v35 = vpop.f32.mrb[1].mxu1 }
  0xfc   : > { %v960_v36 = vadd.f32 %v959_v34, %v958_v32  ;;  %v984_v37 = vadd.f32 %v983_v35, %v982_v33  ;;  %v961_v38 = vpop.f32.mrb[2].mxu0  ;;  %v985_v39 = vpop.f32.mrb[2].mxu1 }
  0xfd   : > { %v962_v40 = vpop.f32.mrb[3].mxu0  ;;  %v986_v41 = vpop.f32.mrb[3].mxu1 }
  0xfe   : > { %v963_v42 = vadd.f32 %v962_v40, %v961_v38  ;;  %v987_v43 = vadd.f32 %v986_v41, %v985_v39 }
 0x100   : > { %v898_v44 = vpack.c.bf16 %v963_v42, %v960_v36  ;;  %v918_v45 = vpack.c.bf16 %v987_v43, %v984_v37 }
 0x102   : > { %899 = vst [vmem:[%s1219_s29] sm:$0xff] %v898_v44   ;;  %938 = vst [vmem:[%s1219_s29 + $0x20] sm:$0xff] %v918_v45   ;;  %v964_v46 = vpop.f32.mrb[4].mxu0  ;;  %v988_v47 = vpop.f32.mrb[4].mxu1 }
 0x103   : > { %v965_v48 = vpop.f32.mrb[5].mxu0  ;;  %v989_v49 = vpop.f32.mrb[5].mxu1 }
 0x104   : > { %v966_v50 = vadd.f32 %v965_v48, %v964_v46  ;;  %v990_v51 = vadd.f32 %v989_v49, %v988_v47  ;;  %v967_v52 = vpop.f32.mrb[6].mxu0  ;;  %v991_v53 = vpop.f32.mrb[6].mxu1 }
 0x105   : > { %v968_v54 = vpop.f32.mrb[7].mxu0  ;;  %v992_v55 = vpop.f32.mrb[7].mxu1 }
 0x106   : > { %v969_v56 = vadd.f32 %v968_v54, %v967_v52  ;;  %v993_v57 = vadd.f32 %v992_v55, %v991_v53 }
 0x108   : > { %v903_v58 = vpack.c.bf16 %v969_v56, %v966_v50  ;;  %v923_v59 = vpack.c.bf16 %v993_v57, %v990_v51 }
 0x10a   : > { %935 = vst [vmem:[%s1219_s29 + $0x8] sm:$0xff] %v903_v58   ;;  %939 = vst [vmem:[%s1219_s29 + $0x28] sm:$0xff] %v923_v59   ;;  %v970_v60 = vpop.f32.mrb[8].mxu0  ;;  %v994_v61 = vpop.f32.mrb[8].mxu1 }
 0x10b   : > { %v971_v62 = vpop.f32.mrb[9].mxu0  ;;  %v995_v63 = vpop.f32.mrb[9].mxu1 }
 0x10c   : > { %v972_v0 = vadd.f32 %v971_v62, %v970_v60  ;;  %v996_v1 = vadd.f32 %v995_v63, %v994_v61  ;;  %v973_v2 = vpop.f32.mrb[10].mxu0  ;;  %v997_v3 = vpop.f32.mrb[10].mxu1 }
 0x10d   : > { %v974_v4 = vpop.f32.mrb[11].mxu0  ;;  %v998_v5 = vpop.f32.mrb[11].mxu1 }
 0x10e   : > { %v975_v6 = vadd.f32 %v974_v4, %v973_v2  ;;  %v999_v7 = vadd.f32 %v998_v5, %v997_v3 }
 0x110   : > { %v908_v8 = vpack.c.bf16 %v975_v6, %v972_v0  ;;  %v928_v9 = vpack.c.bf16 %v999_v7, %v996_v1 }
 0x112   : > { %936 = vst [vmem:[%s1219_s29 + $0x10] sm:$0xff] %v908_v8   ;;  %940 = vst [vmem:[%s1219_s29 + $0x30] sm:$0xff] %v928_v9   ;;  %v976_v10 = vpop.f32.mrb[12].mxu0  ;;  %v1000_v11 = vpop.f32.mrb[12].mxu1 }
 0x113   : > { %v977_v12 = vpop.f32.mrb[13].mxu0  ;;  %v1001_v13 = vpop.f32.mrb[13].mxu1 }
 0x114   : > { %v978_v14 = vadd.f32 %v977_v12, %v976_v10  ;;  %v1002_v15 = vadd.f32 %v1001_v13, %v1000_v11  ;;  %v979_v16 = vpop.f32.mrb[14].mxu0  ;;  %v1003_v17 = vpop.f32.mrb[14].mxu1 }
 0x115   : > { %v980_v18 = vpop.f32.mrb[15].mxu0  ;;  %v1004_v19 = vpop.f32.mrb[15].mxu1 }
 0x116   : > { %v981_v20 = vadd.f32 %v980_v18, %v979_v16  ;;  %v1005_v21 = vadd.f32 %v1004_v19, %v1003_v17 }
 0x118   : > { %v913_v22 = vpack.c.bf16 %v981_v20, %v978_v14  ;;  %v933_v23 = vpack.c.bf16 %v1005_v21, %v1002_v15 }
 0x11a   : > { %937 = vst [vmem:[%s1219_s29 + $0x18] sm:$0xff] %v913_v22   ;;  %941 = vst [vmem:[%s1219_s29 + $0x38] sm:$0xff] %v933_v23  }
 0x11b PF: > { %s12_s11 = sadd.s32 1, %s1108_s11   ;;  %s1241_s9 = smov %s1104_s10 }
 0x11c   : > { %p9_p5 = scmp.ge.s32.totalorder %s12_s11, 6   ;;  %s1242_s10 = smov %s1244_s12 }
 0x11e   :  { %11 = sbr.rel (!%p9_p5) target bundleno = 2 (0x2), region = 69 }

// kernel: simple_resnet_forward.45
= control target key start
LH: loop header
LB: loop body
LE: loop exit
PB: predicated region body
PF: predicated region fallthrough
CT: control target
= control target key end

     0   :  { %s939_s15 = smov 0   ;;  %s1211_s0 = inlined_call_operand.vmem [shape: bf16[2,9,9,64], index: 0, kind: input, shape index: {}]   ;;  %s1212_s1 = inlined_call_operand.vmem [shape: bf16[2,9,9,64], index: 1, kind: input, shape index: {}]   ;;  %s1213_s2 = inlined_call_operand.vmem [shape: bf16[2,9,9,64], index: 2, kind: input, shape index: {}]   ;;  %s1214_s3 = inlined_call_operand.vmem [shape: bf16[2,9,9,64], index: 3, kind: input, shape index: {}]   ;;  %s1215_s4 = inlined_call_operand.vmem [shape: bf16[2,8,8,64], index: 4, kind: output, shape index: {}]  }
   0x1 LB: > { %s859_s16 = sadd.s32 4294967295, %s912_s15   ;;  %p863_p0 = scmp.ge.s32.totalorder %s912_s15, 1  ;;  %s912_s15 = sphi %s939_s15, %s14_s15  }
   0x2   : > { %p192_p1 = scmp.lt.s32.totalorder %s912_s15, 3 }
   0x4   : > { %p193_p2 = pnand %p863_p0, %p192_p1 }
   0x5   : > { %p233_p3 = scmp.lt.s32.totalorder (!%p193_p2), %s859_s16, 1  ;;  %vm274_vm0 = vsmask.f32 (!%p193_p2), 3328  ;;  %vm275_vm1 = vsmask.f32 (!%p193_p2), 7440  ;;  %vm759_vm3 = vcmask (!%p193_p2), 519168  }
   0x6   : > { %196 = sbr.rel (%p193_p2) target bundleno = 101 (0x65), region = 36  ;;  %vm981_vm2 = vmor (!%p193_p2), %vm274_vm0, %vm275_vm1 }
   0xd   : > { %s1219_s16 = smov (!%p233_p3, %s859_s16), 1 }
   0xe   : > { %s950_s17 = smul.u32 72, %s1219_s16  ;;  %s896_s30 = sshll.u32 %s1219_s16, 5 }
   0xf   : > { %s1058_s7 = scalar_lea.vmem %s1215_s4, %s896_s30 }
  0x10   : > { %s956_s20 = scalar_lea.vmem %s1211_s0, %s950_s17  ;;  %s962_s23 = scalar_lea.vmem %s1213_s2, %s950_s17 }
  0x11   : > { %v258_v0 = vld [vmem:[%s956_s20] sm:$0xf]  ;;  %v266_v1 = vld [vmem:[%s956_s20 + $0x4] sm:$0x1]  ;;  %v967_v2 = vld [vmem:[%s956_s20 + $0x8] sm:$0xf]  ;;  %s997_s26 = scalar_lea.vmem %s1212_s1, %s950_s17  ;;  %s1033_s29 = scalar_lea.vmem %s1214_s3, %s950_s17 }
  0x12   : > { %v278_v3 = vshrl.u32 %v258_v0, 16  ;;  %v281_v4 = vshll.u32 %v258_v0, 16  ;;  %v287_v5 = vshll.u32 %v266_v1, 16  ;;  %v878_v6 = vld [vmem:[%s956_s20 + $0xc] sm:$0x1]  ;;  %v431_v7 = vshrl.u32 %v967_v2, 16 }
  0x13   : > { %v434_v8 = vshll.u32 %v967_v2, 16  ;;  %v440_v9 = vshll.u32 %v878_v6, 16  ;;  %v973_v13 = vld [vmem:[%s962_s23] sm:$0xf]  ;;  %v607_v15 = vld [vmem:[%s962_s23 + $0x4] sm:$0x1] }
  0x14   : > { %v280_v10 = vrot.slane %v278_v3, 4  ;;  %v283_v11 = vrot.slane %v281_v4, 5  ;;  %v433_v12 = vrot.slane %v431_v7, 4  ;;  %v616_v16 = vshrl.u32 %v973_v13, 16  ;;  %v259_v22 = vld [vmem:[%s956_s20 + $0x8] sm:$0xf] }
  0x15   : > { %v436_v14 = vrot.slane %v434_v8, 5  ;;  %v619_v17 = vshll.u32 %v973_v13, 16  ;;  %v289_v19 = vrot.slane %v287_v5, 5  ;;  %v442_v20 = vrot.slane %v440_v9, 5  ;;  %v267_v27 = vld [vmem:[%s956_s20 + $0xc] sm:$0x1] }
  0x16   : > { %v284_v18 = vor.u32 %v283_v11, %v280_v10  ;;  %v625_v21 = vshll.u32 %v607_v15, 16  ;;  %v618_v25 = vrot.slane %v616_v16, 4  ;;  %v292_v28 = vshrl.u32 %v259_v22, 16  ;;  %v989_v33 = vld [vmem:[%s956_s20 + $0x10] sm:$0xf] }
  0x17   : > { %v437_v24 = vor.u32 %v436_v14, %v433_v12  ;;  %v621_v26 = vrot.slane %v619_v17, 5  ;;  %v295_v31 = vshll.u32 %v259_v22, 16  ;;  %v301_v32 = vshll.u32 %v267_v27, 16  ;;  %v879_v37 = vld [vmem:[%s956_s20 + $0x14] sm:$0x1] }
  0x18   : > { %v285_v29 = vrot.slane %v284_v18, 4  ;;  %v986_v30 = vrot.slane %v625_v21, 5  ;;  %v294_v36 = vrot.slane %v292_v28, 4  ;;  %v445_v38 = vshrl.u32 %v989_v33, 16  ;;  %v1007_v47 = vld [vmem:[%s962_s23 + $0x8] sm:$0xf] }
  0x19   : > { %v438_v34 = vrot.slane %v437_v24, 4  ;;  %v622_v35 = vor.u32 %v621_v26, %v618_v25  ;;  %v297_v40 = vrot.slane %v295_v31, 5  ;;  %v303_v41 = vrot.slane %v301_v32, 5  ;;  %v608_v51 = vld [vmem:[%s962_s23 + $0xc] sm:$0x1] }
  0x1a   : > { %v290_v39 = vsel %vm981_vm2, %v285_v29, %v289_v19  ;;  %v448_v42 = vshll.u32 %v989_v33, 16  ;;  %v447_v46 = vrot.slane %v445_v38, 4  ;;  %v454_v50 = vshll.u32 %v879_v37, 16  ;;  %v558_v54 = vld [vmem:[%s997_s26] sm:$0xf] }
  0x1b   : > { %v397_v43 = vmax.bf16 %v290_v39, %v258_v0  ;;  %v443_v44 = vsel %vm981_vm2, %v438_v34, %v442_v20  ;;  %v1004_v45 = vrot.slane %v622_v35, 4  ;;  %v298_v48 = vor.u32 %v297_v40, %v294_v36  ;;  %v260_v58 = vld [vmem:[%s956_s20 + $0x10] sm:$0xf]  ;;  %v268_v63 = vld [vmem:[%s956_s20 + $0x14] sm:$0x1] }
  0x1c   : > { %v450_v49 = vrot.slane %v448_v42, 5  ;;  %v630_v52 = vshrl.u32 %v1007_v47, 16  ;;  %v633_v56 = vshll.u32 %v1007_v47, 16  ;;  %v639_v57 = vshll.u32 %v608_v51, 16  ;;  %v1023_v4 = vld [vmem:[%s956_s20 + $0x18] sm:$0xf] }
  0x1d   : > { %v414_v53 = vmax.bf16 %v967_v2, %v397_v43  ;;  %v628_v55 = vsel %vm981_vm2, %v1004_v45, %v986_v30  ;;  %v299_v59 = vrot.slane %v298_v48, 4  ;;  %v456_v61 = vrot.slane %v454_v50, 5  ;;  %v886_v5 = vld [vmem:[%s997_s26 + $0x8] sm:$0xf]  ;;  %v880_v15 = vld [vmem:[%s956_s20 + $0x1c] sm:$0x1] }
  0x1e   : > { %v451_v60 = vor.u32 %v450_v49, %v447_v46  ;;  %v632_v62 = vrot.slane %v630_v52, 4  ;;  %v635_v1 = vrot.slane %v633_v56, 5  ;;  %v1020_v2 = vrot.slane %v639_v57, 5  ;;  %v1039_v20 = vld [vmem:[%s962_s23 + $0x10] sm:$0xf] }
  0x1f   : > { %v550_v0 = vmax.bf16 %v443_v44, %v414_v53  ;;  %v306_v3 = vshrl.u32 %v260_v58, 16  ;;  %v304_v6 = vsel %vm981_vm2, %v299_v59, %v303_v41  ;;  %v309_v8 = vshll.u32 %v260_v58, 16  ;;  %v559_v24 = vld [vmem:[%s997_s26 + $0x8] sm:$0xf]  ;;  %v609_v30 = vld [vmem:[%s962_s23 + $0x14] sm:$0x1] }
  0x20   : > { %v452_v7 = vrot.slane %v451_v60, 4  ;;  %v315_v9 = vshll.u32 %v268_v63, 16  ;;  %v398_v11 = vmax.bf16 %v304_v6, %v259_v22  ;;  %v636_v12 = vor.u32 %v635_v1, %v632_v62  ;;  %v743_v34 = vld [vmem:[%s1033_s29] sm:$0xf]  ;;  %v261_v37 = vld [vmem:[%s956_s20 + $0x18] sm:$0xf] }
  0x21   : > { %v566_v10 = vmax.bf16 %v558_v54, %v550_v0  ;;  %v308_v14 = vrot.slane %v306_v3, 4  ;;  %v311_v17 = vrot.slane %v309_v8, 5  ;;  %v459_v19 = vshrl.u32 %v1023_v4, 16  ;;  %v887_v38 = vld [vmem:[%s997_s26 + $0x10] sm:$0xf] }
  0x22   : > { %v457_v16 = vsel %vm981_vm2, %v452_v7, %v456_v61  ;;  %v317_v18 = vrot.slane %v315_v9, 5  ;;  %v415_v22 = vmax.bf16 %v989_v33, %v398_v11  ;;  %v637_v25 = vrot.slane %v636_v12, 4  ;;  %v269_v49 = vld [vmem:[%s956_s20 + $0x1c] sm:$0x1]  ;;  %v873_v56 = vld [vmem:[%s956_s20 + $0x20] sm:$0xf] }
  0x23   : > { %v583_v21 = vmax.bf16 %v886_v5, %v566_v10  ;;  %v462_v26 = vshll.u32 %v1023_v4, 16  ;;  %v312_v27 = vor.u32 %v311_v17, %v308_v14  ;;  %v461_v28 = vrot.slane %v459_v19, 4  ;;  %v881_v62 = vld [vmem:[%s956_s20 + $0x24] sm:$0x1]  ;;  %v744_v0 = vld [vmem:[%s1033_s29 + $0x8] sm:$0xf] }
  0x24   : > { %v468_v29 = vshll.u32 %v880_v15, 16  ;;  %v644_v31 = vshrl.u32 %v1039_v20, 16  ;;  %v551_v35 = vmax.bf16 %v457_v16, %v415_v22  ;;  %v642_v33 = vsel %vm981_vm2, %v637_v25, %v1020_v2  ;;  %v560_v2 = vld [vmem:[%s997_s26 + $0x10] sm:$0xf]  ;;  %v1074_v9 = vld [vmem:[%s962_s23 + $0x18] sm:$0xf] }
  0x25   : > { %v599_v32 = vmax.bf16 %v973_v13, %v583_v21  ;;  %v464_v36 = vrot.slane %v462_v26, 5  ;;  %v313_v39 = vrot.slane %v312_v27, 4  ;;  %v647_v42 = vshll.u32 %v1039_v20, 16  ;;  %v888_v12 = vld [vmem:[%s997_s26 + $0x18] sm:$0xf] }
  0x26   : > { %v470_v40 = vrot.slane %v468_v29, 5  ;;  %v646_v41 = vrot.slane %v644_v31, 4  ;;  %v567_v44 = vmax.bf16 %v559_v24, %v551_v35  ;;  %v653_v13 = vshll.u32 %v609_v30, 16  ;;  %v1081_v19 = vld [vmem:[%s956_s20 + $0x20] sm:$0xf] }
  0x27   : > { %v735_v43 = vmax.bf16 %v628_v55, %v599_v32  ;;  %v465_v45 = vor.u32 %v464_v36, %v461_v28  ;;  %v318_v46 = vsel %vm981_vm2, %v313_v39, %v317_v18  ;;  %v649_v48 = vrot.slane %v647_v42, 5  ;;  %v270_v30 = vld [vmem:[%s956_s20 + $0x24] sm:$0x1]  ;;  %v745_v42 = vld [vmem:[%s1033_s29 + $0x10] sm:$0xf] }
  0x28   : > { %v320_v50 = vshrl.u32 %v261_v37, 16  ;;  %v323_v51 = vshll.u32 %v261_v37, 16  ;;  %v584_v53 = vmax.bf16 %v887_v38, %v567_v44  ;;  %v399_v54 = vmax.bf16 %v318_v46, %v260_v58  ;;  %v561_v46 = vld [vmem:[%s997_s26 + $0x18] sm:$0xf] }
  0x29   : > { %v751_v52 = vmax.bf16 %v743_v34, %v735_v43  ;;  %v466_v55 = vrot.slane %v465_v45, 4  ;;  %v650_v57 = vor.u32 %v649_v48, %v646_v41  ;;  %v655_v59 = vrot.slane %v653_v13, 5  ;;  %v882_v13 = vld [vmem:[%s956_s20 + $0x2c] sm:$0x1] }
  0x2a   : > { %v322_v60 = vrot.slane %v320_v50, 4  ;;  %v325_v61 = vrot.slane %v323_v51, 5  ;;  %v600_v63 = vmax.bf16 %v1007_v47, %v584_v53  ;;  %v416_v1 = vmax.bf16 %v1023_v4, %v399_v54  ;;  %v610_v4 = vld [vmem:[%s962_s23 + $0x1c] sm:$0x1]  ;;  %v1103_v51 = vld [vmem:[%s962_s23 + $0x20] sm:$0xf] }
  0x2b   : > { %760 = vst.msk [vmem:[%s1058_s7] sm:$0xf] %vm759_vm3, %v751_v52  ;;  %v471_v58 = vsel %vm981_vm2, %v466_v55, %v470_v40  ;;  %v329_v3 = vshll.u32 %v269_v49, 16  ;;  %v651_v5 = vrot.slane %v650_v57, 4  ;;  %v473_v7 = vshrl.u32 %v873_v56, 16 }
  0x2c   : > { %v326_v6 = vor.u32 %v325_v61, %v322_v60  ;;  %v476_v8 = vshll.u32 %v873_v56, 16  ;;  %v736_v10 = vmax.bf16 %v642_v33, %v600_v63  ;;  %v552_v11 = vmax.bf16 %v471_v58, %v416_v1  ;;  %v1092_v33 = vld [vmem:[%s956_s20 + $0x28] sm:$0xf]  ;;  %v611_v61 = vld [vmem:[%s962_s23 + $0x24] sm:$0x1] }
  0x2d   : > { %v331_v47 = vrot.slane %v329_v3, 5  ;;  %v482_v14 = vshll.u32 %v881_v62, 16  ;;  %v656_v15 = vsel %vm981_vm2, %v651_v5, %v655_v59  ;;  %v475_v17 = vrot.slane %v473_v7, 4  ;;  %v263_v58 = vld [vmem:[%s956_s20 + $0x28] sm:$0xf] }
  0x2e   : > { %v327_v16 = vrot.slane %v326_v6, 4  ;;  %v478_v18 = vrot.slane %v476_v8, 5  ;;  %v752_v21 = vmax.bf16 %v744_v0, %v736_v10  ;;  %v568_v22 = vmax.bf16 %v560_v2, %v552_v11 }
  0x2f   : > { %v484_v24 = vrot.slane %v482_v14, 5  ;;  %v658_v25 = vshrl.u32 %v1074_v9, 16  ;;  %v661_v28 = vshll.u32 %v1074_v9, 16  ;;  %v667_v29 = vshll.u32 %v610_v4, 16 }
  0x30   : > { %v332_v26 = vsel %vm981_vm2, %v327_v16, %v331_v47  ;;  %v479_v27 = vor.u32 %v478_v18, %v475_v17  ;;  %761 = vst.msk [vmem:[%s1058_s7 + $0x4] sm:$0xf] %vm759_vm3, %v752_v21  ;;  %v585_v31 = vmax.bf16 %v888_v12, %v568_v22  ;;  %v334_v35 = vshrl.u32 %v1081_v19, 16  ;;  %v271_v12 = vld [vmem:[%s956_s20 + $0x2c] sm:$0x1] }
  0x31   : > { %v400_v32 = vmax.bf16 %v332_v26, %v261_v37  ;;  %v660_v34 = vrot.slane %v658_v25, 4  ;;  %v663_v38 = vrot.slane %v661_v28, 5  ;;  %v669_v39 = vrot.slane %v667_v29, 5  ;;  %v1119_v16 = vld [vmem:[%s956_s20 + $0x30] sm:$0xf] }
  0x32   : > { %v480_v36 = vrot.slane %v479_v27, 4  ;;  %v337_v40 = vshll.u32 %v1081_v19, 16  ;;  %v601_v41 = vmax.bf16 %v1039_v20, %v585_v31  ;;  %v336_v44 = vrot.slane %v334_v35, 4  ;;  %v889_v20 = vld [vmem:[%s997_s26 + $0x20] sm:$0xf] }
  0x33   : > { %v417_v43 = vmax.bf16 %v873_v56, %v400_v32  ;;  %v343_v45 = vshll.u32 %v270_v30, 16  ;;  %v664_v48 = vor.u32 %v663_v38, %v660_v34  ;;  %v487_v50 = vshrl.u32 %v1092_v33, 16  ;;  %v746_v18 = vld [vmem:[%s1033_s29 + $0x18] sm:$0xf]  ;;  %v883_v29 = vld [vmem:[%s956_s20 + $0x34] sm:$0x1] }
  0x34   : > { %v485_v37 = vsel %vm981_vm2, %v480_v36, %v484_v24  ;;  %v339_v49 = vrot.slane %v337_v40, 5  ;;  %v737_v52 = vmax.bf16 %v656_v15, %v601_v41  ;;  %v490_v55 = vshll.u32 %v1092_v33, 16  ;;  %v612_v40 = vld [vmem:[%s962_s23 + $0x2c] sm:$0x1] }
  0x35   : > { %v553_v53 = vmax.bf16 %v485_v37, %v417_v43  ;;  %v345_v54 = vrot.slane %v343_v45, 5  ;;  %v665_v56 = vrot.slane %v664_v48, 4  ;;  %v489_v59 = vrot.slane %v487_v50, 4  ;;  %v890_v45 = vld [vmem:[%s997_s26 + $0x28] sm:$0xf] }
  0x36   : > { %v340_v57 = vor.u32 %v339_v49, %v336_v44  ;;  %v496_v60 = vshll.u32 %v882_v13, 16  ;;  %v753_v62 = vmax.bf16 %v745_v42, %v737_v52  ;;  %v492_v0 = vrot.slane %v490_v55, 5  ;;  %v1136_v44 = vld [vmem:[%s956_s20 + $0x30] sm:$0xf] }
  0x37   : > { %v569_v63 = vmax.bf16 %v561_v46, %v553_v53  ;;  %v672_v1 = vshrl.u32 %v1103_v51, 16  ;;  %v670_v2 = vsel %vm981_vm2, %v665_v56, %v669_v39  ;;  %v675_v6 = vshll.u32 %v1103_v51, 16 }
  0x38   : > { %v341_v3 = vrot.slane %v340_v57, 4  ;;  %v498_v5 = vrot.slane %v496_v60, 5  ;;  %762 = vst.msk [vmem:[%s1058_s7 + $0x8] sm:$0xf] %vm759_vm3, %v753_v62  ;;  %v493_v8 = vor.u32 %v492_v0, %v489_v59  ;;  %v681_v11 = vshll.u32 %v611_v61, 16 }
  0x39   : > { %v586_v7 = vmax.bf16 %v889_v20, %v569_v63  ;;  %v674_v10 = vrot.slane %v672_v1, 4  ;;  %v677_v14 = vrot.slane %v675_v6, 5  ;;  %v348_v4 = vshrl.u32 %v263_v58, 16  ;;  %v272_v20 = vld [vmem:[%s956_s20 + $0x34] sm:$0x1] }
  0x3a   : > { %v346_v47 = vsel %vm981_vm2, %v341_v3, %v345_v54  ;;  %v351_v15 = vshll.u32 %v263_v58, 16  ;;  %v494_v22 = vrot.slane %v493_v8, 4  ;;  %v683_v24 = vrot.slane %v681_v11, 5  ;;  %v1150_v59 = vld [vmem:[%s956_s20 + $0x38] sm:$0xf] }
  0x3b   : > { %v602_v17 = vmax.bf16 %v1074_v9, %v586_v7  ;;  %v401_v21 = vmax.bf16 %v346_v47, %v1081_v19  ;;  %v678_v25 = vor.u32 %v677_v14, %v674_v10  ;;  %v350_v26 = vrot.slane %v348_v4, 4  ;;  %v562_v9 = vld [vmem:[%s997_s26 + $0x20] sm:$0xf]  ;;  %v1131_v19 = vld [vmem:[%s962_s23 + $0x28] sm:$0xf] }
  0x3c   : > { %v353_v27 = vrot.slane %v351_v15, 5  ;;  %v357_v28 = vshll.u32 %v271_v12, 16  ;;  %v499_v32 = vsel %vm981_vm2, %v494_v22, %v498_v5  ;;  %v501_v34 = vshrl.u32 %v1119_v16, 16  ;;  %v747_v0 = vld [vmem:[%s1033_s29 + $0x20] sm:$0xf] }
  0x3d   : > { %v738_v30 = vmax.bf16 %v670_v2, %v602_v17  ;;  %v418_v31 = vmax.bf16 %v1092_v33, %v401_v21  ;;  %v679_v35 = vrot.slane %v678_v25, 4  ;;  %v504_v39 = vshll.u32 %v1119_v16, 16  ;;  %v884_v10 = vld [vmem:[%s956_s20 + $0x3c] sm:$0x1]  ;;  %v1159_v12 = vld [vmem:[%s962_s23 + $0x30] sm:$0xf] }
  0x3e   : > { %v354_v36 = vor.u32 %v353_v27, %v350_v26  ;;  %v359_v38 = vrot.slane %v357_v28, 5  ;;  %v503_v43 = vrot.slane %v501_v34, 4  ;;  %v510_v33 = vshll.u32 %v883_v29, 16  ;;  %v563_v47 = vld [vmem:[%s997_s26 + $0x28] sm:$0xf] }
  0x3f   : > { %v754_v41 = vmax.bf16 %v746_v18, %v738_v30  ;;  %v554_v42 = vmax.bf16 %v499_v32, %v418_v31  ;;  %v684_v13 = vsel %vm981_vm2, %v679_v35, %v683_v24  ;;  %v506_v46 = vrot.slane %v504_v39, 5  ;;  %v265_v27 = vld [vmem:[%s956_s20 + $0x38] sm:$0xf]  ;;  %v273_v31 = vld [vmem:[%s956_s20 + $0x3c] sm:$0x1] }
  0x40   : > { %v355_v37 = vrot.slane %v354_v36, 4  ;;  %v686_v48 = vshrl.u32 %v1131_v19, 16  ;;  %v512_v50 = vrot.slane %v510_v33, 5  ;;  %v689_v52 = vshll.u32 %v1131_v19, 16  ;;  %v613_v35 = vld [vmem:[%s962_s23 + $0x34] sm:$0x1] }
  0x41   : > { %763 = vst.msk [vmem:[%s1058_s7 + $0xc] sm:$0xf] %vm759_vm3, %v754_v41  ;;  %v570_v49 = vmax.bf16 %v562_v9, %v554_v42  ;;  %v695_v53 = vshll.u32 %v612_v40, 16  ;;  %v507_v55 = vor.u32 %v506_v46, %v503_v43  ;;  %v362_v57 = vshrl.u32 %v1136_v44, 16 }
  0x42   : > { %v360_v54 = vsel %vm981_vm2, %v355_v37, %v359_v38  ;;  %v688_v56 = vrot.slane %v686_v48, 4  ;;  %v691_v62 = vrot.slane %v689_v52, 5  ;;  %v365_v3 = vshll.u32 %v1136_v44, 16  ;;  %v748_v52 = vld [vmem:[%s1033_s29 + $0x28] sm:$0xf] }
  0x43   : > { %v587_v60 = vmax.bf16 %v890_v45, %v570_v49  ;;  %v402_v61 = vmax.bf16 %v360_v54, %v263_v58  ;;  %v697_v63 = vrot.slane %v695_v53, 5  ;;  %v508_v1 = vrot.slane %v507_v55, 4  ;;  %v885_v49 = vld [vmem:[%s956_s20 + $0x44] sm:$0x1] }
  0x44   : > { %v364_v2 = vrot.slane %v362_v57, 4  ;;  %v371_v5 = vshll.u32 %v272_v20, 16  ;;  %v692_v8 = vor.u32 %v691_v62, %v688_v56  ;;  %v515_v11 = vshrl.u32 %v1150_v59, 16 }
  0x45   : > { %v603_v6 = vmax.bf16 %v1103_v51, %v587_v60  ;;  %v419_v7 = vmax.bf16 %v1119_v16, %v402_v61  ;;  %v513_v58 = vsel %vm981_vm2, %v508_v1, %v512_v50  ;;  %v367_v14 = vrot.slane %v365_v3, 5  ;;  %v891_v16 = vld [vmem:[%s997_s26 + $0x30] sm:$0xf]  ;;  %v598_v50 = vld [vmem:[%s962_s23 + $0x38] sm:$0xf] }
  0x46   : > { %v373_v4 = vrot.slane %v371_v5, 5  ;;  %v518_v15 = vshll.u32 %v1150_v59, 16  ;;  %v693_v18 = vrot.slane %v692_v8, 4  ;;  %v517_v21 = vrot.slane %v515_v11, 4  ;;  %v892_v5 = vld [vmem:[%s997_s26 + $0x38] sm:$0xf] }
  0x47   : > { %v739_v17 = vmax.bf16 %v684_v13, %v603_v6  ;;  %v555_v51 = vmax.bf16 %v513_v58, %v419_v7  ;;  %v368_v22 = vor.u32 %v367_v14, %v364_v2  ;;  %v524_v25 = vshll.u32 %v884_v10, 16  ;;  %v877_v13 = vld [vmem:[%s956_s20 + $0x40] sm:$0xf]  ;;  %v614_v11 = vld [vmem:[%s962_s23 + $0x3c] sm:$0x1] }
  0x48   : > { %v520_v24 = vrot.slane %v518_v15, 5  ;;  %v700_v26 = vshrl.u32 %v1159_v12, 16  ;;  %v703_v30 = vshll.u32 %v1159_v12, 16  ;;  %v698_v39 = vsel %vm981_vm2, %v693_v18, %v697_v63 }
  0x49   : > { %v755_v28 = vmax.bf16 %v747_v0, %v739_v17  ;;  %v571_v29 = vmax.bf16 %v563_v47, %v555_v51  ;;  %v369_v32 = vrot.slane %v368_v22, 4  ;;  %v526_v34 = vrot.slane %v524_v25, 5 }
  0x4a   : > { %v521_v9 = vor.u32 %v520_v24, %v517_v21  ;;  %v702_v36 = vrot.slane %v700_v26, 4  ;;  %v705_v40 = vrot.slane %v703_v30, 5  ;;  %v376_v41 = vshrl.u32 %v265_v27, 16  ;;  %v565_v30 = vld [vmem:[%s997_s26 + $0x38] sm:$0xf] }
  0x4b   : > { %764 = vst.msk [vmem:[%s1058_s7 + $0x10] sm:$0xf] %vm759_vm3, %v755_v28  ;;  %v588_v38 = vmax.bf16 %v891_v16, %v571_v29  ;;  %v374_v42 = vsel %vm981_vm2, %v369_v32, %v373_v4  ;;  %v379_v33 = vshll.u32 %v265_v27, 16  ;;  %v385_v45 = vshll.u32 %v273_v31, 16  ;;  %v749_v28 = vld [vmem:[%s1033_s29 + $0x30] sm:$0xf] }
  0x4c   : > { %v522_v43 = vrot.slane %v521_v9, 4  ;;  %v403_v46 = vmax.bf16 %v374_v42, %v1136_v44  ;;  %v709_v48 = vshll.u32 %v613_v35, 16  ;;  %v706_v20 = vor.u32 %v705_v40, %v702_v36  ;;  %v893_v32 = vld [vmem:[%s997_s26 + $0x40] sm:$0xf]  ;;  %v750_v40 = vld [vmem:[%s1033_s29 + $0x38] sm:$0xf] }
  0x4d   : > { %v604_v37 = vmax.bf16 %v1131_v19, %v588_v38  ;;  %v378_v54 = vrot.slane %v376_v41, 4  ;;  %v381_v55 = vrot.slane %v379_v33, 5  ;;  %v387_v60 = vrot.slane %v385_v45, 5  ;;  %v564_v19 = vld [vmem:[%s997_s26 + $0x30] sm:$0xf] }
  0x4e   : > { %v527_v53 = vsel %vm981_vm2, %v522_v43, %v526_v34  ;;  %v420_v57 = vmax.bf16 %v1150_v59, %v403_v46  ;;  %v529_v61 = vshrl.u32 %v877_v13, 16  ;;  %v532_v62 = vshll.u32 %v877_v13, 16 }
  0x4f   : > { %v740_v56 = vmax.bf16 %v698_v39, %v604_v37  ;;  %v382_v44 = vor.u32 %v381_v55, %v378_v54  ;;  %v538_v63 = vshll.u32 %v885_v49, 16  ;;  %v714_v0 = vshrl.u32 %v598_v50, 16 }
  0x50   : > { %v556_v2 = vmax.bf16 %v527_v53, %v420_v57  ;;  %v531_v3 = vrot.slane %v529_v61, 4  ;;  %v707_v6 = vrot.slane %v706_v20, 4  ;;  %v711_v7 = vrot.slane %v709_v48, 5 }
  0x51   : > { %v756_v1 = vmax.bf16 %v748_v52, %v740_v56  ;;  %v383_v8 = vrot.slane %v382_v44, 4  ;;  %v534_v10 = vrot.slane %v532_v62, 5  ;;  %v716_v58 = vrot.slane %v714_v0, 4 }
  0x52   : > { %v572_v59 = vmax.bf16 %v564_v19, %v556_v2  ;;  %v717_v47 = vshll.u32 %v598_v50, 16  ;;  %v540_v15 = vrot.slane %v538_v63, 5  ;;  %v712_v18 = vsel %vm981_vm2, %v707_v6, %v711_v7 }
  0x53   : > { %765 = vst.msk [vmem:[%s1058_s7 + $0x14] sm:$0xf] %vm759_vm3, %v756_v1  ;;  %v388_v14 = vsel %vm981_vm2, %v383_v8, %v387_v60  ;;  %v535_v4 = vor.u32 %v534_v10, %v531_v3  ;;  %v723_v22 = vshll.u32 %v614_v11, 16 }
  0x54   : > { %v589_v17 = vmax.bf16 %v892_v5, %v572_v59  ;;  %v404_v51 = vmax.bf16 %v388_v14, %v265_v27  ;;  %v719_v16 = vrot.slane %v717_v47, 5 }
  0x55   : > { %v536_v21 = vrot.slane %v535_v4, 4  ;;  %v725_v34 = vrot.slane %v723_v22, 5 }
  0x56   : > { %v605_v24 = vmax.bf16 %v1159_v12, %v589_v17  ;;  %v421_v25 = vmax.bf16 %v877_v13, %v404_v51  ;;  %v720_v26 = vor.u32 %v719_v16, %v716_v58 }
  0x57   : > { %v541_v29 = vsel %vm981_vm2, %v536_v21, %v540_v15 }
  0x58   : > { %v741_v31 = vmax.bf16 %v712_v18, %v605_v24  ;;  %v557_v27 = vmax.bf16 %v541_v29, %v421_v25  ;;  %v721_v9 = vrot.slane %v720_v26, 4 }
  0x5a   : > { %v757_v35 = vmax.bf16 %v749_v28, %v741_v31  ;;  %v573_v36 = vmax.bf16 %v565_v30, %v557_v27  ;;  %v726_v12 = vsel %vm981_vm2, %v721_v9, %v725_v34 }
  0x5c   : > { %766 = vst.msk [vmem:[%s1058_s7 + $0x18] sm:$0xf] %vm759_vm3, %v757_v35  ;;  %v590_v38 = vmax.bf16 %v893_v32, %v573_v36 }
  0x5e   : > { %v606_v39 = vmax.bf16 %v598_v50, %v590_v38 }
  0x60   : > { %v742_v41 = vmax.bf16 %v726_v12, %v606_v39 }
  0x62   : > { %v758_v42 = vmax.bf16 %v750_v40, %v742_v41 }
  0x64   : > { %767 = vst.msk [vmem:[%s1058_s7 + $0x1c] sm:$0xf] %vm759_vm3, %v758_v42 }
  0x65 PF: > { %s14_s15 = sadd.s32 1, %s912_s15  }
  0x66   : > { %p11_p4 = scmp.ge.s32.totalorder %s14_s15, 4  }
  0x68   :  { %13 = sbr.rel (!%p11_p4) target bundleno = 1 (0x1), region = 77 }

// kernel: simple_resnet_forward.47
= control target key start
LH: loop header
LB: loop body
LE: loop exit
PB: predicated region body
PF: predicated region fallthrough
CT: control target
= control target key end

     0   :  { %s361_s12 = smov 0   ;;  %s384_s0 = inlined_call_operand.vmem [shape: bf16[64,128], index: 0, kind: input, shape index: {}]   ;;  %s385_s1 = inlined_call_operand.vmem [shape: f32[1,128], index: 1, kind: input, shape index: {}]   ;;  %s386_s2 = inlined_call_operand.vmem [shape: f32[1,128], index: 2, kind: input, shape index: {}]   ;;  %s387_s3 = inlined_call_operand.vmem [shape: bf16[64,128], index: 3, kind: output, shape index: {}]  }
   0x1 LB: > { %s284_s13 = sadd.s32 4294967295, %s339_s12   ;;  %p288_p0 = scmp.ge.s32.totalorder %s339_s12, 1  ;;  %s339_s12 = sphi %s361_s12, %s13_s12  }
   0x2   : > { %p138_p1 = scmp.lt.s32.totalorder %s339_s12, 3 }
   0x4   : > { %p139_p2 = pnand %p288_p0, %p138_p1 }
   0x5   : > { %s289_s14 = sshll.u32 (!%p139_p2), %s284_s13, 2  ;;  %v293_v2 = vld [vmem:[%s385_s1] ss:$0 sm:$0xff] (!%p139_p2) }
   0x6   : > { %142 = sbr.rel (%p139_p2) target bundleno = 28 (0x1c), region = 32  ;;  %p163_p3 = scmp.lt.s32.totalorder (!%p139_p2), %s289_s14, 7  ;;  %v294_v7 = vld [vmem:[%s386_s2] ss:$0 sm:$0xff] (!%p139_p2) }
   0xd   : > { %s389_s14 = smov (!%p163_p3, %s289_s14), 7 }
   0xe   : > { %s290_s15 = sshll.u32 %s389_s14, 2 }
   0xf   : > { %s166_s18 = scalar_lea.vmem %s384_s0, %s290_s15  ;;  %s172_s25 = scalar_lea.vmem %s387_s3, %s290_s15 }
  0x10   : > { %v306_v0 = vld [vmem:[%s166_s18] sm:$0xff]   ;;  %v323_v1 = vld [vmem:[%s166_s18 + $0x8] sm:$0xff]  }
  0x11   : > { %v307_v3 = vunpack.c.l.bf16 %v306_v0  ;;  %v308_v4 = vunpack.c.h.bf16 %v306_v0  ;;  %v311_v5 = vunpack.c.l.bf16 %v323_v1  ;;  %v312_v6 = vunpack.c.h.bf16 %v323_v1 }
  0x13   : > { %v189_v8 = vmul.f32 %v307_v3, %v293_v2  ;;  %v190_v9 = vmul.f32 %v308_v4, %v293_v2  ;;  %v191_v10 = vmul.f32 %v311_v5, %v293_v2  ;;  %v192_v11 = vmul.f32 %v312_v6, %v293_v2 }
  0x15   : > { %v200_v12 = vadd.f32 %v294_v7, %v189_v8  ;;  %v201_v13 = vadd.f32 %v294_v7, %v190_v9  ;;  %v202_v14 = vadd.f32 %v294_v7, %v191_v10  ;;  %v203_v15 = vadd.f32 %v294_v7, %v192_v11 }
  0x17   : > { %v204_v16 = vmax.f32 %v200_v12, 0.0  ;;  %v205_v17 = vmax.f32 %v201_v13, 0.0  ;;  %v206_v18 = vmax.f32 %v202_v14, 0.0  ;;  %v207_v19 = vmax.f32 %v203_v15, 0.0 }
  0x19   : > { %v316_v20 = vpack.c.bf16 %v205_v17, %v204_v16  ;;  %v321_v21 = vpack.c.bf16 %v207_v19, %v206_v18 }
  0x1b   : > { %317 = vst [vmem:[%s172_s25] sm:$0xff] %v316_v20   ;;  %324 = vst [vmem:[%s172_s25 + $0x8] sm:$0xff] %v321_v21  }
  0x1c PF: > { %s13_s12 = sadd.s32 1, %s339_s12  }
  0x1d   : > { %p10_p4 = scmp.ge.s32.totalorder %s13_s12, 4  }
  0x1f   :  { %12 = sbr.rel (!%p10_p4) target bundleno = 1 (0x1), region = 62 }

// kernel: simple_resnet_forward.46
= control target key start
LH: loop header
LB: loop body
LE: loop exit
PB: predicated region body
PF: predicated region fallthrough
CT: control target
= control target key end

     0   :  { %s1800_s1 = inlined_call_operand.vmem [shape: bf16[640,128], index: 1, kind: input, shape index: {}]   ;;  %s1801_s0 = inlined_call_operand.vmem [shape: bf16[128,640], index: 0, kind: input, shape index: {}]   ;;  %s1802_s2 = inlined_call_operand.vmem [shape: bf16[128,128], index: 2, kind: output, shape index: {}]  }
   0x1   :  { %v1401_v0 = vld [vmem:[%s1800_s1 + $0x40] sm:$0xff]   ;;  %v1405_v4 = vld [vmem:[%s1800_s1 + $0x48] sm:$0xff]   ;;  %v1409_v8 = vld [vmem:[%s1800_s1 + $0x50] sm:$0xff]  }
   0x2   :  { %v1402_v1 = vld [vmem:[%s1800_s1 + $0xc0] sm:$0xff]   ;;  %1209 = vmatprep.subr.bf16.mxu0 %v1401_v0  ;;  %v1406_v5 = vld [vmem:[%s1800_s1 + $0xc8] sm:$0xff]   ;;  %v1410_v9 = vld [vmem:[%s1800_s1 + $0xd0] sm:$0xff]  }
   0x3   :  { %v1403_v2 = vld [vmem:[%s1800_s1] sm:$0xff]   ;;  %1273 = vmatprep.subr.bf16.mxu1 %v1402_v1  ;;  %v1407_v6 = vld [vmem:[%s1800_s1 + $0x8] sm:$0xff]   ;;  %v1411_v10 = vld [vmem:[%s1800_s1 + $0x10] sm:$0xff]  }
   0x4   :  { %v1404_v3 = vld [vmem:[%s1800_s1 + $0x80] sm:$0xff]   ;;  %1210 = vmatpush3.bf16.msra.mxu0 %v1403_v2  ;;  %v1408_v7 = vld [vmem:[%s1800_s1 + $0x88] sm:$0xff]   ;;  %v1412_v11 = vld [vmem:[%s1800_s1 + $0x90] sm:$0xff]  }
   0x5   :  { %1274 = vmatpush3.bf16.msra.mxu1 %v1404_v3  ;;  %1211 = vmatprep.subr.bf16.mxu0 %v1405_v4  ;;  %v1413_v12 = vld [vmem:[%s1800_s1 + $0x58] sm:$0xff]   ;;  %v1417_v16 = vld [vmem:[%s1800_s1 + $0x60] sm:$0xff]   ;;  %v1421_v20 = vld [vmem:[%s1800_s1 + $0x68] sm:$0xff]  }
   0x6   :  { %1275 = vmatprep.subr.bf16.mxu1 %v1406_v5  ;;  %v1414_v13 = vld [vmem:[%s1800_s1 + $0xd8] sm:$0xff]   ;;  %v1418_v17 = vld [vmem:[%s1800_s1 + $0xe0] sm:$0xff]   ;;  %v1422_v21 = vld [vmem:[%s1800_s1 + $0xe8] sm:$0xff]  }
   0x7   :  { %v1415_v14 = vld [vmem:[%s1800_s1 + $0x18] sm:$0xff]   ;;  %v1419_v18 = vld [vmem:[%s1800_s1 + $0x20] sm:$0xff]   ;;  %v1423_v22 = vld [vmem:[%s1800_s1 + $0x28] sm:$0xff]  }
   0x8   :  { %1212 = vmatpush3.bf16.msra.mxu0 %v1407_v6  ;;  %v1416_v15 = vld [vmem:[%s1800_s1 + $0x98] sm:$0xff]   ;;  %v1420_v19 = vld [vmem:[%s1800_s1 + $0xa0] sm:$0xff]   ;;  %v1424_v23 = vld [vmem:[%s1800_s1 + $0xa8] sm:$0xff]  }
   0x9   :  { %1276 = vmatpush3.bf16.msra.mxu1 %v1408_v7  ;;  %1213 = vmatprep.subr.bf16.mxu0 %v1409_v8  ;;  %v1425_v24 = vld [vmem:[%s1800_s1 + $0x70] sm:$0xff]   ;;  %v1429_v28 = vld [vmem:[%s1800_s1 + $0x78] sm:$0xff]   ;;  %v1438_v35 = vld [vmem:[%s1801_s0 + $0xc] ss:$20 sps:$4 sm:$0xff]  }
   0xa   :  { %1277 = vmatprep.subr.bf16.mxu1 %v1410_v9  ;;  %v1426_v25 = vld [vmem:[%s1800_s1 + $0xf0] sm:$0xff]   ;;  %v1430_v29 = vld [vmem:[%s1800_s1 + $0xf8] sm:$0xff]   ;;  %v1439_v36 = vld [vmem:[%s1800_s1 + $0x100] sm:$0xff]   ;;  %753 = vmatprep.mubr.bf16.mxu1 %v1438_v35 }
   0xb   :  { %v1427_v26 = vld [vmem:[%s1800_s1 + $0x30] sm:$0xff]   ;;  %v1431_v30 = vld [vmem:[%s1800_s1 + $0x38] sm:$0xff]   ;;  %v1440_v37 = vld [vmem:[%s1801_s0 + $0x2c] ss:$20 sps:$4 sm:$0xff]  }
   0xc   :  { %1214 = vmatpush3.bf16.msra.mxu0 %v1411_v10  ;;  %v1428_v27 = vld [vmem:[%s1800_s1 + $0xb0] sm:$0xff]   ;;  %v1432_v31 = vld [vmem:[%s1800_s1 + $0xb8] sm:$0xff]   ;;  %v1446_v39 = vld [vmem:[%s1800_s1 + $0x108] sm:$0xff]  }
   0xd   :  { %1278 = vmatpush3.bf16.msra.mxu1 %v1412_v11  ;;  %1215 = vmatprep.subr.bf16.mxu0 %v1413_v12  ;;  %v1433_v32 = vld [vmem:[%s1801_s0] ss:$20 sps:$4 sm:$0xff]   ;;  %v1435_v33 = vld [vmem:[%s1801_s0 + $0x4] ss:$20 sps:$4 sm:$0xff]   ;;  %v1436_v34 = vld [vmem:[%s1801_s0 + $0x8] ss:$20 sps:$4 sm:$0xff]  }
   0xe   :  { %1279 = vmatprep.subr.bf16.mxu1 %v1414_v13  ;;  %656 = vmatprep.mubr.bf16.mxu0 %v1435_v33  ;;  %v1442_v38 = vld [vmem:[%s1801_s0 + $0x34] ss:$20 sps:$4 sm:$0xff]   ;;  %v1445_v41 = vld [vmem:[%s1801_s0 + $0x30] ss:$20 sps:$4 sm:$0xff]   ;;  %v1460_v45 = vld [vmem:[%s1800_s1 + $0x118] sm:$0xff]  }
   0xf   :  { %v1444_v40 = vld [vmem:[%s1801_s0 + $0x28] ss:$20 sps:$4 sm:$0xff]   ;;  %v1453_v44 = vld [vmem:[%s1800_s1 + $0x110] sm:$0xff]   ;;  %v1452_v47 = vld [vmem:[%s1801_s0 + $0x58] ss:$20 sps:$4 sm:$0xff]  }
  0x10   :  { %1216 = vmatpush3.bf16.msra.mxu0 %v1415_v14  ;;  %v1447_v42 = vld [vmem:[%s1801_s0 + $0x54] ss:$20 sps:$4 sm:$0xff]   ;;  %v1449_v43 = vld [vmem:[%s1801_s0 + $0x5c] ss:$20 sps:$4 sm:$0xff]   ;;  %v1456_v49 = vld [vmem:[%s1801_s0 + $0x84] ss:$20 sps:$4 sm:$0xff]  }
  0x11   :  { %1280 = vmatpush3.bf16.msra.mxu1 %v1416_v15  ;;  %1217 = vmatprep.subr.bf16.mxu0 %v1417_v16  ;;  %v1451_v46 = vld [vmem:[%s1801_s0 + $0x50] ss:$20 sps:$4 sm:$0xff]   ;;  %v1474_v51 = vld [vmem:[%s1800_s1 + $0x128] sm:$0xff]   ;;  %v1459_v53 = vld [vmem:[%s1801_s0 + $0x80] ss:$20 sps:$4 sm:$0xff]  }
  0x12   :  { %1281 = vmatprep.subr.bf16.mxu1 %v1418_v17  ;;  %v1454_v48 = vld [vmem:[%s1801_s0 + $0x7c] ss:$20 sps:$4 sm:$0xff]   ;;  %v1467_v50 = vld [vmem:[%s1800_s1 + $0x120] sm:$0xff]   ;;  %v1458_v52 = vld [vmem:[%s1801_s0 + $0x78] ss:$20 sps:$4 sm:$0xff]  }
  0x13   :  { %v1461_v54 = vld [vmem:[%s1801_s0 + $0xa4] ss:$20 sps:$4 sm:$0xff]   ;;  %v1481_v55 = vld [vmem:[%s1800_s1 + $0x130] sm:$0xff]   ;;  %v1463_v56 = vld [vmem:[%s1801_s0 + $0xac] ss:$20 sps:$4 sm:$0xff]  }
  0x14   :  { %1218 = vmatpush3.bf16.msra.mxu0 %v1419_v18  ;;  %v1488_v57 = vld [vmem:[%s1800_s1 + $0x138] sm:$0xff]   ;;  %v1465_v58 = vld [vmem:[%s1801_s0 + $0xa0] ss:$20 sps:$4 sm:$0xff]   ;;  %v1473_v63 = vld [vmem:[%s1801_s0 + $0xd0] ss:$20 sps:$4 sm:$0xff]  }
  0x15   :  { %1282 = vmatpush3.bf16.msra.mxu1 %v1420_v19  ;;  %1219 = vmatprep.subr.bf16.mxu0 %v1421_v20  ;;  %v1466_v59 = vld [vmem:[%s1801_s0 + $0xa8] ss:$20 sps:$4 sm:$0xff]   ;;  %v1468_v60 = vld [vmem:[%s1801_s0 + $0xcc] ss:$20 sps:$4 sm:$0xff]   ;;  %v1479_v2 = vld [vmem:[%s1801_s0 + $0xf0] ss:$20 sps:$4 sm:$0xff]  }
  0x16   :  { %1283 = vmatprep.subr.bf16.mxu1 %v1422_v21  ;;  %v1470_v61 = vld [vmem:[%s1801_s0 + $0xd4] ss:$20 sps:$4 sm:$0xff]   ;;  %v1477_v1 = vld [vmem:[%s1801_s0 + $0xfc] ss:$20 sps:$4 sm:$0xff]   ;;  %v1480_v3 = vld [vmem:[%s1801_s0 + $0xf8] ss:$20 sps:$4 sm:$0xff]  }
  0x17   :  { %v1472_v62 = vld [vmem:[%s1801_s0 + $0xc8] ss:$20 sps:$4 sm:$0xff]   ;;  %v1484_v5 = vld [vmem:[%s1801_s0 + $0x124] ss:$20 sps:$4 sm:$0xff]   ;;  %v1487_v7 = vld [vmem:[%s1801_s0 + $0x120] ss:$20 sps:$4 sm:$0xff]  }
  0x18   :  { %1220 = vmatpush3.bf16.msra.mxu0 %v1423_v22  ;;  %v1475_v0 = vld [vmem:[%s1801_s0 + $0xf4] ss:$20 sps:$4 sm:$0xff]   ;;  %v1482_v4 = vld [vmem:[%s1801_s0 + $0x11c] ss:$20 sps:$4 sm:$0xff]   ;;  %v1486_v6 = vld [vmem:[%s1801_s0 + $0x118] ss:$20 sps:$4 sm:$0xff]  }
  0x19   :  { %1284 = vmatpush3.bf16.msra.mxu1 %v1424_v23  ;;  %1221 = vmatprep.subr.bf16.mxu0 %v1425_v24  ;;  %v1489_v8 = vld [vmem:[%s1801_s0 + $0x10] ss:$20 sps:$4 sm:$0xff]   ;;  %v1491_v10 = vld [vmem:[%s1801_s0 + $0x38] ss:$20 sps:$4 sm:$0xff]   ;;  %v1493_v12 = vld [vmem:[%s1801_s0 + $0x60] ss:$20 sps:$4 sm:$0xff]  }
  0x1a   :  { %1285 = vmatprep.subr.bf16.mxu1 %v1426_v25  ;;  %v1490_v9 = vld [vmem:[%s1801_s0 + $0xb0] ss:$20 sps:$4 sm:$0xff]   ;;  %v1492_v11 = vld [vmem:[%s1801_s0 + $0xd8] ss:$20 sps:$4 sm:$0xff]   ;;  %v1494_v13 = vld [vmem:[%s1801_s0 + $0x100] ss:$20 sps:$4 sm:$0xff]  }
  0x1b   :  { %v1495_v14 = vld [vmem:[%s1801_s0 + $0x88] ss:$20 sps:$4 sm:$0xff]  }
  0x1c   :  { %1222 = vmatpush3.bf16.msra.mxu0 %v1427_v26  ;;  %v1496_v15 = vld [vmem:[%s1801_s0 + $0x128] ss:$20 sps:$4 sm:$0xff]  }
  0x1d   :  { %1286 = vmatpush3.bf16.msra.mxu1 %v1428_v27  ;;  %1223 = vmatprep.subr.bf16.mxu0 %v1429_v28 }
  0x1e   :  { %1287 = vmatprep.subr.bf16.mxu1 %v1430_v29 }
  0x20   :  { %1224 = vmatpush3.bf16.msra.mxu0 %v1431_v30 }
  0x21   :  { %1288 = vmatpush3.bf16.msra.mxu1 %v1432_v31  ;;  %1353 = vmatprep.subr.bf16.mxu0 %v1439_v36 }
  0x22   :  { %1385 = vmatprep.subr.bf16.mxu1 %v1439_v36 }
  0x23   :  { %657 = vmatmul.mubr.bf16.vlgmr.msra.gmra.mrb[0].mxu0 %v1433_v32 }
  0x24   :  { %754 = vmatmul.mubr.bf16.vlgmr.msra.gmra.mrb[0].mxu1 %v1436_v34  ;;  %1354 = vmatpush3.bf16.msra.mxu0 %v1439_v36 }
  0x25   :  { %1393 = vmatpush3.bf16.msra.mxu1 %v1439_v36  ;;  %664 = vmatprep.mubr.bf16.mxu0 %v1440_v37 }
  0x26   :  { %761 = vmatprep.mubr.bf16.mxu1 %v1442_v38  ;;  %1355 = vmatprep.subr.bf16.mxu0 %v1446_v39 }
  0x27   :  { %1386 = vmatprep.subr.bf16.mxu1 %v1446_v39 }
  0x28   :  { %1356 = vmatpush3.bf16.msra.mxu0 %v1446_v39 }
  0x29   :  { %1394 = vmatpush3.bf16.msra.mxu1 %v1446_v39  ;;  %1357 = vmatprep.subr.bf16.mxu0 %v1453_v44 }
  0x2a   :  { %1387 = vmatprep.subr.bf16.mxu1 %v1453_v44 }
  0x2b   :  { %665 = vmatmul.mubr.bf16.gmra.mrb[4].mxu0 %v1444_v40 }
  0x2c   :  { %762 = vmatmul.mubr.bf16.gmra.mrb[4].mxu1 %v1445_v41  ;;  %672 = vmatprep.mubr.bf16.mxu0 %v1447_v42 }
  0x2d   :  { %769 = vmatprep.mubr.bf16.mxu1 %v1449_v43  ;;  %1358 = vmatpush3.bf16.msra.mxu0 %v1453_v44 }
  0x2e   :  { %1395 = vmatpush3.bf16.msra.mxu1 %v1453_v44  ;;  %1359 = vmatprep.subr.bf16.mxu0 %v1460_v45 }
  0x2f   :  { %1388 = vmatprep.subr.bf16.mxu1 %v1460_v45 }
  0x31   :  { %1360 = vmatpush3.bf16.msra.mxu0 %v1460_v45 }
  0x32   :  { %1396 = vmatpush3.bf16.msra.mxu1 %v1460_v45  ;;  %1361 = vmatprep.subr.bf16.mxu0 %v1467_v50 }
  0x33   :  { %673 = vmatmul.mubr.bf16.gmra.mrb[8].mxu0 %v1451_v46  ;;  %1389 = vmatprep.subr.bf16.mxu1 %v1467_v50 }
  0x34   :  { %770 = vmatmul.mubr.bf16.gmra.mrb[8].mxu1 %v1452_v47  ;;  %680 = vmatprep.mubr.bf16.mxu0 %v1454_v48 }
  0x35   :  { %777 = vmatprep.mubr.bf16.mxu1 %v1456_v49  ;;  %1362 = vmatpush3.bf16.msra.mxu0 %v1467_v50 }
  0x36   :  { %1397 = vmatpush3.bf16.msra.mxu1 %v1467_v50  ;;  %1363 = vmatprep.subr.bf16.mxu0 %v1474_v51 }
  0x37   :  { %1390 = vmatprep.subr.bf16.mxu1 %v1474_v51 }
  0x39   :  { %1364 = vmatpush3.bf16.msra.mxu0 %v1474_v51 }
  0x3a   :  { %1398 = vmatpush3.bf16.msra.mxu1 %v1474_v51  ;;  %1365 = vmatprep.subr.bf16.mxu0 %v1481_v55 }
  0x3b   :  { %681 = vmatmul.mubr.bf16.gmra.mrb[12].mxu0 %v1458_v52  ;;  %1391 = vmatprep.subr.bf16.mxu1 %v1481_v55 }
  0x3c   :  { %778 = vmatmul.mubr.bf16.gmra.mrb[12].mxu1 %v1459_v53  ;;  %688 = vmatprep.mubr.bf16.mxu0 %v1461_v54 }
  0x3d   :  { %785 = vmatprep.mubr.bf16.mxu1 %v1463_v56  ;;  %1366 = vmatpush3.bf16.msra.mxu0 %v1481_v55 }
  0x3e   :  { %1399 = vmatpush3.bf16.msra.mxu1 %v1481_v55  ;;  %1367 = vmatprep.subr.bf16.mxu0 %v1488_v57 }
  0x3f   :  { %1392 = vmatprep.subr.bf16.mxu1 %v1488_v57 }
  0x41   :  { %1368 = vmatpush3.bf16.msra.mxu0 %v1488_v57 }
  0x42   :  { %1400 = vmatpush3.bf16.msra.mxu1 %v1488_v57 }
  0x43   :  { %689 = vmatmul.mubr.bf16.gmra.mrb[16].mxu0 %v1465_v58 }
  0x44   :  { %786 = vmatmul.mubr.bf16.gmra.mrb[16].mxu1 %v1466_v59  ;;  %696 = vmatprep.mubr.bf16.mxu0 %v1468_v60 }
  0x45   :  { %793 = vmatprep.mubr.bf16.mxu1 %v1470_v61 }
  0x4b   :  { %697 = vmatmul.mubr.bf16.gmra.mrb[20].mxu0 %v1472_v62 }
  0x4c   :  { %794 = vmatmul.mubr.bf16.gmra.mrb[20].mxu1 %v1473_v63  ;;  %704 = vmatprep.mubr.bf16.mxu0 %v1475_v0 }
  0x4d   :  { %801 = vmatprep.mubr.bf16.mxu1 %v1477_v1 }
  0x53   :  { %705 = vmatmul.mubr.bf16.gmra.mrb[24].mxu0 %v1479_v2 }
  0x54   :  { %802 = vmatmul.mubr.bf16.gmra.mrb[24].mxu1 %v1480_v3  ;;  %712 = vmatprep.mubr.bf16.mxu0 %v1482_v4 }
  0x55   :  { %809 = vmatprep.mubr.bf16.mxu1 %v1484_v5 }
  0x5b   :  { %713 = vmatmul.mubr.bf16.gmra.mrb[28].mxu0 %v1486_v6 }
  0x5c   :  { %810 = vmatmul.mubr.bf16.gmra.mrb[28].mxu1 %v1487_v7  ;;  %1369 = vmatprep.mubr.bf16.mxu0 %v1489_v8 }
  0x5d   :  { %1377 = vmatprep.mubr.bf16.mxu1 %v1490_v9 }
  0x63   :  { %1370 = vmatmul.mubr.bf16.vlgmr.msra.gmra.mrb[32].mxu0 %v1491_v10 }
  0x64   :  { %1378 = vmatmul.mubr.bf16.vlgmr.msra.gmra.mrb[32].mxu1 %v1492_v11  ;;  %1373 = vmatprep.mubr.bf16.mxu0 %v1493_v12 }
  0x65   :  { %1381 = vmatprep.mubr.bf16.mxu1 %v1494_v13 }
  0x6b   :  { %1374 = vmatmul.mubr.bf16.gmra.mrb[36].mxu0 %v1495_v14 }
  0x6c   :  { %1382 = vmatmul.mubr.bf16.gmra.mrb[36].mxu1 %v1496_v15 }
  0xf6   :  { %v1225_v16 = vpop.f32.mrb[0].mxu0 }
  0xf7   :  { %v1289_v17 = vpop.f32.mrb[0].mxu1  ;;  %v1226_v18 = vpop.f32.mrb[1].mxu0 }
  0xf8   :  { %v1227_v19 = vadd.f32 %v1226_v18, %v1225_v16  ;;  %v1290_v20 = vpop.f32.mrb[1].mxu1  ;;  %v1228_v21 = vpop.f32.mrb[2].mxu0 }
  0xf9   :  { %v1291_v22 = vadd.f32 %v1290_v20, %v1289_v17  ;;  %v1292_v23 = vpop.f32.mrb[2].mxu1  ;;  %v1229_v24 = vpop.f32.mrb[3].mxu0 }
  0xfa   :  { %v1230_v25 = vadd.f32 %v1229_v24, %v1228_v21  ;;  %v1293_v26 = vpop.f32.mrb[3].mxu1 }
  0xfb   :  { %v1294_v27 = vadd.f32 %v1293_v26, %v1292_v23  ;;  %v1752_v28 = vadd.f32 %v1291_v22, %v1227_v19 }
  0xfd   :  { %v1754_v29 = vadd.f32 %v1294_v27, %v1230_v25 }
  0xfe   :  { %v1231_v30 = vpop.f32.mrb[4].mxu0 }
  0xff   :  { %v1295_v31 = vpop.f32.mrb[4].mxu1  ;;  %v1232_v32 = vpop.f32.mrb[5].mxu0 }
 0x100   :  { %v1233_v33 = vadd.f32 %v1232_v32, %v1231_v30  ;;  %v1296_v34 = vpop.f32.mrb[5].mxu1  ;;  %v1234_v35 = vpop.f32.mrb[6].mxu0 }
 0x101   :  { %v1297_v36 = vadd.f32 %v1296_v34, %v1295_v31  ;;  %v1298_v37 = vpop.f32.mrb[6].mxu1  ;;  %v1235_v38 = vpop.f32.mrb[7].mxu0 }
 0x102   :  { %v1236_v39 = vadd.f32 %v1235_v38, %v1234_v35  ;;  %v1299_v40 = vpop.f32.mrb[7].mxu1 }
 0x103   :  { %v1300_v41 = vadd.f32 %v1299_v40, %v1298_v37  ;;  %v1756_v42 = vadd.f32 %v1297_v36, %v1233_v33 }
 0x105   :  { %v1758_v43 = vadd.f32 %v1300_v41, %v1236_v39 }
 0x106   :  { %v1237_v44 = vpop.f32.mrb[8].mxu0 }
 0x107   :  { %v1301_v45 = vpop.f32.mrb[8].mxu1  ;;  %v1238_v46 = vpop.f32.mrb[9].mxu0 }
 0x108   :  { %v1239_v47 = vadd.f32 %v1238_v46, %v1237_v44  ;;  %v1302_v48 = vpop.f32.mrb[9].mxu1  ;;  %v1240_v49 = vpop.f32.mrb[10].mxu0 }
 0x109   :  { %v1303_v50 = vadd.f32 %v1302_v48, %v1301_v45  ;;  %v1304_v51 = vpop.f32.mrb[10].mxu1  ;;  %v1241_v52 = vpop.f32.mrb[11].mxu0 }
 0x10a   :  { %v1242_v53 = vadd.f32 %v1241_v52, %v1240_v49  ;;  %v1305_v54 = vpop.f32.mrb[11].mxu1 }
 0x10b   :  { %v1306_v55 = vadd.f32 %v1305_v54, %v1304_v51  ;;  %v1760_v56 = vadd.f32 %v1303_v50, %v1239_v47 }
 0x10d   :  { %v1762_v57 = vadd.f32 %v1306_v55, %v1242_v53 }
 0x10e   :  { %v1243_v58 = vpop.f32.mrb[12].mxu0 }
 0x10f   :  { %v1307_v59 = vpop.f32.mrb[12].mxu1  ;;  %v1244_v60 = vpop.f32.mrb[13].mxu0 }
 0x110   :  { %v1245_v61 = vadd.f32 %v1244_v60, %v1243_v58  ;;  %v1308_v62 = vpop.f32.mrb[13].mxu1  ;;  %v1246_v63 = vpop.f32.mrb[14].mxu0 }
 0x111   :  { %v1309_v0 = vadd.f32 %v1308_v62, %v1307_v59  ;;  %v1310_v1 = vpop.f32.mrb[14].mxu1  ;;  %v1247_v2 = vpop.f32.mrb[15].mxu0 }
 0x112   :  { %v1248_v3 = vadd.f32 %v1247_v2, %v1246_v63  ;;  %v1311_v4 = vpop.f32.mrb[15].mxu1 }
 0x113   :  { %v1312_v5 = vadd.f32 %v1311_v4, %v1310_v1  ;;  %v1764_v6 = vadd.f32 %v1309_v0, %v1245_v61 }
 0x115   :  { %v1766_v7 = vadd.f32 %v1312_v5, %v1248_v3 }
 0x116   :  { %v1249_v8 = vpop.f32.mrb[16].mxu0 }
 0x117   :  { %v1313_v9 = vpop.f32.mrb[16].mxu1  ;;  %v1250_v10 = vpop.f32.mrb[17].mxu0 }
 0x118   :  { %v1251_v11 = vadd.f32 %v1250_v10, %v1249_v8  ;;  %v1314_v12 = vpop.f32.mrb[17].mxu1  ;;  %v1252_v13 = vpop.f32.mrb[18].mxu0 }
 0x119   :  { %v1315_v14 = vadd.f32 %v1314_v12, %v1313_v9  ;;  %v1316_v15 = vpop.f32.mrb[18].mxu1  ;;  %v1253_v16 = vpop.f32.mrb[19].mxu0 }
 0x11a   :  { %v1254_v17 = vadd.f32 %v1253_v16, %v1252_v13  ;;  %v1317_v18 = vpop.f32.mrb[19].mxu1 }
 0x11b   :  { %v1318_v19 = vadd.f32 %v1317_v18, %v1316_v15  ;;  %v788_v20 = vadd.f32 %v1315_v14, %v1251_v11 }
 0x11d   :  { %v791_v21 = vadd.f32 %v1318_v19, %v1254_v17 }
 0x11e   :  { %v1255_v22 = vpop.f32.mrb[20].mxu0 }
 0x11f   :  { %v1319_v23 = vpop.f32.mrb[20].mxu1  ;;  %v1256_v24 = vpop.f32.mrb[21].mxu0 }
 0x120   :  { %v1257_v25 = vadd.f32 %v1256_v24, %v1255_v22  ;;  %v1320_v26 = vpop.f32.mrb[21].mxu1  ;;  %v1258_v27 = vpop.f32.mrb[22].mxu0 }
 0x121   :  { %v1321_v30 = vadd.f32 %v1320_v26, %v1319_v23  ;;  %v1322_v31 = vpop.f32.mrb[22].mxu1  ;;  %v1259_v32 = vpop.f32.mrb[23].mxu0 }
 0x122   :  { %v1260_v33 = vadd.f32 %v1259_v32, %v1258_v27  ;;  %v1323_v34 = vpop.f32.mrb[23].mxu1 }
 0x123   :  { %v1324_v35 = vadd.f32 %v1323_v34, %v1322_v31  ;;  %v796_v36 = vadd.f32 %v1321_v30, %v1257_v25 }
 0x125   :  { %v799_v37 = vadd.f32 %v1324_v35, %v1260_v33 }
 0x126   :  { %v1261_v38 = vpop.f32.mrb[24].mxu0 }
 0x127   :  { %v1325_v39 = vpop.f32.mrb[24].mxu1  ;;  %v1262_v40 = vpop.f32.mrb[25].mxu0 }
 0x128   :  { %v1263_v41 = vadd.f32 %v1262_v40, %v1261_v38  ;;  %v1326_v44 = vpop.f32.mrb[25].mxu1  ;;  %v1264_v45 = vpop.f32.mrb[26].mxu0 }
 0x129   :  { %v1327_v46 = vadd.f32 %v1326_v44, %v1325_v39  ;;  %v1328_v47 = vpop.f32.mrb[26].mxu1  ;;  %v1265_v48 = vpop.f32.mrb[27].mxu0 }
 0x12a   :  { %v1266_v49 = vadd.f32 %v1265_v48, %v1264_v45  ;;  %v1329_v50 = vpop.f32.mrb[27].mxu1 }
 0x12b   :  { %v1330_v51 = vadd.f32 %v1329_v50, %v1328_v47  ;;  %v804_v52 = vadd.f32 %v1327_v46, %v1263_v41 }
 0x12d   :  { %v807_v53 = vadd.f32 %v1330_v51, %v1266_v49 }
 0x12e   :  { %v1267_v54 = vpop.f32.mrb[28].mxu0 }
 0x12f   :  { %v1331_v55 = vpop.f32.mrb[28].mxu1  ;;  %v1268_v58 = vpop.f32.mrb[29].mxu0 }
 0x130   :  { %v1269_v59 = vadd.f32 %v1268_v58, %v1267_v54  ;;  %v1332_v60 = vpop.f32.mrb[29].mxu1  ;;  %v1270_v61 = vpop.f32.mrb[30].mxu0 }
 0x131   :  { %v1333_v62 = vadd.f32 %v1332_v60, %v1331_v55  ;;  %v1334_v63 = vpop.f32.mrb[30].mxu1  ;;  %v1271_v0 = vpop.f32.mrb[31].mxu0 }
 0x132   :  { %v1272_v1 = vadd.f32 %v1271_v0, %v1270_v61  ;;  %v1335_v2 = vpop.f32.mrb[31].mxu1 }
 0x133   :  { %v1336_v3 = vadd.f32 %v1335_v2, %v1334_v63  ;;  %v812_v4 = vadd.f32 %v1333_v62, %v1269_v59 }
 0x135   :  { %v815_v5 = vadd.f32 %v1336_v3, %v1272_v1 }
 0x136   :  { %v1371_v8 = vpop.f32.mrb[32].mxu0 }
 0x137   :  { %v861_v9 = vadd.f32 %v1371_v8, %v1756_v42  ;;  %v1379_v10 = vpop.f32.mrb[32].mxu1  ;;  %v852_v11 = vpop.f32.mrb[33].mxu0 }
 0x138   :  { %v893_v12 = vadd.f32 %v1379_v10, %v796_v36  ;;  %v853_v13 = vadd.f32 %v852_v11, %v1752_v28  ;;  %v884_v14 = vpop.f32.mrb[33].mxu1  ;;  %v1372_v15 = vpop.f32.mrb[34].mxu0 }
 0x139   :  { %v885_v16 = vadd.f32 %v884_v14, %v788_v20  ;;  %v864_v17 = vadd.f32 %v1372_v15, %v1758_v43  ;;  %v1380_v18 = vpop.f32.mrb[34].mxu1  ;;  %v855_v19 = vpop.f32.mrb[35].mxu0 }
 0x13a   :  { %v896_v22 = vadd.f32 %v1380_v18, %v799_v37  ;;  %v856_v23 = vadd.f32 %v855_v19, %v1754_v29  ;;  %v887_v24 = vpop.f32.mrb[35].mxu1 }
 0x13b   :  { %v1170_v25 = vpack.c.bf16 %v864_v17, %v861_v9  ;;  %v888_v26 = vadd.f32 %v887_v24, %v791_v21 }
 0x13c   :  { %v1190_v27 = vpack.c.bf16 %v896_v22, %v893_v12  ;;  %v1165_v42 = vpack.c.bf16 %v856_v23, %v853_v13 }
 0x13d   :  { %1202 = vst [vmem:[%s1802_s2 + $0x8] sm:$0xff] %v1170_v25   ;;  %v1185_v28 = vpack.c.bf16 %v888_v26, %v885_v16 }
 0x13e   :  { %1206 = vst [vmem:[%s1802_s2 + $0x28] sm:$0xff] %v1190_v27   ;;  %1166 = vst [vmem:[%s1802_s2] sm:$0xff] %v1165_v42   ;;  %v1375_v43 = vpop.f32.mrb[36].mxu0 }
 0x13f   :  { %1205 = vst [vmem:[%s1802_s2 + $0x20] sm:$0xff] %v1185_v28   ;;  %v877_v29 = vadd.f32 %v1375_v43, %v1764_v6  ;;  %v1383_v20 = vpop.f32.mrb[36].mxu1  ;;  %v868_v21 = vpop.f32.mrb[37].mxu0 }
 0x140   :  { %v909_v30 = vadd.f32 %v1383_v20, %v812_v4  ;;  %v869_v31 = vadd.f32 %v868_v21, %v1760_v56  ;;  %v900_v32 = vpop.f32.mrb[37].mxu1  ;;  %v1376_v33 = vpop.f32.mrb[38].mxu0 }
 0x141   :  { %v901_v34 = vadd.f32 %v900_v32, %v804_v52  ;;  %v880_v35 = vadd.f32 %v1376_v33, %v1766_v7  ;;  %v1384_v36 = vpop.f32.mrb[38].mxu1  ;;  %v871_v37 = vpop.f32.mrb[39].mxu0 }
 0x142   :  { %v912_v38 = vadd.f32 %v1384_v36, %v815_v5  ;;  %v872_v39 = vadd.f32 %v871_v37, %v1762_v57  ;;  %v903_v40 = vpop.f32.mrb[39].mxu1 }
 0x143   :  { %v1180_v41 = vpack.c.bf16 %v880_v35, %v877_v29  ;;  %v904_v44 = vadd.f32 %v903_v40, %v807_v53 }
 0x144   :  { %v1200_v45 = vpack.c.bf16 %v912_v38, %v909_v30  ;;  %v1175_v6 = vpack.c.bf16 %v872_v39, %v869_v31 }
 0x145   :  { %1204 = vst [vmem:[%s1802_s2 + $0x18] sm:$0xff] %v1180_v41   ;;  %v1195_v56 = vpack.c.bf16 %v904_v44, %v901_v34 }
 0x146   :  { %1208 = vst [vmem:[%s1802_s2 + $0x38] sm:$0xff] %v1200_v45   ;;  %1203 = vst [vmem:[%s1802_s2 + $0x10] sm:$0xff] %v1175_v6  }
 0x147   :  { %1207 = vst [vmem:[%s1802_s2 + $0x30] sm:$0xff] %v1195_v56  }

// kernel: simple_resnet_forward.49
= control target key start
LH: loop header
LB: loop body
LE: loop exit
PB: predicated region body
PF: predicated region fallthrough
CT: control target
= control target key end

     0   :  { %s450_s15 = smov 0   ;;  %s481_s0 = inlined_call_operand.vmem [shape: bf16[64,128], index: 0, kind: input, shape index: {}]   ;;  %s482_s1 = inlined_call_operand.vmem [shape: f32[1,128], index: 1, kind: input, shape index: {}]   ;;  %s483_s2 = inlined_call_operand.vmem [shape: f32[1,128], index: 2, kind: input, shape index: {}]   ;;  %s484_s3 = inlined_call_operand.vmem [shape: bf16[64,128], index: 3, kind: input, shape index: {}]   ;;  %s485_s4 = inlined_call_operand.vmem [shape: bf16[64,128], index: 4, kind: output, shape index: {}]  }
   0x1 LB: > { %s357_s16 = sadd.s32 4294967295, %s423_s15   ;;  %p361_p0 = scmp.ge.s32.totalorder %s423_s15, 1  ;;  %s423_s15 = sphi %s450_s15, %s14_s15  }
   0x2   : > { %p174_p1 = scmp.lt.s32.totalorder %s423_s15, 3 }
   0x4   : > { %p175_p2 = pnand %p361_p0, %p174_p1 }
   0x5   : > { %s362_s17 = sshll.u32 (!%p175_p2), %s357_s16, 2  ;;  %v368_v0 = vld [vmem:[%s482_s1] ss:$0 sm:$0xff] (!%p175_p2) }
   0x6   : > { %178 = sbr.rel (%p175_p2) target bundleno = 30 (0x1e), region = 36  ;;  %p206_p3 = scmp.lt.s32.totalorder (!%p175_p2), %s362_s17, 7  ;;  %v369_v9 = vld [vmem:[%s483_s2] ss:$0 sm:$0xff] (!%p175_p2) }
   0xd   : > { %s487_s17 = smov (!%p206_p3, %s362_s17), 7 }
   0xe   : > { %s458_s18 = sshll.u32 %s487_s17, 2 }
   0xf   : > { %s209_s21 = scalar_lea.vmem %s481_s0, %s458_s18  ;;  %s215_s24 = scalar_lea.vmem %s484_s3, %s458_s18 }
  0x10   : > { %v381_v1 = vld [vmem:[%s209_s21] sm:$0xff]   ;;  %v406_v2 = vld [vmem:[%s209_s21 + $0x8] sm:$0xff]   ;;  %s221_s5 = scalar_lea.vmem %s485_s4, %s458_s18 }
  0x11   : > { %v389_v3 = vld [vmem:[%s215_s24] sm:$0xff]   ;;  %v382_v4 = vunpack.c.l.bf16 %v381_v1  ;;  %v383_v5 = vunpack.c.h.bf16 %v381_v1  ;;  %v386_v6 = vunpack.c.l.bf16 %v406_v2  ;;  %v387_v7 = vunpack.c.h.bf16 %v406_v2  ;;  %v407_v8 = vld [vmem:[%s215_s24 + $0x8] sm:$0xff]  }
  0x12   : > { %v390_v10 = vunpack.c.l.bf16 %v389_v3  ;;  %v391_v11 = vunpack.c.h.bf16 %v389_v3  ;;  %v394_v12 = vunpack.c.l.bf16 %v407_v8  ;;  %v395_v13 = vunpack.c.h.bf16 %v407_v8 }
  0x13   : > { %v238_v14 = vmul.f32 %v382_v4, %v368_v0  ;;  %v239_v15 = vmul.f32 %v383_v5, %v368_v0  ;;  %v240_v16 = vmul.f32 %v386_v6, %v368_v0  ;;  %v241_v17 = vmul.f32 %v387_v7, %v368_v0 }
  0x15   : > { %v249_v18 = vadd.f32 %v369_v9, %v238_v14  ;;  %v250_v19 = vadd.f32 %v369_v9, %v239_v15  ;;  %v251_v20 = vadd.f32 %v369_v9, %v240_v16  ;;  %v252_v21 = vadd.f32 %v369_v9, %v241_v17 }
  0x17   : > { %v261_v22 = vadd.f32 %v390_v10, %v249_v18  ;;  %v262_v23 = vadd.f32 %v391_v11, %v250_v19  ;;  %v263_v24 = vadd.f32 %v394_v12, %v251_v20  ;;  %v264_v25 = vadd.f32 %v395_v13, %v252_v21 }
  0x19   : > { %v265_v26 = vmax.f32 %v261_v22, 0.0  ;;  %v266_v27 = vmax.f32 %v262_v23, 0.0  ;;  %v267_v28 = vmax.f32 %v263_v24, 0.0  ;;  %v268_v29 = vmax.f32 %v264_v25, 0.0 }
  0x1b   : > { %v399_v30 = vpack.c.bf16 %v266_v27, %v265_v26  ;;  %v404_v31 = vpack.c.bf16 %v268_v29, %v267_v28 }
  0x1d   : > { %400 = vst [vmem:[%s221_s5] sm:$0xff] %v399_v30   ;;  %408 = vst [vmem:[%s221_s5 + $0x8] sm:$0xff] %v404_v31  }
  0x1e PF: > { %s14_s15 = sadd.s32 1, %s423_s15  }
  0x1f   : > { %p11_p4 = scmp.ge.s32.totalorder %s14_s15, 4  }
  0x21   :  { %13 = sbr.rel (!%p11_p4) target bundleno = 1 (0x1), region = 69 }

// kernel: simple_resnet_forward.58
= control target key start
LH: loop header
LB: loop body
LE: loop exit
PB: predicated region body
PF: predicated region fallthrough
CT: control target
= control target key end

     0   :  { %s324_s12 = smov 0   ;;  %s341_s0 = inlined_call_operand.vmem [shape: bf16[32,128], index: 0, kind: input, shape index: {}]   ;;  %s342_s1 = inlined_call_operand.vmem [shape: f32[1,128], index: 1, kind: input, shape index: {}]   ;;  %s343_s2 = inlined_call_operand.vmem [shape: f32[1,128], index: 2, kind: input, shape index: {}]   ;;  %s344_s3 = inlined_call_operand.vmem [shape: bf16[32,128], index: 3, kind: output, shape index: {}]  }
   0x1 LB: > { %s262_s13 = sadd.s32 4294967295, %s302_s12   ;;  %p266_p0 = scmp.ge.s32.totalorder %s302_s12, 1  ;;  %s302_s12 = sphi %s324_s12, %s13_s12  }
   0x2   : > { %p138_p1 = scmp.lt.s32.totalorder %s302_s12, 3 }
   0x4   : > { %p139_p2 = pnand %p266_p0, %p138_p1 }
   0x5   : > { %s267_s14 = sshll.u32 (!%p139_p2), %s262_s13, 1  ;;  %v271_v1 = vld [vmem:[%s342_s1] ss:$0 sm:$0xff] (!%p139_p2) }
   0x6   : > { %142 = sbr.rel (%p139_p2) target bundleno = 26 (0x1a), region = 32  ;;  %p163_p3 = scmp.lt.s32.totalorder (!%p139_p2), %s267_s14, 3  ;;  %v272_v4 = vld [vmem:[%s343_s2] ss:$0 sm:$0xff] (!%p139_p2) }
   0xd   : > { %s346_s14 = smov (!%p163_p3, %s267_s14), 3 }
   0xe   : > { %s268_s15 = sshll.u32 %s346_s14, 2 }
   0xf   : > { %s166_s18 = scalar_lea.vmem %s341_s0, %s268_s15  ;;  %s172_s25 = scalar_lea.vmem %s344_s3, %s268_s15 }
  0x10   : > { %v280_v0 = vld [vmem:[%s166_s18] sm:$0xff]  }
  0x11   : > { %v281_v2 = vunpack.c.l.bf16 %v280_v0  ;;  %v282_v3 = vunpack.c.h.bf16 %v280_v0 }
  0x13   : > { %v185_v5 = vmul.f32 %v281_v2, %v271_v1  ;;  %v186_v6 = vmul.f32 %v282_v3, %v271_v1 }
  0x15   : > { %v194_v7 = vadd.f32 %v272_v4, %v185_v5  ;;  %v195_v8 = vadd.f32 %v272_v4, %v186_v6 }
  0x17   : > { %v286_v9 = vpack.c.bf16 %v195_v8, %v194_v7 }
  0x19   : > { %287 = vst [vmem:[%s172_s25] sm:$0xff] %v286_v9  }
  0x1a PF: > { %s13_s12 = sadd.s32 1, %s302_s12  }
  0x1b   : > { %p10_p4 = scmp.ge.s32.totalorder %s13_s12, 4  }
  0x1d   :  { %12 = sbr.rel (!%p10_p4) target bundleno = 1 (0x1), region = 62 }

// kernel: simple_resnet_forward.57
= control target key start
LH: loop header
LB: loop body
LE: loop exit
PB: predicated region body
PF: predicated region fallthrough
CT: control target
= control target key end

     0   :  { %s312_s1 = inlined_call_operand.vmem [shape: bf16[128,128], index: 1, kind: input, shape index: {}]   ;;  %s313_s0 = inlined_call_operand.vmem [shape: bf16[32,128], index: 0, kind: input, shape index: {}]   ;;  %s314_s2 = inlined_call_operand.vmem [shape: bf16[32,128], index: 2, kind: output, shape index: {}]  }
   0x1   :  { %v251_v0 = vld [vmem:[%s312_s1] sm:$0xff]   ;;  %v252_v1 = vld [vmem:[%s312_s1 + $0x8] sm:$0xff]   ;;  %v253_v2 = vld [vmem:[%s312_s1 + $0x10] sm:$0xff]  }
   0x2   :  { %231 = vmatprep.subr.bf16.mxu0 %v251_v0  ;;  %v254_v3 = vld [vmem:[%s312_s1 + $0x18] sm:$0xff]   ;;  %v259_v4 = vld [vmem:[%s313_s0] sm:$0xff]   ;;  %v256_v6 = vld [vmem:[%s312_s1 + $0x28] sm:$0xff]  }
   0x3   :  { %232 = vmatpush3.bf16.msra.mxu0 %v251_v0  ;;  %247 = vmatprep.mubr.bf16.mxu0 %v259_v4  ;;  %v255_v5 = vld [vmem:[%s312_s1 + $0x20] sm:$0xff]   ;;  %v257_v7 = vld [vmem:[%s312_s1 + $0x30] sm:$0xff]   ;;  %v258_v8 = vld [vmem:[%s312_s1 + $0x38] sm:$0xff]  }
   0x4   :  { %233 = vmatprep.subr.bf16.mxu0 %v252_v1  ;;  %v260_v9 = vld [vmem:[%s313_s0 + $0x8] sm:$0xff]  }
   0x7   :  { %234 = vmatpush3.bf16.msra.mxu0 %v252_v1 }
   0x8   :  { %235 = vmatprep.subr.bf16.mxu0 %v253_v2 }
   0xb   :  { %236 = vmatpush3.bf16.msra.mxu0 %v253_v2 }
   0xc   :  { %237 = vmatprep.subr.bf16.mxu0 %v254_v3 }
   0xf   :  { %238 = vmatpush3.bf16.msra.mxu0 %v254_v3 }
  0x10   :  { %239 = vmatprep.subr.bf16.mxu0 %v255_v5 }
  0x13   :  { %240 = vmatpush3.bf16.msra.mxu0 %v255_v5 }
  0x14   :  { %241 = vmatprep.subr.bf16.mxu0 %v256_v6 }
  0x17   :  { %242 = vmatpush3.bf16.msra.mxu0 %v256_v6 }
  0x18   :  { %243 = vmatprep.subr.bf16.mxu0 %v257_v7 }
  0x1b   :  { %244 = vmatpush3.bf16.msra.mxu0 %v257_v7 }
  0x1c   :  { %245 = vmatprep.subr.bf16.mxu0 %v258_v8 }
  0x1f   :  { %246 = vmatpush3.bf16.msra.mxu0 %v258_v8 }
  0x22   :  { %248 = vmatmul.mubr.bf16.vlgmr.msra.gmra.mrb[0].mxu0 %v260_v9 }
  0xf5   :  { %v249_v10 = vpop.f32.mrb[0].mxu0 }
  0xf6   :  { %v138_v11 = vpop.f32.mrb[1].mxu0 }
  0xf7   :  { %v250_v12 = vpop.f32.mrb[2].mxu0 }
  0xf8   :  { %v218_v13 = vpack.c.bf16 %v250_v12, %v249_v10  ;;  %v141_v14 = vpop.f32.mrb[3].mxu0 }
  0xf9   :  { %v213_v15 = vpack.c.bf16 %v141_v14, %v138_v11 }
  0xfa   :  { %220 = vst [vmem:[%s314_s2 + $0x8] sm:$0xff] %v218_v13  }
  0xfb   :  { %214 = vst [vmem:[%s314_s2] sm:$0xff] %v213_v15  }

// kernel: simple_resnet_forward.55
= control target key start
LH: loop header
LB: loop body
LE: loop exit
PB: predicated region body
PF: predicated region fallthrough
CT: control target
= control target key end

     0   :  { %s326_s12 = smov 0   ;;  %s343_s0 = inlined_call_operand.vmem [shape: bf16[32,128], index: 0, kind: input, shape index: {}]   ;;  %s344_s1 = inlined_call_operand.vmem [shape: f32[1,128], index: 1, kind: input, shape index: {}]   ;;  %s345_s2 = inlined_call_operand.vmem [shape: f32[1,128], index: 2, kind: input, shape index: {}]   ;;  %s346_s3 = inlined_call_operand.vmem [shape: bf16[32,128], index: 3, kind: output, shape index: {}]  }
   0x1 LB: > { %s264_s13 = sadd.s32 4294967295, %s304_s12   ;;  %p268_p0 = scmp.ge.s32.totalorder %s304_s12, 1  ;;  %s304_s12 = sphi %s326_s12, %s13_s12  }
   0x2   : > { %p138_p1 = scmp.lt.s32.totalorder %s304_s12, 3 }
   0x4   : > { %p139_p2 = pnand %p268_p0, %p138_p1 }
   0x5   : > { %s269_s14 = sshll.u32 (!%p139_p2), %s264_s13, 1  ;;  %v273_v1 = vld [vmem:[%s344_s1] ss:$0 sm:$0xff] (!%p139_p2) }
   0x6   : > { %142 = sbr.rel (%p139_p2) target bundleno = 28 (0x1c), region = 32  ;;  %p163_p3 = scmp.lt.s32.totalorder (!%p139_p2), %s269_s14, 3  ;;  %v274_v4 = vld [vmem:[%s345_s2] ss:$0 sm:$0xff] (!%p139_p2) }
   0xd   : > { %s348_s14 = smov (!%p163_p3, %s269_s14), 3 }
   0xe   : > { %s270_s15 = sshll.u32 %s348_s14, 2 }
   0xf   : > { %s166_s18 = scalar_lea.vmem %s343_s0, %s270_s15  ;;  %s172_s25 = scalar_lea.vmem %s346_s3, %s270_s15 }
  0x10   : > { %v282_v0 = vld [vmem:[%s166_s18] sm:$0xff]  }
  0x11   : > { %v283_v2 = vunpack.c.l.bf16 %v282_v0  ;;  %v284_v3 = vunpack.c.h.bf16 %v282_v0 }
  0x13   : > { %v185_v5 = vmul.f32 %v283_v2, %v273_v1  ;;  %v186_v6 = vmul.f32 %v284_v3, %v273_v1 }
  0x15   : > { %v194_v7 = vadd.f32 %v274_v4, %v185_v5  ;;  %v195_v8 = vadd.f32 %v274_v4, %v186_v6 }
  0x17   : > { %v196_v9 = vmax.f32 %v194_v7, 0.0  ;;  %v197_v10 = vmax.f32 %v195_v8, 0.0 }
  0x19   : > { %v288_v11 = vpack.c.bf16 %v197_v10, %v196_v9 }
  0x1b   : > { %289 = vst [vmem:[%s172_s25] sm:$0xff] %v288_v11  }
  0x1c PF: > { %s13_s12 = sadd.s32 1, %s304_s12  }
  0x1d   : > { %p10_p4 = scmp.ge.s32.totalorder %s13_s12, 4  }
  0x1f   :  { %12 = sbr.rel (!%p10_p4) target bundleno = 1 (0x1), region = 62 }

// kernel: simple_resnet_forward.59
= control target key start
LH: loop header
LB: loop body
LE: loop exit
PB: predicated region body
PF: predicated region fallthrough
CT: control target
= control target key end

     0   :  { %s404_s15 = smov 0   ;;  %s430_s0 = inlined_call_operand.vmem [shape: bf16[32,128], index: 0, kind: input, shape index: {}]   ;;  %s431_s1 = inlined_call_operand.vmem [shape: f32[1,128], index: 1, kind: input, shape index: {}]   ;;  %s432_s2 = inlined_call_operand.vmem [shape: f32[1,128], index: 2, kind: input, shape index: {}]   ;;  %s433_s3 = inlined_call_operand.vmem [shape: bf16[32,128], index: 3, kind: input, shape index: {}]   ;;  %s434_s4 = inlined_call_operand.vmem [shape: bf16[32,128], index: 4, kind: output, shape index: {}]  }
   0x1 LB: > { %s331_s16 = sadd.s32 4294967295, %s377_s15   ;;  %p335_p0 = scmp.ge.s32.totalorder %s377_s15, 1  ;;  %s377_s15 = sphi %s404_s15, %s14_s15  }
   0x2   : > { %p174_p1 = scmp.lt.s32.totalorder %s377_s15, 3 }
   0x4   : > { %p175_p2 = pnand %p335_p0, %p174_p1 }
   0x5   : > { %s336_s17 = sshll.u32 (!%p175_p2), %s331_s16, 1  ;;  %v342_v1 = vld [vmem:[%s431_s1] ss:$0 sm:$0xff] (!%p175_p2) }
   0x6   : > { %178 = sbr.rel (%p175_p2) target bundleno = 30 (0x1e), region = 36  ;;  %p206_p3 = scmp.lt.s32.totalorder (!%p175_p2), %s336_s17, 3  ;;  %v343_v5 = vld [vmem:[%s432_s2] ss:$0 sm:$0xff] (!%p175_p2) }
   0xd   : > { %s436_s17 = smov (!%p206_p3, %s336_s17), 3 }
   0xe   : > { %s337_s18 = sshll.u32 %s436_s17, 2 }
   0xf   : > { %s209_s21 = scalar_lea.vmem %s430_s0, %s337_s18  ;;  %s215_s24 = scalar_lea.vmem %s433_s3, %s337_s18 }
  0x10   : > { %v351_v0 = vld [vmem:[%s209_s21] sm:$0xff]   ;;  %s221_s5 = scalar_lea.vmem %s434_s4, %s337_s18 }
  0x11   : > { %v355_v2 = vld [vmem:[%s215_s24] sm:$0xff]   ;;  %v352_v3 = vunpack.c.l.bf16 %v351_v0  ;;  %v353_v4 = vunpack.c.h.bf16 %v351_v0 }
  0x12   : > { %v356_v8 = vunpack.c.l.bf16 %v355_v2  ;;  %v357_v9 = vunpack.c.h.bf16 %v355_v2 }
  0x13   : > { %v234_v6 = vmul.f32 %v352_v3, %v342_v1  ;;  %v235_v7 = vmul.f32 %v353_v4, %v342_v1 }
  0x15   : > { %v243_v10 = vadd.f32 %v343_v5, %v234_v6  ;;  %v244_v11 = vadd.f32 %v343_v5, %v235_v7 }
  0x17   : > { %v249_v12 = vadd.f32 %v356_v8, %v243_v10  ;;  %v250_v13 = vadd.f32 %v357_v9, %v244_v11 }
  0x19   : > { %v251_v14 = vmax.f32 %v249_v12, 0.0  ;;  %v252_v15 = vmax.f32 %v250_v13, 0.0 }
  0x1b   : > { %v361_v16 = vpack.c.bf16 %v252_v15, %v251_v14 }
  0x1d   : > { %362 = vst [vmem:[%s221_s5] sm:$0xff] %v361_v16  }
  0x1e PF: > { %s14_s15 = sadd.s32 1, %s377_s15  }
  0x1f   : > { %p11_p4 = scmp.ge.s32.totalorder %s14_s15, 4  }
  0x21   :  { %13 = sbr.rel (!%p11_p4) target bundleno = 1 (0x1), region = 69 }

// kernel: simple_resnet_forward.54
= control target key start
LH: loop header
LB: loop body
LE: loop exit
PB: predicated region body
PF: predicated region fallthrough
CT: control target
= control target key end

     0   :  { %s974_s1 = inlined_call_operand.vmem [shape: bf16[640,128], index: 1, kind: input, shape index: {}]   ;;  %s975_s0 = inlined_call_operand.vmem [shape: bf16[32,640], index: 0, kind: input, shape index: {}]   ;;  %s976_s2 = inlined_call_operand.vmem [shape: bf16[32,128], index: 2, kind: output, shape index: {}]  }
   0x1   :  { %v749_v0 = vld [vmem:[%s974_s1 + $0x40] sm:$0xff]   ;;  %v753_v4 = vld [vmem:[%s974_s1 + $0x48] sm:$0xff]   ;;  %v757_v8 = vld [vmem:[%s974_s1 + $0x50] sm:$0xff]  }
   0x2   :  { %v750_v1 = vld [vmem:[%s974_s1 + $0xc0] sm:$0xff]   ;;  %663 = vmatprep.subr.bf16.mxu0 %v749_v0  ;;  %v754_v5 = vld [vmem:[%s974_s1 + $0xc8] sm:$0xff]   ;;  %v758_v9 = vld [vmem:[%s974_s1 + $0xd0] sm:$0xff]  }
   0x3   :  { %v751_v2 = vld [vmem:[%s974_s1] sm:$0xff]   ;;  %691 = vmatprep.subr.bf16.mxu1 %v750_v1  ;;  %v755_v6 = vld [vmem:[%s974_s1 + $0x8] sm:$0xff]   ;;  %v759_v10 = vld [vmem:[%s974_s1 + $0x10] sm:$0xff]  }
   0x4   :  { %v752_v3 = vld [vmem:[%s974_s1 + $0x80] sm:$0xff]   ;;  %664 = vmatpush3.bf16.msra.mxu0 %v751_v2  ;;  %v756_v7 = vld [vmem:[%s974_s1 + $0x88] sm:$0xff]   ;;  %v760_v11 = vld [vmem:[%s974_s1 + $0x90] sm:$0xff]  }
   0x5   :  { %692 = vmatpush3.bf16.msra.mxu1 %v752_v3  ;;  %665 = vmatprep.subr.bf16.mxu0 %v753_v4  ;;  %v761_v12 = vld [vmem:[%s974_s1 + $0x58] sm:$0xff]   ;;  %v765_v16 = vld [vmem:[%s974_s1 + $0x60] sm:$0xff]   ;;  %v769_v20 = vld [vmem:[%s974_s1 + $0x68] sm:$0xff]  }
   0x6   :  { %693 = vmatprep.subr.bf16.mxu1 %v754_v5  ;;  %v762_v13 = vld [vmem:[%s974_s1 + $0xd8] sm:$0xff]   ;;  %v766_v17 = vld [vmem:[%s974_s1 + $0xe0] sm:$0xff]   ;;  %v770_v21 = vld [vmem:[%s974_s1 + $0xe8] sm:$0xff]  }
   0x7   :  { %v763_v14 = vld [vmem:[%s974_s1 + $0x18] sm:$0xff]   ;;  %v767_v18 = vld [vmem:[%s974_s1 + $0x20] sm:$0xff]   ;;  %v771_v22 = vld [vmem:[%s974_s1 + $0x28] sm:$0xff]  }
   0x8   :  { %666 = vmatpush3.bf16.msra.mxu0 %v755_v6  ;;  %v764_v15 = vld [vmem:[%s974_s1 + $0x98] sm:$0xff]   ;;  %v768_v19 = vld [vmem:[%s974_s1 + $0xa0] sm:$0xff]   ;;  %v772_v23 = vld [vmem:[%s974_s1 + $0xa8] sm:$0xff]  }
   0x9   :  { %694 = vmatpush3.bf16.msra.mxu1 %v756_v7  ;;  %667 = vmatprep.subr.bf16.mxu0 %v757_v8  ;;  %v773_v24 = vld [vmem:[%s974_s1 + $0x70] sm:$0xff]   ;;  %v777_v28 = vld [vmem:[%s974_s1 + $0x78] sm:$0xff]   ;;  %v786_v35 = vld [vmem:[%s975_s0 + $0xc] ss:$20 sps:$4 sm:$0xff]  }
   0xa   :  { %695 = vmatprep.subr.bf16.mxu1 %v758_v9  ;;  %v774_v25 = vld [vmem:[%s974_s1 + $0xf0] sm:$0xff]   ;;  %v778_v29 = vld [vmem:[%s974_s1 + $0xf8] sm:$0xff]   ;;  %v787_v36 = vld [vmem:[%s974_s1 + $0x100] sm:$0xff]   ;;  %489 = vmatprep.mubr.bf16.mxu1 %v786_v35 }
   0xb   :  { %v775_v26 = vld [vmem:[%s974_s1 + $0x30] sm:$0xff]   ;;  %v779_v30 = vld [vmem:[%s974_s1 + $0x38] sm:$0xff]   ;;  %v788_v37 = vld [vmem:[%s974_s1 + $0x108] sm:$0xff]  }
   0xc   :  { %668 = vmatpush3.bf16.msra.mxu0 %v759_v10  ;;  %v776_v27 = vld [vmem:[%s974_s1 + $0xb0] sm:$0xff]   ;;  %v780_v31 = vld [vmem:[%s974_s1 + $0xb8] sm:$0xff]   ;;  %v792_v39 = vld [vmem:[%s975_s0 + $0x2c] ss:$20 sps:$4 sm:$0xff]  }
   0xd   :  { %696 = vmatpush3.bf16.msra.mxu1 %v760_v11  ;;  %669 = vmatprep.subr.bf16.mxu0 %v761_v12  ;;  %v781_v32 = vld [vmem:[%s975_s0] ss:$20 sps:$4 sm:$0xff]   ;;  %v783_v33 = vld [vmem:[%s975_s0 + $0x4] ss:$20 sps:$4 sm:$0xff]   ;;  %v784_v34 = vld [vmem:[%s975_s0 + $0x8] ss:$20 sps:$4 sm:$0xff]  }
   0xe   :  { %697 = vmatprep.subr.bf16.mxu1 %v762_v13  ;;  %440 = vmatprep.mubr.bf16.mxu0 %v783_v33  ;;  %v789_v38 = vld [vmem:[%s974_s1 + $0x110] sm:$0xff]   ;;  %v790_v41 = vld [vmem:[%s974_s1 + $0x118] sm:$0xff]   ;;  %v791_v45 = vld [vmem:[%s974_s1 + $0x120] sm:$0xff]  }
   0xf   :  { %v794_v40 = vld [vmem:[%s975_s0 + $0x34] ss:$20 sps:$4 sm:$0xff]   ;;  %v798_v43 = vld [vmem:[%s975_s0 + $0x30] ss:$20 sps:$4 sm:$0xff]   ;;  %v800_v48 = vld [vmem:[%s974_s1 + $0x138] sm:$0xff]  }
  0x10   :  { %670 = vmatpush3.bf16.msra.mxu0 %v763_v14  ;;  %v797_v42 = vld [vmem:[%s975_s0 + $0x28] ss:$20 sps:$4 sm:$0xff]   ;;  %v801_v44 = vld [vmem:[%s975_s0 + $0x10] ss:$20 sps:$4 sm:$0xff]   ;;  %v802_v49 = vld [vmem:[%s975_s0 + $0x38] ss:$20 sps:$4 sm:$0xff]  }
  0x11   :  { %698 = vmatpush3.bf16.msra.mxu1 %v764_v15  ;;  %671 = vmatprep.subr.bf16.mxu0 %v765_v16  ;;  %v796_v46 = vld [vmem:[%s974_s1 + $0x128] sm:$0xff]   ;;  %v799_v47 = vld [vmem:[%s974_s1 + $0x130] sm:$0xff]  }
  0x12   :  { %699 = vmatprep.subr.bf16.mxu1 %v766_v17 }
  0x14   :  { %672 = vmatpush3.bf16.msra.mxu0 %v767_v18 }
  0x15   :  { %700 = vmatpush3.bf16.msra.mxu1 %v768_v19  ;;  %673 = vmatprep.subr.bf16.mxu0 %v769_v20 }
  0x16   :  { %701 = vmatprep.subr.bf16.mxu1 %v770_v21 }
  0x18   :  { %674 = vmatpush3.bf16.msra.mxu0 %v771_v22 }
  0x19   :  { %702 = vmatpush3.bf16.msra.mxu1 %v772_v23  ;;  %675 = vmatprep.subr.bf16.mxu0 %v773_v24 }
  0x1a   :  { %703 = vmatprep.subr.bf16.mxu1 %v774_v25 }
  0x1c   :  { %676 = vmatpush3.bf16.msra.mxu0 %v775_v26 }
  0x1d   :  { %704 = vmatpush3.bf16.msra.mxu1 %v776_v27  ;;  %677 = vmatprep.subr.bf16.mxu0 %v777_v28 }
  0x1e   :  { %705 = vmatprep.subr.bf16.mxu1 %v778_v29 }
  0x20   :  { %678 = vmatpush3.bf16.msra.mxu0 %v779_v30 }
  0x21   :  { %706 = vmatpush3.bf16.msra.mxu1 %v780_v31  ;;  %729 = vmatprep.subr.bf16.mxu0 %v787_v36 }
  0x23   :  { %441 = vmatmul.mubr.bf16.vlgmr.msra.gmra.mrb[0].mxu0 %v781_v32 }
  0x24   :  { %490 = vmatmul.mubr.bf16.vlgmr.msra.gmra.mrb[0].mxu1 %v784_v34  ;;  %730 = vmatpush3.bf16.msra.mxu0 %v787_v36 }
  0x25   :  { %731 = vmatprep.subr.bf16.mxu0 %v788_v37  ;;  %448 = vmatprep.mubr.bf16.mxu0 %v792_v39 }
  0x26   :  { %497 = vmatprep.mubr.bf16.mxu1 %v794_v40 }
  0x28   :  { %732 = vmatpush3.bf16.msra.mxu0 %v788_v37 }
  0x29   :  { %733 = vmatprep.subr.bf16.mxu0 %v789_v38 }
  0x2b   :  { %449 = vmatmul.mubr.bf16.gmra.mrb[4].mxu0 %v797_v42 }
  0x2c   :  { %498 = vmatmul.mubr.bf16.gmra.mrb[4].mxu1 %v798_v43  ;;  %734 = vmatpush3.bf16.msra.mxu0 %v789_v38 }
  0x2d   :  { %735 = vmatprep.subr.bf16.mxu0 %v790_v41  ;;  %745 = vmatprep.mubr.bf16.mxu0 %v801_v44 }
  0x30   :  { %736 = vmatpush3.bf16.msra.mxu0 %v790_v41 }
  0x31   :  { %737 = vmatprep.subr.bf16.mxu0 %v791_v45 }
  0x34   :  { %738 = vmatpush3.bf16.msra.mxu0 %v791_v45 }
  0x35   :  { %739 = vmatprep.subr.bf16.mxu0 %v796_v46 }
  0x38   :  { %740 = vmatpush3.bf16.msra.mxu0 %v796_v46 }
  0x39   :  { %741 = vmatprep.subr.bf16.mxu0 %v799_v47 }
  0x3c   :  { %742 = vmatpush3.bf16.msra.mxu0 %v799_v47 }
  0x3d   :  { %743 = vmatprep.subr.bf16.mxu0 %v800_v48 }
  0x40   :  { %744 = vmatpush3.bf16.msra.mxu0 %v800_v48 }
  0x43   :  { %746 = vmatmul.mubr.bf16.vlgmr.msra.gmra.mrb[8].mxu0 %v802_v49 }
  0xf6   :  { %v679_v50 = vpop.f32.mrb[0].mxu0 }
  0xf7   :  { %v707_v51 = vpop.f32.mrb[0].mxu1  ;;  %v680_v52 = vpop.f32.mrb[1].mxu0 }
  0xf8   :  { %v681_v53 = vadd.f32 %v680_v52, %v679_v50  ;;  %v708_v54 = vpop.f32.mrb[1].mxu1  ;;  %v682_v55 = vpop.f32.mrb[2].mxu0 }
  0xf9   :  { %v709_v56 = vadd.f32 %v708_v54, %v707_v51  ;;  %v710_v57 = vpop.f32.mrb[2].mxu1  ;;  %v683_v58 = vpop.f32.mrb[3].mxu0 }
  0xfa   :  { %v684_v59 = vadd.f32 %v683_v58, %v682_v55  ;;  %v711_v60 = vpop.f32.mrb[3].mxu1 }
  0xfb   :  { %v712_v61 = vadd.f32 %v711_v60, %v710_v57  ;;  %v492_v62 = vadd.f32 %v709_v56, %v681_v53 }
  0xfd   :  { %v495_v63 = vadd.f32 %v712_v61, %v684_v59 }
  0xfe   :  { %v685_v0 = vpop.f32.mrb[4].mxu0 }
  0xff   :  { %v713_v1 = vpop.f32.mrb[4].mxu1  ;;  %v686_v2 = vpop.f32.mrb[5].mxu0 }
 0x100   :  { %v687_v3 = vadd.f32 %v686_v2, %v685_v0  ;;  %v714_v4 = vpop.f32.mrb[5].mxu1  ;;  %v688_v5 = vpop.f32.mrb[6].mxu0 }
 0x101   :  { %v715_v6 = vadd.f32 %v714_v4, %v713_v1  ;;  %v716_v7 = vpop.f32.mrb[6].mxu1  ;;  %v689_v8 = vpop.f32.mrb[7].mxu0 }
 0x102   :  { %v690_v9 = vadd.f32 %v689_v8, %v688_v5  ;;  %v717_v10 = vpop.f32.mrb[7].mxu1 }
 0x103   :  { %v718_v11 = vadd.f32 %v717_v10, %v716_v7  ;;  %v500_v12 = vadd.f32 %v715_v6, %v687_v3 }
 0x105   :  { %v503_v13 = vadd.f32 %v718_v11, %v690_v9 }
 0x116   :  { %v747_v14 = vpop.f32.mrb[8].mxu0 }
 0x117   :  { %v549_v15 = vadd.f32 %v747_v14, %v500_v12  ;;  %v540_v16 = vpop.f32.mrb[9].mxu0 }
 0x118   :  { %v541_v17 = vadd.f32 %v540_v16, %v492_v62  ;;  %v748_v18 = vpop.f32.mrb[10].mxu0 }
 0x119   :  { %v552_v19 = vadd.f32 %v748_v18, %v503_v13  ;;  %v543_v20 = vpop.f32.mrb[11].mxu0 }
 0x11a   :  { %v544_v21 = vadd.f32 %v543_v20, %v495_v63 }
 0x11b   :  { %v660_v22 = vpack.c.bf16 %v552_v19, %v549_v15 }
 0x11c   :  { %v655_v23 = vpack.c.bf16 %v544_v21, %v541_v17 }
 0x11d   :  { %662 = vst [vmem:[%s976_s2 + $0x8] sm:$0xff] %v660_v22  }
 0x11e   :  { %656 = vst [vmem:[%s976_s2] sm:$0xff] %v655_v23  }

// kernel: simple_resnet_forward.68
= control target key start
LH: loop header
LB: loop body
LE: loop exit
PB: predicated region body
PF: predicated region fallthrough
CT: control target
= control target key end

     0   :  { %v19_v0 = vlaneseq  ;;  %s92_s0 = inlined_call_operand.vmem [shape: bf16[8,256], index: 0, kind: input, shape index: {}]   ;;  %s93_s1 = inlined_call_operand.vmem [shape: f32[1,256], index: 1, kind: input, shape index: {}]   ;;  %s94_s2 = inlined_call_operand.vmem [shape: f32[1,256], index: 2, kind: input, shape index: {}]   ;;  %s95_s3 = inlined_call_operand.vmem [shape: bf16[8,256], index: 3, kind: output, shape index: {}]  }
   0x1   :  { %v14_v1 = vld [vmem:[%s92_s0] sm:$0xff] }
   0x2   :  { %v20_v2 = vshrl.u32 %v19_v0, 7  ;;  %v17_v3 = vld [vmem:[%s93_s1] sm:$0x3]  ;;  %v15_v5 = vunpack.c.l.bf16 %v14_v1  ;;  %v16_v6 = vunpack.c.h.bf16 %v14_v1 }
   0x3   :  { %v31_v4 = vld [vmem:[%s94_s2] sm:$0x3] }
   0x4   :  { %v21_v7 = vsub.s32 0, %v20_v2  ;;  %v25_v8 = vsub.s32 1, %v20_v2 }
   0x6   :  { %v22_v9 = vrot.slane %v17_v3, %v21_v7  ;;  %v26_v10 = vrot.slane %v17_v3, %v25_v8  ;;  %v36_v11 = vrot.slane %v31_v4, %v21_v7  ;;  %v40_v12 = vrot.slane %v31_v4, %v25_v8 }
   0x8   :  { %v29_v13 = vmul.f32 %v22_v9, %v15_v5  ;;  %v30_v14 = vmul.f32 %v26_v10, %v16_v6 }
   0xa   :  { %v43_v15 = vadd.f32 %v36_v11, %v29_v13  ;;  %v44_v16 = vadd.f32 %v40_v12, %v30_v14 }
   0xc   :  { %v59_v17 = vpack.c.bf16 %v44_v16, %v43_v15 }
   0xe   :  { %53 = vst [vmem:[%s95_s3] sm:$0xff] %v59_v17 }

// kernel: simple_resnet_forward.67
= control target key start
LH: loop header
LB: loop body
LE: loop exit
PB: predicated region body
PF: predicated region fallthrough
CT: control target
= control target key end

     0   :  { %v223_v1 = vmov 0   ;;  %s293_s1 = inlined_call_operand.vmem [shape: bf16[128,256], index: 1, kind: input, shape index: {}]   ;;  %s294_s0 = inlined_call_operand.vmem [shape: bf16[8,128], index: 0, kind: input, shape index: {}]   ;;  %s295_s2 = inlined_call_operand.vmem [shape: bf16[8,256], index: 2, kind: output, shape index: {}]  }
   0x1   :  { %v199_v0 = vld [vmem:[%s293_s1 + $0x4] ss:$8 sps:$4 sm:$0xff]   ;;  %149 = vmatprep.mubr.bf16.mxu0 %v223_v1  ;;  %v201_v2 = vld [vmem:[%s293_s1] ss:$8 sps:$4 sm:$0xff]   ;;  %v202_v3 = vld [vmem:[%s293_s1 + $0x14] ss:$8 sps:$4 sm:$0xff]  }
   0x2   :  { %117 = vmatprep.subr.bf16.mxu0 %v199_v0  ;;  %v204_v4 = vld [vmem:[%s293_s1 + $0x10] ss:$8 sps:$4 sm:$0xff]   ;;  %v205_v5 = vld [vmem:[%s293_s1 + $0x24] ss:$8 sps:$4 sm:$0xff]   ;;  %v207_v6 = vld [vmem:[%s293_s1 + $0x20] ss:$8 sps:$4 sm:$0xff]  }
   0x3   :  { %118 = vmatpush1.bf16.msra.mxu0 %v201_v2  ;;  %v208_v7 = vld [vmem:[%s293_s1 + $0x34] ss:$8 sps:$4 sm:$0xff]   ;;  %v210_v8 = vld [vmem:[%s293_s1 + $0x30] ss:$8 sps:$4 sm:$0xff]   ;;  %v211_v9 = vld [vmem:[%s293_s1 + $0x44] ss:$8 sps:$4 sm:$0xff]  }
   0x4   :  { %119 = vmatprep.subr.bf16.mxu0 %v202_v3  ;;  %v213_v10 = vld [vmem:[%s293_s1 + $0x40] ss:$8 sps:$4 sm:$0xff]   ;;  %v214_v11 = vld [vmem:[%s293_s1 + $0x54] ss:$8 sps:$4 sm:$0xff]   ;;  %v216_v12 = vld [vmem:[%s293_s1 + $0x50] ss:$8 sps:$4 sm:$0xff]  }
   0x5   :  { %v217_v13 = vld [vmem:[%s293_s1 + $0x64] ss:$8 sps:$4 sm:$0xff]   ;;  %v219_v14 = vld [vmem:[%s293_s1 + $0x60] ss:$8 sps:$4 sm:$0xff]   ;;  %v220_v15 = vld [vmem:[%s293_s1 + $0x74] ss:$8 sps:$4 sm:$0xff]  }
   0x6   :  { %v222_v16 = vld [vmem:[%s293_s1 + $0x70] ss:$8 sps:$4 sm:$0xff]   ;;  %v20_v17 = vld [vmem:[%s294_s0] sm:$0xf] }
   0x7   :  { %120 = vmatpush1.bf16.msra.mxu0 %v204_v4 }
   0x8   :  { %121 = vmatprep.subr.bf16.mxu0 %v205_v5 }
   0xb   :  { %122 = vmatpush1.bf16.msra.mxu0 %v207_v6 }
   0xc   :  { %123 = vmatprep.subr.bf16.mxu0 %v208_v7 }
   0xf   :  { %124 = vmatpush1.bf16.msra.mxu0 %v210_v8 }
  0x10   :  { %125 = vmatprep.subr.bf16.mxu0 %v211_v9 }
  0x13   :  { %126 = vmatpush1.bf16.msra.mxu0 %v213_v10 }
  0x14   :  { %127 = vmatprep.subr.bf16.mxu0 %v214_v11 }
  0x17   :  { %128 = vmatpush1.bf16.msra.mxu0 %v216_v12 }
  0x18   :  { %129 = vmatprep.subr.bf16.mxu0 %v217_v13 }
  0x1b   :  { %130 = vmatpush1.bf16.msra.mxu0 %v219_v14 }
  0x1c   :  { %131 = vmatprep.subr.bf16.mxu0 %v220_v15 }
  0x1f   :  { %132 = vmatpush1.bf16.msra.mxu0 %v222_v16 }
  0x22   :  { %150 = vmatmul.mubr.bf16.vlgmr.msra.gmra.mrb[0].mxu0 %v20_v17 }
  0xf5   :  { %v151_v18 = vpop.f32.mrb[0].mxu0 }
  0xf6   :  { %v153_v19 = vpop.f32.mrb[1].mxu0 }
  0xf7   :  { %v197_v20 = vpack.c.bf16 %v153_v19, %v151_v18  ;;  %v155_v21 = vpop.f32.mrb[2].mxu0 }
  0xf8   :  { %v156_v22 = vpop.f32.mrb[3].mxu0 }
  0xf9   :  { %175 = vst [vmem:[%s295_s2] sm:$0xff] %v197_v20 }

// kernel: simple_resnet_forward.56
= control target key start
LH: loop header
LB: loop body
LE: loop exit
PB: predicated region body
PF: predicated region fallthrough
CT: control target
= control target key end

     0   :  { %s1069_s9 = smov 0   ;;  %s1071_s10 = smov 0   ;;  %s1186_s0 = inlined_call_operand.vmem [shape: bf16[32,1536], index: 0, kind: input, shape index: {}]   ;;  %s1187_s1 = inlined_call_operand.vmem [shape: bf16[1536,128], index: 1, kind: input, shape index: {}]   ;;  %s1188_s2 = inlined_call_operand.vmem [shape: bf16[32,128], index: 2, kind: output, shape index: {}]  }
   0x1   :  { %s1073_s11 = smov 0   ;;  %s1075_s12 = smov 0  }
   0x2   :  { %s1077_s13 = smov 0  }
   0x3 LB: > { %s24_s14 = sadd.s32 1, %s1047_s12  ;;  %p47_p1 = scmp.ne.s32.totalorder %s1039_s10, %s1035_s9  ;;  %s1051_s13 = sphi %s1077_s13, %s12_s13   ;;  %s1047_s12 = sphi %s1075_s12, %s1192_s12   ;;  %s1043_s11 = sphi %s1073_s11, %s1191_s11   ;;  %s1039_s10 = sphi %s1071_s10, %s1190_s10   ;;  %s1035_s9 = sphi %s1069_s9, %s1189_s9  }
   0x4   : > { %p25_p0 = scmp.ge.s32.totalorder %s24_s14, 3  ;;  %p48_p2 = scmp.eq.s32.totalorder %s1051_s13, 0 }
   0x5   : > { %s40_s16 = sadd.s32 1, %s1039_s10  ;;  %p798_p5 = scmp.ge.s32.totalorder %s1051_s13, 3 }
   0x6   : > { %s1194_s14 = smov (%p25_p0, %s24_s14), 0  ;;  %p49_p3 = por %p48_p2, %p47_p1 }
   0x7   : > { %s36_s15 = ssub.s32 %s1047_s12, %s1194_s14  ;;  %129 = sbr.rel (%p798_p5) target bundleno = 22 (0x16), region = 16 }
   0x8   : > { %p38_p4 = scmp.eq.s32.totalorder %s36_s15, 0 }
   0xa   : > { %s1104_s17 = scalar_select %p38_p4, %s1039_s10, %s40_s16  }
   0xe   : > { %132 = sbr.rel (!%p49_p3) target bundleno = 22 (0x16), region = 20  ;;  %s134_s18 = sand.u32 (%p49_p3), 1, %s1039_s10  }
   0xf   : > { %s856_s19 = sshll.u32 (%p49_p3), %s1047_s12, 4  ;;  %s799_s20 = sshll.u32 (%p49_p3), %s134_s18, 6 }
  0x10   : > { %s142_s23 = scalar_lea.vmem (%p49_p3), %s1186_s0, %s856_s19  ;;  %s136_s24 = scalar_lea.vmem (%p49_p3), [#allocation3], %s799_s20 }
  0x11   : > { %v155_v0 = vld [vmem:[%s142_s23] sm:$0xff] (%p49_p3)  ;;  %v157_v1 = vld [vmem:[%s142_s23 + $0x8] sm:$0xff] (%p49_p3)  ;;  %v159_v2 = vld [vmem:[%s142_s23 + $0x30] sm:$0xff] (%p49_p3) }
  0x12   : > { %156 = vst [vmem:[%s136_s24] sm:$0xff] (%p49_p3), %v155_v0  ;;  %158 = vst [vmem:[%s136_s24 + $0x8] sm:$0xff] (%p49_p3), %v157_v1  ;;  %v161_v3 = vld [vmem:[%s142_s23 + $0x38] sm:$0xff] (%p49_p3)  ;;  %v163_v4 = vld [vmem:[%s142_s23 + $0x60] sm:$0xff] (%p49_p3) }
  0x13   : > { %160 = vst [vmem:[%s136_s24 + $0x10] sm:$0xff] (%p49_p3), %v159_v2  ;;  %v165_v5 = vld [vmem:[%s142_s23 + $0x68] sm:$0xff] (%p49_p3)  ;;  %162 = vst [vmem:[%s136_s24 + $0x18] sm:$0xff] (%p49_p3), %v161_v3  ;;  %v167_v6 = vld [vmem:[%s142_s23 + $0x90] sm:$0xff] (%p49_p3) }
  0x14   : > { %164 = vst [vmem:[%s136_s24 + $0x20] sm:$0xff] (%p49_p3), %v163_v4  ;;  %166 = vst [vmem:[%s136_s24 + $0x28] sm:$0xff] (%p49_p3), %v165_v5  ;;  %v169_v7 = vld [vmem:[%s142_s23 + $0x98] sm:$0xff] (%p49_p3) }
  0x15   : > { %168 = vst [vmem:[%s136_s24 + $0x30] sm:$0xff] %v167_v6  ;;  %170 = vst [vmem:[%s136_s24 + $0x38] sm:$0xff] %v169_v7 }
  0x16 PF: > { %p802_p6 = scmp.ge.s32.totalorder %s1051_s13, 1  ;;  %p187_p7 = scmp.lt.s32.totalorder %s1051_s13, 4 }
  0x18   : > { %p188_p8 = pnand %p802_p6, %p187_p7 }
  0x19   : > { %s194_s25 = sand.u32 (!%p188_p8), 1, %s1035_s9   ;;  %s804_s26 = sshll.u32 (!%p188_p8), %s1043_s11, 6 }
  0x1a   : > { %191 = sbr.rel (%p188_p8) target bundleno = 315 (0x13b), region = 47  ;;  %s803_s27 = sshll.u32 (!%p188_p8), %s194_s25, 6 }
  0x1b   : > { %p229_p9 = scmp.lt.s32.totalorder (!%p188_p8), %s804_s26, 191  ;;  %s1121_s4 = scalar_lea.vmem (!%p188_p8), [#allocation3], %s803_s27 }
  0x1c   : > { %p806_p10 = scmp.ne.s32.totalorder (!%p188_p8), %s1043_s11, 0 }
  0x21   : > { %s1196_s26 = smov (!%p229_p9, %s804_s26), 191  ;;  %250 = sbr.rel (%p806_p10) target bundleno = 40 (0x28), region = 55 }
  0x22   : > { %s805_s28 = sshll.u32 %s1196_s26, 2  ;;  %v1053_v8 = vmov (!%p806_p10), 0.0  }
  0x23   : > { %s1119_s3 = scalar_lea.vmem %s1187_s1, %s805_s28  ;;  %251 = vst [vmem:[#allocation2] sm:$0xff] (!%p806_p10), %v1053_v8  ;;  %252 = vst [vmem:[#allocation2 + $0x8] sm:$0xff] (!%p806_p10), %v1053_v8 }
  0x24   : > { %253 = vst [vmem:[#allocation2 + $0x10] sm:$0xff] (!%p806_p10), %v1053_v8  ;;  %254 = vst [vmem:[#allocation2 + $0x18] sm:$0xff] (!%p806_p10), %v1053_v8 }
  0x28 PF: > { %v969_v9 = vld [vmem:[%s1119_s3 + $0x40] sm:$0xff]   ;;  %v973_v13 = vld [vmem:[%s1119_s3 + $0x48] sm:$0xff]   ;;  %v977_v17 = vld [vmem:[%s1119_s3 + $0x50] sm:$0xff]   ;;  %p847_p11 = scmp.ne.s32.totalorder %s1043_s11, 2 }
  0x29   : > { %v970_v10 = vld [vmem:[%s1119_s3 + $0xc0] sm:$0xff]   ;;  %872 = vmatprep.subr.bf16.mxu0 %v969_v9  ;;  %v974_v14 = vld [vmem:[%s1119_s3 + $0xc8] sm:$0xff]   ;;  %v978_v18 = vld [vmem:[%s1119_s3 + $0xd0] sm:$0xff]  }
  0x2a   : > { %v971_v11 = vld [vmem:[%s1119_s3] sm:$0xff]   ;;  %900 = vmatprep.subr.bf16.mxu1 %v970_v10  ;;  %v975_v15 = vld [vmem:[%s1119_s3 + $0x8] sm:$0xff]   ;;  %v979_v19 = vld [vmem:[%s1119_s3 + $0x10] sm:$0xff]  }
  0x2b   : > { %v972_v12 = vld [vmem:[%s1119_s3 + $0x80] sm:$0xff]   ;;  %873 = vmatpush3.bf16.msra.mxu0 %v971_v11  ;;  %v976_v16 = vld [vmem:[%s1119_s3 + $0x88] sm:$0xff]   ;;  %v980_v20 = vld [vmem:[%s1119_s3 + $0x90] sm:$0xff]  }
  0x2c   : > { %901 = vmatpush3.bf16.msra.mxu1 %v972_v12  ;;  %874 = vmatprep.subr.bf16.mxu0 %v973_v13  ;;  %v981_v21 = vld [vmem:[%s1119_s3 + $0x58] sm:$0xff]   ;;  %v985_v25 = vld [vmem:[%s1119_s3 + $0x60] sm:$0xff]   ;;  %v989_v29 = vld [vmem:[%s1119_s3 + $0x68] sm:$0xff]  }
  0x2d   : > { %902 = vmatprep.subr.bf16.mxu1 %v974_v14  ;;  %v982_v22 = vld [vmem:[%s1119_s3 + $0xd8] sm:$0xff]   ;;  %v986_v26 = vld [vmem:[%s1119_s3 + $0xe0] sm:$0xff]   ;;  %v990_v30 = vld [vmem:[%s1119_s3 + $0xe8] sm:$0xff]  }
  0x2e   : > { %v983_v23 = vld [vmem:[%s1119_s3 + $0x18] sm:$0xff]   ;;  %v987_v27 = vld [vmem:[%s1119_s3 + $0x20] sm:$0xff]   ;;  %v991_v31 = vld [vmem:[%s1119_s3 + $0x28] sm:$0xff]  }
  0x2f   : > { %875 = vmatpush3.bf16.msra.mxu0 %v975_v15  ;;  %v984_v24 = vld [vmem:[%s1119_s3 + $0x98] sm:$0xff]   ;;  %v988_v28 = vld [vmem:[%s1119_s3 + $0xa0] sm:$0xff]   ;;  %v992_v32 = vld [vmem:[%s1119_s3 + $0xa8] sm:$0xff]  }
  0x30   : > { %903 = vmatpush3.bf16.msra.mxu1 %v976_v16  ;;  %876 = vmatprep.subr.bf16.mxu0 %v977_v17  ;;  %v993_v33 = vld [vmem:[%s1119_s3 + $0x70] sm:$0xff]   ;;  %v997_v37 = vld [vmem:[%s1119_s3 + $0x78] sm:$0xff]   ;;  %v255_v58 = vld [vmem:[#allocation2] sm:$0xff] }
  0x31   : > { %904 = vmatprep.subr.bf16.mxu1 %v978_v18  ;;  %v994_v34 = vld [vmem:[%s1119_s3 + $0xf0] sm:$0xff]   ;;  %v998_v38 = vld [vmem:[%s1119_s3 + $0xf8] sm:$0xff]   ;;  %v256_v63 = vld [vmem:[#allocation2 + $0x8] sm:$0xff] }
  0x32   : > { %v995_v35 = vld [vmem:[%s1119_s3 + $0x30] sm:$0xff]   ;;  %v999_v39 = vld [vmem:[%s1119_s3 + $0x38] sm:$0xff]  }
  0x33   : > { %877 = vmatpush3.bf16.msra.mxu0 %v979_v19  ;;  %v996_v36 = vld [vmem:[%s1119_s3 + $0xb0] sm:$0xff]   ;;  %v1000_v40 = vld [vmem:[%s1119_s3 + $0xb8] sm:$0xff]  }
  0x34   : > { %905 = vmatpush3.bf16.msra.mxu1 %v980_v20  ;;  %878 = vmatprep.subr.bf16.mxu0 %v981_v21  ;;  %v1001_v41 = vld [vmem:[%s1121_s4] ss:$16 sps:$4 sm:$0xff]   ;;  %v1003_v42 = vld [vmem:[%s1121_s4 + $0x4] ss:$16 sps:$4 sm:$0xff]   ;;  %v1004_v43 = vld [vmem:[%s1121_s4 + $0x8] ss:$16 sps:$4 sm:$0xff]  }
  0x35   : > { %906 = vmatprep.subr.bf16.mxu1 %v982_v22  ;;  %v1006_v44 = vld [vmem:[%s1121_s4 + $0xc] ss:$16 sps:$4 sm:$0xff]   ;;  %595 = vmatprep.mubr.bf16.mxu0 %v1003_v42  ;;  %v1007_v45 = vld [vmem:[%s1121_s4 + $0x24] ss:$16 sps:$4 sm:$0xff]   ;;  %v1011_v47 = vld [vmem:[%s1121_s4 + $0x20] ss:$16 sps:$4 sm:$0xff]  }
  0x36   : > { %644 = vmatprep.mubr.bf16.mxu1 %v1006_v44  ;;  %v1009_v46 = vld [vmem:[%s1121_s4 + $0x2c] ss:$16 sps:$4 sm:$0xff]   ;;  %v1012_v48 = vld [vmem:[%s1121_s4 + $0x28] ss:$16 sps:$4 sm:$0xff]   ;;  %v257_v12 = vld [vmem:[#allocation2 + $0x10] sm:$0xff] }
  0x37   : > { %879 = vmatpush3.bf16.msra.mxu0 %v983_v23  ;;  %v258_v17 = vld [vmem:[#allocation2 + $0x18] sm:$0xff] }
  0x38   : > { %907 = vmatpush3.bf16.msra.mxu1 %v984_v24  ;;  %880 = vmatprep.subr.bf16.mxu0 %v985_v25 }
  0x39   : > { %908 = vmatprep.subr.bf16.mxu1 %v986_v26 }
  0x3b   : > { %881 = vmatpush3.bf16.msra.mxu0 %v987_v27 }
  0x3c   : > { %909 = vmatpush3.bf16.msra.mxu1 %v988_v28  ;;  %882 = vmatprep.subr.bf16.mxu0 %v989_v29 }
  0x3d   : > { %910 = vmatprep.subr.bf16.mxu1 %v990_v30 }
  0x3f   : > { %883 = vmatpush3.bf16.msra.mxu0 %v991_v31 }
  0x40   : > { %911 = vmatpush3.bf16.msra.mxu1 %v992_v32  ;;  %884 = vmatprep.subr.bf16.mxu0 %v993_v33 }
  0x41   : > { %912 = vmatprep.subr.bf16.mxu1 %v994_v34 }
  0x43   : > { %885 = vmatpush3.bf16.msra.mxu0 %v995_v35 }
  0x44   : > { %913 = vmatpush3.bf16.msra.mxu1 %v996_v36  ;;  %886 = vmatprep.subr.bf16.mxu0 %v997_v37 }
  0x45   : > { %914 = vmatprep.subr.bf16.mxu1 %v998_v38 }
  0x47   : > { %887 = vmatpush3.bf16.msra.mxu0 %v999_v39 }
  0x48   : > { %915 = vmatpush3.bf16.msra.mxu1 %v1000_v40 }
  0x4a   : > { %596 = vmatmul.mubr.bf16.vlgmr.msra.gmra.mrb[0].mxu0 %v1001_v41 }
  0x4b   : > { %645 = vmatmul.mubr.bf16.vlgmr.msra.gmra.mrb[0].mxu1 %v1004_v43  ;;  %603 = vmatprep.mubr.bf16.mxu0 %v1007_v45 }
  0x4c   : > { %652 = vmatprep.mubr.bf16.mxu1 %v1009_v46 }
  0x52   : > { %604 = vmatmul.mubr.bf16.gmra.mrb[4].mxu0 %v1011_v47 }
  0x53   : > { %653 = vmatmul.mubr.bf16.gmra.mrb[4].mxu1 %v1012_v48 }
 0x11d   : > { %v888_v49 = vpop.f32.mrb[0].mxu0 }
 0x11e   : > { %v916_v50 = vpop.f32.mrb[0].mxu1  ;;  %v889_v51 = vpop.f32.mrb[1].mxu0 }
 0x11f   : > { %v890_v52 = vadd.f32 %v889_v51, %v888_v49  ;;  %v917_v53 = vpop.f32.mrb[1].mxu1  ;;  %v891_v54 = vpop.f32.mrb[2].mxu0 }
 0x120   : > { %v918_v55 = vadd.f32 %v917_v53, %v916_v50  ;;  %v919_v56 = vpop.f32.mrb[2].mxu1  ;;  %v892_v57 = vpop.f32.mrb[3].mxu0 }
 0x121   : > { %v893_v59 = vadd.f32 %v892_v57, %v891_v54  ;;  %v920_v60 = vpop.f32.mrb[3].mxu1 }
 0x122   : > { %v647_v61 = vadd.f32 %v918_v55, %v890_v52  ;;  %v921_v62 = vadd.f32 %v920_v60, %v919_v56 }
 0x124   : > { %v661_v0 = vadd.f32 %v647_v61, %v255_v58  ;;  %v650_v1 = vadd.f32 %v921_v62, %v893_v59 }
 0x125   : > { %v894_v2 = vpop.f32.mrb[4].mxu0 }
 0x126   : > { %665 = vst [vmem:[#allocation2] sm:$0xff] %v661_v0  ;;  %v662_v3 = vadd.f32 %v650_v1, %v256_v63  ;;  %v922_v4 = vpop.f32.mrb[4].mxu1  ;;  %v895_v5 = vpop.f32.mrb[5].mxu0 }
 0x127   : > { %v896_v6 = vadd.f32 %v895_v5, %v894_v2  ;;  %v923_v7 = vpop.f32.mrb[5].mxu1  ;;  %v897_v8 = vpop.f32.mrb[6].mxu0 }
 0x128   : > { %666 = vst [vmem:[#allocation2 + $0x8] sm:$0xff] %v662_v3  ;;  %v924_v9 = vadd.f32 %v923_v7, %v922_v4  ;;  %v925_v10 = vpop.f32.mrb[6].mxu1  ;;  %v898_v11 = vpop.f32.mrb[7].mxu0 }
 0x129   : > { %v899_v13 = vadd.f32 %v898_v11, %v897_v8  ;;  %v926_v14 = vpop.f32.mrb[7].mxu1 }
 0x12a   : > { %v655_v15 = vadd.f32 %v924_v9, %v896_v6  ;;  %v927_v16 = vadd.f32 %v926_v14, %v925_v10  ;;  %672 = sbr.rel (%p847_p11) target bundleno = 315 (0x13b), region = 59 }
 0x12c   : > { %v663_v18 = vadd.f32 %v655_v15, %v257_v12  ;;  %v658_v19 = vadd.f32 %v927_v16, %v899_v13 }
 0x12d   : > { %v673_v21 = vld [vmem:[#allocation2] sm:$0xff] (!%p847_p11) }
 0x12e   : > { %667 = vst [vmem:[#allocation2 + $0x10] sm:$0xff] %v663_v18  ;;  %v664_v20 = vadd.f32 %v658_v19, %v258_v17 }
 0x12f   : > { %v674_v22 = vld [vmem:[#allocation2 + $0x8] sm:$0xff] (!%p847_p11) }
 0x130   : > { %668 = vst [vmem:[#allocation2 + $0x18] sm:$0xff] %v664_v20  ;;  %v864_v24 = vpack.c.bf16 (!%p847_p11), %v674_v22, %v673_v21 }
 0x132   : > { %865 = vst [vmem:[%s1188_s2] sm:$0xff] %v864_v24  }
 0x135   : > { %v675_v23 = vld [vmem:[#allocation2 + $0x10] sm:$0xff] }
 0x137   : > { %v676_v25 = vld [vmem:[#allocation2 + $0x18] sm:$0xff] }
 0x138   : > { %v869_v26 = vpack.c.bf16 %v676_v25, %v675_v23 }
 0x13a   : > { %871 = vst [vmem:[%s1188_s2 + $0x8] sm:$0xff] %v869_v26  }
 0x13b PF: > { %s12_s13 = sadd.s32 1, %s1051_s13   ;;  %s1189_s9 = smov %s1039_s10 }
 0x13c   : > { %p9_p12 = scmp.ge.s32.totalorder %s12_s13, 5   ;;  %s1190_s10 = smov %s1104_s17 }
 0x13d   : > { %s1191_s11 = smov %s1047_s12  ;;  %s1192_s12 = smov %s1194_s14 }
 0x13e   :  { %11 = sbr.rel (!%p9_p12) target bundleno = 3 (0x3), region = 97 }

// kernel: simple_resnet_forward.65
= control target key start
LH: loop header
LB: loop body
LE: loop exit
PB: predicated region body
PF: predicated region fallthrough
CT: control target
= control target key end

     0   :  { %v19_v0 = vlaneseq  ;;  %s94_s0 = inlined_call_operand.vmem [shape: bf16[8,256], index: 0, kind: input, shape index: {}]   ;;  %s95_s1 = inlined_call_operand.vmem [shape: f32[1,256], index: 1, kind: input, shape index: {}]   ;;  %s96_s2 = inlined_call_operand.vmem [shape: f32[1,256], index: 2, kind: input, shape index: {}]   ;;  %s97_s3 = inlined_call_operand.vmem [shape: bf16[8,256], index: 3, kind: output, shape index: {}]  }
   0x1   :  { %v14_v1 = vld [vmem:[%s94_s0] sm:$0xff] }
   0x2   :  { %v20_v2 = vshrl.u32 %v19_v0, 7  ;;  %v17_v3 = vld [vmem:[%s95_s1] sm:$0x3]  ;;  %v15_v5 = vunpack.c.l.bf16 %v14_v1  ;;  %v16_v6 = vunpack.c.h.bf16 %v14_v1 }
   0x3   :  { %v31_v4 = vld [vmem:[%s96_s2] sm:$0x3] }
   0x4   :  { %v21_v7 = vsub.s32 0, %v20_v2  ;;  %v25_v8 = vsub.s32 1, %v20_v2 }
   0x6   :  { %v22_v9 = vrot.slane %v17_v3, %v21_v7  ;;  %v26_v10 = vrot.slane %v17_v3, %v25_v8  ;;  %v36_v11 = vrot.slane %v31_v4, %v21_v7  ;;  %v40_v12 = vrot.slane %v31_v4, %v25_v8 }
   0x8   :  { %v29_v13 = vmul.f32 %v22_v9, %v15_v5  ;;  %v30_v14 = vmul.f32 %v26_v10, %v16_v6 }
   0xa   :  { %v43_v15 = vadd.f32 %v36_v11, %v29_v13  ;;  %v44_v16 = vadd.f32 %v40_v12, %v30_v14 }
   0xc   :  { %v45_v17 = vmax.f32 %v43_v15, 0.0  ;;  %v46_v18 = vmax.f32 %v44_v16, 0.0 }
   0xe   :  { %v61_v19 = vpack.c.bf16 %v46_v18, %v45_v17 }
  0x10   :  { %55 = vst [vmem:[%s97_s3] sm:$0xff] %v61_v19 }

// kernel: simple_resnet_forward.64
= control target key start
LH: loop header
LB: loop body
LE: loop exit
PB: predicated region body
PF: predicated region fallthrough
CT: control target
= control target key end

     0   :  { %s1096_s9 = smov 0   ;;  %s1098_s10 = smov 0   ;;  %s1208_s0 = inlined_call_operand.vmem [shape: bf16[8,1536], index: 0, kind: input, shape index: {}]   ;;  %s1209_s1 = inlined_call_operand.vmem [shape: bf16[1536,256], index: 1, kind: input, shape index: {}]   ;;  %s1210_s2 = inlined_call_operand.vmem [shape: bf16[8,256], index: 2, kind: output, shape index: {}]  }
   0x1   :  { %s1100_s11 = smov 0  }
   0x2 LB: > { %s24_s12 = sadd.s32 1, %s1074_s10  ;;  %p848_p0 = scmp.ge.s32.totalorder %s1078_s11, 1  ;;  %s1078_s11 = sphi %s1100_s11, %s12_s11   ;;  %s1074_s10 = sphi %s1098_s10, %s1212_s10   ;;  %s1070_s9 = sphi %s1096_s9, %s1211_s9  }
   0x3   : > { %p25_p1 = scmp.ge.s32.totalorder %s24_s12, 3  ;;  %p159_p2 = scmp.lt.s32.totalorder %s1078_s11, 4 }
   0x5   : > { %s1214_s12 = smov (%p25_p1, %s24_s12), 0  ;;  %p160_p3 = pnand %p848_p0, %p159_p2 }
   0x6   : > { %s849_s13 = sshll.u32 (!%p160_p3), %s1070_s9, 2  ;;  %s851_s14 = sshll.u32 (!%p160_p3), %s1070_s9, 6 }
   0x7   : > { %163 = sbr.rel (%p160_p3) target bundleno = 318 (0x13e), region = 28  ;;  %p202_p4 = scmp.lt.s32.totalorder (!%p160_p3), %s849_s13, 11 }
   0x8   : > { %p211_p5 = scmp.lt.s32.totalorder (!%p160_p3), %s851_s14, 191  ;;  %p854_p6 = scmp.ne.s32.totalorder (!%p160_p3), %s1070_s9, 0 }
   0xe   : > { %s1216_s13 = smov (!%p202_p4, %s849_s13), 11  ;;  %s1218_s14 = smov (!%p211_p5, %s851_s14), 191 }
   0xf   : > { %s850_s15 = sshll.u32 %s1216_s13, 2  ;;  %s929_s19 = sshll.u32 %s1218_s14, 3  ;;  %v1080_v0 = vmov (!%p854_p6), 0.0  }
  0x10   : > { %s1121_s18 = scalar_lea.vmem %s1208_s0, %s850_s15  ;;  %s1126_s22 = scalar_lea.vmem %s1209_s1, %s929_s19  ;;  %235 = vst [vmem:[#allocation2] sm:$0xff] (!%p854_p6), %v1080_v0  ;;  %236 = vst [vmem:[#allocation2 + $0x8] sm:$0xff] (!%p854_p6), %v1080_v0 }
  0x11   : > { %234 = sbr.rel (%p854_p6) target bundleno = 24 (0x18), region = 32 }
  0x18 PF: > { %v956_v1 = vld [vmem:[%s1126_s22 + $0x4] ss:$8 sps:$4 sm:$0xff]   ;;  %v960_v3 = vld [vmem:[%s1126_s22] ss:$8 sps:$4 sm:$0xff]   ;;  %v962_v5 = vld [vmem:[%s1126_s22 + $0x14] ss:$8 sps:$4 sm:$0xff]  }
  0x19   : > { %v958_v2 = vld [vmem:[%s1126_s22 + $0x104] ss:$8 sps:$4 sm:$0xff]   ;;  %639 = vmatprep.subr.bf16.mxu0 %v956_v1  ;;  %v961_v4 = vld [vmem:[%s1126_s22 + $0x100] ss:$8 sps:$4 sm:$0xff]   ;;  %v964_v6 = vld [vmem:[%s1126_s22 + $0x114] ss:$8 sps:$4 sm:$0xff]  }
  0x1a   : > { %680 = vmatprep.subr.bf16.mxu1 %v958_v2  ;;  %640 = vmatpush1.bf16.msra.mxu0 %v960_v3  ;;  %v966_v7 = vld [vmem:[%s1126_s22 + $0x10] ss:$8 sps:$4 sm:$0xff]   ;;  %v968_v9 = vld [vmem:[%s1126_s22 + $0x24] ss:$8 sps:$4 sm:$0xff]   ;;  %v972_v11 = vld [vmem:[%s1126_s22 + $0x20] ss:$8 sps:$4 sm:$0xff]  }
  0x1b   : > { %681 = vmatpush1.bf16.msra.mxu1 %v961_v4  ;;  %641 = vmatprep.subr.bf16.mxu0 %v962_v5  ;;  %v967_v8 = vld [vmem:[%s1126_s22 + $0x110] ss:$8 sps:$4 sm:$0xff]   ;;  %v970_v10 = vld [vmem:[%s1126_s22 + $0x124] ss:$8 sps:$4 sm:$0xff]   ;;  %v973_v12 = vld [vmem:[%s1126_s22 + $0x120] ss:$8 sps:$4 sm:$0xff]  }
  0x1c   : > { %682 = vmatprep.subr.bf16.mxu1 %v964_v6  ;;  %v974_v13 = vld [vmem:[%s1126_s22 + $0x34] ss:$8 sps:$4 sm:$0xff]   ;;  %v978_v15 = vld [vmem:[%s1126_s22 + $0x30] ss:$8 sps:$4 sm:$0xff]   ;;  %v980_v17 = vld [vmem:[%s1126_s22 + $0x44] ss:$8 sps:$4 sm:$0xff]  }
  0x1d   : > { %v976_v14 = vld [vmem:[%s1126_s22 + $0x134] ss:$8 sps:$4 sm:$0xff]   ;;  %v979_v16 = vld [vmem:[%s1126_s22 + $0x130] ss:$8 sps:$4 sm:$0xff]   ;;  %v982_v18 = vld [vmem:[%s1126_s22 + $0x144] ss:$8 sps:$4 sm:$0xff]  }
  0x1e   : > { %642 = vmatpush1.bf16.msra.mxu0 %v966_v7  ;;  %v984_v19 = vld [vmem:[%s1126_s22 + $0x40] ss:$8 sps:$4 sm:$0xff]   ;;  %v986_v21 = vld [vmem:[%s1126_s22 + $0x54] ss:$8 sps:$4 sm:$0xff]   ;;  %v990_v23 = vld [vmem:[%s1126_s22 + $0x50] ss:$8 sps:$4 sm:$0xff]  }
  0x1f   : > { %683 = vmatpush1.bf16.msra.mxu1 %v967_v8  ;;  %643 = vmatprep.subr.bf16.mxu0 %v968_v9  ;;  %v985_v20 = vld [vmem:[%s1126_s22 + $0x140] ss:$8 sps:$4 sm:$0xff]   ;;  %v988_v22 = vld [vmem:[%s1126_s22 + $0x154] ss:$8 sps:$4 sm:$0xff]   ;;  %v991_v24 = vld [vmem:[%s1126_s22 + $0x150] ss:$8 sps:$4 sm:$0xff]  }
  0x20   : > { %684 = vmatprep.subr.bf16.mxu1 %v970_v10  ;;  %v992_v25 = vld [vmem:[%s1126_s22 + $0x64] ss:$8 sps:$4 sm:$0xff]   ;;  %v996_v27 = vld [vmem:[%s1126_s22 + $0x60] ss:$8 sps:$4 sm:$0xff]   ;;  %v998_v29 = vld [vmem:[%s1126_s22 + $0x74] ss:$8 sps:$4 sm:$0xff]  }
  0x21   : > { %v994_v26 = vld [vmem:[%s1126_s22 + $0x164] ss:$8 sps:$4 sm:$0xff]   ;;  %v997_v28 = vld [vmem:[%s1126_s22 + $0x160] ss:$8 sps:$4 sm:$0xff]   ;;  %v1000_v30 = vld [vmem:[%s1126_s22 + $0x174] ss:$8 sps:$4 sm:$0xff]  }
  0x22   : > { %644 = vmatpush1.bf16.msra.mxu0 %v972_v11  ;;  %v1002_v31 = vld [vmem:[%s1126_s22 + $0x70] ss:$8 sps:$4 sm:$0xff]   ;;  %v1004_v33 = vld [vmem:[%s1126_s22 + $0x84] ss:$8 sps:$4 sm:$0xff]   ;;  %v1008_v35 = vld [vmem:[%s1126_s22 + $0x80] ss:$8 sps:$4 sm:$0xff]  }
  0x23   : > { %685 = vmatpush1.bf16.msra.mxu1 %v973_v12  ;;  %645 = vmatprep.subr.bf16.mxu0 %v974_v13  ;;  %v1003_v32 = vld [vmem:[%s1126_s22 + $0x170] ss:$8 sps:$4 sm:$0xff]   ;;  %v1006_v34 = vld [vmem:[%s1126_s22 + $0x184] ss:$8 sps:$4 sm:$0xff]   ;;  %v1009_v36 = vld [vmem:[%s1126_s22 + $0x180] ss:$8 sps:$4 sm:$0xff]  }
  0x24   : > { %686 = vmatprep.subr.bf16.mxu1 %v976_v14  ;;  %v1010_v37 = vld [vmem:[%s1126_s22 + $0x94] ss:$8 sps:$4 sm:$0xff]   ;;  %v1014_v39 = vld [vmem:[%s1126_s22 + $0x90] ss:$8 sps:$4 sm:$0xff]   ;;  %v1016_v41 = vld [vmem:[%s1126_s22 + $0xa4] ss:$8 sps:$4 sm:$0xff]  }
  0x25   : > { %v1012_v38 = vld [vmem:[%s1126_s22 + $0x194] ss:$8 sps:$4 sm:$0xff]   ;;  %v1015_v40 = vld [vmem:[%s1126_s22 + $0x190] ss:$8 sps:$4 sm:$0xff]   ;;  %v1018_v42 = vld [vmem:[%s1126_s22 + $0x1a4] ss:$8 sps:$4 sm:$0xff]  }
  0x26   : > { %646 = vmatpush1.bf16.msra.mxu0 %v978_v15  ;;  %v1020_v43 = vld [vmem:[%s1126_s22 + $0xa0] ss:$8 sps:$4 sm:$0xff]   ;;  %v1022_v45 = vld [vmem:[%s1126_s22 + $0xb4] ss:$8 sps:$4 sm:$0xff]   ;;  %v1026_v50 = vld [vmem:[%s1126_s22 + $0xb0] ss:$8 sps:$4 sm:$0xff]  }
  0x27   : > { %687 = vmatpush1.bf16.msra.mxu1 %v979_v16  ;;  %647 = vmatprep.subr.bf16.mxu0 %v980_v17  ;;  %v1021_v44 = vld [vmem:[%s1126_s22 + $0x1a0] ss:$8 sps:$4 sm:$0xff]   ;;  %v1024_v46 = vld [vmem:[%s1126_s22 + $0x1b4] ss:$8 sps:$4 sm:$0xff]   ;;  %v1027_v51 = vld [vmem:[%s1126_s22 + $0x1b0] ss:$8 sps:$4 sm:$0xff]  }
  0x28   : > { %688 = vmatprep.subr.bf16.mxu1 %v982_v18  ;;  %v239_v47 = vld [vmem:[%s1121_s18] sm:$0xff]  ;;  %v240_v49 = vld [vmem:[%s1121_s18 + $0x8] sm:$0xff]  ;;  %v1034_v57 = vld [vmem:[%s1126_s22 + $0xd4] ss:$8 sps:$4 sm:$0xff]   ;;  %p923_p7 = scmp.ne.s32.totalorder %s1070_s9, 2 }
  0x29   : > { %v856_v48 = vcombine.high %v239_v47, %v239_v47  ;;  %v858_v52 = vcombine.high %v240_v49, %v240_v49  ;;  %v1028_v53 = vld [vmem:[%s1126_s22 + $0xc4] ss:$8 sps:$4 sm:$0xff]   ;;  %v1032_v55 = vld [vmem:[%s1126_s22 + $0xc0] ss:$8 sps:$4 sm:$0xff]   ;;  %v1036_v58 = vld [vmem:[%s1126_s22 + $0x1d4] ss:$8 sps:$4 sm:$0xff]   ;;  %v855_v5 = vcombine.low %v239_v47, %v239_v47  ;;  %v857_v6 = vcombine.low %v240_v49, %v240_v49 }
  0x2a   : > { %648 = vmatpush1.bf16.msra.mxu0 %v984_v19  ;;  %v1030_v54 = vld [vmem:[%s1126_s22 + $0x1c4] ss:$8 sps:$4 sm:$0xff]   ;;  %v1033_v56 = vld [vmem:[%s1126_s22 + $0x1c0] ss:$8 sps:$4 sm:$0xff]   ;;  %v1038_v59 = vld [vmem:[%s1126_s22 + $0xd0] ss:$8 sps:$4 sm:$0xff]  }
  0x2b   : > { %689 = vmatpush1.bf16.msra.mxu1 %v985_v20  ;;  %649 = vmatprep.subr.bf16.mxu0 %v986_v21  ;;  %v1039_v60 = vld [vmem:[%s1126_s22 + $0x1d0] ss:$8 sps:$4 sm:$0xff]   ;;  %v1040_v61 = vld [vmem:[%s1126_s22 + $0xe4] ss:$8 sps:$4 sm:$0xff]   ;;  %v1044_v63 = vld [vmem:[%s1126_s22 + $0xe0] ss:$8 sps:$4 sm:$0xff]  }
  0x2c   : > { %690 = vmatprep.subr.bf16.mxu1 %v988_v22  ;;  %671 = vmatprep.mubr.bf16.mxu0 %v856_v48  ;;  %v1042_v62 = vld [vmem:[%s1126_s22 + $0x1e4] ss:$8 sps:$4 sm:$0xff]   ;;  %v1045_v0 = vld [vmem:[%s1126_s22 + $0x1e0] ss:$8 sps:$4 sm:$0xff]   ;;  %v1046_v1 = vld [vmem:[%s1126_s22 + $0xf4] ss:$8 sps:$4 sm:$0xff]  }
  0x2d   : > { %712 = vmatprep.mubr.bf16.mxu1 %v858_v52  ;;  %v1048_v2 = vld [vmem:[%s1126_s22 + $0x1f4] ss:$8 sps:$4 sm:$0xff]   ;;  %v1050_v3 = vld [vmem:[%s1126_s22 + $0xf0] ss:$8 sps:$4 sm:$0xff]   ;;  %v237_v8 = vld [vmem:[#allocation2] sm:$0xff] }
  0x2e   : > { %650 = vmatpush1.bf16.msra.mxu0 %v990_v23  ;;  %v1051_v4 = vld [vmem:[%s1126_s22 + $0x1f0] ss:$8 sps:$4 sm:$0xff]   ;;  %v238_v12 = vld [vmem:[#allocation2 + $0x8] sm:$0xff] }
  0x2f   : > { %691 = vmatpush1.bf16.msra.mxu1 %v991_v24  ;;  %651 = vmatprep.subr.bf16.mxu0 %v992_v25 }
  0x30   : > { %692 = vmatprep.subr.bf16.mxu1 %v994_v26 }
  0x32   : > { %652 = vmatpush1.bf16.msra.mxu0 %v996_v27 }
  0x33   : > { %693 = vmatpush1.bf16.msra.mxu1 %v997_v28  ;;  %653 = vmatprep.subr.bf16.mxu0 %v998_v29 }
  0x34   : > { %694 = vmatprep.subr.bf16.mxu1 %v1000_v30 }
  0x36   : > { %654 = vmatpush1.bf16.msra.mxu0 %v1002_v31 }
  0x37   : > { %695 = vmatpush1.bf16.msra.mxu1 %v1003_v32  ;;  %655 = vmatprep.subr.bf16.mxu0 %v1004_v33 }
  0x38   : > { %696 = vmatprep.subr.bf16.mxu1 %v1006_v34 }
  0x3a   : > { %656 = vmatpush1.bf16.msra.mxu0 %v1008_v35 }
  0x3b   : > { %697 = vmatpush1.bf16.msra.mxu1 %v1009_v36  ;;  %657 = vmatprep.subr.bf16.mxu0 %v1010_v37 }
  0x3c   : > { %698 = vmatprep.subr.bf16.mxu1 %v1012_v38 }
  0x3e   : > { %658 = vmatpush1.bf16.msra.mxu0 %v1014_v39 }
  0x3f   : > { %699 = vmatpush1.bf16.msra.mxu1 %v1015_v40  ;;  %659 = vmatprep.subr.bf16.mxu0 %v1016_v41 }
  0x40   : > { %700 = vmatprep.subr.bf16.mxu1 %v1018_v42 }
  0x42   : > { %660 = vmatpush1.bf16.msra.mxu0 %v1020_v43 }
  0x43   : > { %701 = vmatpush1.bf16.msra.mxu1 %v1021_v44  ;;  %661 = vmatprep.subr.bf16.mxu0 %v1022_v45 }
  0x44   : > { %702 = vmatprep.subr.bf16.mxu1 %v1024_v46 }
  0x46   : > { %662 = vmatpush1.bf16.msra.mxu0 %v1026_v50 }
  0x47   : > { %703 = vmatpush1.bf16.msra.mxu1 %v1027_v51  ;;  %663 = vmatprep.subr.bf16.mxu0 %v1028_v53 }
  0x48   : > { %704 = vmatprep.subr.bf16.mxu1 %v1030_v54 }
  0x4a   : > { %664 = vmatpush1.bf16.msra.mxu0 %v1032_v55 }
  0x4b   : > { %705 = vmatpush1.bf16.msra.mxu1 %v1033_v56  ;;  %665 = vmatprep.subr.bf16.mxu0 %v1034_v57 }
  0x4c   : > { %706 = vmatprep.subr.bf16.mxu1 %v1036_v58 }
  0x4e   : > { %666 = vmatpush1.bf16.msra.mxu0 %v1038_v59 }
  0x4f   : > { %707 = vmatpush1.bf16.msra.mxu1 %v1039_v60  ;;  %667 = vmatprep.subr.bf16.mxu0 %v1040_v61 }
  0x50   : > { %708 = vmatprep.subr.bf16.mxu1 %v1042_v62 }
  0x52   : > { %668 = vmatpush1.bf16.msra.mxu0 %v1044_v63 }
  0x53   : > { %709 = vmatpush1.bf16.msra.mxu1 %v1045_v0  ;;  %669 = vmatprep.subr.bf16.mxu0 %v1046_v1 }
  0x54   : > { %710 = vmatprep.subr.bf16.mxu1 %v1048_v2 }
  0x56   : > { %670 = vmatpush1.bf16.msra.mxu0 %v1050_v3 }
  0x57   : > { %711 = vmatpush1.bf16.msra.mxu1 %v1051_v4 }
  0x59   : > { %672 = vmatmul.mubr.bf16.vlgmr.msra.gmra.mrb[0].mxu0 %v855_v5 }
  0x5a   : > { %713 = vmatmul.mubr.bf16.vlgmr.msra.gmra.mrb[0].mxu1 %v857_v6 }
 0x12c   : > { %v673_v7 = vpop.f32.mrb[0].mxu0 }
 0x12d   : > { %v714_v9 = vpop.f32.mrb[0].mxu1  ;;  %v675_v11 = vpop.f32.mrb[1].mxu0  ;;  %728 = sbr.rel (%p923_p7) target bundleno = 318 (0x13e), region = 36 }
 0x12e   : > { %v715_v10 = vadd.f32 %v714_v9, %v673_v7  ;;  %v716_v13 = vpop.f32.mrb[1].mxu1  ;;  %v677_v15 = vpop.f32.mrb[2].mxu0 }
 0x12f   : > { %v717_v14 = vadd.f32 %v716_v13, %v675_v11  ;;  %v718_v16 = vpop.f32.mrb[2].mxu1  ;;  %v678_v18 = vpop.f32.mrb[3].mxu0 }
 0x130   : > { %v721_v17 = vadd.f32 %v715_v10, %v237_v8  ;;  %v719_v19 = vpop.f32.mrb[3].mxu1 }
 0x131   : > { %v722_v20 = vadd.f32 %v717_v14, %v238_v12 }
 0x132   : > { %723 = vst [vmem:[#allocation2] sm:$0xff] %v721_v17 }
 0x133   : > { %724 = vst [vmem:[#allocation2 + $0x8] sm:$0xff] %v722_v20 }
 0x139   : > { %v729_v21 = vld [vmem:[#allocation2] sm:$0xff] }
 0x13a   : > { %v730_v22 = vld [vmem:[#allocation2 + $0x8] sm:$0xff] }
 0x13b   : > { %v930_v23 = vpack.c.bf16 %v730_v22, %v729_v21 }
 0x13d   : > { %739 = vst [vmem:[%s1210_s2] sm:$0xff] %v930_v23 }
 0x13e PF: > { %s12_s11 = sadd.s32 1, %s1078_s11   ;;  %s1211_s9 = smov %s1074_s10 }
 0x13f   : > { %p9_p8 = scmp.ge.s32.totalorder %s12_s11, 5   ;;  %s1212_s10 = smov %s1214_s12 }
 0x141   :  { %11 = sbr.rel (!%p9_p8) target bundleno = 2 (0x2), region = 69 }

// kernel: simple_resnet_forward.69
= control target key start
LH: loop header
LB: loop body
LE: loop exit
PB: predicated region body
PF: predicated region fallthrough
CT: control target
= control target key end

     0   :  { %v22_v0 = vlaneseq  ;;  %s110_s0 = inlined_call_operand.vmem [shape: bf16[8,256], index: 0, kind: input, shape index: {}]   ;;  %s111_s1 = inlined_call_operand.vmem [shape: f32[1,256], index: 1, kind: input, shape index: {}]   ;;  %s112_s2 = inlined_call_operand.vmem [shape: f32[1,256], index: 2, kind: input, shape index: {}]   ;;  %s113_s3 = inlined_call_operand.vmem [shape: bf16[8,256], index: 3, kind: input, shape index: {}]   ;;  %s114_s4 = inlined_call_operand.vmem [shape: bf16[8,256], index: 4, kind: output, shape index: {}]  }
   0x1   :  { %v17_v1 = vld [vmem:[%s110_s0] sm:$0xff] }
   0x2   :  { %v23_v2 = vshrl.u32 %v22_v0, 7  ;;  %v20_v3 = vld [vmem:[%s111_s1] sm:$0x3]  ;;  %v18_v5 = vunpack.c.l.bf16 %v17_v1  ;;  %v19_v6 = vunpack.c.h.bf16 %v17_v1 }
   0x3   :  { %v34_v4 = vld [vmem:[%s112_s2] sm:$0x3] }
   0x4   :  { %v24_v7 = vsub.s32 0, %v23_v2  ;;  %v28_v8 = vsub.s32 1, %v23_v2  ;;  %v48_v9 = vld [vmem:[%s113_s3] sm:$0xff] }
   0x5   :  { %v49_v16 = vunpack.c.l.bf16 %v48_v9  ;;  %v50_v17 = vunpack.c.h.bf16 %v48_v9 }
   0x6   :  { %v25_v10 = vrot.slane %v20_v3, %v24_v7  ;;  %v29_v11 = vrot.slane %v20_v3, %v28_v8  ;;  %v39_v12 = vrot.slane %v34_v4, %v24_v7  ;;  %v43_v13 = vrot.slane %v34_v4, %v28_v8 }
   0x8   :  { %v32_v14 = vmul.f32 %v25_v10, %v18_v5  ;;  %v33_v15 = vmul.f32 %v29_v11, %v19_v6 }
   0xa   :  { %v46_v18 = vadd.f32 %v39_v12, %v32_v14  ;;  %v47_v19 = vadd.f32 %v43_v13, %v33_v15 }
   0xc   :  { %v51_v20 = vadd.f32 %v49_v16, %v46_v18  ;;  %v52_v21 = vadd.f32 %v50_v17, %v47_v19 }
   0xe   :  { %v53_v22 = vmax.f32 %v51_v20, 0.0  ;;  %v54_v23 = vmax.f32 %v52_v21, 0.0 }
  0x10   :  { %v69_v24 = vpack.c.bf16 %v54_v23, %v53_v22 }
  0x12   :  { %63 = vst [vmem:[%s114_s4] sm:$0xff] %v69_v24 }

// kernel: simple_resnet_forward.66
= control target key start
LH: loop header
LB: loop body
LE: loop exit
PB: predicated region body
PF: predicated region fallthrough
CT: control target
= control target key end

     0   :  { %s1096_s9 = smov 0   ;;  %s1098_s10 = smov 0   ;;  %s1208_s0 = inlined_call_operand.vmem [shape: bf16[8,2560], index: 0, kind: input, shape index: {}]   ;;  %s1209_s1 = inlined_call_operand.vmem [shape: bf16[2560,256], index: 1, kind: input, shape index: {}]   ;;  %s1210_s2 = inlined_call_operand.vmem [shape: bf16[8,256], index: 2, kind: output, shape index: {}]  }
   0x1   :  { %s1100_s11 = smov 0  }
   0x2 LB: > { %s24_s12 = sadd.s32 1, %s1074_s10  ;;  %p848_p0 = scmp.ge.s32.totalorder %s1078_s11, 1  ;;  %s1078_s11 = sphi %s1100_s11, %s12_s11   ;;  %s1074_s10 = sphi %s1098_s10, %s1212_s10   ;;  %s1070_s9 = sphi %s1096_s9, %s1211_s9  }
   0x3   : > { %p25_p1 = scmp.ge.s32.totalorder %s24_s12, 5  ;;  %p159_p2 = scmp.lt.s32.totalorder %s1078_s11, 6 }
   0x5   : > { %s1214_s12 = smov (%p25_p1, %s24_s12), 0  ;;  %p160_p3 = pnand %p848_p0, %p159_p2 }
   0x6   : > { %s849_s13 = sshll.u32 (!%p160_p3), %s1070_s9, 2  ;;  %s851_s14 = sshll.u32 (!%p160_p3), %s1070_s9, 6 }
   0x7   : > { %163 = sbr.rel (%p160_p3) target bundleno = 318 (0x13e), region = 28  ;;  %p202_p4 = scmp.lt.s32.totalorder (!%p160_p3), %s849_s13, 19 }
   0x8   : > { %p211_p5 = scmp.lt.s32.totalorder (!%p160_p3), %s851_s14, 319  ;;  %p854_p6 = scmp.ne.s32.totalorder (!%p160_p3), %s1070_s9, 0 }
   0xe   : > { %s1216_s13 = smov (!%p202_p4, %s849_s13), 19  ;;  %s1218_s14 = smov (!%p211_p5, %s851_s14), 319 }
   0xf   : > { %s850_s15 = sshll.u32 %s1216_s13, 2  ;;  %s929_s19 = sshll.u32 %s1218_s14, 3  ;;  %v1080_v0 = vmov (!%p854_p6), 0.0  }
  0x10   : > { %s1121_s18 = scalar_lea.vmem %s1208_s0, %s850_s15  ;;  %s1126_s22 = scalar_lea.vmem %s1209_s1, %s929_s19  ;;  %235 = vst [vmem:[#allocation2] sm:$0xff] (!%p854_p6), %v1080_v0  ;;  %236 = vst [vmem:[#allocation2 + $0x8] sm:$0xff] (!%p854_p6), %v1080_v0 }
  0x11   : > { %234 = sbr.rel (%p854_p6) target bundleno = 24 (0x18), region = 32 }
  0x18 PF: > { %v956_v1 = vld [vmem:[%s1126_s22 + $0x4] ss:$8 sps:$4 sm:$0xff]   ;;  %v960_v3 = vld [vmem:[%s1126_s22] ss:$8 sps:$4 sm:$0xff]   ;;  %v962_v5 = vld [vmem:[%s1126_s22 + $0x14] ss:$8 sps:$4 sm:$0xff]  }
  0x19   : > { %v958_v2 = vld [vmem:[%s1126_s22 + $0x104] ss:$8 sps:$4 sm:$0xff]   ;;  %639 = vmatprep.subr.bf16.mxu0 %v956_v1  ;;  %v961_v4 = vld [vmem:[%s1126_s22 + $0x100] ss:$8 sps:$4 sm:$0xff]   ;;  %v964_v6 = vld [vmem:[%s1126_s22 + $0x114] ss:$8 sps:$4 sm:$0xff]  }
  0x1a   : > { %680 = vmatprep.subr.bf16.mxu1 %v958_v2  ;;  %640 = vmatpush1.bf16.msra.mxu0 %v960_v3  ;;  %v966_v7 = vld [vmem:[%s1126_s22 + $0x10] ss:$8 sps:$4 sm:$0xff]   ;;  %v968_v9 = vld [vmem:[%s1126_s22 + $0x24] ss:$8 sps:$4 sm:$0xff]   ;;  %v972_v11 = vld [vmem:[%s1126_s22 + $0x20] ss:$8 sps:$4 sm:$0xff]  }
  0x1b   : > { %681 = vmatpush1.bf16.msra.mxu1 %v961_v4  ;;  %641 = vmatprep.subr.bf16.mxu0 %v962_v5  ;;  %v967_v8 = vld [vmem:[%s1126_s22 + $0x110] ss:$8 sps:$4 sm:$0xff]   ;;  %v970_v10 = vld [vmem:[%s1126_s22 + $0x124] ss:$8 sps:$4 sm:$0xff]   ;;  %v973_v12 = vld [vmem:[%s1126_s22 + $0x120] ss:$8 sps:$4 sm:$0xff]  }
  0x1c   : > { %682 = vmatprep.subr.bf16.mxu1 %v964_v6  ;;  %v974_v13 = vld [vmem:[%s1126_s22 + $0x34] ss:$8 sps:$4 sm:$0xff]   ;;  %v978_v15 = vld [vmem:[%s1126_s22 + $0x30] ss:$8 sps:$4 sm:$0xff]   ;;  %v980_v17 = vld [vmem:[%s1126_s22 + $0x44] ss:$8 sps:$4 sm:$0xff]  }
  0x1d   : > { %v976_v14 = vld [vmem:[%s1126_s22 + $0x134] ss:$8 sps:$4 sm:$0xff]   ;;  %v979_v16 = vld [vmem:[%s1126_s22 + $0x130] ss:$8 sps:$4 sm:$0xff]   ;;  %v982_v18 = vld [vmem:[%s1126_s22 + $0x144] ss:$8 sps:$4 sm:$0xff]  }
  0x1e   : > { %642 = vmatpush1.bf16.msra.mxu0 %v966_v7  ;;  %v984_v19 = vld [vmem:[%s1126_s22 + $0x40] ss:$8 sps:$4 sm:$0xff]   ;;  %v986_v21 = vld [vmem:[%s1126_s22 + $0x54] ss:$8 sps:$4 sm:$0xff]   ;;  %v990_v23 = vld [vmem:[%s1126_s22 + $0x50] ss:$8 sps:$4 sm:$0xff]  }
  0x1f   : > { %683 = vmatpush1.bf16.msra.mxu1 %v967_v8  ;;  %643 = vmatprep.subr.bf16.mxu0 %v968_v9  ;;  %v985_v20 = vld [vmem:[%s1126_s22 + $0x140] ss:$8 sps:$4 sm:$0xff]   ;;  %v988_v22 = vld [vmem:[%s1126_s22 + $0x154] ss:$8 sps:$4 sm:$0xff]   ;;  %v991_v24 = vld [vmem:[%s1126_s22 + $0x150] ss:$8 sps:$4 sm:$0xff]  }
  0x20   : > { %684 = vmatprep.subr.bf16.mxu1 %v970_v10  ;;  %v992_v25 = vld [vmem:[%s1126_s22 + $0x64] ss:$8 sps:$4 sm:$0xff]   ;;  %v996_v27 = vld [vmem:[%s1126_s22 + $0x60] ss:$8 sps:$4 sm:$0xff]   ;;  %v998_v29 = vld [vmem:[%s1126_s22 + $0x74] ss:$8 sps:$4 sm:$0xff]  }
  0x21   : > { %v994_v26 = vld [vmem:[%s1126_s22 + $0x164] ss:$8 sps:$4 sm:$0xff]   ;;  %v997_v28 = vld [vmem:[%s1126_s22 + $0x160] ss:$8 sps:$4 sm:$0xff]   ;;  %v1000_v30 = vld [vmem:[%s1126_s22 + $0x174] ss:$8 sps:$4 sm:$0xff]  }
  0x22   : > { %644 = vmatpush1.bf16.msra.mxu0 %v972_v11  ;;  %v1002_v31 = vld [vmem:[%s1126_s22 + $0x70] ss:$8 sps:$4 sm:$0xff]   ;;  %v1004_v33 = vld [vmem:[%s1126_s22 + $0x84] ss:$8 sps:$4 sm:$0xff]   ;;  %v1008_v35 = vld [vmem:[%s1126_s22 + $0x80] ss:$8 sps:$4 sm:$0xff]  }
  0x23   : > { %685 = vmatpush1.bf16.msra.mxu1 %v973_v12  ;;  %645 = vmatprep.subr.bf16.mxu0 %v974_v13  ;;  %v1003_v32 = vld [vmem:[%s1126_s22 + $0x170] ss:$8 sps:$4 sm:$0xff]   ;;  %v1006_v34 = vld [vmem:[%s1126_s22 + $0x184] ss:$8 sps:$4 sm:$0xff]   ;;  %v1009_v36 = vld [vmem:[%s1126_s22 + $0x180] ss:$8 sps:$4 sm:$0xff]  }
  0x24   : > { %686 = vmatprep.subr.bf16.mxu1 %v976_v14  ;;  %v1010_v37 = vld [vmem:[%s1126_s22 + $0x94] ss:$8 sps:$4 sm:$0xff]   ;;  %v1014_v39 = vld [vmem:[%s1126_s22 + $0x90] ss:$8 sps:$4 sm:$0xff]   ;;  %v1016_v41 = vld [vmem:[%s1126_s22 + $0xa4] ss:$8 sps:$4 sm:$0xff]  }
  0x25   : > { %v1012_v38 = vld [vmem:[%s1126_s22 + $0x194] ss:$8 sps:$4 sm:$0xff]   ;;  %v1015_v40 = vld [vmem:[%s1126_s22 + $0x190] ss:$8 sps:$4 sm:$0xff]   ;;  %v1018_v42 = vld [vmem:[%s1126_s22 + $0x1a4] ss:$8 sps:$4 sm:$0xff]  }
  0x26   : > { %646 = vmatpush1.bf16.msra.mxu0 %v978_v15  ;;  %v1020_v43 = vld [vmem:[%s1126_s22 + $0xa0] ss:$8 sps:$4 sm:$0xff]   ;;  %v1022_v45 = vld [vmem:[%s1126_s22 + $0xb4] ss:$8 sps:$4 sm:$0xff]   ;;  %v1026_v50 = vld [vmem:[%s1126_s22 + $0xb0] ss:$8 sps:$4 sm:$0xff]  }
  0x27   : > { %687 = vmatpush1.bf16.msra.mxu1 %v979_v16  ;;  %647 = vmatprep.subr.bf16.mxu0 %v980_v17  ;;  %v1021_v44 = vld [vmem:[%s1126_s22 + $0x1a0] ss:$8 sps:$4 sm:$0xff]   ;;  %v1024_v46 = vld [vmem:[%s1126_s22 + $0x1b4] ss:$8 sps:$4 sm:$0xff]   ;;  %v1027_v51 = vld [vmem:[%s1126_s22 + $0x1b0] ss:$8 sps:$4 sm:$0xff]  }
  0x28   : > { %688 = vmatprep.subr.bf16.mxu1 %v982_v18  ;;  %v239_v47 = vld [vmem:[%s1121_s18] sm:$0xff]  ;;  %v240_v49 = vld [vmem:[%s1121_s18 + $0x8] sm:$0xff]  ;;  %v1034_v57 = vld [vmem:[%s1126_s22 + $0xd4] ss:$8 sps:$4 sm:$0xff]   ;;  %p923_p7 = scmp.ne.s32.totalorder %s1070_s9, 4 }
  0x29   : > { %v856_v48 = vcombine.high %v239_v47, %v239_v47  ;;  %v858_v52 = vcombine.high %v240_v49, %v240_v49  ;;  %v1028_v53 = vld [vmem:[%s1126_s22 + $0xc4] ss:$8 sps:$4 sm:$0xff]   ;;  %v1032_v55 = vld [vmem:[%s1126_s22 + $0xc0] ss:$8 sps:$4 sm:$0xff]   ;;  %v1036_v58 = vld [vmem:[%s1126_s22 + $0x1d4] ss:$8 sps:$4 sm:$0xff]   ;;  %v855_v5 = vcombine.low %v239_v47, %v239_v47  ;;  %v857_v6 = vcombine.low %v240_v49, %v240_v49 }
  0x2a   : > { %648 = vmatpush1.bf16.msra.mxu0 %v984_v19  ;;  %v1030_v54 = vld [vmem:[%s1126_s22 + $0x1c4] ss:$8 sps:$4 sm:$0xff]   ;;  %v1033_v56 = vld [vmem:[%s1126_s22 + $0x1c0] ss:$8 sps:$4 sm:$0xff]   ;;  %v1038_v59 = vld [vmem:[%s1126_s22 + $0xd0] ss:$8 sps:$4 sm:$0xff]  }
  0x2b   : > { %689 = vmatpush1.bf16.msra.mxu1 %v985_v20  ;;  %649 = vmatprep.subr.bf16.mxu0 %v986_v21  ;;  %v1039_v60 = vld [vmem:[%s1126_s22 + $0x1d0] ss:$8 sps:$4 sm:$0xff]   ;;  %v1040_v61 = vld [vmem:[%s1126_s22 + $0xe4] ss:$8 sps:$4 sm:$0xff]   ;;  %v1044_v63 = vld [vmem:[%s1126_s22 + $0xe0] ss:$8 sps:$4 sm:$0xff]  }
  0x2c   : > { %690 = vmatprep.subr.bf16.mxu1 %v988_v22  ;;  %671 = vmatprep.mubr.bf16.mxu0 %v856_v48  ;;  %v1042_v62 = vld [vmem:[%s1126_s22 + $0x1e4] ss:$8 sps:$4 sm:$0xff]   ;;  %v1045_v0 = vld [vmem:[%s1126_s22 + $0x1e0] ss:$8 sps:$4 sm:$0xff]   ;;  %v1046_v1 = vld [vmem:[%s1126_s22 + $0xf4] ss:$8 sps:$4 sm:$0xff]  }
  0x2d   : > { %712 = vmatprep.mubr.bf16.mxu1 %v858_v52  ;;  %v1048_v2 = vld [vmem:[%s1126_s22 + $0x1f4] ss:$8 sps:$4 sm:$0xff]   ;;  %v1050_v3 = vld [vmem:[%s1126_s22 + $0xf0] ss:$8 sps:$4 sm:$0xff]   ;;  %v237_v8 = vld [vmem:[#allocation2] sm:$0xff] }
  0x2e   : > { %650 = vmatpush1.bf16.msra.mxu0 %v990_v23  ;;  %v1051_v4 = vld [vmem:[%s1126_s22 + $0x1f0] ss:$8 sps:$4 sm:$0xff]   ;;  %v238_v12 = vld [vmem:[#allocation2 + $0x8] sm:$0xff] }
  0x2f   : > { %691 = vmatpush1.bf16.msra.mxu1 %v991_v24  ;;  %651 = vmatprep.subr.bf16.mxu0 %v992_v25 }
  0x30   : > { %692 = vmatprep.subr.bf16.mxu1 %v994_v26 }
  0x32   : > { %652 = vmatpush1.bf16.msra.mxu0 %v996_v27 }
  0x33   : > { %693 = vmatpush1.bf16.msra.mxu1 %v997_v28  ;;  %653 = vmatprep.subr.bf16.mxu0 %v998_v29 }
  0x34   : > { %694 = vmatprep.subr.bf16.mxu1 %v1000_v30 }
  0x36   : > { %654 = vmatpush1.bf16.msra.mxu0 %v1002_v31 }
  0x37   : > { %695 = vmatpush1.bf16.msra.mxu1 %v1003_v32  ;;  %655 = vmatprep.subr.bf16.mxu0 %v1004_v33 }
  0x38   : > { %696 = vmatprep.subr.bf16.mxu1 %v1006_v34 }
  0x3a   : > { %656 = vmatpush1.bf16.msra.mxu0 %v1008_v35 }
  0x3b   : > { %697 = vmatpush1.bf16.msra.mxu1 %v1009_v36  ;;  %657 = vmatprep.subr.bf16.mxu0 %v1010_v37 }
  0x3c   : > { %698 = vmatprep.subr.bf16.mxu1 %v1012_v38 }
  0x3e   : > { %658 = vmatpush1.bf16.msra.mxu0 %v1014_v39 }
  0x3f   : > { %699 = vmatpush1.bf16.msra.mxu1 %v1015_v40  ;;  %659 = vmatprep.subr.bf16.mxu0 %v1016_v41 }
  0x40   : > { %700 = vmatprep.subr.bf16.mxu1 %v1018_v42 }
  0x42   : > { %660 = vmatpush1.bf16.msra.mxu0 %v1020_v43 }
  0x43   : > { %701 = vmatpush1.bf16.msra.mxu1 %v1021_v44  ;;  %661 = vmatprep.subr.bf16.mxu0 %v1022_v45 }
  0x44   : > { %702 = vmatprep.subr.bf16.mxu1 %v1024_v46 }
  0x46   : > { %662 = vmatpush1.bf16.msra.mxu0 %v1026_v50 }
  0x47   : > { %703 = vmatpush1.bf16.msra.mxu1 %v1027_v51  ;;  %663 = vmatprep.subr.bf16.mxu0 %v1028_v53 }
  0x48   : > { %704 = vmatprep.subr.bf16.mxu1 %v1030_v54 }
  0x4a   : > { %664 = vmatpush1.bf16.msra.mxu0 %v1032_v55 }
  0x4b   : > { %705 = vmatpush1.bf16.msra.mxu1 %v1033_v56  ;;  %665 = vmatprep.subr.bf16.mxu0 %v1034_v57 }
  0x4c   : > { %706 = vmatprep.subr.bf16.mxu1 %v1036_v58 }
  0x4e   : > { %666 = vmatpush1.bf16.msra.mxu0 %v1038_v59 }
  0x4f   : > { %707 = vmatpush1.bf16.msra.mxu1 %v1039_v60  ;;  %667 = vmatprep.subr.bf16.mxu0 %v1040_v61 }
  0x50   : > { %708 = vmatprep.subr.bf16.mxu1 %v1042_v62 }
  0x52   : > { %668 = vmatpush1.bf16.msra.mxu0 %v1044_v63 }
  0x53   : > { %709 = vmatpush1.bf16.msra.mxu1 %v1045_v0  ;;  %669 = vmatprep.subr.bf16.mxu0 %v1046_v1 }
  0x54   : > { %710 = vmatprep.subr.bf16.mxu1 %v1048_v2 }
  0x56   : > { %670 = vmatpush1.bf16.msra.mxu0 %v1050_v3 }
  0x57   : > { %711 = vmatpush1.bf16.msra.mxu1 %v1051_v4 }
  0x59   : > { %672 = vmatmul.mubr.bf16.vlgmr.msra.gmra.mrb[0].mxu0 %v855_v5 }
  0x5a   : > { %713 = vmatmul.mubr.bf16.vlgmr.msra.gmra.mrb[0].mxu1 %v857_v6 }
 0x12c   : > { %v673_v7 = vpop.f32.mrb[0].mxu0 }
 0x12d   : > { %v714_v9 = vpop.f32.mrb[0].mxu1  ;;  %v675_v11 = vpop.f32.mrb[1].mxu0  ;;  %728 = sbr.rel (%p923_p7) target bundleno = 318 (0x13e), region = 36 }
 0x12e   : > { %v715_v10 = vadd.f32 %v714_v9, %v673_v7  ;;  %v716_v13 = vpop.f32.mrb[1].mxu1  ;;  %v677_v15 = vpop.f32.mrb[2].mxu0 }
 0x12f   : > { %v717_v14 = vadd.f32 %v716_v13, %v675_v11  ;;  %v718_v16 = vpop.f32.mrb[2].mxu1  ;;  %v678_v18 = vpop.f32.mrb[3].mxu0 }
 0x130   : > { %v721_v17 = vadd.f32 %v715_v10, %v237_v8  ;;  %v719_v19 = vpop.f32.mrb[3].mxu1 }
 0x131   : > { %v722_v20 = vadd.f32 %v717_v14, %v238_v12 }
 0x132   : > { %723 = vst [vmem:[#allocation2] sm:$0xff] %v721_v17 }
 0x133   : > { %724 = vst [vmem:[#allocation2 + $0x8] sm:$0xff] %v722_v20 }
 0x139   : > { %v729_v21 = vld [vmem:[#allocation2] sm:$0xff] }
 0x13a   : > { %v730_v22 = vld [vmem:[#allocation2 + $0x8] sm:$0xff] }
 0x13b   : > { %v930_v23 = vpack.c.bf16 %v730_v22, %v729_v21 }
 0x13d   : > { %739 = vst [vmem:[%s1210_s2] sm:$0xff] %v930_v23 }
 0x13e PF: > { %s12_s11 = sadd.s32 1, %s1078_s11   ;;  %s1211_s9 = smov %s1074_s10 }
 0x13f   : > { %p9_p8 = scmp.ge.s32.totalorder %s12_s11, 7   ;;  %s1212_s10 = smov %s1214_s12 }
 0x141   :  { %11 = sbr.rel (!%p9_p8) target bundleno = 2 (0x2), region = 69 }

// kernel: simple_resnet_forward.74
= control target key start
LH: loop header
LB: loop body
LE: loop exit
PB: predicated region body
PF: predicated region fallthrough
CT: control target
= control target key end

     0   :  { %s1446_s9 = smov 0   ;;  %s1448_s10 = smov 0   ;;  %s1745_s0 = inlined_call_operand.vmem [shape: bf16[8,2560], index: 0, kind: input, shape index: {}]   ;;  %s1746_s1 = inlined_call_operand.vmem [shape: bf16[2560,512], index: 1, kind: input, shape index: {}]   ;;  %s1747_s2 = inlined_call_operand.vmem [shape: bf16[8,512], index: 2, kind: output, shape index: {}]  }
   0x1   :  { %s1450_s11 = smov 0   ;;  %s1452_s12 = smov 0  }
   0x2   :  { %s1454_s13 = smov 0   ;;  %s1456_s14 = smov 0  }
   0x3   :  { %s1458_s15 = smov 0  }
   0x4 LB: > { %s24_s16 = sadd.s32 1, %s1420_s13  ;;  %s27_s17 = sadd.s32 1, %s1424_s14  ;;  %s1428_s15 = sphi %s1458_s15, %s12_s15   ;;  %s1424_s14 = sphi %s1456_s14, %s1753_s14   ;;  %s1420_s13 = sphi %s1454_s13, %s1752_s13   ;;  %s1416_s12 = sphi %s1452_s12, %s1751_s12   ;;  %s1412_s11 = sphi %s1450_s11, %s1750_s11   ;;  %s1408_s10 = sphi %s1448_s10, %s1749_s10   ;;  %s1404_s9 = sphi %s1446_s9, %s1748_s9  }
   0x5   : > { %p25_p0 = scmp.ge.s32.totalorder %s24_s16, 5  ;;  %p75_p1 = scmp.ne.s32.totalorder %s1408_s10, %s1404_s9 }
   0x6   : > { %p76_p2 = scmp.eq.s32.totalorder %s1428_s15, 0  ;;  %s68_s21 = sadd.s32 1, %s1408_s10 }
   0x7   : > { %s1755_s16 = smov (%p25_p0, %s24_s16), 0  ;;  %s1757_s17 = smov (!%p25_p0, %s27_s17), %s1424_s14 }
   0x8   : > { %p77_p3 = por %p76_p2, %p75_p1  ;;  %p29_p4 = scmp.ge.s32.totalorder %s1757_s17, 2 }
   0x9   : > { %s63_s18 = ssub.s32 %s1420_s13, %s1755_s16  ;;  %p1130_p6 = scmp.ge.s32.totalorder %s1428_s15, 10 }
   0xa   : > { %s1759_s17 = smov (%p29_p4, %s1757_s17), 0 }
   0xb   : > { %s64_s19 = ssub.s32 %s1424_s14, %s1759_s17  ;;  %129 = sbr.rel (%p1130_p6) target bundleno = 57 (0x39), region = 16 }
   0xc   : > { %s65_s20 = sor.u32 %s64_s19, %s63_s18 }
   0xd   : > { %p66_p5 = scmp.eq.s32.totalorder %s65_s20, 0 }
   0xf   : > { %s1497_s22 = scalar_select %p66_p5, %s1408_s10, %s68_s21  }
  0x12   : > { %145 = sbr.rel (!%p77_p3) target bundleno = 57 (0x39), region = 24  ;;  %s147_s23 = sand.u32 (%p77_p3), 1, %s1408_s10  }
  0x13   : > { %s1133_s24 = sshll.u32 (%p77_p3), %s1424_s14, 1  ;;  %s1131_s25 = sshll.u32 (%p77_p3), %s147_s23, 9 }
  0x14   : > { %s1215_s26 = sshll.u32 (%p77_p3), %s1420_s13, 8  ;;  %s1511_s4 = scalar_lea.vmem (%p77_p3), [#allocation3], %s1131_s25 }
  0x15   : > { %s153_s27 = sadd.s32 (%p77_p3), %s1215_s26, %s1133_s24 }
  0x16   : > { %s1135_s28 = sshll.u32 (%p77_p3), %s153_s27, 2 }
  0x17   : > { %s1506_s3 = scalar_lea.vmem (%p77_p3), %s1746_s1, %s1135_s28 }
  0x18   : > { %v309_v0 = vld [vmem:[%s1506_s3] sm:$0xff] (%p77_p3)  ;;  %v311_v1 = vld [vmem:[%s1506_s3 + $0x10] sm:$0xff] (%p77_p3) }
  0x19   : > { %v313_v2 = vld [vmem:[%s1506_s3 + $0x20] sm:$0xff]  ;;  %310 = vst [vmem:[%s1511_s4] sm:$0xff] %v309_v0  ;;  %312 = vst [vmem:[%s1511_s4 + $0x8] sm:$0xff] %v311_v1  ;;  %v315_v3 = vld [vmem:[%s1506_s3 + $0x30] sm:$0xff] }
  0x1a   : > { %314 = vst [vmem:[%s1511_s4 + $0x10] sm:$0xff] %v313_v2  ;;  %v317_v4 = vld [vmem:[%s1506_s3 + $0x40] sm:$0xff]  ;;  %v319_v5 = vld [vmem:[%s1506_s3 + $0x50] sm:$0xff]  ;;  %316 = vst [vmem:[%s1511_s4 + $0x18] sm:$0xff] %v315_v3 }
  0x1b   : > { %318 = vst [vmem:[%s1511_s4 + $0x20] sm:$0xff] %v317_v4  ;;  %320 = vst [vmem:[%s1511_s4 + $0x28] sm:$0xff] %v319_v5  ;;  %v321_v6 = vld [vmem:[%s1506_s3 + $0x60] sm:$0xff]  ;;  %v323_v7 = vld [vmem:[%s1506_s3 + $0x70] sm:$0xff] }
  0x1c   : > { %v325_v8 = vld [vmem:[%s1506_s3 + $0x80] sm:$0xff]  ;;  %322 = vst [vmem:[%s1511_s4 + $0x30] sm:$0xff] %v321_v6  ;;  %324 = vst [vmem:[%s1511_s4 + $0x38] sm:$0xff] %v323_v7  ;;  %v327_v9 = vld [vmem:[%s1506_s3 + $0x90] sm:$0xff] }
  0x1d   : > { %326 = vst [vmem:[%s1511_s4 + $0x40] sm:$0xff] %v325_v8  ;;  %v329_v10 = vld [vmem:[%s1506_s3 + $0xa0] sm:$0xff]  ;;  %v331_v11 = vld [vmem:[%s1506_s3 + $0xb0] sm:$0xff]  ;;  %328 = vst [vmem:[%s1511_s4 + $0x48] sm:$0xff] %v327_v9 }
  0x1e   : > { %330 = vst [vmem:[%s1511_s4 + $0x50] sm:$0xff] %v329_v10  ;;  %332 = vst [vmem:[%s1511_s4 + $0x58] sm:$0xff] %v331_v11  ;;  %v333_v12 = vld [vmem:[%s1506_s3 + $0xc0] sm:$0xff]  ;;  %v335_v13 = vld [vmem:[%s1506_s3 + $0xd0] sm:$0xff] }
  0x1f   : > { %v337_v14 = vld [vmem:[%s1506_s3 + $0xe0] sm:$0xff]  ;;  %334 = vst [vmem:[%s1511_s4 + $0x60] sm:$0xff] %v333_v12  ;;  %336 = vst [vmem:[%s1511_s4 + $0x68] sm:$0xff] %v335_v13  ;;  %v339_v15 = vld [vmem:[%s1506_s3 + $0xf0] sm:$0xff] }
  0x20   : > { %338 = vst [vmem:[%s1511_s4 + $0x70] sm:$0xff] %v337_v14  ;;  %v341_v16 = vld [vmem:[%s1506_s3 + $0x100] sm:$0xff]  ;;  %v343_v17 = vld [vmem:[%s1506_s3 + $0x110] sm:$0xff]  ;;  %340 = vst [vmem:[%s1511_s4 + $0x78] sm:$0xff] %v339_v15 }
  0x21   : > { %342 = vst [vmem:[%s1511_s4 + $0x80] sm:$0xff] %v341_v16  ;;  %344 = vst [vmem:[%s1511_s4 + $0x88] sm:$0xff] %v343_v17  ;;  %v345_v18 = vld [vmem:[%s1506_s3 + $0x120] sm:$0xff]  ;;  %v347_v19 = vld [vmem:[%s1506_s3 + $0x130] sm:$0xff] }
  0x22   : > { %v349_v20 = vld [vmem:[%s1506_s3 + $0x140] sm:$0xff]  ;;  %346 = vst [vmem:[%s1511_s4 + $0x90] sm:$0xff] %v345_v18  ;;  %348 = vst [vmem:[%s1511_s4 + $0x98] sm:$0xff] %v347_v19  ;;  %v351_v21 = vld [vmem:[%s1506_s3 + $0x150] sm:$0xff] }
  0x23   : > { %350 = vst [vmem:[%s1511_s4 + $0xa0] sm:$0xff] %v349_v20  ;;  %v353_v22 = vld [vmem:[%s1506_s3 + $0x160] sm:$0xff]  ;;  %v355_v23 = vld [vmem:[%s1506_s3 + $0x170] sm:$0xff]  ;;  %352 = vst [vmem:[%s1511_s4 + $0xa8] sm:$0xff] %v351_v21 }
  0x24   : > { %354 = vst [vmem:[%s1511_s4 + $0xb0] sm:$0xff] %v353_v22  ;;  %356 = vst [vmem:[%s1511_s4 + $0xb8] sm:$0xff] %v355_v23  ;;  %v357_v24 = vld [vmem:[%s1506_s3 + $0x180] sm:$0xff]  ;;  %v359_v25 = vld [vmem:[%s1506_s3 + $0x190] sm:$0xff] }
  0x25   : > { %v361_v26 = vld [vmem:[%s1506_s3 + $0x1a0] sm:$0xff]  ;;  %358 = vst [vmem:[%s1511_s4 + $0xc0] sm:$0xff] %v357_v24  ;;  %360 = vst [vmem:[%s1511_s4 + $0xc8] sm:$0xff] %v359_v25  ;;  %v363_v27 = vld [vmem:[%s1506_s3 + $0x1b0] sm:$0xff] }
  0x26   : > { %362 = vst [vmem:[%s1511_s4 + $0xd0] sm:$0xff] %v361_v26  ;;  %v365_v28 = vld [vmem:[%s1506_s3 + $0x1c0] sm:$0xff]  ;;  %v367_v29 = vld [vmem:[%s1506_s3 + $0x1d0] sm:$0xff]  ;;  %364 = vst [vmem:[%s1511_s4 + $0xd8] sm:$0xff] %v363_v27 }
  0x27   : > { %366 = vst [vmem:[%s1511_s4 + $0xe0] sm:$0xff] %v365_v28  ;;  %368 = vst [vmem:[%s1511_s4 + $0xe8] sm:$0xff] %v367_v29  ;;  %v369_v30 = vld [vmem:[%s1506_s3 + $0x1e0] sm:$0xff]  ;;  %v371_v31 = vld [vmem:[%s1506_s3 + $0x1f0] sm:$0xff] }
  0x28   : > { %v373_v32 = vld [vmem:[%s1506_s3 + $0x200] sm:$0xff]  ;;  %370 = vst [vmem:[%s1511_s4 + $0xf0] sm:$0xff] %v369_v30  ;;  %372 = vst [vmem:[%s1511_s4 + $0xf8] sm:$0xff] %v371_v31  ;;  %v375_v33 = vld [vmem:[%s1506_s3 + $0x210] sm:$0xff] }
  0x29   : > { %374 = vst [vmem:[%s1511_s4 + $0x100] sm:$0xff] %v373_v32  ;;  %v377_v34 = vld [vmem:[%s1506_s3 + $0x220] sm:$0xff]  ;;  %v379_v35 = vld [vmem:[%s1506_s3 + $0x230] sm:$0xff]  ;;  %376 = vst [vmem:[%s1511_s4 + $0x108] sm:$0xff] %v375_v33 }
  0x2a   : > { %378 = vst [vmem:[%s1511_s4 + $0x110] sm:$0xff] %v377_v34  ;;  %380 = vst [vmem:[%s1511_s4 + $0x118] sm:$0xff] %v379_v35  ;;  %v381_v36 = vld [vmem:[%s1506_s3 + $0x240] sm:$0xff]  ;;  %v383_v37 = vld [vmem:[%s1506_s3 + $0x250] sm:$0xff] }
  0x2b   : > { %v385_v38 = vld [vmem:[%s1506_s3 + $0x260] sm:$0xff]  ;;  %382 = vst [vmem:[%s1511_s4 + $0x120] sm:$0xff] %v381_v36  ;;  %384 = vst [vmem:[%s1511_s4 + $0x128] sm:$0xff] %v383_v37  ;;  %v387_v39 = vld [vmem:[%s1506_s3 + $0x270] sm:$0xff] }
  0x2c   : > { %386 = vst [vmem:[%s1511_s4 + $0x130] sm:$0xff] %v385_v38  ;;  %v389_v40 = vld [vmem:[%s1506_s3 + $0x280] sm:$0xff]  ;;  %v391_v41 = vld [vmem:[%s1506_s3 + $0x290] sm:$0xff]  ;;  %388 = vst [vmem:[%s1511_s4 + $0x138] sm:$0xff] %v387_v39 }
  0x2d   : > { %390 = vst [vmem:[%s1511_s4 + $0x140] sm:$0xff] %v389_v40  ;;  %392 = vst [vmem:[%s1511_s4 + $0x148] sm:$0xff] %v391_v41  ;;  %v393_v42 = vld [vmem:[%s1506_s3 + $0x2a0] sm:$0xff]  ;;  %v395_v43 = vld [vmem:[%s1506_s3 + $0x2b0] sm:$0xff] }
  0x2e   : > { %v397_v44 = vld [vmem:[%s1506_s3 + $0x2c0] sm:$0xff]  ;;  %394 = vst [vmem:[%s1511_s4 + $0x150] sm:$0xff] %v393_v42  ;;  %396 = vst [vmem:[%s1511_s4 + $0x158] sm:$0xff] %v395_v43  ;;  %v399_v45 = vld [vmem:[%s1506_s3 + $0x2d0] sm:$0xff] }
  0x2f   : > { %398 = vst [vmem:[%s1511_s4 + $0x160] sm:$0xff] %v397_v44  ;;  %v401_v46 = vld [vmem:[%s1506_s3 + $0x2e0] sm:$0xff]  ;;  %v403_v47 = vld [vmem:[%s1506_s3 + $0x2f0] sm:$0xff]  ;;  %400 = vst [vmem:[%s1511_s4 + $0x168] sm:$0xff] %v399_v45 }
  0x30   : > { %402 = vst [vmem:[%s1511_s4 + $0x170] sm:$0xff] %v401_v46  ;;  %404 = vst [vmem:[%s1511_s4 + $0x178] sm:$0xff] %v403_v47  ;;  %v405_v48 = vld [vmem:[%s1506_s3 + $0x300] sm:$0xff]  ;;  %v407_v49 = vld [vmem:[%s1506_s3 + $0x310] sm:$0xff] }
  0x31   : > { %v409_v50 = vld [vmem:[%s1506_s3 + $0x320] sm:$0xff]  ;;  %406 = vst [vmem:[%s1511_s4 + $0x180] sm:$0xff] %v405_v48  ;;  %408 = vst [vmem:[%s1511_s4 + $0x188] sm:$0xff] %v407_v49  ;;  %v411_v51 = vld [vmem:[%s1506_s3 + $0x330] sm:$0xff] }
  0x32   : > { %410 = vst [vmem:[%s1511_s4 + $0x190] sm:$0xff] %v409_v50  ;;  %v413_v52 = vld [vmem:[%s1506_s3 + $0x340] sm:$0xff]  ;;  %v415_v53 = vld [vmem:[%s1506_s3 + $0x350] sm:$0xff]  ;;  %412 = vst [vmem:[%s1511_s4 + $0x198] sm:$0xff] %v411_v51 }
  0x33   : > { %414 = vst [vmem:[%s1511_s4 + $0x1a0] sm:$0xff] %v413_v52  ;;  %416 = vst [vmem:[%s1511_s4 + $0x1a8] sm:$0xff] %v415_v53  ;;  %v417_v54 = vld [vmem:[%s1506_s3 + $0x360] sm:$0xff]  ;;  %v419_v55 = vld [vmem:[%s1506_s3 + $0x370] sm:$0xff] }
  0x34   : > { %v421_v56 = vld [vmem:[%s1506_s3 + $0x380] sm:$0xff]  ;;  %418 = vst [vmem:[%s1511_s4 + $0x1b0] sm:$0xff] %v417_v54  ;;  %420 = vst [vmem:[%s1511_s4 + $0x1b8] sm:$0xff] %v419_v55  ;;  %v423_v57 = vld [vmem:[%s1506_s3 + $0x390] sm:$0xff] }
  0x35   : > { %422 = vst [vmem:[%s1511_s4 + $0x1c0] sm:$0xff] %v421_v56  ;;  %v425_v58 = vld [vmem:[%s1506_s3 + $0x3a0] sm:$0xff]  ;;  %v427_v59 = vld [vmem:[%s1506_s3 + $0x3b0] sm:$0xff]  ;;  %424 = vst [vmem:[%s1511_s4 + $0x1c8] sm:$0xff] %v423_v57 }
  0x36   : > { %426 = vst [vmem:[%s1511_s4 + $0x1d0] sm:$0xff] %v425_v58  ;;  %428 = vst [vmem:[%s1511_s4 + $0x1d8] sm:$0xff] %v427_v59  ;;  %v429_v60 = vld [vmem:[%s1506_s3 + $0x3c0] sm:$0xff]  ;;  %v431_v61 = vld [vmem:[%s1506_s3 + $0x3d0] sm:$0xff] }
  0x37   : > { %v433_v62 = vld [vmem:[%s1506_s3 + $0x3e0] sm:$0xff]  ;;  %430 = vst [vmem:[%s1511_s4 + $0x1e0] sm:$0xff] %v429_v60  ;;  %432 = vst [vmem:[%s1511_s4 + $0x1e8] sm:$0xff] %v431_v61  ;;  %v435_v63 = vld [vmem:[%s1506_s3 + $0x3f0] sm:$0xff] }
  0x38   : > { %434 = vst [vmem:[%s1511_s4 + $0x1f0] sm:$0xff] %v433_v62  ;;  %436 = vst [vmem:[%s1511_s4 + $0x1f8] sm:$0xff] %v435_v63 }
  0x39 PF: > { %p1136_p7 = scmp.ge.s32.totalorder %s1428_s15, 1  ;;  %p441_p8 = scmp.lt.s32.totalorder %s1428_s15, 11 }
  0x3b   : > { %p442_p9 = pnand %p1136_p7, %p441_p8 }
  0x3c   : > { %s448_s5 = sand.u32 (!%p442_p9), 1, %s1404_s9   ;;  %s1138_s6 = sshll.u32 (!%p442_p9), %s1412_s11, 2 }
  0x3d   : > { %445 = sbr.rel (%p442_p9) target bundleno = 372 (0x174), region = 62  ;;  %s1137_s7 = sshll.u32 (!%p442_p9), %s448_s5, 9 }
  0x3e   : > { %p485_p10 = scmp.lt.s32.totalorder (!%p442_p9), %s1138_s6, 19  ;;  %s1140_s8 = sshll.u32 (!%p442_p9), %s1416_s12, 1 }
  0x3f   : > { %p497_p11 = scmp.lt.s32.totalorder (!%p442_p9), %s1140_s8, 3  ;;  %s1653_s9 = scalar_lea.vmem (!%p442_p9), [#allocation3], %s1137_s7 }
  0x40   : > { %p1142_p12 = scmp.ne.s32.totalorder (!%p442_p9), %s1412_s11, 0 }
  0x44   : > { %s1761_s6 = smov (!%p485_p10, %s1138_s6), 19  ;;  %s1763_s8 = smov (!%p497_p11, %s1140_s8), 3 }
  0x45   : > { %s1139_s18 = sshll.u32 %s1761_s6, 2  ;;  %s1141_s23 = sshll.u32 %s1763_s8, 2  ;;  %v1430_v0 = vmov (!%p1142_p12), 0.0  }
  0x46   : > { %s1646_s21 = scalar_lea.vmem %s1745_s0, %s1139_s18  ;;  %s1651_s26 = scalar_lea.vmem %s1747_s2, %s1141_s23  ;;  %508 = vst [vmem:[#allocation2] sm:$0xff] (!%p1142_p12), %v1430_v0  ;;  %509 = vst [vmem:[#allocation2 + $0x8] sm:$0xff] (!%p1142_p12), %v1430_v0 }
  0x47   : > { %507 = sbr.rel (%p1142_p12) target bundleno = 78 (0x4e), region = 70 }
  0x4e PF: > { %v1274_v1 = vld [vmem:[%s1653_s9 + $0x4] ss:$8 sps:$4 sm:$0xff]   ;;  %v1278_v3 = vld [vmem:[%s1653_s9] ss:$8 sps:$4 sm:$0xff]   ;;  %v1280_v5 = vld [vmem:[%s1653_s9 + $0x14] ss:$8 sps:$4 sm:$0xff]  }
  0x4f   : > { %v1276_v2 = vld [vmem:[%s1653_s9 + $0x104] ss:$8 sps:$4 sm:$0xff]   ;;  %912 = vmatprep.subr.bf16.mxu0 %v1274_v1  ;;  %v1279_v4 = vld [vmem:[%s1653_s9 + $0x100] ss:$8 sps:$4 sm:$0xff]   ;;  %v1282_v6 = vld [vmem:[%s1653_s9 + $0x114] ss:$8 sps:$4 sm:$0xff]  }
  0x50   : > { %953 = vmatprep.subr.bf16.mxu1 %v1276_v2  ;;  %913 = vmatpush1.bf16.msra.mxu0 %v1278_v3  ;;  %v1284_v7 = vld [vmem:[%s1653_s9 + $0x10] ss:$8 sps:$4 sm:$0xff]   ;;  %v1286_v9 = vld [vmem:[%s1653_s9 + $0x24] ss:$8 sps:$4 sm:$0xff]   ;;  %v1290_v11 = vld [vmem:[%s1653_s9 + $0x20] ss:$8 sps:$4 sm:$0xff]  }
  0x51   : > { %954 = vmatpush1.bf16.msra.mxu1 %v1279_v4  ;;  %914 = vmatprep.subr.bf16.mxu0 %v1280_v5  ;;  %v1285_v8 = vld [vmem:[%s1653_s9 + $0x110] ss:$8 sps:$4 sm:$0xff]   ;;  %v1288_v10 = vld [vmem:[%s1653_s9 + $0x124] ss:$8 sps:$4 sm:$0xff]   ;;  %v1291_v12 = vld [vmem:[%s1653_s9 + $0x120] ss:$8 sps:$4 sm:$0xff]  }
  0x52   : > { %955 = vmatprep.subr.bf16.mxu1 %v1282_v6  ;;  %v1292_v13 = vld [vmem:[%s1653_s9 + $0x34] ss:$8 sps:$4 sm:$0xff]   ;;  %v1296_v15 = vld [vmem:[%s1653_s9 + $0x30] ss:$8 sps:$4 sm:$0xff]   ;;  %v1298_v17 = vld [vmem:[%s1653_s9 + $0x44] ss:$8 sps:$4 sm:$0xff]  }
  0x53   : > { %v1294_v14 = vld [vmem:[%s1653_s9 + $0x134] ss:$8 sps:$4 sm:$0xff]   ;;  %v1297_v16 = vld [vmem:[%s1653_s9 + $0x130] ss:$8 sps:$4 sm:$0xff]   ;;  %v1300_v18 = vld [vmem:[%s1653_s9 + $0x144] ss:$8 sps:$4 sm:$0xff]  }
  0x54   : > { %915 = vmatpush1.bf16.msra.mxu0 %v1284_v7  ;;  %v1302_v19 = vld [vmem:[%s1653_s9 + $0x40] ss:$8 sps:$4 sm:$0xff]   ;;  %v1304_v21 = vld [vmem:[%s1653_s9 + $0x54] ss:$8 sps:$4 sm:$0xff]   ;;  %v1308_v23 = vld [vmem:[%s1653_s9 + $0x50] ss:$8 sps:$4 sm:$0xff]  }
  0x55   : > { %956 = vmatpush1.bf16.msra.mxu1 %v1285_v8  ;;  %916 = vmatprep.subr.bf16.mxu0 %v1286_v9  ;;  %v1303_v20 = vld [vmem:[%s1653_s9 + $0x140] ss:$8 sps:$4 sm:$0xff]   ;;  %v1306_v22 = vld [vmem:[%s1653_s9 + $0x154] ss:$8 sps:$4 sm:$0xff]   ;;  %v1309_v24 = vld [vmem:[%s1653_s9 + $0x150] ss:$8 sps:$4 sm:$0xff]  }
  0x56   : > { %957 = vmatprep.subr.bf16.mxu1 %v1288_v10  ;;  %v1310_v25 = vld [vmem:[%s1653_s9 + $0x64] ss:$8 sps:$4 sm:$0xff]   ;;  %v1314_v27 = vld [vmem:[%s1653_s9 + $0x60] ss:$8 sps:$4 sm:$0xff]   ;;  %v1316_v29 = vld [vmem:[%s1653_s9 + $0x74] ss:$8 sps:$4 sm:$0xff]  }
  0x57   : > { %v1312_v26 = vld [vmem:[%s1653_s9 + $0x164] ss:$8 sps:$4 sm:$0xff]   ;;  %v1315_v28 = vld [vmem:[%s1653_s9 + $0x160] ss:$8 sps:$4 sm:$0xff]   ;;  %v1318_v30 = vld [vmem:[%s1653_s9 + $0x174] ss:$8 sps:$4 sm:$0xff]  }
  0x58   : > { %917 = vmatpush1.bf16.msra.mxu0 %v1290_v11  ;;  %v1320_v31 = vld [vmem:[%s1653_s9 + $0x70] ss:$8 sps:$4 sm:$0xff]   ;;  %v1322_v33 = vld [vmem:[%s1653_s9 + $0x84] ss:$8 sps:$4 sm:$0xff]   ;;  %v1326_v35 = vld [vmem:[%s1653_s9 + $0x80] ss:$8 sps:$4 sm:$0xff]  }
  0x59   : > { %958 = vmatpush1.bf16.msra.mxu1 %v1291_v12  ;;  %918 = vmatprep.subr.bf16.mxu0 %v1292_v13  ;;  %v1321_v32 = vld [vmem:[%s1653_s9 + $0x170] ss:$8 sps:$4 sm:$0xff]   ;;  %v1324_v34 = vld [vmem:[%s1653_s9 + $0x184] ss:$8 sps:$4 sm:$0xff]   ;;  %v1327_v36 = vld [vmem:[%s1653_s9 + $0x180] ss:$8 sps:$4 sm:$0xff]  }
  0x5a   : > { %959 = vmatprep.subr.bf16.mxu1 %v1294_v14  ;;  %v1328_v37 = vld [vmem:[%s1653_s9 + $0x94] ss:$8 sps:$4 sm:$0xff]   ;;  %v1332_v39 = vld [vmem:[%s1653_s9 + $0x90] ss:$8 sps:$4 sm:$0xff]   ;;  %v1334_v41 = vld [vmem:[%s1653_s9 + $0xa4] ss:$8 sps:$4 sm:$0xff]  }
  0x5b   : > { %v1330_v38 = vld [vmem:[%s1653_s9 + $0x194] ss:$8 sps:$4 sm:$0xff]   ;;  %v1333_v40 = vld [vmem:[%s1653_s9 + $0x190] ss:$8 sps:$4 sm:$0xff]   ;;  %v1336_v42 = vld [vmem:[%s1653_s9 + $0x1a4] ss:$8 sps:$4 sm:$0xff]  }
  0x5c   : > { %919 = vmatpush1.bf16.msra.mxu0 %v1296_v15  ;;  %v1338_v43 = vld [vmem:[%s1653_s9 + $0xa0] ss:$8 sps:$4 sm:$0xff]   ;;  %v1340_v45 = vld [vmem:[%s1653_s9 + $0xb4] ss:$8 sps:$4 sm:$0xff]   ;;  %v1344_v50 = vld [vmem:[%s1653_s9 + $0xb0] ss:$8 sps:$4 sm:$0xff]  }
  0x5d   : > { %960 = vmatpush1.bf16.msra.mxu1 %v1297_v16  ;;  %920 = vmatprep.subr.bf16.mxu0 %v1298_v17  ;;  %v1339_v44 = vld [vmem:[%s1653_s9 + $0x1a0] ss:$8 sps:$4 sm:$0xff]   ;;  %v1342_v46 = vld [vmem:[%s1653_s9 + $0x1b4] ss:$8 sps:$4 sm:$0xff]   ;;  %v1345_v51 = vld [vmem:[%s1653_s9 + $0x1b0] ss:$8 sps:$4 sm:$0xff]  }
  0x5e   : > { %961 = vmatprep.subr.bf16.mxu1 %v1300_v18  ;;  %v512_v47 = vld [vmem:[%s1646_s21] sm:$0xff]  ;;  %v513_v49 = vld [vmem:[%s1646_s21 + $0x8] sm:$0xff]  ;;  %v1346_v53 = vld [vmem:[%s1653_s9 + $0xc4] ss:$8 sps:$4 sm:$0xff]   ;;  %p1211_p13 = scmp.ne.s32.totalorder %s1412_s11, 4 }
  0x5f   : > { %v1144_v48 = vcombine.high %v512_v47, %v512_v47  ;;  %v1146_v52 = vcombine.high %v513_v49, %v513_v49  ;;  %v1348_v54 = vld [vmem:[%s1653_s9 + $0x1c4] ss:$8 sps:$4 sm:$0xff]   ;;  %v1350_v55 = vld [vmem:[%s1653_s9 + $0xc0] ss:$8 sps:$4 sm:$0xff]   ;;  %v1352_v57 = vld [vmem:[%s1653_s9 + $0xd4] ss:$8 sps:$4 sm:$0xff]   ;;  %v1143_v5 = vcombine.low %v512_v47, %v512_v47  ;;  %v1145_v6 = vcombine.low %v513_v49, %v513_v49 }
  0x60   : > { %921 = vmatpush1.bf16.msra.mxu0 %v1302_v19  ;;  %v1351_v56 = vld [vmem:[%s1653_s9 + $0x1c0] ss:$8 sps:$4 sm:$0xff]   ;;  %v1354_v58 = vld [vmem:[%s1653_s9 + $0x1d4] ss:$8 sps:$4 sm:$0xff]   ;;  %v1356_v59 = vld [vmem:[%s1653_s9 + $0xd0] ss:$8 sps:$4 sm:$0xff]  }
  0x61   : > { %962 = vmatpush1.bf16.msra.mxu1 %v1303_v20  ;;  %922 = vmatprep.subr.bf16.mxu0 %v1304_v21  ;;  %v1357_v60 = vld [vmem:[%s1653_s9 + $0x1d0] ss:$8 sps:$4 sm:$0xff]   ;;  %v1358_v61 = vld [vmem:[%s1653_s9 + $0xe4] ss:$8 sps:$4 sm:$0xff]   ;;  %v1362_v63 = vld [vmem:[%s1653_s9 + $0xe0] ss:$8 sps:$4 sm:$0xff]  }
  0x62   : > { %963 = vmatprep.subr.bf16.mxu1 %v1306_v22  ;;  %944 = vmatprep.mubr.bf16.mxu0 %v1144_v48  ;;  %v1360_v62 = vld [vmem:[%s1653_s9 + $0x1e4] ss:$8 sps:$4 sm:$0xff]   ;;  %v1363_v0 = vld [vmem:[%s1653_s9 + $0x1e0] ss:$8 sps:$4 sm:$0xff]   ;;  %v1364_v1 = vld [vmem:[%s1653_s9 + $0xf4] ss:$8 sps:$4 sm:$0xff]  }
  0x63   : > { %985 = vmatprep.mubr.bf16.mxu1 %v1146_v52  ;;  %v1366_v2 = vld [vmem:[%s1653_s9 + $0x1f4] ss:$8 sps:$4 sm:$0xff]   ;;  %v1368_v3 = vld [vmem:[%s1653_s9 + $0xf0] ss:$8 sps:$4 sm:$0xff]  }
  0x64   : > { %923 = vmatpush1.bf16.msra.mxu0 %v1308_v23  ;;  %v1369_v4 = vld [vmem:[%s1653_s9 + $0x1f0] ss:$8 sps:$4 sm:$0xff]  }
  0x65   : > { %964 = vmatpush1.bf16.msra.mxu1 %v1309_v24  ;;  %924 = vmatprep.subr.bf16.mxu0 %v1310_v25  ;;  %v510_v8 = vld [vmem:[#allocation2] sm:$0xff]  ;;  %v511_v12 = vld [vmem:[#allocation2 + $0x8] sm:$0xff] }
  0x66   : > { %965 = vmatprep.subr.bf16.mxu1 %v1312_v26 }
  0x68   : > { %925 = vmatpush1.bf16.msra.mxu0 %v1314_v27 }
  0x69   : > { %966 = vmatpush1.bf16.msra.mxu1 %v1315_v28  ;;  %926 = vmatprep.subr.bf16.mxu0 %v1316_v29 }
  0x6a   : > { %967 = vmatprep.subr.bf16.mxu1 %v1318_v30 }
  0x6c   : > { %927 = vmatpush1.bf16.msra.mxu0 %v1320_v31 }
  0x6d   : > { %968 = vmatpush1.bf16.msra.mxu1 %v1321_v32  ;;  %928 = vmatprep.subr.bf16.mxu0 %v1322_v33 }
  0x6e   : > { %969 = vmatprep.subr.bf16.mxu1 %v1324_v34 }
  0x70   : > { %929 = vmatpush1.bf16.msra.mxu0 %v1326_v35 }
  0x71   : > { %970 = vmatpush1.bf16.msra.mxu1 %v1327_v36  ;;  %930 = vmatprep.subr.bf16.mxu0 %v1328_v37 }
  0x72   : > { %971 = vmatprep.subr.bf16.mxu1 %v1330_v38 }
  0x74   : > { %931 = vmatpush1.bf16.msra.mxu0 %v1332_v39 }
  0x75   : > { %972 = vmatpush1.bf16.msra.mxu1 %v1333_v40  ;;  %932 = vmatprep.subr.bf16.mxu0 %v1334_v41 }
  0x76   : > { %973 = vmatprep.subr.bf16.mxu1 %v1336_v42 }
  0x78   : > { %933 = vmatpush1.bf16.msra.mxu0 %v1338_v43 }
  0x79   : > { %974 = vmatpush1.bf16.msra.mxu1 %v1339_v44  ;;  %934 = vmatprep.subr.bf16.mxu0 %v1340_v45 }
  0x7a   : > { %975 = vmatprep.subr.bf16.mxu1 %v1342_v46 }
  0x7c   : > { %935 = vmatpush1.bf16.msra.mxu0 %v1344_v50 }
  0x7d   : > { %976 = vmatpush1.bf16.msra.mxu1 %v1345_v51  ;;  %936 = vmatprep.subr.bf16.mxu0 %v1346_v53 }
  0x7e   : > { %977 = vmatprep.subr.bf16.mxu1 %v1348_v54 }
  0x80   : > { %937 = vmatpush1.bf16.msra.mxu0 %v1350_v55 }
  0x81   : > { %978 = vmatpush1.bf16.msra.mxu1 %v1351_v56  ;;  %938 = vmatprep.subr.bf16.mxu0 %v1352_v57 }
  0x82   : > { %979 = vmatprep.subr.bf16.mxu1 %v1354_v58 }
  0x84   : > { %939 = vmatpush1.bf16.msra.mxu0 %v1356_v59 }
  0x85   : > { %980 = vmatpush1.bf16.msra.mxu1 %v1357_v60  ;;  %940 = vmatprep.subr.bf16.mxu0 %v1358_v61 }
  0x86   : > { %981 = vmatprep.subr.bf16.mxu1 %v1360_v62 }
  0x88   : > { %941 = vmatpush1.bf16.msra.mxu0 %v1362_v63 }
  0x89   : > { %982 = vmatpush1.bf16.msra.mxu1 %v1363_v0  ;;  %942 = vmatprep.subr.bf16.mxu0 %v1364_v1 }
  0x8a   : > { %983 = vmatprep.subr.bf16.mxu1 %v1366_v2 }
  0x8c   : > { %943 = vmatpush1.bf16.msra.mxu0 %v1368_v3 }
  0x8d   : > { %984 = vmatpush1.bf16.msra.mxu1 %v1369_v4 }
  0x8f   : > { %945 = vmatmul.mubr.bf16.vlgmr.msra.gmra.mrb[0].mxu0 %v1143_v5 }
  0x90   : > { %986 = vmatmul.mubr.bf16.vlgmr.msra.gmra.mrb[0].mxu1 %v1145_v6 }
 0x162   : > { %v946_v7 = vpop.f32.mrb[0].mxu0 }
 0x163   : > { %v987_v9 = vpop.f32.mrb[0].mxu1  ;;  %v948_v11 = vpop.f32.mrb[1].mxu0  ;;  %1001 = sbr.rel (%p1211_p13) target bundleno = 372 (0x174), region = 74 }
 0x164   : > { %v988_v10 = vadd.f32 %v987_v9, %v946_v7  ;;  %v989_v13 = vpop.f32.mrb[1].mxu1  ;;  %v950_v15 = vpop.f32.mrb[2].mxu0 }
 0x165   : > { %v990_v14 = vadd.f32 %v989_v13, %v948_v11  ;;  %v991_v16 = vpop.f32.mrb[2].mxu1  ;;  %v951_v18 = vpop.f32.mrb[3].mxu0 }
 0x166   : > { %v994_v17 = vadd.f32 %v988_v10, %v510_v8  ;;  %v992_v19 = vpop.f32.mrb[3].mxu1 }
 0x167   : > { %v995_v20 = vadd.f32 %v990_v14, %v511_v12 }
 0x168   : > { %996 = vst [vmem:[#allocation2] sm:$0xff] %v994_v17 }
 0x169   : > { %997 = vst [vmem:[#allocation2 + $0x8] sm:$0xff] %v995_v20 }
 0x16f   : > { %v1002_v21 = vld [vmem:[#allocation2] sm:$0xff] }
 0x170   : > { %v1003_v22 = vld [vmem:[#allocation2 + $0x8] sm:$0xff] }
 0x171   : > { %v1216_v23 = vpack.c.bf16 %v1003_v22, %v1002_v21 }
 0x173   : > { %1012 = vst [vmem:[%s1651_s26] sm:$0xff] %v1216_v23 }
 0x174 PF: > { %s12_s15 = sadd.s32 1, %s1428_s15   ;;  %s1748_s9 = smov %s1408_s10 }
 0x175   : > { %p9_p0 = scmp.ge.s32.totalorder %s12_s15, 12   ;;  %s1749_s10 = smov %s1497_s22 }
 0x176   : > { %s1750_s11 = smov %s1420_s13  ;;  %s1751_s12 = smov %s1424_s14 }
 0x177   : > { %s1752_s13 = smov %s1755_s16  ;;  %s1753_s14 = smov %s1759_s17 }
 0x178   :  { %11 = sbr.rel (!%p9_p0) target bundleno = 4 (0x4), region = 112 }

// kernel: simple_resnet_forward.75
= control target key start
LH: loop header
LB: loop body
LE: loop exit
PB: predicated region body
PF: predicated region fallthrough
CT: control target
= control target key end

     0   :  { %v22_v0 = vlaneseq  ;;  %s140_s0 = inlined_call_operand.vmem [shape: bf16[8,512], index: 0, kind: input, shape index: {}]   ;;  %s141_s1 = inlined_call_operand.vmem [shape: f32[1,512], index: 1, kind: input, shape index: {}]   ;;  %s142_s2 = inlined_call_operand.vmem [shape: f32[1,512], index: 2, kind: input, shape index: {}]   ;;  %s143_s3 = inlined_call_operand.vmem [shape: bf16[8,512], index: 3, kind: output, shape index: {}]  }
   0x1   :  { %v14_v1 = vld [vmem:[%s140_s0] sm:$0xff]  ;;  %v15_v3 = vld [vmem:[%s140_s0 + $0x8] sm:$0xff] }
   0x2   :  { %v23_v2 = vshrl.u32 %v22_v0, 7  ;;  %v16_v4 = vunpack.c.l.bf16 %v14_v1  ;;  %v17_v5 = vunpack.c.h.bf16 %v14_v1  ;;  %v20_v6 = vld [vmem:[%s141_s1] sm:$0xf]  ;;  %v18_v12 = vunpack.c.l.bf16 %v15_v3 }
   0x3   :  { %v46_v7 = vld [vmem:[%s142_s2] sm:$0xf]  ;;  %v19_v13 = vunpack.c.h.bf16 %v15_v3 }
   0x4   :  { %v24_v8 = vsub.s32 0, %v23_v2  ;;  %v28_v9 = vsub.s32 1, %v23_v2  ;;  %v32_v10 = vsub.s32 2, %v23_v2  ;;  %v36_v11 = vsub.s32 3, %v23_v2 }
   0x6   :  { %v25_v14 = vrot.slane %v20_v6, %v24_v8  ;;  %v29_v15 = vrot.slane %v20_v6, %v28_v9  ;;  %v51_v16 = vrot.slane %v46_v7, %v24_v8  ;;  %v55_v17 = vrot.slane %v46_v7, %v28_v9 }
   0x7   :  { %v33_v18 = vrot.slane %v20_v6, %v32_v10  ;;  %v37_v19 = vrot.slane %v20_v6, %v36_v11  ;;  %v59_v20 = vrot.slane %v46_v7, %v32_v10  ;;  %v63_v21 = vrot.slane %v46_v7, %v36_v11 }
   0x8   :  { %v42_v22 = vmul.f32 %v25_v14, %v16_v4  ;;  %v43_v23 = vmul.f32 %v29_v15, %v17_v5 }
   0x9   :  { %v44_v24 = vmul.f32 %v33_v18, %v18_v12  ;;  %v45_v25 = vmul.f32 %v37_v19, %v19_v13 }
   0xa   :  { %v68_v26 = vadd.f32 %v51_v16, %v42_v22  ;;  %v69_v27 = vadd.f32 %v55_v17, %v43_v23 }
   0xb   :  { %v70_v28 = vadd.f32 %v59_v20, %v44_v24  ;;  %v71_v29 = vadd.f32 %v63_v21, %v45_v25 }
   0xc   :  { %v72_v30 = vmax.f32 %v68_v26, 0.0  ;;  %v73_v31 = vmax.f32 %v69_v27, 0.0 }
   0xd   :  { %v74_v32 = vmax.f32 %v70_v28, 0.0  ;;  %v75_v33 = vmax.f32 %v71_v29, 0.0 }
   0xe   :  { %v100_v34 = vpack.c.bf16 %v73_v31, %v72_v30 }
   0xf   :  { %v101_v35 = vpack.c.bf16 %v75_v33, %v74_v32 }
  0x10   :  { %92 = vst [vmem:[%s143_s3] sm:$0xff] %v100_v34 }
  0x11   :  { %93 = vst [vmem:[%s143_s3 + $0x8] sm:$0xff] %v101_v35 }

// kernel: simple_resnet_forward.77
= control target key start
LH: loop header
LB: loop body
LE: loop exit
PB: predicated region body
PF: predicated region fallthrough
CT: control target
= control target key end

     0   :  { %s953_s9 = smov 0   ;;  %s955_s10 = smov 0   ;;  %s1129_s0 = inlined_call_operand.vmem [shape: bf16[8,256], index: 0, kind: input, shape index: {}]   ;;  %s1130_s1 = inlined_call_operand.vmem [shape: bf16[256,512], index: 1, kind: input, shape index: {}]   ;;  %s1131_s2 = inlined_call_operand.vmem [shape: bf16[8,512], index: 2, kind: output, shape index: {}]  }
   0x1   :  { %s957_s11 = smov 0   ;;  %s959_s12 = smov 0  }
   0x2   :  { %s961_s13 = smov 0  }
   0x3 LB: > { %s27_s14 = sadd.s32 1, %s932_s12  ;;  %p75_p1 = scmp.ne.s32.totalorder %s924_s10, %s920_s9  ;;  %s936_s13 = sphi %s961_s13, %s12_s13   ;;  %s932_s12 = sphi %s959_s12, %s1135_s12   ;;  %s928_s11 = sphi %s957_s11, %s1134_s11   ;;  %s924_s10 = sphi %s955_s10, %s1133_s10   ;;  %s920_s9 = sphi %s953_s9, %s1132_s9  }
   0x4   : > { %p29_p0 = scmp.ge.s32.totalorder %s27_s14, 2  ;;  %p76_p2 = scmp.eq.s32.totalorder %s936_s13, 0 }
   0x5   : > { %s68_s16 = sadd.s32 1, %s924_s10  ;;  %p761_p5 = scmp.ge.s32.totalorder %s936_s13, 2 }
   0x6   : > { %s1137_s14 = smov (%p29_p0, %s27_s14), 0  ;;  %p77_p3 = por %p76_p2, %p75_p1 }
   0x7   : > { %s64_s15 = ssub.s32 %s932_s12, %s1137_s14  ;;  %142 = sbr.rel (%p761_p5) target bundleno = 34 (0x22), region = 20 }
   0x8   : > { %p66_p4 = scmp.eq.s32.totalorder %s64_s15, 0 }
   0xa   : > { %s988_s17 = scalar_select %p66_p4, %s924_s10, %s68_s16  }
   0xe   : > { %145 = sbr.rel (!%p77_p3) target bundleno = 34 (0x22), region = 24  ;;  %s147_s18 = sand.u32 (%p77_p3), 1, %s924_s10  }
   0xf   : > { %s806_s19 = sshll.u32 (%p77_p3), %s932_s12, 3  ;;  %s762_s20 = sshll.u32 (%p77_p3), %s147_s18, 8 }
  0x10   : > { %s996_s23 = scalar_lea.vmem (%p77_p3), %s1130_s1, %s806_s19  ;;  %s1001_s24 = scalar_lea.vmem (%p77_p3), [#allocation3], %s762_s20 }
  0x11   : > { %v245_v0 = vld [vmem:[%s996_s23] sm:$0xff] (%p77_p3)  ;;  %v247_v1 = vld [vmem:[%s996_s23 + $0x10] sm:$0xff] (%p77_p3) }
  0x12   : > { %v249_v2 = vld [vmem:[%s996_s23 + $0x20] sm:$0xff] (%p77_p3)  ;;  %246 = vst [vmem:[%s1001_s24] sm:$0xff] (%p77_p3), %v245_v0  ;;  %248 = vst [vmem:[%s1001_s24 + $0x8] sm:$0xff] (%p77_p3), %v247_v1  ;;  %v251_v3 = vld [vmem:[%s996_s23 + $0x30] sm:$0xff] (%p77_p3) }
  0x13   : > { %250 = vst [vmem:[%s1001_s24 + $0x10] sm:$0xff] (%p77_p3), %v249_v2  ;;  %v253_v4 = vld [vmem:[%s996_s23 + $0x40] sm:$0xff] (%p77_p3)  ;;  %v255_v5 = vld [vmem:[%s996_s23 + $0x50] sm:$0xff] (%p77_p3)  ;;  %252 = vst [vmem:[%s1001_s24 + $0x18] sm:$0xff] (%p77_p3), %v251_v3 }
  0x14   : > { %254 = vst [vmem:[%s1001_s24 + $0x20] sm:$0xff] (%p77_p3), %v253_v4  ;;  %256 = vst [vmem:[%s1001_s24 + $0x28] sm:$0xff] (%p77_p3), %v255_v5  ;;  %v257_v6 = vld [vmem:[%s996_s23 + $0x60] sm:$0xff] (%p77_p3)  ;;  %v259_v7 = vld [vmem:[%s996_s23 + $0x70] sm:$0xff] (%p77_p3) }
  0x15   : > { %v261_v8 = vld [vmem:[%s996_s23 + $0x80] sm:$0xff]  ;;  %258 = vst [vmem:[%s1001_s24 + $0x30] sm:$0xff] %v257_v6  ;;  %260 = vst [vmem:[%s1001_s24 + $0x38] sm:$0xff] %v259_v7  ;;  %v263_v9 = vld [vmem:[%s996_s23 + $0x90] sm:$0xff] }
  0x16   : > { %262 = vst [vmem:[%s1001_s24 + $0x40] sm:$0xff] %v261_v8  ;;  %v265_v10 = vld [vmem:[%s996_s23 + $0xa0] sm:$0xff]  ;;  %v267_v11 = vld [vmem:[%s996_s23 + $0xb0] sm:$0xff]  ;;  %264 = vst [vmem:[%s1001_s24 + $0x48] sm:$0xff] %v263_v9 }
  0x17   : > { %266 = vst [vmem:[%s1001_s24 + $0x50] sm:$0xff] %v265_v10  ;;  %268 = vst [vmem:[%s1001_s24 + $0x58] sm:$0xff] %v267_v11  ;;  %v269_v12 = vld [vmem:[%s996_s23 + $0xc0] sm:$0xff]  ;;  %v271_v13 = vld [vmem:[%s996_s23 + $0xd0] sm:$0xff] }
  0x18   : > { %v273_v14 = vld [vmem:[%s996_s23 + $0xe0] sm:$0xff]  ;;  %270 = vst [vmem:[%s1001_s24 + $0x60] sm:$0xff] %v269_v12  ;;  %272 = vst [vmem:[%s1001_s24 + $0x68] sm:$0xff] %v271_v13  ;;  %v275_v15 = vld [vmem:[%s996_s23 + $0xf0] sm:$0xff] }
  0x19   : > { %274 = vst [vmem:[%s1001_s24 + $0x70] sm:$0xff] %v273_v14  ;;  %v277_v16 = vld [vmem:[%s996_s23 + $0x100] sm:$0xff]  ;;  %v279_v17 = vld [vmem:[%s996_s23 + $0x110] sm:$0xff]  ;;  %276 = vst [vmem:[%s1001_s24 + $0x78] sm:$0xff] %v275_v15 }
  0x1a   : > { %278 = vst [vmem:[%s1001_s24 + $0x80] sm:$0xff] %v277_v16  ;;  %280 = vst [vmem:[%s1001_s24 + $0x88] sm:$0xff] %v279_v17  ;;  %v281_v18 = vld [vmem:[%s996_s23 + $0x120] sm:$0xff]  ;;  %v283_v19 = vld [vmem:[%s996_s23 + $0x130] sm:$0xff] }
  0x1b   : > { %v285_v20 = vld [vmem:[%s996_s23 + $0x140] sm:$0xff]  ;;  %282 = vst [vmem:[%s1001_s24 + $0x90] sm:$0xff] %v281_v18  ;;  %284 = vst [vmem:[%s1001_s24 + $0x98] sm:$0xff] %v283_v19  ;;  %v287_v21 = vld [vmem:[%s996_s23 + $0x150] sm:$0xff] }
  0x1c   : > { %286 = vst [vmem:[%s1001_s24 + $0xa0] sm:$0xff] %v285_v20  ;;  %v289_v22 = vld [vmem:[%s996_s23 + $0x160] sm:$0xff]  ;;  %v291_v23 = vld [vmem:[%s996_s23 + $0x170] sm:$0xff]  ;;  %288 = vst [vmem:[%s1001_s24 + $0xa8] sm:$0xff] %v287_v21 }
  0x1d   : > { %290 = vst [vmem:[%s1001_s24 + $0xb0] sm:$0xff] %v289_v22  ;;  %292 = vst [vmem:[%s1001_s24 + $0xb8] sm:$0xff] %v291_v23  ;;  %v293_v24 = vld [vmem:[%s996_s23 + $0x180] sm:$0xff]  ;;  %v295_v25 = vld [vmem:[%s996_s23 + $0x190] sm:$0xff] }
  0x1e   : > { %v297_v26 = vld [vmem:[%s996_s23 + $0x1a0] sm:$0xff]  ;;  %294 = vst [vmem:[%s1001_s24 + $0xc0] sm:$0xff] %v293_v24  ;;  %296 = vst [vmem:[%s1001_s24 + $0xc8] sm:$0xff] %v295_v25  ;;  %v299_v27 = vld [vmem:[%s996_s23 + $0x1b0] sm:$0xff] }
  0x1f   : > { %298 = vst [vmem:[%s1001_s24 + $0xd0] sm:$0xff] %v297_v26  ;;  %v301_v28 = vld [vmem:[%s996_s23 + $0x1c0] sm:$0xff]  ;;  %v303_v29 = vld [vmem:[%s996_s23 + $0x1d0] sm:$0xff]  ;;  %300 = vst [vmem:[%s1001_s24 + $0xd8] sm:$0xff] %v299_v27 }
  0x20   : > { %302 = vst [vmem:[%s1001_s24 + $0xe0] sm:$0xff] %v301_v28  ;;  %304 = vst [vmem:[%s1001_s24 + $0xe8] sm:$0xff] %v303_v29  ;;  %v305_v30 = vld [vmem:[%s996_s23 + $0x1e0] sm:$0xff]  ;;  %v307_v31 = vld [vmem:[%s996_s23 + $0x1f0] sm:$0xff] }
  0x21   : > { %306 = vst [vmem:[%s1001_s24 + $0xf0] sm:$0xff] %v305_v30  ;;  %308 = vst [vmem:[%s1001_s24 + $0xf8] sm:$0xff] %v307_v31 }
  0x22 PF: > { %p765_p6 = scmp.ge.s32.totalorder %s936_s13, 1  ;;  %p313_p7 = scmp.lt.s32.totalorder %s936_s13, 3 }
  0x24   : > { %p314_p8 = pnand %p765_p6, %p313_p7 }
  0x25   : > { %s320_s25 = sand.u32 (!%p314_p8), 1, %s920_s9   ;;  %v1070_v32 = vld [vmem:[%s1129_s0] sm:$0xff] (!%p314_p8)  ;;  %s767_s30 = sshll.u32 (!%p314_p8), %s928_s11, 1 }
  0x26   : > { %317 = sbr.rel (%p314_p8) target bundleno = 321 (0x141), region = 62  ;;  %s766_s28 = sshll.u32 (!%p314_p8), %s320_s25, 8  ;;  %v770_v33 = vcombine.high (!%p314_p8), %v1070_v32, %v1070_v32  ;;  %v769_v2 = vcombine.low (!%p314_p8), %v1070_v32, %v1070_v32 }
  0x27   : > { %s1074_s29 = scalar_lea.vmem (!%p314_p8), [#allocation3], %s766_s28  ;;  %p369_p9 = scmp.lt.s32.totalorder (!%p314_p8), %s767_s30, 3 }
  0x28   : > { %v848_v34 = vld [vmem:[%s1074_s29 + $0x4] ss:$8 sps:$4 sm:$0xff] (!%p314_p8)   ;;  %616 = vmatprep.mubr.bf16.mxu0 (!%p314_p8), %v770_v33  ;;  %v850_v35 = vld [vmem:[%s1074_s29] ss:$8 sps:$4 sm:$0xff] (!%p314_p8)   ;;  %v851_v36 = vld [vmem:[%s1074_s29 + $0x14] ss:$8 sps:$4 sm:$0xff] (!%p314_p8)  }
  0x29   : > { %584 = vmatprep.subr.bf16.mxu0 (!%p314_p8), %v848_v34  ;;  %v853_v37 = vld [vmem:[%s1074_s29 + $0x10] ss:$8 sps:$4 sm:$0xff] (!%p314_p8)   ;;  %v854_v38 = vld [vmem:[%s1074_s29 + $0x24] ss:$8 sps:$4 sm:$0xff] (!%p314_p8)   ;;  %v856_v39 = vld [vmem:[%s1074_s29 + $0x20] ss:$8 sps:$4 sm:$0xff] (!%p314_p8)  }
  0x2a   : > { %585 = vmatpush1.bf16.msra.mxu0 (!%p314_p8), %v850_v35  ;;  %v857_v40 = vld [vmem:[%s1074_s29 + $0x34] ss:$8 sps:$4 sm:$0xff] (!%p314_p8)   ;;  %v859_v41 = vld [vmem:[%s1074_s29 + $0x30] ss:$8 sps:$4 sm:$0xff] (!%p314_p8)   ;;  %v860_v42 = vld [vmem:[%s1074_s29 + $0x44] ss:$8 sps:$4 sm:$0xff] (!%p314_p8)  }
  0x2b   : > { %586 = vmatprep.subr.bf16.mxu0 (!%p314_p8), %v851_v36  ;;  %v862_v43 = vld [vmem:[%s1074_s29 + $0x40] ss:$8 sps:$4 sm:$0xff] (!%p314_p8)   ;;  %v863_v44 = vld [vmem:[%s1074_s29 + $0x54] ss:$8 sps:$4 sm:$0xff] (!%p314_p8)   ;;  %v865_v45 = vld [vmem:[%s1074_s29 + $0x50] ss:$8 sps:$4 sm:$0xff] (!%p314_p8)  }
  0x2c   : > { %v866_v46 = vld [vmem:[%s1074_s29 + $0x64] ss:$8 sps:$4 sm:$0xff] (!%p314_p8)   ;;  %v868_v47 = vld [vmem:[%s1074_s29 + $0x60] ss:$8 sps:$4 sm:$0xff] (!%p314_p8)   ;;  %v869_v48 = vld [vmem:[%s1074_s29 + $0x74] ss:$8 sps:$4 sm:$0xff] (!%p314_p8)  }
  0x2d   : > { %v871_v49 = vld [vmem:[%s1074_s29 + $0x70] ss:$8 sps:$4 sm:$0xff]   ;;  %v872_v50 = vld [vmem:[%s1074_s29 + $0x84] ss:$8 sps:$4 sm:$0xff]   ;;  %v874_v51 = vld [vmem:[%s1074_s29 + $0x80] ss:$8 sps:$4 sm:$0xff]  }
  0x2e   : > { %587 = vmatpush1.bf16.msra.mxu0 %v853_v37  ;;  %v875_v52 = vld [vmem:[%s1074_s29 + $0x94] ss:$8 sps:$4 sm:$0xff]   ;;  %v877_v53 = vld [vmem:[%s1074_s29 + $0x90] ss:$8 sps:$4 sm:$0xff]   ;;  %v878_v54 = vld [vmem:[%s1074_s29 + $0xa4] ss:$8 sps:$4 sm:$0xff]  }
  0x2f   : > { %588 = vmatprep.subr.bf16.mxu0 %v854_v38  ;;  %v880_v55 = vld [vmem:[%s1074_s29 + $0xa0] ss:$8 sps:$4 sm:$0xff]   ;;  %v881_v56 = vld [vmem:[%s1074_s29 + $0xb4] ss:$8 sps:$4 sm:$0xff]   ;;  %v883_v57 = vld [vmem:[%s1074_s29 + $0xb0] ss:$8 sps:$4 sm:$0xff]  }
  0x30   : > { %v884_v58 = vld [vmem:[%s1074_s29 + $0xc4] ss:$8 sps:$4 sm:$0xff]   ;;  %v886_v59 = vld [vmem:[%s1074_s29 + $0xc0] ss:$8 sps:$4 sm:$0xff]   ;;  %v887_v60 = vld [vmem:[%s1074_s29 + $0xd4] ss:$8 sps:$4 sm:$0xff]  }
  0x31   : > { %v889_v61 = vld [vmem:[%s1074_s29 + $0xd0] ss:$8 sps:$4 sm:$0xff]   ;;  %v890_v62 = vld [vmem:[%s1074_s29 + $0xe4] ss:$8 sps:$4 sm:$0xff]   ;;  %v892_v63 = vld [vmem:[%s1074_s29 + $0xe0] ss:$8 sps:$4 sm:$0xff]  }
  0x32   : > { %589 = vmatpush1.bf16.msra.mxu0 %v856_v39  ;;  %v893_v0 = vld [vmem:[%s1074_s29 + $0xf4] ss:$8 sps:$4 sm:$0xff]   ;;  %v895_v1 = vld [vmem:[%s1074_s29 + $0xf0] ss:$8 sps:$4 sm:$0xff]   ;;  %s1139_s30 = smov (!%p369_p9, %s767_s30), 3 }
  0x33   : > { %590 = vmatprep.subr.bf16.mxu0 %v857_v40  ;;  %s768_s3 = sshll.u32 %s1139_s30, 2 }
  0x34   : > { %s374_s6 = scalar_lea.vmem %s1131_s2, %s768_s3 }
  0x36   : > { %591 = vmatpush1.bf16.msra.mxu0 %v859_v41 }
  0x37   : > { %592 = vmatprep.subr.bf16.mxu0 %v860_v42 }
  0x3a   : > { %593 = vmatpush1.bf16.msra.mxu0 %v862_v43 }
  0x3b   : > { %594 = vmatprep.subr.bf16.mxu0 %v863_v44 }
  0x3e   : > { %595 = vmatpush1.bf16.msra.mxu0 %v865_v45 }
  0x3f   : > { %596 = vmatprep.subr.bf16.mxu0 %v866_v46 }
  0x42   : > { %597 = vmatpush1.bf16.msra.mxu0 %v868_v47 }
  0x43   : > { %598 = vmatprep.subr.bf16.mxu0 %v869_v48 }
  0x46   : > { %599 = vmatpush1.bf16.msra.mxu0 %v871_v49 }
  0x47   : > { %600 = vmatprep.subr.bf16.mxu0 %v872_v50 }
  0x4a   : > { %601 = vmatpush1.bf16.msra.mxu0 %v874_v51 }
  0x4b   : > { %602 = vmatprep.subr.bf16.mxu0 %v875_v52 }
  0x4e   : > { %603 = vmatpush1.bf16.msra.mxu0 %v877_v53 }
  0x4f   : > { %604 = vmatprep.subr.bf16.mxu0 %v878_v54 }
  0x52   : > { %605 = vmatpush1.bf16.msra.mxu0 %v880_v55 }
  0x53   : > { %606 = vmatprep.subr.bf16.mxu0 %v881_v56 }
  0x56   : > { %607 = vmatpush1.bf16.msra.mxu0 %v883_v57 }
  0x57   : > { %608 = vmatprep.subr.bf16.mxu0 %v884_v58 }
  0x5a   : > { %609 = vmatpush1.bf16.msra.mxu0 %v886_v59 }
  0x5b   : > { %610 = vmatprep.subr.bf16.mxu0 %v887_v60 }
  0x5e   : > { %611 = vmatpush1.bf16.msra.mxu0 %v889_v61 }
  0x5f   : > { %612 = vmatprep.subr.bf16.mxu0 %v890_v62 }
  0x62   : > { %613 = vmatpush1.bf16.msra.mxu0 %v892_v63 }
  0x63   : > { %614 = vmatprep.subr.bf16.mxu0 %v893_v0 }
  0x66   : > { %615 = vmatpush1.bf16.msra.mxu0 %v895_v1 }
  0x69   : > { %617 = vmatmul.mubr.bf16.vlgmr.msra.gmra.mrb[0].mxu0 %v769_v2 }
 0x13c   : > { %v618_v3 = vpop.f32.mrb[0].mxu0 }
 0x13d   : > { %v620_v4 = vpop.f32.mrb[1].mxu0 }
 0x13e   : > { %v807_v5 = vpack.c.bf16 %v620_v4, %v618_v3  ;;  %v622_v6 = vpop.f32.mrb[2].mxu0 }
 0x13f   : > { %v623_v7 = vpop.f32.mrb[3].mxu0 }
 0x140   : > { %642 = vst [vmem:[%s374_s6] sm:$0xff] %v807_v5 }
 0x141 PF: > { %s12_s13 = sadd.s32 1, %s936_s13   ;;  %s1132_s9 = smov %s924_s10 }
 0x142   : > { %p9_p10 = scmp.ge.s32.totalorder %s12_s13, 4   ;;  %s1133_s10 = smov %s988_s17 }
 0x143   : > { %s1134_s11 = smov %s932_s12  ;;  %s1135_s12 = smov %s1137_s14 }
 0x144   :  { %11 = sbr.rel (!%p9_p10) target bundleno = 3 (0x3), region = 112 }

// kernel: simple_resnet_forward.78
= control target key start
LH: loop header
LB: loop body
LE: loop exit
PB: predicated region body
PF: predicated region fallthrough
CT: control target
= control target key end

     0   :  { %v22_v0 = vlaneseq  ;;  %s136_s0 = inlined_call_operand.vmem [shape: bf16[8,512], index: 0, kind: input, shape index: {}]   ;;  %s137_s1 = inlined_call_operand.vmem [shape: f32[1,512], index: 1, kind: input, shape index: {}]   ;;  %s138_s2 = inlined_call_operand.vmem [shape: f32[1,512], index: 2, kind: input, shape index: {}]   ;;  %s139_s3 = inlined_call_operand.vmem [shape: bf16[8,512], index: 3, kind: output, shape index: {}]  }
   0x1   :  { %v14_v1 = vld [vmem:[%s136_s0] sm:$0xff]  ;;  %v15_v3 = vld [vmem:[%s136_s0 + $0x8] sm:$0xff] }
   0x2   :  { %v23_v2 = vshrl.u32 %v22_v0, 7  ;;  %v16_v4 = vunpack.c.l.bf16 %v14_v1  ;;  %v17_v5 = vunpack.c.h.bf16 %v14_v1  ;;  %v20_v6 = vld [vmem:[%s137_s1] sm:$0xf]  ;;  %v18_v12 = vunpack.c.l.bf16 %v15_v3 }
   0x3   :  { %v46_v7 = vld [vmem:[%s138_s2] sm:$0xf]  ;;  %v19_v13 = vunpack.c.h.bf16 %v15_v3 }
   0x4   :  { %v24_v8 = vsub.s32 0, %v23_v2  ;;  %v28_v9 = vsub.s32 1, %v23_v2  ;;  %v32_v10 = vsub.s32 2, %v23_v2  ;;  %v36_v11 = vsub.s32 3, %v23_v2 }
   0x6   :  { %v25_v14 = vrot.slane %v20_v6, %v24_v8  ;;  %v29_v15 = vrot.slane %v20_v6, %v28_v9  ;;  %v51_v16 = vrot.slane %v46_v7, %v24_v8  ;;  %v55_v17 = vrot.slane %v46_v7, %v28_v9 }
   0x7   :  { %v33_v18 = vrot.slane %v20_v6, %v32_v10  ;;  %v37_v19 = vrot.slane %v20_v6, %v36_v11  ;;  %v59_v20 = vrot.slane %v46_v7, %v32_v10  ;;  %v63_v21 = vrot.slane %v46_v7, %v36_v11 }
   0x8   :  { %v42_v22 = vmul.f32 %v25_v14, %v16_v4  ;;  %v43_v23 = vmul.f32 %v29_v15, %v17_v5 }
   0x9   :  { %v44_v24 = vmul.f32 %v33_v18, %v18_v12  ;;  %v45_v25 = vmul.f32 %v37_v19, %v19_v13 }
   0xa   :  { %v68_v26 = vadd.f32 %v51_v16, %v42_v22  ;;  %v69_v27 = vadd.f32 %v55_v17, %v43_v23 }
   0xb   :  { %v70_v28 = vadd.f32 %v59_v20, %v44_v24  ;;  %v71_v29 = vadd.f32 %v63_v21, %v45_v25 }
   0xc   :  { %v96_v30 = vpack.c.bf16 %v69_v27, %v68_v26 }
   0xd   :  { %v97_v31 = vpack.c.bf16 %v71_v29, %v70_v28 }
   0xe   :  { %88 = vst [vmem:[%s139_s3] sm:$0xff] %v96_v30 }
   0xf   :  { %89 = vst [vmem:[%s139_s3 + $0x8] sm:$0xff] %v97_v31 }

// kernel: simple_resnet_forward.76
= control target key start
LH: loop header
LB: loop body
LE: loop exit
PB: predicated region body
PF: predicated region fallthrough
CT: control target
= control target key end

     0   :  { %s1446_s9 = smov 0   ;;  %s1448_s10 = smov 0   ;;  %s1745_s0 = inlined_call_operand.vmem [shape: bf16[8,4608], index: 0, kind: input, shape index: {}]   ;;  %s1746_s1 = inlined_call_operand.vmem [shape: bf16[4608,512], index: 1, kind: input, shape index: {}]   ;;  %s1747_s2 = inlined_call_operand.vmem [shape: bf16[8,512], index: 2, kind: output, shape index: {}]  }
   0x1   :  { %s1450_s11 = smov 0   ;;  %s1452_s12 = smov 0  }
   0x2   :  { %s1454_s13 = smov 0   ;;  %s1456_s14 = smov 0  }
   0x3   :  { %s1458_s15 = smov 0  }
   0x4 LB: > { %s24_s16 = sadd.s32 1, %s1420_s13  ;;  %s27_s17 = sadd.s32 1, %s1424_s14  ;;  %s1428_s15 = sphi %s1458_s15, %s12_s15   ;;  %s1424_s14 = sphi %s1456_s14, %s1753_s14   ;;  %s1420_s13 = sphi %s1454_s13, %s1752_s13   ;;  %s1416_s12 = sphi %s1452_s12, %s1751_s12   ;;  %s1412_s11 = sphi %s1450_s11, %s1750_s11   ;;  %s1408_s10 = sphi %s1448_s10, %s1749_s10   ;;  %s1404_s9 = sphi %s1446_s9, %s1748_s9  }
   0x5   : > { %p25_p0 = scmp.ge.s32.totalorder %s24_s16, 9  ;;  %p75_p1 = scmp.ne.s32.totalorder %s1408_s10, %s1404_s9 }
   0x6   : > { %p76_p2 = scmp.eq.s32.totalorder %s1428_s15, 0  ;;  %s68_s21 = sadd.s32 1, %s1408_s10 }
   0x7   : > { %s1755_s16 = smov (%p25_p0, %s24_s16), 0  ;;  %s1757_s17 = smov (!%p25_p0, %s27_s17), %s1424_s14 }
   0x8   : > { %p77_p3 = por %p76_p2, %p75_p1  ;;  %p29_p4 = scmp.ge.s32.totalorder %s1757_s17, 2 }
   0x9   : > { %s63_s18 = ssub.s32 %s1420_s13, %s1755_s16  ;;  %p1130_p6 = scmp.ge.s32.totalorder %s1428_s15, 18 }
   0xa   : > { %s1759_s17 = smov (%p29_p4, %s1757_s17), 0 }
   0xb   : > { %s64_s19 = ssub.s32 %s1424_s14, %s1759_s17  ;;  %129 = sbr.rel (%p1130_p6) target bundleno = 57 (0x39), region = 16 }
   0xc   : > { %s65_s20 = sor.u32 %s64_s19, %s63_s18 }
   0xd   : > { %p66_p5 = scmp.eq.s32.totalorder %s65_s20, 0 }
   0xf   : > { %s1497_s22 = scalar_select %p66_p5, %s1408_s10, %s68_s21  }
  0x12   : > { %145 = sbr.rel (!%p77_p3) target bundleno = 57 (0x39), region = 24  ;;  %s147_s23 = sand.u32 (%p77_p3), 1, %s1408_s10  }
  0x13   : > { %s1133_s24 = sshll.u32 (%p77_p3), %s1424_s14, 1  ;;  %s1131_s25 = sshll.u32 (%p77_p3), %s147_s23, 9 }
  0x14   : > { %s1215_s26 = sshll.u32 (%p77_p3), %s1420_s13, 8  ;;  %s1511_s4 = scalar_lea.vmem (%p77_p3), [#allocation3], %s1131_s25 }
  0x15   : > { %s153_s27 = sadd.s32 (%p77_p3), %s1215_s26, %s1133_s24 }
  0x16   : > { %s1135_s28 = sshll.u32 (%p77_p3), %s153_s27, 2 }
  0x17   : > { %s1506_s3 = scalar_lea.vmem (%p77_p3), %s1746_s1, %s1135_s28 }
  0x18   : > { %v309_v0 = vld [vmem:[%s1506_s3] sm:$0xff] (%p77_p3)  ;;  %v311_v1 = vld [vmem:[%s1506_s3 + $0x10] sm:$0xff] (%p77_p3) }
  0x19   : > { %v313_v2 = vld [vmem:[%s1506_s3 + $0x20] sm:$0xff]  ;;  %310 = vst [vmem:[%s1511_s4] sm:$0xff] %v309_v0  ;;  %312 = vst [vmem:[%s1511_s4 + $0x8] sm:$0xff] %v311_v1  ;;  %v315_v3 = vld [vmem:[%s1506_s3 + $0x30] sm:$0xff] }
  0x1a   : > { %314 = vst [vmem:[%s1511_s4 + $0x10] sm:$0xff] %v313_v2  ;;  %v317_v4 = vld [vmem:[%s1506_s3 + $0x40] sm:$0xff]  ;;  %v319_v5 = vld [vmem:[%s1506_s3 + $0x50] sm:$0xff]  ;;  %316 = vst [vmem:[%s1511_s4 + $0x18] sm:$0xff] %v315_v3 }
  0x1b   : > { %318 = vst [vmem:[%s1511_s4 + $0x20] sm:$0xff] %v317_v4  ;;  %320 = vst [vmem:[%s1511_s4 + $0x28] sm:$0xff] %v319_v5  ;;  %v321_v6 = vld [vmem:[%s1506_s3 + $0x60] sm:$0xff]  ;;  %v323_v7 = vld [vmem:[%s1506_s3 + $0x70] sm:$0xff] }
  0x1c   : > { %v325_v8 = vld [vmem:[%s1506_s3 + $0x80] sm:$0xff]  ;;  %322 = vst [vmem:[%s1511_s4 + $0x30] sm:$0xff] %v321_v6  ;;  %324 = vst [vmem:[%s1511_s4 + $0x38] sm:$0xff] %v323_v7  ;;  %v327_v9 = vld [vmem:[%s1506_s3 + $0x90] sm:$0xff] }
  0x1d   : > { %326 = vst [vmem:[%s1511_s4 + $0x40] sm:$0xff] %v325_v8  ;;  %v329_v10 = vld [vmem:[%s1506_s3 + $0xa0] sm:$0xff]  ;;  %v331_v11 = vld [vmem:[%s1506_s3 + $0xb0] sm:$0xff]  ;;  %328 = vst [vmem:[%s1511_s4 + $0x48] sm:$0xff] %v327_v9 }
  0x1e   : > { %330 = vst [vmem:[%s1511_s4 + $0x50] sm:$0xff] %v329_v10  ;;  %332 = vst [vmem:[%s1511_s4 + $0x58] sm:$0xff] %v331_v11  ;;  %v333_v12 = vld [vmem:[%s1506_s3 + $0xc0] sm:$0xff]  ;;  %v335_v13 = vld [vmem:[%s1506_s3 + $0xd0] sm:$0xff] }
  0x1f   : > { %v337_v14 = vld [vmem:[%s1506_s3 + $0xe0] sm:$0xff]  ;;  %334 = vst [vmem:[%s1511_s4 + $0x60] sm:$0xff] %v333_v12  ;;  %336 = vst [vmem:[%s1511_s4 + $0x68] sm:$0xff] %v335_v13  ;;  %v339_v15 = vld [vmem:[%s1506_s3 + $0xf0] sm:$0xff] }
  0x20   : > { %338 = vst [vmem:[%s1511_s4 + $0x70] sm:$0xff] %v337_v14  ;;  %v341_v16 = vld [vmem:[%s1506_s3 + $0x100] sm:$0xff]  ;;  %v343_v17 = vld [vmem:[%s1506_s3 + $0x110] sm:$0xff]  ;;  %340 = vst [vmem:[%s1511_s4 + $0x78] sm:$0xff] %v339_v15 }
  0x21   : > { %342 = vst [vmem:[%s1511_s4 + $0x80] sm:$0xff] %v341_v16  ;;  %344 = vst [vmem:[%s1511_s4 + $0x88] sm:$0xff] %v343_v17  ;;  %v345_v18 = vld [vmem:[%s1506_s3 + $0x120] sm:$0xff]  ;;  %v347_v19 = vld [vmem:[%s1506_s3 + $0x130] sm:$0xff] }
  0x22   : > { %v349_v20 = vld [vmem:[%s1506_s3 + $0x140] sm:$0xff]  ;;  %346 = vst [vmem:[%s1511_s4 + $0x90] sm:$0xff] %v345_v18  ;;  %348 = vst [vmem:[%s1511_s4 + $0x98] sm:$0xff] %v347_v19  ;;  %v351_v21 = vld [vmem:[%s1506_s3 + $0x150] sm:$0xff] }
  0x23   : > { %350 = vst [vmem:[%s1511_s4 + $0xa0] sm:$0xff] %v349_v20  ;;  %v353_v22 = vld [vmem:[%s1506_s3 + $0x160] sm:$0xff]  ;;  %v355_v23 = vld [vmem:[%s1506_s3 + $0x170] sm:$0xff]  ;;  %352 = vst [vmem:[%s1511_s4 + $0xa8] sm:$0xff] %v351_v21 }
  0x24   : > { %354 = vst [vmem:[%s1511_s4 + $0xb0] sm:$0xff] %v353_v22  ;;  %356 = vst [vmem:[%s1511_s4 + $0xb8] sm:$0xff] %v355_v23  ;;  %v357_v24 = vld [vmem:[%s1506_s3 + $0x180] sm:$0xff]  ;;  %v359_v25 = vld [vmem:[%s1506_s3 + $0x190] sm:$0xff] }
  0x25   : > { %v361_v26 = vld [vmem:[%s1506_s3 + $0x1a0] sm:$0xff]  ;;  %358 = vst [vmem:[%s1511_s4 + $0xc0] sm:$0xff] %v357_v24  ;;  %360 = vst [vmem:[%s1511_s4 + $0xc8] sm:$0xff] %v359_v25  ;;  %v363_v27 = vld [vmem:[%s1506_s3 + $0x1b0] sm:$0xff] }
  0x26   : > { %362 = vst [vmem:[%s1511_s4 + $0xd0] sm:$0xff] %v361_v26  ;;  %v365_v28 = vld [vmem:[%s1506_s3 + $0x1c0] sm:$0xff]  ;;  %v367_v29 = vld [vmem:[%s1506_s3 + $0x1d0] sm:$0xff]  ;;  %364 = vst [vmem:[%s1511_s4 + $0xd8] sm:$0xff] %v363_v27 }
  0x27   : > { %366 = vst [vmem:[%s1511_s4 + $0xe0] sm:$0xff] %v365_v28  ;;  %368 = vst [vmem:[%s1511_s4 + $0xe8] sm:$0xff] %v367_v29  ;;  %v369_v30 = vld [vmem:[%s1506_s3 + $0x1e0] sm:$0xff]  ;;  %v371_v31 = vld [vmem:[%s1506_s3 + $0x1f0] sm:$0xff] }
  0x28   : > { %v373_v32 = vld [vmem:[%s1506_s3 + $0x200] sm:$0xff]  ;;  %370 = vst [vmem:[%s1511_s4 + $0xf0] sm:$0xff] %v369_v30  ;;  %372 = vst [vmem:[%s1511_s4 + $0xf8] sm:$0xff] %v371_v31  ;;  %v375_v33 = vld [vmem:[%s1506_s3 + $0x210] sm:$0xff] }
  0x29   : > { %374 = vst [vmem:[%s1511_s4 + $0x100] sm:$0xff] %v373_v32  ;;  %v377_v34 = vld [vmem:[%s1506_s3 + $0x220] sm:$0xff]  ;;  %v379_v35 = vld [vmem:[%s1506_s3 + $0x230] sm:$0xff]  ;;  %376 = vst [vmem:[%s1511_s4 + $0x108] sm:$0xff] %v375_v33 }
  0x2a   : > { %378 = vst [vmem:[%s1511_s4 + $0x110] sm:$0xff] %v377_v34  ;;  %380 = vst [vmem:[%s1511_s4 + $0x118] sm:$0xff] %v379_v35  ;;  %v381_v36 = vld [vmem:[%s1506_s3 + $0x240] sm:$0xff]  ;;  %v383_v37 = vld [vmem:[%s1506_s3 + $0x250] sm:$0xff] }
  0x2b   : > { %v385_v38 = vld [vmem:[%s1506_s3 + $0x260] sm:$0xff]  ;;  %382 = vst [vmem:[%s1511_s4 + $0x120] sm:$0xff] %v381_v36  ;;  %384 = vst [vmem:[%s1511_s4 + $0x128] sm:$0xff] %v383_v37  ;;  %v387_v39 = vld [vmem:[%s1506_s3 + $0x270] sm:$0xff] }
  0x2c   : > { %386 = vst [vmem:[%s1511_s4 + $0x130] sm:$0xff] %v385_v38  ;;  %v389_v40 = vld [vmem:[%s1506_s3 + $0x280] sm:$0xff]  ;;  %v391_v41 = vld [vmem:[%s1506_s3 + $0x290] sm:$0xff]  ;;  %388 = vst [vmem:[%s1511_s4 + $0x138] sm:$0xff] %v387_v39 }
  0x2d   : > { %390 = vst [vmem:[%s1511_s4 + $0x140] sm:$0xff] %v389_v40  ;;  %392 = vst [vmem:[%s1511_s4 + $0x148] sm:$0xff] %v391_v41  ;;  %v393_v42 = vld [vmem:[%s1506_s3 + $0x2a0] sm:$0xff]  ;;  %v395_v43 = vld [vmem:[%s1506_s3 + $0x2b0] sm:$0xff] }
  0x2e   : > { %v397_v44 = vld [vmem:[%s1506_s3 + $0x2c0] sm:$0xff]  ;;  %394 = vst [vmem:[%s1511_s4 + $0x150] sm:$0xff] %v393_v42  ;;  %396 = vst [vmem:[%s1511_s4 + $0x158] sm:$0xff] %v395_v43  ;;  %v399_v45 = vld [vmem:[%s1506_s3 + $0x2d0] sm:$0xff] }
  0x2f   : > { %398 = vst [vmem:[%s1511_s4 + $0x160] sm:$0xff] %v397_v44  ;;  %v401_v46 = vld [vmem:[%s1506_s3 + $0x2e0] sm:$0xff]  ;;  %v403_v47 = vld [vmem:[%s1506_s3 + $0x2f0] sm:$0xff]  ;;  %400 = vst [vmem:[%s1511_s4 + $0x168] sm:$0xff] %v399_v45 }
  0x30   : > { %402 = vst [vmem:[%s1511_s4 + $0x170] sm:$0xff] %v401_v46  ;;  %404 = vst [vmem:[%s1511_s4 + $0x178] sm:$0xff] %v403_v47  ;;  %v405_v48 = vld [vmem:[%s1506_s3 + $0x300] sm:$0xff]  ;;  %v407_v49 = vld [vmem:[%s1506_s3 + $0x310] sm:$0xff] }
  0x31   : > { %v409_v50 = vld [vmem:[%s1506_s3 + $0x320] sm:$0xff]  ;;  %406 = vst [vmem:[%s1511_s4 + $0x180] sm:$0xff] %v405_v48  ;;  %408 = vst [vmem:[%s1511_s4 + $0x188] sm:$0xff] %v407_v49  ;;  %v411_v51 = vld [vmem:[%s1506_s3 + $0x330] sm:$0xff] }
  0x32   : > { %410 = vst [vmem:[%s1511_s4 + $0x190] sm:$0xff] %v409_v50  ;;  %v413_v52 = vld [vmem:[%s1506_s3 + $0x340] sm:$0xff]  ;;  %v415_v53 = vld [vmem:[%s1506_s3 + $0x350] sm:$0xff]  ;;  %412 = vst [vmem:[%s1511_s4 + $0x198] sm:$0xff] %v411_v51 }
  0x33   : > { %414 = vst [vmem:[%s1511_s4 + $0x1a0] sm:$0xff] %v413_v52  ;;  %416 = vst [vmem:[%s1511_s4 + $0x1a8] sm:$0xff] %v415_v53  ;;  %v417_v54 = vld [vmem:[%s1506_s3 + $0x360] sm:$0xff]  ;;  %v419_v55 = vld [vmem:[%s1506_s3 + $0x370] sm:$0xff] }
  0x34   : > { %v421_v56 = vld [vmem:[%s1506_s3 + $0x380] sm:$0xff]  ;;  %418 = vst [vmem:[%s1511_s4 + $0x1b0] sm:$0xff] %v417_v54  ;;  %420 = vst [vmem:[%s1511_s4 + $0x1b8] sm:$0xff] %v419_v55  ;;  %v423_v57 = vld [vmem:[%s1506_s3 + $0x390] sm:$0xff] }
  0x35   : > { %422 = vst [vmem:[%s1511_s4 + $0x1c0] sm:$0xff] %v421_v56  ;;  %v425_v58 = vld [vmem:[%s1506_s3 + $0x3a0] sm:$0xff]  ;;  %v427_v59 = vld [vmem:[%s1506_s3 + $0x3b0] sm:$0xff]  ;;  %424 = vst [vmem:[%s1511_s4 + $0x1c8] sm:$0xff] %v423_v57 }
  0x36   : > { %426 = vst [vmem:[%s1511_s4 + $0x1d0] sm:$0xff] %v425_v58  ;;  %428 = vst [vmem:[%s1511_s4 + $0x1d8] sm:$0xff] %v427_v59  ;;  %v429_v60 = vld [vmem:[%s1506_s3 + $0x3c0] sm:$0xff]  ;;  %v431_v61 = vld [vmem:[%s1506_s3 + $0x3d0] sm:$0xff] }
  0x37   : > { %v433_v62 = vld [vmem:[%s1506_s3 + $0x3e0] sm:$0xff]  ;;  %430 = vst [vmem:[%s1511_s4 + $0x1e0] sm:$0xff] %v429_v60  ;;  %432 = vst [vmem:[%s1511_s4 + $0x1e8] sm:$0xff] %v431_v61  ;;  %v435_v63 = vld [vmem:[%s1506_s3 + $0x3f0] sm:$0xff] }
  0x38   : > { %434 = vst [vmem:[%s1511_s4 + $0x1f0] sm:$0xff] %v433_v62  ;;  %436 = vst [vmem:[%s1511_s4 + $0x1f8] sm:$0xff] %v435_v63 }
  0x39 PF: > { %p1136_p7 = scmp.ge.s32.totalorder %s1428_s15, 1  ;;  %p441_p8 = scmp.lt.s32.totalorder %s1428_s15, 19 }
  0x3b   : > { %p442_p9 = pnand %p1136_p7, %p441_p8 }
  0x3c   : > { %s448_s5 = sand.u32 (!%p442_p9), 1, %s1404_s9   ;;  %s1138_s6 = sshll.u32 (!%p442_p9), %s1412_s11, 2 }
  0x3d   : > { %445 = sbr.rel (%p442_p9) target bundleno = 372 (0x174), region = 62  ;;  %s1137_s7 = sshll.u32 (!%p442_p9), %s448_s5, 9 }
  0x3e   : > { %p485_p10 = scmp.lt.s32.totalorder (!%p442_p9), %s1138_s6, 35  ;;  %s1140_s8 = sshll.u32 (!%p442_p9), %s1416_s12, 1 }
  0x3f   : > { %p497_p11 = scmp.lt.s32.totalorder (!%p442_p9), %s1140_s8, 3  ;;  %s1653_s9 = scalar_lea.vmem (!%p442_p9), [#allocation3], %s1137_s7 }
  0x40   : > { %p1142_p12 = scmp.ne.s32.totalorder (!%p442_p9), %s1412_s11, 0 }
  0x44   : > { %s1761_s6 = smov (!%p485_p10, %s1138_s6), 35  ;;  %s1763_s8 = smov (!%p497_p11, %s1140_s8), 3 }
  0x45   : > { %s1139_s18 = sshll.u32 %s1761_s6, 2  ;;  %s1141_s23 = sshll.u32 %s1763_s8, 2  ;;  %v1430_v0 = vmov (!%p1142_p12), 0.0  }
  0x46   : > { %s1646_s21 = scalar_lea.vmem %s1745_s0, %s1139_s18  ;;  %s1651_s26 = scalar_lea.vmem %s1747_s2, %s1141_s23  ;;  %508 = vst [vmem:[#allocation2] sm:$0xff] (!%p1142_p12), %v1430_v0  ;;  %509 = vst [vmem:[#allocation2 + $0x8] sm:$0xff] (!%p1142_p12), %v1430_v0 }
  0x47   : > { %507 = sbr.rel (%p1142_p12) target bundleno = 78 (0x4e), region = 70 }
  0x4e PF: > { %v1274_v1 = vld [vmem:[%s1653_s9 + $0x4] ss:$8 sps:$4 sm:$0xff]   ;;  %v1278_v3 = vld [vmem:[%s1653_s9] ss:$8 sps:$4 sm:$0xff]   ;;  %v1280_v5 = vld [vmem:[%s1653_s9 + $0x14] ss:$8 sps:$4 sm:$0xff]  }
  0x4f   : > { %v1276_v2 = vld [vmem:[%s1653_s9 + $0x104] ss:$8 sps:$4 sm:$0xff]   ;;  %912 = vmatprep.subr.bf16.mxu0 %v1274_v1  ;;  %v1279_v4 = vld [vmem:[%s1653_s9 + $0x100] ss:$8 sps:$4 sm:$0xff]   ;;  %v1282_v6 = vld [vmem:[%s1653_s9 + $0x114] ss:$8 sps:$4 sm:$0xff]  }
  0x50   : > { %953 = vmatprep.subr.bf16.mxu1 %v1276_v2  ;;  %913 = vmatpush1.bf16.msra.mxu0 %v1278_v3  ;;  %v1284_v7 = vld [vmem:[%s1653_s9 + $0x10] ss:$8 sps:$4 sm:$0xff]   ;;  %v1286_v9 = vld [vmem:[%s1653_s9 + $0x24] ss:$8 sps:$4 sm:$0xff]   ;;  %v1290_v11 = vld [vmem:[%s1653_s9 + $0x20] ss:$8 sps:$4 sm:$0xff]  }
  0x51   : > { %954 = vmatpush1.bf16.msra.mxu1 %v1279_v4  ;;  %914 = vmatprep.subr.bf16.mxu0 %v1280_v5  ;;  %v1285_v8 = vld [vmem:[%s1653_s9 + $0x110] ss:$8 sps:$4 sm:$0xff]   ;;  %v1288_v10 = vld [vmem:[%s1653_s9 + $0x124] ss:$8 sps:$4 sm:$0xff]   ;;  %v1291_v12 = vld [vmem:[%s1653_s9 + $0x120] ss:$8 sps:$4 sm:$0xff]  }
  0x52   : > { %955 = vmatprep.subr.bf16.mxu1 %v1282_v6  ;;  %v1292_v13 = vld [vmem:[%s1653_s9 + $0x34] ss:$8 sps:$4 sm:$0xff]   ;;  %v1296_v15 = vld [vmem:[%s1653_s9 + $0x30] ss:$8 sps:$4 sm:$0xff]   ;;  %v1298_v17 = vld [vmem:[%s1653_s9 + $0x44] ss:$8 sps:$4 sm:$0xff]  }
  0x53   : > { %v1294_v14 = vld [vmem:[%s1653_s9 + $0x134] ss:$8 sps:$4 sm:$0xff]   ;;  %v1297_v16 = vld [vmem:[%s1653_s9 + $0x130] ss:$8 sps:$4 sm:$0xff]   ;;  %v1300_v18 = vld [vmem:[%s1653_s9 + $0x144] ss:$8 sps:$4 sm:$0xff]  }
  0x54   : > { %915 = vmatpush1.bf16.msra.mxu0 %v1284_v7  ;;  %v1302_v19 = vld [vmem:[%s1653_s9 + $0x40] ss:$8 sps:$4 sm:$0xff]   ;;  %v1304_v21 = vld [vmem:[%s1653_s9 + $0x54] ss:$8 sps:$4 sm:$0xff]   ;;  %v1308_v23 = vld [vmem:[%s1653_s9 + $0x50] ss:$8 sps:$4 sm:$0xff]  }
  0x55   : > { %956 = vmatpush1.bf16.msra.mxu1 %v1285_v8  ;;  %916 = vmatprep.subr.bf16.mxu0 %v1286_v9  ;;  %v1303_v20 = vld [vmem:[%s1653_s9 + $0x140] ss:$8 sps:$4 sm:$0xff]   ;;  %v1306_v22 = vld [vmem:[%s1653_s9 + $0x154] ss:$8 sps:$4 sm:$0xff]   ;;  %v1309_v24 = vld [vmem:[%s1653_s9 + $0x150] ss:$8 sps:$4 sm:$0xff]  }
  0x56   : > { %957 = vmatprep.subr.bf16.mxu1 %v1288_v10  ;;  %v1310_v25 = vld [vmem:[%s1653_s9 + $0x64] ss:$8 sps:$4 sm:$0xff]   ;;  %v1314_v27 = vld [vmem:[%s1653_s9 + $0x60] ss:$8 sps:$4 sm:$0xff]   ;;  %v1316_v29 = vld [vmem:[%s1653_s9 + $0x74] ss:$8 sps:$4 sm:$0xff]  }
  0x57   : > { %v1312_v26 = vld [vmem:[%s1653_s9 + $0x164] ss:$8 sps:$4 sm:$0xff]   ;;  %v1315_v28 = vld [vmem:[%s1653_s9 + $0x160] ss:$8 sps:$4 sm:$0xff]   ;;  %v1318_v30 = vld [vmem:[%s1653_s9 + $0x174] ss:$8 sps:$4 sm:$0xff]  }
  0x58   : > { %917 = vmatpush1.bf16.msra.mxu0 %v1290_v11  ;;  %v1320_v31 = vld [vmem:[%s1653_s9 + $0x70] ss:$8 sps:$4 sm:$0xff]   ;;  %v1322_v33 = vld [vmem:[%s1653_s9 + $0x84] ss:$8 sps:$4 sm:$0xff]   ;;  %v1326_v35 = vld [vmem:[%s1653_s9 + $0x80] ss:$8 sps:$4 sm:$0xff]  }
  0x59   : > { %958 = vmatpush1.bf16.msra.mxu1 %v1291_v12  ;;  %918 = vmatprep.subr.bf16.mxu0 %v1292_v13  ;;  %v1321_v32 = vld [vmem:[%s1653_s9 + $0x170] ss:$8 sps:$4 sm:$0xff]   ;;  %v1324_v34 = vld [vmem:[%s1653_s9 + $0x184] ss:$8 sps:$4 sm:$0xff]   ;;  %v1327_v36 = vld [vmem:[%s1653_s9 + $0x180] ss:$8 sps:$4 sm:$0xff]  }
  0x5a   : > { %959 = vmatprep.subr.bf16.mxu1 %v1294_v14  ;;  %v1328_v37 = vld [vmem:[%s1653_s9 + $0x94] ss:$8 sps:$4 sm:$0xff]   ;;  %v1332_v39 = vld [vmem:[%s1653_s9 + $0x90] ss:$8 sps:$4 sm:$0xff]   ;;  %v1334_v41 = vld [vmem:[%s1653_s9 + $0xa4] ss:$8 sps:$4 sm:$0xff]  }
  0x5b   : > { %v1330_v38 = vld [vmem:[%s1653_s9 + $0x194] ss:$8 sps:$4 sm:$0xff]   ;;  %v1333_v40 = vld [vmem:[%s1653_s9 + $0x190] ss:$8 sps:$4 sm:$0xff]   ;;  %v1336_v42 = vld [vmem:[%s1653_s9 + $0x1a4] ss:$8 sps:$4 sm:$0xff]  }
  0x5c   : > { %919 = vmatpush1.bf16.msra.mxu0 %v1296_v15  ;;  %v1338_v43 = vld [vmem:[%s1653_s9 + $0xa0] ss:$8 sps:$4 sm:$0xff]   ;;  %v1340_v45 = vld [vmem:[%s1653_s9 + $0xb4] ss:$8 sps:$4 sm:$0xff]   ;;  %v1344_v50 = vld [vmem:[%s1653_s9 + $0xb0] ss:$8 sps:$4 sm:$0xff]  }
  0x5d   : > { %960 = vmatpush1.bf16.msra.mxu1 %v1297_v16  ;;  %920 = vmatprep.subr.bf16.mxu0 %v1298_v17  ;;  %v1339_v44 = vld [vmem:[%s1653_s9 + $0x1a0] ss:$8 sps:$4 sm:$0xff]   ;;  %v1342_v46 = vld [vmem:[%s1653_s9 + $0x1b4] ss:$8 sps:$4 sm:$0xff]   ;;  %v1345_v51 = vld [vmem:[%s1653_s9 + $0x1b0] ss:$8 sps:$4 sm:$0xff]  }
  0x5e   : > { %961 = vmatprep.subr.bf16.mxu1 %v1300_v18  ;;  %v512_v47 = vld [vmem:[%s1646_s21] sm:$0xff]  ;;  %v513_v49 = vld [vmem:[%s1646_s21 + $0x8] sm:$0xff]  ;;  %v1346_v53 = vld [vmem:[%s1653_s9 + $0xc4] ss:$8 sps:$4 sm:$0xff]   ;;  %p1211_p13 = scmp.ne.s32.totalorder %s1412_s11, 8 }
  0x5f   : > { %v1144_v48 = vcombine.high %v512_v47, %v512_v47  ;;  %v1146_v52 = vcombine.high %v513_v49, %v513_v49  ;;  %v1348_v54 = vld [vmem:[%s1653_s9 + $0x1c4] ss:$8 sps:$4 sm:$0xff]   ;;  %v1350_v55 = vld [vmem:[%s1653_s9 + $0xc0] ss:$8 sps:$4 sm:$0xff]   ;;  %v1352_v57 = vld [vmem:[%s1653_s9 + $0xd4] ss:$8 sps:$4 sm:$0xff]   ;;  %v1143_v5 = vcombine.low %v512_v47, %v512_v47  ;;  %v1145_v6 = vcombine.low %v513_v49, %v513_v49 }
  0x60   : > { %921 = vmatpush1.bf16.msra.mxu0 %v1302_v19  ;;  %v1351_v56 = vld [vmem:[%s1653_s9 + $0x1c0] ss:$8 sps:$4 sm:$0xff]   ;;  %v1354_v58 = vld [vmem:[%s1653_s9 + $0x1d4] ss:$8 sps:$4 sm:$0xff]   ;;  %v1356_v59 = vld [vmem:[%s1653_s9 + $0xd0] ss:$8 sps:$4 sm:$0xff]  }
  0x61   : > { %962 = vmatpush1.bf16.msra.mxu1 %v1303_v20  ;;  %922 = vmatprep.subr.bf16.mxu0 %v1304_v21  ;;  %v1357_v60 = vld [vmem:[%s1653_s9 + $0x1d0] ss:$8 sps:$4 sm:$0xff]   ;;  %v1358_v61 = vld [vmem:[%s1653_s9 + $0xe4] ss:$8 sps:$4 sm:$0xff]   ;;  %v1362_v63 = vld [vmem:[%s1653_s9 + $0xe0] ss:$8 sps:$4 sm:$0xff]  }
  0x62   : > { %963 = vmatprep.subr.bf16.mxu1 %v1306_v22  ;;  %944 = vmatprep.mubr.bf16.mxu0 %v1144_v48  ;;  %v1360_v62 = vld [vmem:[%s1653_s9 + $0x1e4] ss:$8 sps:$4 sm:$0xff]   ;;  %v1363_v0 = vld [vmem:[%s1653_s9 + $0x1e0] ss:$8 sps:$4 sm:$0xff]   ;;  %v1364_v1 = vld [vmem:[%s1653_s9 + $0xf4] ss:$8 sps:$4 sm:$0xff]  }
  0x63   : > { %985 = vmatprep.mubr.bf16.mxu1 %v1146_v52  ;;  %v1366_v2 = vld [vmem:[%s1653_s9 + $0x1f4] ss:$8 sps:$4 sm:$0xff]   ;;  %v1368_v3 = vld [vmem:[%s1653_s9 + $0xf0] ss:$8 sps:$4 sm:$0xff]  }
  0x64   : > { %923 = vmatpush1.bf16.msra.mxu0 %v1308_v23  ;;  %v1369_v4 = vld [vmem:[%s1653_s9 + $0x1f0] ss:$8 sps:$4 sm:$0xff]  }
  0x65   : > { %964 = vmatpush1.bf16.msra.mxu1 %v1309_v24  ;;  %924 = vmatprep.subr.bf16.mxu0 %v1310_v25  ;;  %v510_v8 = vld [vmem:[#allocation2] sm:$0xff]  ;;  %v511_v12 = vld [vmem:[#allocation2 + $0x8] sm:$0xff] }
  0x66   : > { %965 = vmatprep.subr.bf16.mxu1 %v1312_v26 }
  0x68   : > { %925 = vmatpush1.bf16.msra.mxu0 %v1314_v27 }
  0x69   : > { %966 = vmatpush1.bf16.msra.mxu1 %v1315_v28  ;;  %926 = vmatprep.subr.bf16.mxu0 %v1316_v29 }
  0x6a   : > { %967 = vmatprep.subr.bf16.mxu1 %v1318_v30 }
  0x6c   : > { %927 = vmatpush1.bf16.msra.mxu0 %v1320_v31 }
  0x6d   : > { %968 = vmatpush1.bf16.msra.mxu1 %v1321_v32  ;;  %928 = vmatprep.subr.bf16.mxu0 %v1322_v33 }
  0x6e   : > { %969 = vmatprep.subr.bf16.mxu1 %v1324_v34 }
  0x70   : > { %929 = vmatpush1.bf16.msra.mxu0 %v1326_v35 }
  0x71   : > { %970 = vmatpush1.bf16.msra.mxu1 %v1327_v36  ;;  %930 = vmatprep.subr.bf16.mxu0 %v1328_v37 }
  0x72   : > { %971 = vmatprep.subr.bf16.mxu1 %v1330_v38 }
  0x74   : > { %931 = vmatpush1.bf16.msra.mxu0 %v1332_v39 }
  0x75   : > { %972 = vmatpush1.bf16.msra.mxu1 %v1333_v40  ;;  %932 = vmatprep.subr.bf16.mxu0 %v1334_v41 }
  0x76   : > { %973 = vmatprep.subr.bf16.mxu1 %v1336_v42 }
  0x78   : > { %933 = vmatpush1.bf16.msra.mxu0 %v1338_v43 }
  0x79   : > { %974 = vmatpush1.bf16.msra.mxu1 %v1339_v44  ;;  %934 = vmatprep.subr.bf16.mxu0 %v1340_v45 }
  0x7a   : > { %975 = vmatprep.subr.bf16.mxu1 %v1342_v46 }
  0x7c   : > { %935 = vmatpush1.bf16.msra.mxu0 %v1344_v50 }
  0x7d   : > { %976 = vmatpush1.bf16.msra.mxu1 %v1345_v51  ;;  %936 = vmatprep.subr.bf16.mxu0 %v1346_v53 }
  0x7e   : > { %977 = vmatprep.subr.bf16.mxu1 %v1348_v54 }
  0x80   : > { %937 = vmatpush1.bf16.msra.mxu0 %v1350_v55 }
  0x81   : > { %978 = vmatpush1.bf16.msra.mxu1 %v1351_v56  ;;  %938 = vmatprep.subr.bf16.mxu0 %v1352_v57 }
  0x82   : > { %979 = vmatprep.subr.bf16.mxu1 %v1354_v58 }
  0x84   : > { %939 = vmatpush1.bf16.msra.mxu0 %v1356_v59 }
  0x85   : > { %980 = vmatpush1.bf16.msra.mxu1 %v1357_v60  ;;  %940 = vmatprep.subr.bf16.mxu0 %v1358_v61 }
  0x86   : > { %981 = vmatprep.subr.bf16.mxu1 %v1360_v62 }
  0x88   : > { %941 = vmatpush1.bf16.msra.mxu0 %v1362_v63 }
  0x89   : > { %982 = vmatpush1.bf16.msra.mxu1 %v1363_v0  ;;  %942 = vmatprep.subr.bf16.mxu0 %v1364_v1 }
  0x8a   : > { %983 = vmatprep.subr.bf16.mxu1 %v1366_v2 }
  0x8c   : > { %943 = vmatpush1.bf16.msra.mxu0 %v1368_v3 }
  0x8d   : > { %984 = vmatpush1.bf16.msra.mxu1 %v1369_v4 }
  0x8f   : > { %945 = vmatmul.mubr.bf16.vlgmr.msra.gmra.mrb[0].mxu0 %v1143_v5 }
  0x90   : > { %986 = vmatmul.mubr.bf16.vlgmr.msra.gmra.mrb[0].mxu1 %v1145_v6 }
 0x162   : > { %v946_v7 = vpop.f32.mrb[0].mxu0 }
 0x163   : > { %v987_v9 = vpop.f32.mrb[0].mxu1  ;;  %v948_v11 = vpop.f32.mrb[1].mxu0  ;;  %1001 = sbr.rel (%p1211_p13) target bundleno = 372 (0x174), region = 74 }
 0x164   : > { %v988_v10 = vadd.f32 %v987_v9, %v946_v7  ;;  %v989_v13 = vpop.f32.mrb[1].mxu1  ;;  %v950_v15 = vpop.f32.mrb[2].mxu0 }
 0x165   : > { %v990_v14 = vadd.f32 %v989_v13, %v948_v11  ;;  %v991_v16 = vpop.f32.mrb[2].mxu1  ;;  %v951_v18 = vpop.f32.mrb[3].mxu0 }
 0x166   : > { %v994_v17 = vadd.f32 %v988_v10, %v510_v8  ;;  %v992_v19 = vpop.f32.mrb[3].mxu1 }
 0x167   : > { %v995_v20 = vadd.f32 %v990_v14, %v511_v12 }
 0x168   : > { %996 = vst [vmem:[#allocation2] sm:$0xff] %v994_v17 }
 0x169   : > { %997 = vst [vmem:[#allocation2 + $0x8] sm:$0xff] %v995_v20 }
 0x16f   : > { %v1002_v21 = vld [vmem:[#allocation2] sm:$0xff] }
 0x170   : > { %v1003_v22 = vld [vmem:[#allocation2 + $0x8] sm:$0xff] }
 0x171   : > { %v1216_v23 = vpack.c.bf16 %v1003_v22, %v1002_v21 }
 0x173   : > { %1012 = vst [vmem:[%s1651_s26] sm:$0xff] %v1216_v23 }
 0x174 PF: > { %s12_s15 = sadd.s32 1, %s1428_s15   ;;  %s1748_s9 = smov %s1408_s10 }
 0x175   : > { %p9_p0 = scmp.ge.s32.totalorder %s12_s15, 20   ;;  %s1749_s10 = smov %s1497_s22 }
 0x176   : > { %s1750_s11 = smov %s1420_s13  ;;  %s1751_s12 = smov %s1424_s14 }
 0x177   : > { %s1752_s13 = smov %s1755_s16  ;;  %s1753_s14 = smov %s1759_s17 }
 0x178   :  { %11 = sbr.rel (!%p9_p0) target bundleno = 4 (0x4), region = 112 }

// kernel: simple_resnet_forward.79
= control target key start
LH: loop header
LB: loop body
LE: loop exit
PB: predicated region body
PF: predicated region fallthrough
CT: control target
= control target key end

     0   :  { %v25_v0 = vlaneseq  ;;  %s164_s0 = inlined_call_operand.vmem [shape: bf16[8,512], index: 0, kind: input, shape index: {}]   ;;  %s165_s1 = inlined_call_operand.vmem [shape: f32[1,512], index: 1, kind: input, shape index: {}]   ;;  %s166_s2 = inlined_call_operand.vmem [shape: f32[1,512], index: 2, kind: input, shape index: {}]   ;;  %s167_s3 = inlined_call_operand.vmem [shape: bf16[8,512], index: 3, kind: input, shape index: {}]   ;;  %s168_s4 = inlined_call_operand.vmem [shape: bf16[8,512], index: 4, kind: output, shape index: {}]  }
   0x1   :  { %v17_v1 = vld [vmem:[%s164_s0] sm:$0xff]  ;;  %v18_v3 = vld [vmem:[%s164_s0 + $0x8] sm:$0xff] }
   0x2   :  { %v26_v2 = vshrl.u32 %v25_v0, 7  ;;  %v19_v4 = vunpack.c.l.bf16 %v17_v1  ;;  %v20_v5 = vunpack.c.h.bf16 %v17_v1  ;;  %v23_v6 = vld [vmem:[%s165_s1] sm:$0xf]  ;;  %v21_v13 = vunpack.c.l.bf16 %v18_v3  ;;  %v76_v19 = vld [vmem:[%s167_s3 + $0x8] sm:$0xff] }
   0x3   :  { %v49_v7 = vld [vmem:[%s166_s2] sm:$0xf]  ;;  %v22_v14 = vunpack.c.h.bf16 %v18_v3  ;;  %v79_v30 = vunpack.c.l.bf16 %v76_v19  ;;  %v80_v31 = vunpack.c.h.bf16 %v76_v19 }
   0x4   :  { %v27_v8 = vsub.s32 0, %v26_v2  ;;  %v31_v9 = vsub.s32 1, %v26_v2  ;;  %v35_v10 = vsub.s32 2, %v26_v2  ;;  %v39_v11 = vsub.s32 3, %v26_v2  ;;  %v75_v12 = vld [vmem:[%s167_s3] sm:$0xff] }
   0x5   :  { %v77_v26 = vunpack.c.l.bf16 %v75_v12  ;;  %v78_v27 = vunpack.c.h.bf16 %v75_v12 }
   0x6   :  { %v28_v15 = vrot.slane %v23_v6, %v27_v8  ;;  %v32_v16 = vrot.slane %v23_v6, %v31_v9  ;;  %v54_v17 = vrot.slane %v49_v7, %v27_v8  ;;  %v58_v18 = vrot.slane %v49_v7, %v31_v9 }
   0x7   :  { %v36_v20 = vrot.slane %v23_v6, %v35_v10  ;;  %v40_v21 = vrot.slane %v23_v6, %v39_v11  ;;  %v62_v22 = vrot.slane %v49_v7, %v35_v10  ;;  %v66_v23 = vrot.slane %v49_v7, %v39_v11 }
   0x8   :  { %v45_v24 = vmul.f32 %v28_v15, %v19_v4  ;;  %v46_v25 = vmul.f32 %v32_v16, %v20_v5 }
   0x9   :  { %v47_v28 = vmul.f32 %v36_v20, %v21_v13  ;;  %v48_v29 = vmul.f32 %v40_v21, %v22_v14 }
   0xa   :  { %v71_v32 = vadd.f32 %v54_v17, %v45_v24  ;;  %v72_v33 = vadd.f32 %v58_v18, %v46_v25 }
   0xb   :  { %v73_v34 = vadd.f32 %v62_v22, %v47_v28  ;;  %v74_v35 = vadd.f32 %v66_v23, %v48_v29 }
   0xc   :  { %v81_v36 = vadd.f32 %v77_v26, %v71_v32  ;;  %v82_v37 = vadd.f32 %v78_v27, %v72_v33 }
   0xd   :  { %v83_v38 = vadd.f32 %v79_v30, %v73_v34  ;;  %v84_v39 = vadd.f32 %v80_v31, %v74_v35 }
   0xe   :  { %v85_v40 = vmax.f32 %v81_v36, 0.0  ;;  %v86_v41 = vmax.f32 %v82_v37, 0.0 }
   0xf   :  { %v87_v42 = vmax.f32 %v83_v38, 0.0  ;;  %v88_v43 = vmax.f32 %v84_v39, 0.0 }
  0x10   :  { %v113_v44 = vpack.c.bf16 %v86_v41, %v85_v40 }
  0x11   :  { %v114_v45 = vpack.c.bf16 %v88_v43, %v87_v42 }
  0x12   :  { %105 = vst [vmem:[%s168_s4] sm:$0xff] %v113_v44 }
  0x13   :  { %106 = vst [vmem:[%s168_s4 + $0x8] sm:$0xff] %v114_v45 }

// kernel: simple_resnet_forward.84
= control target key start
LH: loop header
LB: loop body
LE: loop exit
PB: predicated region body
PF: predicated region fallthrough
CT: control target
= control target key end

     0   :  { %s297_s6 = smov 0   ;;  %s299_s7 = smov 0   ;;  %s351_s0 = inlined_call_operand.vmem [shape: bf16[2,1,512], index: 0, kind: input, shape index: {}]   ;;  %s352_s1 = inlined_call_operand.vmem [shape: f32[2,512], index: 1, kind: output, shape index: {}]  }
   0x1   :  { %s301_s8 = smov 0  }
   0x2 LB: > { %s229_s9 = sadd.s32 4294967295, %s285_s8   ;;  %s314_s10 = sadd.s32 1, %s285_s8   ;;  %s285_s8 = sphi %s301_s8, %s355_s8   ;;  %s281_s7 = sphi %s299_s7, %s354_s7   ;;  %s277_s6 = sphi %s297_s6, %s353_s6  }
   0x3   : > { %s15_s11 = ssub.s32 %s285_s8, %s314_s10  ;;  %s18_s12 = sadd.s32 1, %s281_s7 }
   0x4   : > { %p16_p0 = scmp.eq.s32.totalorder %s15_s11, 0  ;;  %p25_p1 = scmp.ne.s32.totalorder %s281_s7, %s277_s6 }
   0x5   : > { %p26_p2 = scmp.eq.s32.totalorder %s285_s8, 0  ;;  %p232_p4 = scmp.ge.s32.totalorder %s285_s8, 4 }
   0x6   : > { %s323_s13 = scalar_select %p16_p0, %s281_s7, %s18_s12  }
   0x7   : > { %p27_p3 = por %p26_p2, %p25_p1  ;;  %77 = sbr.rel (%p232_p4) target bundleno = 21 (0x15), region = 16 }
   0xe   : > { %80 = sbr.rel (!%p27_p3) target bundleno = 21 (0x15), region = 20  ;;  %s82_s14 = sand.u32 (%p27_p3), 1, %s281_s7  }
   0xf   : > { %s85_s17 = scalar_lea.vmem (%p27_p3), %s351_s0, %s285_s8  ;;  %s233_s18 = sshll.u32 (%p27_p3), %s82_s14, 1 }
  0x10   : > { %v101_v0 = vld [vmem:[%s85_s17] sm:$0x1] (%p27_p3)  ;;  %v103_v1 = vld [vmem:[%s85_s17 + $0x4] sm:$0x1] (%p27_p3)  ;;  %s84_s19 = scalar_lea.vmem (%p27_p3), [#allocation2], %s233_s18 }
  0x11   : > { %102 = vst [vmem:[%s84_s19] sm:$0x1] (%p27_p3), %v101_v0  ;;  %104 = vst [vmem:[%s84_s19 + $0x1] sm:$0x1] (%p27_p3), %v103_v1 }
  0x15 PF: > { %p234_p5 = scmp.ge.s32.totalorder %s285_s8, 1  ;;  %p122_p6 = scmp.lt.s32.totalorder %s285_s8, 5 }
  0x17   : > { %p123_p7 = pnand %p234_p5, %p122_p6 }
  0x18   : > { %s129_s20 = sand.u32 (!%p123_p7), 1, %s277_s6   ;;  %p147_p8 = scmp.lt.s32.totalorder (!%p123_p7), %s229_s9, 3  ;;  %v159_v2 = vlaneseq (!%p123_p7)  ;;  %vm167_vm0 = vcmask (!%p123_p7), 1041409  }
  0x19   : > { %126 = sbr.rel (%p123_p7) target bundleno = 36 (0x24), region = 54  ;;  %s235_s21 = sshll.u32 (!%p123_p7), %s129_s20, 1 }
  0x1a   : > { %v160_v3 = vshrl.u32 (!%p123_p7), %v159_v2, 7  ;;  %s131_s22 = scalar_lea.vmem (!%p123_p7), [#allocation2], %s235_s21 }
  0x1b   : > { %v151_v4 = vld [vmem:[%s131_s22] sm:$0x1] (!%p123_p7)  ;;  %v152_v5 = vld [vmem:[%s131_s22 + $0x1] sm:$0x1] (!%p123_p7) }
  0x1c   : > { %v153_v6 = vunpack.c.l.bf16 (!%p123_p7), %v151_v4  ;;  %v154_v7 = vunpack.c.l.bf16 (!%p123_p7), %v152_v5  ;;  %v161_v8 = vsub.s32 (!%p123_p7), 0, %v160_v3 }
  0x1e   : > { %v162_v9 = vrot.slane (!%p123_p7), %v153_v6, %v161_v8  ;;  %v166_v10 = vrot.slane (!%p123_p7), %v154_v7, %v161_v8 }
  0x20   : > { %s357_s9 = smov (!%p147_p8, %s229_s9), 3  ;;  %v168_v11 = vsel %vm167_vm0, %v166_v10, %v162_v9 }
  0x21   : > { %s236_s23 = sshll.u32 %s357_s9, 1 }
  0x22   : > { %s150_s26 = scalar_lea.vmem %s352_s1, %s236_s23 }
  0x23   : > { %170 = vst [vmem:[%s150_s26] sm:$0x3] %v168_v11 }
  0x24 PF: > { %p8_p9 = scmp.ge.s32.totalorder %s314_s10, 6   ;;  %s353_s6 = smov %s281_s7 }
  0x25   : > { %s354_s7 = smov %s323_s13  ;;  %s355_s8 = smov %s314_s10 }
  0x26   :  { %10 = sbr.rel (!%p8_p9) target bundleno = 2 (0x2), region = 93 }

// kernel: simple_resnet_forward.85
= control target key start
LH: loop header
LB: loop body
LE: loop exit
PB: predicated region body
PF: predicated region fallthrough
CT: control target
= control target key end

     0   :  { %s637_s1 = inlined_call_operand.vmem [shape: bf16[512,128], index: 1, kind: input, shape index: {}]   ;;  %s638_s0 = inlined_call_operand.vmem [shape: bf16[8,512], index: 0, kind: input, shape index: {}]   ;;  %s639_s2 = inlined_call_operand.vmem [shape: f32[1,128], index: 2, kind: input, shape index: {}]   ;;  %s640_s3 = inlined_call_operand.vmem [shape: f32[8,128], index: 3, kind: output, shape index: {}]  }
   0x1   :  { %v473_v0 = vld [vmem:[%s637_s1 + $0x40] sm:$0xff]   ;;  %v477_v4 = vld [vmem:[%s637_s1 + $0x48] sm:$0xff]   ;;  %v481_v8 = vld [vmem:[%s637_s1 + $0x50] sm:$0xff]  }
   0x2   :  { %v474_v1 = vld [vmem:[%s637_s1 + $0xc0] sm:$0xff]   ;;  %429 = vmatprep.subr.bf16.mxu0 %v473_v0  ;;  %v478_v5 = vld [vmem:[%s637_s1 + $0xc8] sm:$0xff]   ;;  %v482_v9 = vld [vmem:[%s637_s1 + $0xd0] sm:$0xff]  }
   0x3   :  { %v475_v2 = vld [vmem:[%s637_s1] sm:$0xff]   ;;  %451 = vmatprep.subr.bf16.mxu1 %v474_v1  ;;  %v479_v6 = vld [vmem:[%s637_s1 + $0x8] sm:$0xff]   ;;  %v483_v10 = vld [vmem:[%s637_s1 + $0x10] sm:$0xff]  }
   0x4   :  { %v476_v3 = vld [vmem:[%s637_s1 + $0x80] sm:$0xff]   ;;  %430 = vmatpush3.bf16.msra.mxu0 %v475_v2  ;;  %v480_v7 = vld [vmem:[%s637_s1 + $0x88] sm:$0xff]   ;;  %v484_v11 = vld [vmem:[%s637_s1 + $0x90] sm:$0xff]  }
   0x5   :  { %452 = vmatpush3.bf16.msra.mxu1 %v476_v3  ;;  %431 = vmatprep.subr.bf16.mxu0 %v477_v4  ;;  %v485_v12 = vld [vmem:[%s637_s1 + $0x58] sm:$0xff]   ;;  %v489_v16 = vld [vmem:[%s637_s1 + $0x60] sm:$0xff]   ;;  %v493_v20 = vld [vmem:[%s637_s1 + $0x68] sm:$0xff]  }
   0x6   :  { %453 = vmatprep.subr.bf16.mxu1 %v478_v5  ;;  %v486_v13 = vld [vmem:[%s637_s1 + $0xd8] sm:$0xff]   ;;  %v490_v17 = vld [vmem:[%s637_s1 + $0xe0] sm:$0xff]   ;;  %v494_v21 = vld [vmem:[%s637_s1 + $0xe8] sm:$0xff]  }
   0x7   :  { %v487_v14 = vld [vmem:[%s637_s1 + $0x18] sm:$0xff]   ;;  %v491_v18 = vld [vmem:[%s637_s1 + $0x20] sm:$0xff]   ;;  %v495_v22 = vld [vmem:[%s637_s1 + $0x28] sm:$0xff]  }
   0x8   :  { %432 = vmatpush3.bf16.msra.mxu0 %v479_v6  ;;  %v488_v15 = vld [vmem:[%s637_s1 + $0x98] sm:$0xff]   ;;  %v492_v19 = vld [vmem:[%s637_s1 + $0xa0] sm:$0xff]   ;;  %v496_v23 = vld [vmem:[%s637_s1 + $0xa8] sm:$0xff]  }
   0x9   :  { %454 = vmatpush3.bf16.msra.mxu1 %v480_v7  ;;  %433 = vmatprep.subr.bf16.mxu0 %v481_v8  ;;  %v497_v24 = vld [vmem:[%s637_s1 + $0x70] sm:$0xff]   ;;  %v501_v28 = vld [vmem:[%s637_s1 + $0x78] sm:$0xff]   ;;  %v21_v32 = vld [vmem:[%s638_s0] sm:$0xff] }
   0xa   :  { %455 = vmatprep.subr.bf16.mxu1 %v482_v9  ;;  %v498_v25 = vld [vmem:[%s637_s1 + $0xf0] sm:$0xff]   ;;  %v502_v29 = vld [vmem:[%s637_s1 + $0xf8] sm:$0xff]   ;;  %v22_v33 = vld [vmem:[%s638_s0 + $0x8] sm:$0xff]  ;;  %v392_v34 = vcombine.low %v21_v32, %v21_v32  ;;  %v393_v35 = vcombine.high %v21_v32, %v21_v32 }
   0xb   :  { %v499_v26 = vld [vmem:[%s637_s1 + $0x30] sm:$0xff]   ;;  %v503_v30 = vld [vmem:[%s637_s1 + $0x38] sm:$0xff]   ;;  %v394_v36 = vcombine.low %v22_v33, %v22_v33  ;;  %v395_v37 = vcombine.high %v22_v33, %v22_v33  ;;  %v428_v46 = vld [vmem:[%s639_s2] ss:$0 sm:$0xff] }
   0xc   :  { %434 = vmatpush3.bf16.msra.mxu0 %v483_v10  ;;  %v500_v27 = vld [vmem:[%s637_s1 + $0xb0] sm:$0xff]   ;;  %v504_v31 = vld [vmem:[%s637_s1 + $0xb8] sm:$0xff]   ;;  %325 = vmatprep.mubr.bf16.mxu0 %v393_v35 }
   0xd   :  { %456 = vmatpush3.bf16.msra.mxu1 %v484_v11  ;;  %435 = vmatprep.subr.bf16.mxu0 %v485_v12 }
   0xe   :  { %457 = vmatprep.subr.bf16.mxu1 %v486_v13  ;;  %365 = vmatprep.mubr.bf16.mxu1 %v395_v37 }
  0x10   :  { %436 = vmatpush3.bf16.msra.mxu0 %v487_v14 }
  0x11   :  { %458 = vmatpush3.bf16.msra.mxu1 %v488_v15  ;;  %437 = vmatprep.subr.bf16.mxu0 %v489_v16 }
  0x12   :  { %459 = vmatprep.subr.bf16.mxu1 %v490_v17 }
  0x14   :  { %438 = vmatpush3.bf16.msra.mxu0 %v491_v18 }
  0x15   :  { %460 = vmatpush3.bf16.msra.mxu1 %v492_v19  ;;  %439 = vmatprep.subr.bf16.mxu0 %v493_v20 }
  0x16   :  { %461 = vmatprep.subr.bf16.mxu1 %v494_v21 }
  0x18   :  { %440 = vmatpush3.bf16.msra.mxu0 %v495_v22 }
  0x19   :  { %462 = vmatpush3.bf16.msra.mxu1 %v496_v23  ;;  %441 = vmatprep.subr.bf16.mxu0 %v497_v24 }
  0x1a   :  { %463 = vmatprep.subr.bf16.mxu1 %v498_v25 }
  0x1c   :  { %442 = vmatpush3.bf16.msra.mxu0 %v499_v26 }
  0x1d   :  { %464 = vmatpush3.bf16.msra.mxu1 %v500_v27  ;;  %443 = vmatprep.subr.bf16.mxu0 %v501_v28 }
  0x1e   :  { %465 = vmatprep.subr.bf16.mxu1 %v502_v29 }
  0x20   :  { %444 = vmatpush3.bf16.msra.mxu0 %v503_v30 }
  0x21   :  { %466 = vmatpush3.bf16.msra.mxu1 %v504_v31 }
  0x23   :  { %326 = vmatmul.mubr.bf16.vlgmr.msra.gmra.mrb[0].mxu0 %v392_v34 }
  0x24   :  { %366 = vmatmul.mubr.bf16.vlgmr.msra.gmra.mrb[0].mxu1 %v394_v36 }
  0xf6   :  { %v445_v38 = vpop.f32.mrb[0].mxu0 }
  0xf7   :  { %v467_v39 = vpop.f32.mrb[0].mxu1  ;;  %v446_v40 = vpop.f32.mrb[1].mxu0 }
  0xf8   :  { %v468_v41 = vpop.f32.mrb[1].mxu1  ;;  %v447_v42 = vadd.f32 %v446_v40, %v445_v38  ;;  %v448_v44 = vpop.f32.mrb[2].mxu0 }
  0xf9   :  { %v469_v43 = vadd.f32 %v468_v41, %v467_v39  ;;  %v470_v45 = vpop.f32.mrb[2].mxu1  ;;  %v449_v47 = vpop.f32.mrb[3].mxu0 }
  0xfa   :  { %v471_v48 = vpop.f32.mrb[3].mxu1 }
  0xfb   :  { %v368_v49 = vadd.f32 %v469_v43, %v447_v42 }
  0xfd   :  { %v386_v50 = vadd.f32 %v428_v46, %v368_v49 }
  0xff   :  { %387 = vst [vmem:[%s640_s3] sm:$0xff] %v386_v50 }

</bundles_post_ra>
